<compile_context>
chip_gen: v5e
topology: v5e:2x2
jax: 0.10.0
libtpu: 0.0.40
codegen_flags: <defaults>
</compile_context>

<pallas_src>
import math
import functools

import jax
import jax.numpy as jnp
from jax.experimental import pallas as pl
from jax.experimental.pallas import tpu as pltpu

MXU_DTYPE = jnp.bfloat16     # MXU-native inputs on v6e/v7x; accumulation stays f32.
NORMALIZE_OUTPUT = False     # PyTorch module default (normalize_output=False).
L2_EPS = 1e-10


def _round_up(x, m):
    return (x + m - 1) // m * m


# ----------------------------------------------------------------------------
# Pallas kernels
# ----------------------------------------------------------------------------
def _input_norm_kernel(x_ref, o_ref):
    # Per-sample standardization over the flattened patch (torch.std is unbiased).
    x = x_ref[...]
    d = x.shape[1]
    mean = jnp.sum(x, axis=1, keepdims=True) / d
    c = x - mean
    var = jnp.sum(c * c, axis=1, keepdims=True) / (d - 1)
    std = jnp.sqrt(var) + 1e-7
    o_ref[...] = c / std


def input_norm(x_flat):
    B, D = x_flat.shape
    return pl.pallas_call(
        _input_norm_kernel,
        out_shape=jax.ShapeDtypeStruct((B, D), jnp.float32),
        in_specs=[pl.BlockSpec((B, D), lambda: (0, 0))],
        out_specs=pl.BlockSpec((B, D), lambda: (0, 0)),
    )(x_flat)


def _conv_mm_kernel(p_ref, w_ref, b_ref, o_ref):
    # p: (tm, K) bf16 im2col patches, w: (K, Cout) bf16, b: (1, Cout) f32.
    y = jnp.dot(p_ref[...], w_ref[...], preferred_element_type=jnp.float32)
    y = jnp.maximum(y + b_ref[...], 0.0)
    o_ref[...] = y.astype(o_ref.dtype)


def conv3x3_s2_relu(x_nhwc, w, b, *, tm_max=512):
    """Conv2d(k=3, stride=2, pad=0) + bias + ReLU via im2col + fused MXU matmul."""
    patches, (n, ho, wo) = im2col(x_nhwc, 3, 2)
    M, K = patches.shape
    N = w.shape[1]
    TM = min(tm_max, _round_up(M, 16))
    Mp = _round_up(M, TM)
    if Mp != M:
        patches = jnp.pad(patches, ((0, Mp - M), (0, 0)))
    y = pl.pallas_call(
        _conv_mm_kernel,
        out_shape=jax.ShapeDtypeStruct((Mp, N), MXU_DTYPE),
        grid=(Mp // TM,),
        in_specs=[
            pl.BlockSpec((TM, K), lambda i: (i, 0)),
            pl.BlockSpec((K, N), lambda i: (0, 0)),
            pl.BlockSpec((1, N), lambda i: (0, 0)),
        ],
        out_specs=pl.BlockSpec((TM, N), lambda i: (i, 0)),
        compiler_params=pltpu.CompilerParams(dimension_semantics=("parallel",)),
    )(patches, w, b)
    return y[:M].reshape(n, ho, wo, N)


def _head_kernel(x_ref, w1_ref, b1_ref, w2_ref, b2_ref, o_ref, *, normalize):
    # Fused shared head: 3x3 conv over the final 3x3 feature map (== one matmul
    # since output spatial is 1x1) + ReLU, chained into Linear(128,128) + bias.
    h = jnp.dot(x_ref[...], w1_ref[...], preferred_element_type=jnp.float32)
    h = jnp.maximum(h + b1_ref[...], 0.0)
    y = jnp.dot(h.astype(w2_ref.dtype), w2_ref[...],
                preferred_element_type=jnp.float32)
    y = y + b2_ref[...]
    if normalize:
        nrm = jnp.sqrt(jnp.sum(y * y, axis=1, keepdims=True))
        y = y / (nrm + L2_EPS)
    o_ref[...] = y


def shared_head(feats, w1, b1, w2, b2, *, normalize):
    M, K = feats.shape          # K = 3*3*128 = 1152
    N = w2.shape[1]             # 128
    TM = min(256, _round_up(M, 16))
    Mp = _round_up(M, TM)
    if Mp != M:
        feats = jnp.pad(feats, ((0, Mp - M), (0, 0)))
    out = pl.pallas_call(
        functools.partial(_head_kernel, normalize=normalize),
        out_shape=jax.ShapeDtypeStruct((Mp, N), jnp.float32),
        grid=(Mp // TM,),
        in_specs=[
            pl.BlockSpec((TM, K), lambda i: (i, 0)),
            pl.BlockSpec((K, N), lambda i: (0, 0)),
            pl.BlockSpec((1, N), lambda i: (0, 0)),
            pl.BlockSpec((N, N), lambda i: (0, 0)),
            pl.BlockSpec((1, N), lambda i: (0, 0)),
        ],
        out_specs=pl.BlockSpec((TM, N), lambda i: (i, 0)),
        compiler_params=pltpu.CompilerParams(dimension_semantics=("parallel",)),
    )(feats, w1, b1, w2, b2)
    return out[:M]


# ----------------------------------------------------------------------------
# Glue: im2col + parameter init (plain JAX; fuses into adjacent XLA ops)
# ----------------------------------------------------------------------------
def im2col(x_nhwc, k, stride):
    N, H, W, C = x_nhwc.shape
    Ho = (H - k) // stride + 1
    Wo = (W - k) // stride + 1
    cols = []
    for i in range(k):
        for j in range(k):
            cols.append(x_nhwc[:, i:i + stride * Ho:stride,
                               j:j + stride * Wo:stride, :])
    patches = jnp.concatenate(cols, axis=-1)        # (N, Ho, Wo, k*k*C)
    return patches.reshape(N * Ho * Wo, k * k * C), (N, Ho, Wo)


def _conv_param(key, k, cin, cout):
    # PyTorch-default-like uniform init: bound = 1/sqrt(fan_in) for W and bias.
    fan_in = k * k * cin
    bound = 1.0 / math.sqrt(fan_in)
    kw, kb = jax.random.split(key)
    w = jax.random.uniform(kw, (fan_in, cout), jnp.float32, -bound, bound)
    b = jax.random.uniform(kb, (1, cout), jnp.float32, -bound, bound)
    return w, b


def init_params(key):
    k1, k2, kh = jax.random.split(key, 3)

    # branch1 (photo, 3-channel input)
    branch1 = []
    for kk, (cin, cout) in zip(jax.random.split(k1, 4),
                               [(3, 16), (16, 32), (32, 64), (64, 128)]):
        w, b = _conv_param(kk, 3, cin, cout)
        branch1.append((w.astype(MXU_DTYPE), b))

    # branch2 (render, 8-channel input); fold the fixed `x - 0.5` into conv1 bias.
    branch2 = []
    for idx, (kk, (cin, cout)) in enumerate(zip(jax.random.split(k2, 4),
                                                [(8, 16), (16, 32), (32, 64), (64, 128)])):
        w, b = _conv_param(kk, 3, cin, cout)
        if idx == 0:
            b = b - 0.5 * jnp.sum(w, axis=0, keepdims=True)
        branch2.append((w.astype(MXU_DTYPE), b))

    # shared head: Conv2d(128,128,3,s2) on a 3x3 map (-> 1x1) + Linear(128,128)
    kh1, kh2 = jax.random.split(kh)
    w1, hb1 = _conv_param(kh1, 3, 128, 128)               # (1152, 128)
    klw, klb = jax.random.split(kh2)
    bound = 1.0 / math.sqrt(128.0)
    w2 = jax.random.uniform(klw, (128, 128), jnp.float32, -bound, bound)
    hb2 = jax.random.uniform(klb, (1, 128), jnp.float32, -bound, bound)

    return {
        "branch1": branch1,
        "branch2": branch2,
        "head": (w1.astype(MXU_DTYPE), hb1, w2.astype(MXU_DTYPE), hb2),
    }


# ----------------------------------------------------------------------------
# Forward pass
# ----------------------------------------------------------------------------
def forward(anchor, pos, neg, params):
    B = anchor.shape[0]

    # --- branch1 (photo): per-sample input_norm, then 4 conv+ReLU layers ------
    a_nhwc = jnp.transpose(anchor.astype(jnp.float32), (0, 2, 3, 1))
    a_norm = input_norm(a_nhwc.reshape(B, -1)).reshape(a_nhwc.shape)
    x = a_norm.astype(MXU_DTYPE)
    for w, b in params["branch1"]:
        x = conv3x3_s2_relu(x, w, b)
    feat_a = x                                          # (B, 3, 3, 128)

    # --- branch2 (render): pos & neg batched together; x-0.5 folded in bias ---
    r = jnp.concatenate([pos, neg], axis=0).astype(jnp.float32)
    x = jnp.transpose(r, (0, 2, 3, 1)).astype(MXU_DTYPE)
    for w, b in params["branch2"]:
        x = conv3x3_s2_relu(x, w, b)
    feat_pn = x                                         # (2B, 3, 3, 128)

    assert feat_a.shape[1:] == (3, 3, 128) and feat_pn.shape[1:] == (3, 3, 128)

    # --- shared head on all three towers (one fused kernel) -------------------
    # 3x3 conv over a 3x3 map with stride 2 produces 1x1, so the im2col is just
    # the NHWC flatten of the feature map (same (kh,kw,cin) ordering as weights).
    feats = jnp.concatenate([feat_a, feat_pn], axis=0).reshape(3 * B, 3 * 3 * 128)
    w1, b1, w2, b2 = params["head"]
    out = shared_head(feats, w1, b1, w2, b2, normalize=NORMALIZE_OUTPUT)
    return out[:B], out[B:2 * B], out[2 * B:]


multimodal_forward = jax.jit(forward)


# ----------------------------------------------------------------------------
if __name__ == "__main__":
    key = jax.random.PRNGKey(0)
    kp, ka, kb, kc = jax.random.split(key, 4)
    params = init_params(kp)

    B = 2
    # 64x64 inputs: the spatial chain 64->31->15->7->3->1 makes the flatten
    # before the Linear exactly 128 features, as the PyTorch module requires.
    anchor = jax.random.normal(ka, (B, 3, 64, 64), dtype=jnp.float32)     # photo
    pos = jax.random.uniform(kb, (B, 8, 64, 64), dtype=jnp.float32)       # render
    neg = jax.random.uniform(kc, (B, 8, 64, 64), dtype=jnp.float32)       # render

    a, p, n = multimodal_forward(anchor, pos, neg, params)
    jax.block_until_ready((a, p, n))

    assert a.shape == (B, 128) and p.shape == (B, 128) and n.shape == (B, 128)
    assert bool(jnp.all(jnp.isfinite(a)) & jnp.all(jnp.isfinite(p)) & jnp.all(jnp.isfinite(n)))
    print("KERNEL_OK")
</pallas_src>

<mosaic_0001>
module attributes {stable_mosaic.version = 11 : i64} {
  func.func @_input_norm_kernel(%arg0: memref<2x12288xf32, #tpu.memory_space<vmem>>, %arg1: memref<2x12288xf32, #tpu.memory_space<vmem>>) attributes {dimension_semantics = [], scalar_prefetch = 0 : i64, scratch_operands = 0 : i64, tpu.core_type = #tpu.core_type<tc>} {
    %c0 = arith.constant 0 : index
    %c0_0 = arith.constant 0 : index
    %0 = vector.load %arg0[%c0, %c0_0] : memref<2x12288xf32, #tpu.memory_space<vmem>>, vector<2x12288xf32>
    %cst = arith.constant dense<0.000000e+00> : vector<2xf32>
    %1 = vector.multi_reduction <add>, %0, %cst [1] : vector<2x12288xf32> to vector<2xf32>
    %2 = vector.shape_cast %1 : vector<2xf32> to vector<2x1xf32>
    %cst_1 = arith.constant 1.228800e+04 : f32
    %3 = vector.broadcast %cst_1 : f32 to vector<2x1xf32>
    %4 = arith.divf %2, %3 : vector<2x1xf32>
    %5 = vector.broadcast %4 : vector<2x1xf32> to vector<2x12288xf32>
    %6 = arith.subf %0, %5 : vector<2x12288xf32>
    %7 = arith.mulf %6, %6 : vector<2x12288xf32>
    %cst_2 = arith.constant dense<0.000000e+00> : vector<2xf32>
    %8 = vector.multi_reduction <add>, %7, %cst_2 [1] : vector<2x12288xf32> to vector<2xf32>
    %9 = vector.shape_cast %8 : vector<2xf32> to vector<2x1xf32>
    %cst_3 = arith.constant 1.228700e+04 : f32
    %10 = vector.broadcast %cst_3 : f32 to vector<2x1xf32>
    %11 = arith.divf %9, %10 : vector<2x1xf32>
    %12 = math.sqrt %11 : vector<2x1xf32>
    %cst_4 = arith.constant 1.000000e-07 : f32
    %13 = vector.broadcast %cst_4 : f32 to vector<2x1xf32>
    %14 = arith.addf %12, %13 : vector<2x1xf32>
    %15 = vector.broadcast %14 : vector<2x1xf32> to vector<2x12288xf32>
    %16 = arith.divf %6, %15 : vector<2x12288xf32>
    %c0_5 = arith.constant 0 : index
    %c0_6 = arith.constant 0 : index
    %17 = vector.load %arg1[%c0_5, %c0_6] : memref<2x12288xf32, #tpu.memory_space<vmem>>, vector<2x12288xf32>
    tpu.vector_store %arg1[%c0_5, %c0_6], %16 {strides = array<i32>} : memref<2x12288xf32, #tpu.memory_space<vmem>>, vector<2x12288xf32>,
    return
  }
}

module attributes {stable_mosaic.version = 11 : i64} {
  func.func @_conv_mm_kernel(%arg0: i32, %arg1: memref<512x27xbf16, #tpu.memory_space<vmem>>, %arg2: memref<27x16xbf16, #tpu.memory_space<vmem>>, %arg3: memref<1x16xf32, #tpu.memory_space<vmem>>, %arg4: memref<512x16xbf16, #tpu.memory_space<vmem>>) attributes {dimension_semantics = [#tpu.dimension_semantics<parallel>], iteration_bounds = array<i64: 4>, scalar_prefetch = 0 : i64, scratch_operands = 0 : i64, tpu.core_type = #tpu.core_type<tc>, window_params = [{transform_indices = @transform_0, window_bounds = array<i64: 512, 27>}, {pipeline_mode = #tpu.pipeline_mode<synchronous>, transform_indices = @transform_1, window_bounds = array<i64: 27, 16>}, {pipeline_mode = #tpu.pipeline_mode<synchronous>, transform_indices = @transform_2, window_bounds = array<i64: 1, 16>}, {transform_indices = @transform_3, window_bounds = array<i64: 512, 16>}]} {
    %c0 = arith.constant 0 : index
    %c0_0 = arith.constant 0 : index
    %0 = vector.load %arg1[%c0, %c0_0] : memref<512x27xbf16, #tpu.memory_space<vmem>>, vector<512x27xbf16>
    %c0_1 = arith.constant 0 : index
    %c0_2 = arith.constant 0 : index
    %1 = vector.load %arg2[%c0_1, %c0_2] : memref<27x16xbf16, #tpu.memory_space<vmem>>, vector<27x16xbf16>
    %cst = arith.constant dense<0.000000e+00> : vector<512x16xf32>
    %2 = tpu.matmul %0, %1, %cst {dimension_numbers = #tpu.dot_dimension_numbers<[1], [0], [0], [1], [0, 0, 1, 1], [], []>} : vector<512x27xbf16>, vector<27x16xbf16>, vector<512x16xf32> -> vector<512x16xf32>
    %c0_3 = arith.constant 0 : index
    %c0_4 = arith.constant 0 : index
    %3 = vector.load %arg3[%c0_3, %c0_4] : memref<1x16xf32, #tpu.memory_space<vmem>>, vector<1x16xf32>
    %4 = vector.broadcast %3 : vector<1x16xf32> to vector<512x16xf32>
    %5 = arith.addf %2, %4 : vector<512x16xf32>
    %cst_5 = arith.constant 0.000000e+00 : f32
    %6 = vector.broadcast %cst_5 : f32 to vector<512x16xf32>
    %7 = arith.maximumf %5, %6 : vector<512x16xf32>
    %8 = arith.truncf %7 : vector<512x16xf32> to vector<512x16xbf16>
    %c0_6 = arith.constant 0 : index
    %c0_7 = arith.constant 0 : index
    %9 = vector.load %arg4[%c0_6, %c0_7] : memref<512x16xbf16, #tpu.memory_space<vmem>>, vector<512x16xbf16>
    tpu.vector_store %arg4[%c0_6, %c0_7], %8 {strides = array<i32>} : memref<512x16xbf16, #tpu.memory_space<vmem>>, vector<512x16xbf16>,
    return
  }
  func.func @transform_0(%arg0: i32) -> (i32, i32) {
    %c0_i32 = arith.constant 0 : i32
    %c0_i32_0 = arith.constant 0 : i32
    return %arg0, %c0_i32 : i32, i32
  }
  func.func @transform_1(%arg0: i32) -> (i32, i32) {
    %c0_i32 = arith.constant 0 : i32
    %c0_i32_0 = arith.constant 0 : i32
    %c0_i32_1 = arith.constant 0 : i32
    return %c0_i32, %c0_i32_0 : i32, i32
  }
  func.func @transform_2(%arg0: i32) -> (i32, i32) {
    %c0_i32 = arith.constant 0 : i32
    %c0_i32_0 = arith.constant 0 : i32
    %c0_i32_1 = arith.constant 0 : i32
    return %c0_i32, %c0_i32_0 : i32, i32
  }
  func.func @transform_3(%arg0: i32) -> (i32, i32) {
    %c0_i32 = arith.constant 0 : i32
    %c0_i32_0 = arith.constant 0 : i32
    return %arg0, %c0_i32 : i32, i32
  }
}

module attributes {stable_mosaic.version = 11 : i64} {
  func.func @_conv_mm_kernel(%arg0: i32, %arg1: memref<464x144xbf16, #tpu.memory_space<vmem>>, %arg2: memref<144x32xbf16, #tpu.memory_space<vmem>>, %arg3: memref<1x32xf32, #tpu.memory_space<vmem>>, %arg4: memref<464x32xbf16, #tpu.memory_space<vmem>>) attributes {dimension_semantics = [#tpu.dimension_semantics<parallel>], iteration_bounds = array<i64: 1>, scalar_prefetch = 0 : i64, scratch_operands = 0 : i64, tpu.core_type = #tpu.core_type<tc>, window_params = [{transform_indices = @transform_0, window_bounds = array<i64: 464, 144>}, {pipeline_mode = #tpu.pipeline_mode<synchronous>, transform_indices = @transform_1, window_bounds = array<i64: 144, 32>}, {pipeline_mode = #tpu.pipeline_mode<synchronous>, transform_indices = @transform_2, window_bounds = array<i64: 1, 32>}, {transform_indices = @transform_3, window_bounds = array<i64: 464, 32>}]} {
    %c0 = arith.constant 0 : index
    %c0_0 = arith.constant 0 : index
    %0 = vector.load %arg1[%c0, %c0_0] : memref<464x144xbf16, #tpu.memory_space<vmem>>, vector<464x144xbf16>
    %c0_1 = arith.constant 0 : index
    %c0_2 = arith.constant 0 : index
    %1 = vector.load %arg2[%c0_1, %c0_2] : memref<144x32xbf16, #tpu.memory_space<vmem>>, vector<144x32xbf16>
    %cst = arith.constant dense<0.000000e+00> : vector<464x32xf32>
    %2 = tpu.matmul %0, %1, %cst {dimension_numbers = #tpu.dot_dimension_numbers<[1], [0], [0], [1], [0, 0, 1, 1], [], []>} : vector<464x144xbf16>, vector<144x32xbf16>, vector<464x32xf32> -> vector<464x32xf32>
    %c0_3 = arith.constant 0 : index
    %c0_4 = arith.constant 0 : index
    %3 = vector.load %arg3[%c0_3, %c0_4] : memref<1x32xf32, #tpu.memory_space<vmem>>, vector<1x32xf32>
    %4 = vector.broadcast %3 : vector<1x32xf32> to vector<464x32xf32>
    %5 = arith.addf %2, %4 : vector<464x32xf32>
    %cst_5 = arith.constant 0.000000e+00 : f32
    %6 = vector.broadcast %cst_5 : f32 to vector<464x32xf32>
    %7 = arith.maximumf %5, %6 : vector<464x32xf32>
    %8 = arith.truncf %7 : vector<464x32xf32> to vector<464x32xbf16>
    %c0_6 = arith.constant 0 : index
    %c0_7 = arith.constant 0 : index
    %9 = vector.load %arg4[%c0_6, %c0_7] : memref<464x32xbf16, #tpu.memory_space<vmem>>, vector<464x32xbf16>
    tpu.vector_store %arg4[%c0_6, %c0_7], %8 {strides = array<i32>} : memref<464x32xbf16, #tpu.memory_space<vmem>>, vector<464x32xbf16>,
    return
  }
  func.func @transform_0(%arg0: i32) -> (i32, i32) {
    %c0_i32 = arith.constant 0 : i32
    %c0_i32_0 = arith.constant 0 : i32
    return %arg0, %c0_i32 : i32, i32
  }
  func.func @transform_1(%arg0: i32) -> (i32, i32) {
    %c0_i32 = arith.constant 0 : i32
    %c0_i32_0 = arith.constant 0 : i32
    %c0_i32_1 = arith.constant 0 : i32
    return %c0_i32, %c0_i32_0 : i32, i32
  }
  func.func @transform_2(%arg0: i32) -> (i32, i32) {
    %c0_i32 = arith.constant 0 : i32
    %c0_i32_0 = arith.constant 0 : i32
    %c0_i32_1 = arith.constant 0 : i32
    return %c0_i32, %c0_i32_0 : i32, i32
  }
  func.func @transform_3(%arg0: i32) -> (i32, i32) {
    %c0_i32 = arith.constant 0 : i32
    %c0_i32_0 = arith.constant 0 : i32
    return %arg0, %c0_i32 : i32, i32
  }
}

module attributes {stable_mosaic.version = 11 : i64} {
  func.func @_conv_mm_kernel(%arg0: i32, %arg1: memref<112x288xbf16, #tpu.memory_space<vmem>>, %arg2: memref<288x64xbf16, #tpu.memory_space<vmem>>, %arg3: memref<1x64xf32, #tpu.memory_space<vmem>>, %arg4: memref<112x64xbf16, #tpu.memory_space<vmem>>) attributes {dimension_semantics = [#tpu.dimension_semantics<parallel>], iteration_bounds = array<i64: 1>, scalar_prefetch = 0 : i64, scratch_operands = 0 : i64, tpu.core_type = #tpu.core_type<tc>, window_params = [{transform_indices = @transform_0, window_bounds = array<i64: 112, 288>}, {pipeline_mode = #tpu.pipeline_mode<synchronous>, transform_indices = @transform_1, window_bounds = array<i64: 288, 64>}, {pipeline_mode = #tpu.pipeline_mode<synchronous>, transform_indices = @transform_2, window_bounds = array<i64: 1, 64>}, {transform_indices = @transform_3, window_bounds = array<i64: 112, 64>}]} {
    %c0 = arith.constant 0 : index
    %c0_0 = arith.constant 0 : index
    %0 = vector.load %arg1[%c0, %c0_0] : memref<112x288xbf16, #tpu.memory_space<vmem>>, vector<112x288xbf16>
    %c0_1 = arith.constant 0 : index
    %c0_2 = arith.constant 0 : index
    %1 = vector.load %arg2[%c0_1, %c0_2] : memref<288x64xbf16, #tpu.memory_space<vmem>>, vector<288x64xbf16>
    %cst = arith.constant dense<0.000000e+00> : vector<112x64xf32>
    %2 = tpu.matmul %0, %1, %cst {dimension_numbers = #tpu.dot_dimension_numbers<[1], [0], [0], [1], [0, 0, 1, 1], [], []>} : vector<112x288xbf16>, vector<288x64xbf16>, vector<112x64xf32> -> vector<112x64xf32>
    %c0_3 = arith.constant 0 : index
    %c0_4 = arith.constant 0 : index
    %3 = vector.load %arg3[%c0_3, %c0_4] : memref<1x64xf32, #tpu.memory_space<vmem>>, vector<1x64xf32>
    %4 = vector.broadcast %3 : vector<1x64xf32> to vector<112x64xf32>
    %5 = arith.addf %2, %4 : vector<112x64xf32>
    %cst_5 = arith.constant 0.000000e+00 : f32
    %6 = vector.broadcast %cst_5 : f32 to vector<112x64xf32>
    %7 = arith.maximumf %5, %6 : vector<112x64xf32>
    %8 = arith.truncf %7 : vector<112x64xf32> to vector<112x64xbf16>
    %c0_6 = arith.constant 0 : index
    %c0_7 = arith.constant 0 : index
    %9 = vector.load %arg4[%c0_6, %c0_7] : memref<112x64xbf16, #tpu.memory_space<vmem>>, vector<112x64xbf16>
    tpu.vector_store %arg4[%c0_6, %c0_7], %8 {strides = array<i32>} : memref<112x64xbf16, #tpu.memory_space<vmem>>, vector<112x64xbf16>,
    return
  }
  func.func @transform_0(%arg0: i32) -> (i32, i32) {
    %c0_i32 = arith.constant 0 : i32
    %c0_i32_0 = arith.constant 0 : i32
    return %arg0, %c0_i32 : i32, i32
  }
  func.func @transform_1(%arg0: i32) -> (i32, i32) {
    %c0_i32 = arith.constant 0 : i32
    %c0_i32_0 = arith.constant 0 : i32
    %c0_i32_1 = arith.constant 0 : i32
    return %c0_i32, %c0_i32_0 : i32, i32
  }
  func.func @transform_2(%arg0: i32) -> (i32, i32) {
    %c0_i32 = arith.constant 0 : i32
    %c0_i32_0 = arith.constant 0 : i32
    %c0_i32_1 = arith.constant 0 : i32
    return %c0_i32, %c0_i32_0 : i32, i32
  }
  func.func @transform_3(%arg0: i32) -> (i32, i32) {
    %c0_i32 = arith.constant 0 : i32
    %c0_i32_0 = arith.constant 0 : i32
    return %arg0, %c0_i32 : i32, i32
  }
}

module attributes {stable_mosaic.version = 11 : i64} {
  func.func @_conv_mm_kernel(%arg0: i32, %arg1: memref<32x576xbf16, #tpu.memory_space<vmem>>, %arg2: memref<576x128xbf16, #tpu.memory_space<vmem>>, %arg3: memref<1x128xf32, #tpu.memory_space<vmem>>, %arg4: memref<32x128xbf16, #tpu.memory_space<vmem>>) attributes {dimension_semantics = [#tpu.dimension_semantics<parallel>], iteration_bounds = array<i64: 1>, scalar_prefetch = 0 : i64, scratch_operands = 0 : i64, tpu.core_type = #tpu.core_type<tc>, window_params = [{transform_indices = @transform_0, window_bounds = array<i64: 32, 576>}, {pipeline_mode = #tpu.pipeline_mode<synchronous>, transform_indices = @transform_1, window_bounds = array<i64: 576, 128>}, {pipeline_mode = #tpu.pipeline_mode<synchronous>, transform_indices = @transform_2, window_bounds = array<i64: 1, 128>}, {transform_indices = @transform_3, window_bounds = array<i64: 32, 128>}]} {
    %c0 = arith.constant 0 : index
    %c0_0 = arith.constant 0 : index
    %0 = vector.load %arg1[%c0, %c0_0] : memref<32x576xbf16, #tpu.memory_space<vmem>>, vector<32x576xbf16>
    %c0_1 = arith.constant 0 : index
    %c0_2 = arith.constant 0 : index
    %1 = vector.load %arg2[%c0_1, %c0_2] : memref<576x128xbf16, #tpu.memory_space<vmem>>, vector<576x128xbf16>
    %cst = arith.constant dense<0.000000e+00> : vector<32x128xf32>
    %2 = tpu.matmul %0, %1, %cst {dimension_numbers = #tpu.dot_dimension_numbers<[1], [0], [0], [1], [0, 0, 1, 1], [], []>} : vector<32x576xbf16>, vector<576x128xbf16>, vector<32x128xf32> -> vector<32x128xf32>
    %c0_3 = arith.constant 0 : index
    %c0_4 = arith.constant 0 : index
    %3 = vector.load %arg3[%c0_3, %c0_4] : memref<1x128xf32, #tpu.memory_space<vmem>>, vector<1x128xf32>
    %4 = vector.broadcast %3 : vector<1x128xf32> to vector<32x128xf32>
    %5 = arith.addf %2, %4 : vector<32x128xf32>
    %cst_5 = arith.constant 0.000000e+00 : f32
    %6 = vector.broadcast %cst_5 : f32 to vector<32x128xf32>
    %7 = arith.maximumf %5, %6 : vector<32x128xf32>
    %8 = arith.truncf %7 : vector<32x128xf32> to vector<32x128xbf16>
    %c0_6 = arith.constant 0 : index
    %c0_7 = arith.constant 0 : index
    %9 = vector.load %arg4[%c0_6, %c0_7] : memref<32x128xbf16, #tpu.memory_space<vmem>>, vector<32x128xbf16>
    tpu.vector_store %arg4[%c0_6, %c0_7], %8 {strides = array<i32>} : memref<32x128xbf16, #tpu.memory_space<vmem>>, vector<32x128xbf16>,
    return
  }
  func.func @transform_0(%arg0: i32) -> (i32, i32) {
    %c0_i32 = arith.constant 0 : i32
    %c0_i32_0 = arith.constant 0 : i32
    return %arg0, %c0_i32 : i32, i32
  }
  func.func @transform_1(%arg0: i32) -> (i32, i32) {
    %c0_i32 = arith.constant 0 : i32
    %c0_i32_0 = arith.constant 0 : i32
    %c0_i32_1 = arith.constant 0 : i32
    return %c0_i32, %c0_i32_0 : i32, i32
  }
  func.func @transform_2(%arg0: i32) -> (i32, i32) {
    %c0_i32 = arith.constant 0 : i32
    %c0_i32_0 = arith.constant 0 : i32
    %c0_i32_1 = arith.constant 0 : i32
    return %c0_i32, %c0_i32_0 : i32, i32
  }
  func.func @transform_3(%arg0: i32) -> (i32, i32) {
    %c0_i32 = arith.constant 0 : i32
    %c0_i32_0 = arith.constant 0 : i32
    return %arg0, %c0_i32 : i32, i32
  }
}

module attributes {stable_mosaic.version = 11 : i64} {
  func.func @_conv_mm_kernel(%arg0: i32, %arg1: memref<512x72xbf16, #tpu.memory_space<vmem>>, %arg2: memref<72x16xbf16, #tpu.memory_space<vmem>>, %arg3: memref<1x16xf32, #tpu.memory_space<vmem>>, %arg4: memref<512x16xbf16, #tpu.memory_space<vmem>>) attributes {dimension_semantics = [#tpu.dimension_semantics<parallel>], iteration_bounds = array<i64: 8>, scalar_prefetch = 0 : i64, scratch_operands = 0 : i64, tpu.core_type = #tpu.core_type<tc>, window_params = [{transform_indices = @transform_0, window_bounds = array<i64: 512, 72>}, {pipeline_mode = #tpu.pipeline_mode<synchronous>, transform_indices = @transform_1, window_bounds = array<i64: 72, 16>}, {pipeline_mode = #tpu.pipeline_mode<synchronous>, transform_indices = @transform_2, window_bounds = array<i64: 1, 16>}, {transform_indices = @transform_3, window_bounds = array<i64: 512, 16>}]} {
    %c0 = arith.constant 0 : index
    %c0_0 = arith.constant 0 : index
    %0 = vector.load %arg1[%c0, %c0_0] : memref<512x72xbf16, #tpu.memory_space<vmem>>, vector<512x72xbf16>
    %c0_1 = arith.constant 0 : index
    %c0_2 = arith.constant 0 : index
    %1 = vector.load %arg2[%c0_1, %c0_2] : memref<72x16xbf16, #tpu.memory_space<vmem>>, vector<72x16xbf16>
    %cst = arith.constant dense<0.000000e+00> : vector<512x16xf32>
    %2 = tpu.matmul %0, %1, %cst {dimension_numbers = #tpu.dot_dimension_numbers<[1], [0], [0], [1], [0, 0, 1, 1], [], []>} : vector<512x72xbf16>, vector<72x16xbf16>, vector<512x16xf32> -> vector<512x16xf32>
    %c0_3 = arith.constant 0 : index
    %c0_4 = arith.constant 0 : index
    %3 = vector.load %arg3[%c0_3, %c0_4] : memref<1x16xf32, #tpu.memory_space<vmem>>, vector<1x16xf32>
    %4 = vector.broadcast %3 : vector<1x16xf32> to vector<512x16xf32>
    %5 = arith.addf %2, %4 : vector<512x16xf32>
    %cst_5 = arith.constant 0.000000e+00 : f32
    %6 = vector.broadcast %cst_5 : f32 to vector<512x16xf32>
    %7 = arith.maximumf %5, %6 : vector<512x16xf32>
    %8 = arith.truncf %7 : vector<512x16xf32> to vector<512x16xbf16>
    %c0_6 = arith.constant 0 : index
    %c0_7 = arith.constant 0 : index
    %9 = vector.load %arg4[%c0_6, %c0_7] : memref<512x16xbf16, #tpu.memory_space<vmem>>, vector<512x16xbf16>
    tpu.vector_store %arg4[%c0_6, %c0_7], %8 {strides = array<i32>} : memref<512x16xbf16, #tpu.memory_space<vmem>>, vector<512x16xbf16>,
    return
  }
  func.func @transform_0(%arg0: i32) -> (i32, i32) {
    %c0_i32 = arith.constant 0 : i32
    %c0_i32_0 = arith.constant 0 : i32
    return %arg0, %c0_i32 : i32, i32
  }
  func.func @transform_1(%arg0: i32) -> (i32, i32) {
    %c0_i32 = arith.constant 0 : i32
    %c0_i32_0 = arith.constant 0 : i32
    %c0_i32_1 = arith.constant 0 : i32
    return %c0_i32, %c0_i32_0 : i32, i32
  }
  func.func @transform_2(%arg0: i32) -> (i32, i32) {
    %c0_i32 = arith.constant 0 : i32
    %c0_i32_0 = arith.constant 0 : i32
    %c0_i32_1 = arith.constant 0 : i32
    return %c0_i32, %c0_i32_0 : i32, i32
  }
  func.func @transform_3(%arg0: i32) -> (i32, i32) {
    %c0_i32 = arith.constant 0 : i32
    %c0_i32_0 = arith.constant 0 : i32
    return %arg0, %c0_i32 : i32, i32
  }
}

module attributes {stable_mosaic.version = 11 : i64} {
  func.func @_conv_mm_kernel(%arg0: i32, %arg1: memref<512x144xbf16, #tpu.memory_space<vmem>>, %arg2: memref<144x32xbf16, #tpu.memory_space<vmem>>, %arg3: memref<1x32xf32, #tpu.memory_space<vmem>>, %arg4: memref<512x32xbf16, #tpu.memory_space<vmem>>) attributes {dimension_semantics = [#tpu.dimension_semantics<parallel>], iteration_bounds = array<i64: 2>, scalar_prefetch = 0 : i64, scratch_operands = 0 : i64, tpu.core_type = #tpu.core_type<tc>, window_params = [{transform_indices = @transform_0, window_bounds = array<i64: 512, 144>}, {pipeline_mode = #tpu.pipeline_mode<synchronous>, transform_indices = @transform_1, window_bounds = array<i64: 144, 32>}, {pipeline_mode = #tpu.pipeline_mode<synchronous>, transform_indices = @transform_2, window_bounds = array<i64: 1, 32>}, {transform_indices = @transform_3, window_bounds = array<i64: 512, 32>}]} {
    %c0 = arith.constant 0 : index
    %c0_0 = arith.constant 0 : index
    %0 = vector.load %arg1[%c0, %c0_0] : memref<512x144xbf16, #tpu.memory_space<vmem>>, vector<512x144xbf16>
    %c0_1 = arith.constant 0 : index
    %c0_2 = arith.constant 0 : index
    %1 = vector.load %arg2[%c0_1, %c0_2] : memref<144x32xbf16, #tpu.memory_space<vmem>>, vector<144x32xbf16>
    %cst = arith.constant dense<0.000000e+00> : vector<512x32xf32>
    %2 = tpu.matmul %0, %1, %cst {dimension_numbers = #tpu.dot_dimension_numbers<[1], [0], [0], [1], [0, 0, 1, 1], [], []>} : vector<512x144xbf16>, vector<144x32xbf16>, vector<512x32xf32> -> vector<512x32xf32>
    %c0_3 = arith.constant 0 : index
    %c0_4 = arith.constant 0 : index
    %3 = vector.load %arg3[%c0_3, %c0_4] : memref<1x32xf32, #tpu.memory_space<vmem>>, vector<1x32xf32>
    %4 = vector.broadcast %3 : vector<1x32xf32> to vector<512x32xf32>
    %5 = arith.addf %2, %4 : vector<512x32xf32>
    %cst_5 = arith.constant 0.000000e+00 : f32
    %6 = vector.broadcast %cst_5 : f32 to vector<512x32xf32>
    %7 = arith.maximumf %5, %6 : vector<512x32xf32>
    %8 = arith.truncf %7 : vector<512x32xf32> to vector<512x32xbf16>
    %c0_6 = arith.constant 0 : index
    %c0_7 = arith.constant 0 : index
    %9 = vector.load %arg4[%c0_6, %c0_7] : memref<512x32xbf16, #tpu.memory_space<vmem>>, vector<512x32xbf16>
    tpu.vector_store %arg4[%c0_6, %c0_7], %8 {strides = array<i32>} : memref<512x32xbf16, #tpu.memory_space<vmem>>, vector<512x32xbf16>,
    return
  }
  func.func @transform_0(%arg0: i32) -> (i32, i32) {
    %c0_i32 = arith.constant 0 : i32
    %c0_i32_0 = arith.constant 0 : i32
    return %arg0, %c0_i32 : i32, i32
  }
  func.func @transform_1(%arg0: i32) -> (i32, i32) {
    %c0_i32 = arith.constant 0 : i32
    %c0_i32_0 = arith.constant 0 : i32
    %c0_i32_1 = arith.constant 0 : i32
    return %c0_i32, %c0_i32_0 : i32, i32
  }
  func.func @transform_2(%arg0: i32) -> (i32, i32) {
    %c0_i32 = arith.constant 0 : i32
    %c0_i32_0 = arith.constant 0 : i32
    %c0_i32_1 = arith.constant 0 : i32
    return %c0_i32, %c0_i32_0 : i32, i32
  }
  func.func @transform_3(%arg0: i32) -> (i32, i32) {
    %c0_i32 = arith.constant 0 : i32
    %c0_i32_0 = arith.constant 0 : i32
    return %arg0, %c0_i32 : i32, i32
  }
}

module attributes {stable_mosaic.version = 11 : i64} {
  func.func @_conv_mm_kernel(%arg0: i32, %arg1: memref<208x288xbf16, #tpu.memory_space<vmem>>, %arg2: memref<288x64xbf16, #tpu.memory_space<vmem>>, %arg3: memref<1x64xf32, #tpu.memory_space<vmem>>, %arg4: memref<208x64xbf16, #tpu.memory_space<vmem>>) attributes {dimension_semantics = [#tpu.dimension_semantics<parallel>], iteration_bounds = array<i64: 1>, scalar_prefetch = 0 : i64, scratch_operands = 0 : i64, tpu.core_type = #tpu.core_type<tc>, window_params = [{transform_indices = @transform_0, window_bounds = array<i64: 208, 288>}, {pipeline_mode = #tpu.pipeline_mode<synchronous>, transform_indices = @transform_1, window_bounds = array<i64: 288, 64>}, {pipeline_mode = #tpu.pipeline_mode<synchronous>, transform_indices = @transform_2, window_bounds = array<i64: 1, 64>}, {transform_indices = @transform_3, window_bounds = array<i64: 208, 64>}]} {
    %c0 = arith.constant 0 : index
    %c0_0 = arith.constant 0 : index
    %0 = vector.load %arg1[%c0, %c0_0] : memref<208x288xbf16, #tpu.memory_space<vmem>>, vector<208x288xbf16>
    %c0_1 = arith.constant 0 : index
    %c0_2 = arith.constant 0 : index
    %1 = vector.load %arg2[%c0_1, %c0_2] : memref<288x64xbf16, #tpu.memory_space<vmem>>, vector<288x64xbf16>
    %cst = arith.constant dense<0.000000e+00> : vector<208x64xf32>
    %2 = tpu.matmul %0, %1, %cst {dimension_numbers = #tpu.dot_dimension_numbers<[1], [0], [0], [1], [0, 0, 1, 1], [], []>} : vector<208x288xbf16>, vector<288x64xbf16>, vector<208x64xf32> -> vector<208x64xf32>
    %c0_3 = arith.constant 0 : index
    %c0_4 = arith.constant 0 : index
    %3 = vector.load %arg3[%c0_3, %c0_4] : memref<1x64xf32, #tpu.memory_space<vmem>>, vector<1x64xf32>
    %4 = vector.broadcast %3 : vector<1x64xf32> to vector<208x64xf32>
    %5 = arith.addf %2, %4 : vector<208x64xf32>
    %cst_5 = arith.constant 0.000000e+00 : f32
    %6 = vector.broadcast %cst_5 : f32 to vector<208x64xf32>
    %7 = arith.maximumf %5, %6 : vector<208x64xf32>
    %8 = arith.truncf %7 : vector<208x64xf32> to vector<208x64xbf16>
    %c0_6 = arith.constant 0 : index
    %c0_7 = arith.constant 0 : index
    %9 = vector.load %arg4[%c0_6, %c0_7] : memref<208x64xbf16, #tpu.memory_space<vmem>>, vector<208x64xbf16>
    tpu.vector_store %arg4[%c0_6, %c0_7], %8 {strides = array<i32>} : memref<208x64xbf16, #tpu.memory_space<vmem>>, vector<208x64xbf16>,
    return
  }
  func.func @transform_0(%arg0: i32) -> (i32, i32) {
    %c0_i32 = arith.constant 0 : i32
    %c0_i32_0 = arith.constant 0 : i32
    return %arg0, %c0_i32 : i32, i32
  }
  func.func @transform_1(%arg0: i32) -> (i32, i32) {
    %c0_i32 = arith.constant 0 : i32
    %c0_i32_0 = arith.constant 0 : i32
    %c0_i32_1 = arith.constant 0 : i32
    return %c0_i32, %c0_i32_0 : i32, i32
  }
  func.func @transform_2(%arg0: i32) -> (i32, i32) {
    %c0_i32 = arith.constant 0 : i32
    %c0_i32_0 = arith.constant 0 : i32
    %c0_i32_1 = arith.constant 0 : i32
    return %c0_i32, %c0_i32_0 : i32, i32
  }
  func.func @transform_3(%arg0: i32) -> (i32, i32) {
    %c0_i32 = arith.constant 0 : i32
    %c0_i32_0 = arith.constant 0 : i32
    return %arg0, %c0_i32 : i32, i32
  }
}

module attributes {stable_mosaic.version = 11 : i64} {
  func.func @_conv_mm_kernel(%arg0: i32, %arg1: memref<48x576xbf16, #tpu.memory_space<vmem>>, %arg2: memref<576x128xbf16, #tpu.memory_space<vmem>>, %arg3: memref<1x128xf32, #tpu.memory_space<vmem>>, %arg4: memref<48x128xbf16, #tpu.memory_space<vmem>>) attributes {dimension_semantics = [#tpu.dimension_semantics<parallel>], iteration_bounds = array<i64: 1>, scalar_prefetch = 0 : i64, scratch_operands = 0 : i64, tpu.core_type = #tpu.core_type<tc>, window_params = [{transform_indices = @transform_0, window_bounds = array<i64: 48, 576>}, {pipeline_mode = #tpu.pipeline_mode<synchronous>, transform_indices = @transform_1, window_bounds = array<i64: 576, 128>}, {pipeline_mode = #tpu.pipeline_mode<synchronous>, transform_indices = @transform_2, window_bounds = array<i64: 1, 128>}, {transform_indices = @transform_3, window_bounds = array<i64: 48, 128>}]} {
    %c0 = arith.constant 0 : index
    %c0_0 = arith.constant 0 : index
    %0 = vector.load %arg1[%c0, %c0_0] : memref<48x576xbf16, #tpu.memory_space<vmem>>, vector<48x576xbf16>
    %c0_1 = arith.constant 0 : index
    %c0_2 = arith.constant 0 : index
    %1 = vector.load %arg2[%c0_1, %c0_2] : memref<576x128xbf16, #tpu.memory_space<vmem>>, vector<576x128xbf16>
    %cst = arith.constant dense<0.000000e+00> : vector<48x128xf32>
    %2 = tpu.matmul %0, %1, %cst {dimension_numbers = #tpu.dot_dimension_numbers<[1], [0], [0], [1], [0, 0, 1, 1], [], []>} : vector<48x576xbf16>, vector<576x128xbf16>, vector<48x128xf32> -> vector<48x128xf32>
    %c0_3 = arith.constant 0 : index
    %c0_4 = arith.constant 0 : index
    %3 = vector.load %arg3[%c0_3, %c0_4] : memref<1x128xf32, #tpu.memory_space<vmem>>, vector<1x128xf32>
    %4 = vector.broadcast %3 : vector<1x128xf32> to vector<48x128xf32>
    %5 = arith.addf %2, %4 : vector<48x128xf32>
    %cst_5 = arith.constant 0.000000e+00 : f32
    %6 = vector.broadcast %cst_5 : f32 to vector<48x128xf32>
    %7 = arith.maximumf %5, %6 : vector<48x128xf32>
    %8 = arith.truncf %7 : vector<48x128xf32> to vector<48x128xbf16>
    %c0_6 = arith.constant 0 : index
    %c0_7 = arith.constant 0 : index
    %9 = vector.load %arg4[%c0_6, %c0_7] : memref<48x128xbf16, #tpu.memory_space<vmem>>, vector<48x128xbf16>
    tpu.vector_store %arg4[%c0_6, %c0_7], %8 {strides = array<i32>} : memref<48x128xbf16, #tpu.memory_space<vmem>>, vector<48x128xbf16>,
    return
  }
  func.func @transform_0(%arg0: i32) -> (i32, i32) {
    %c0_i32 = arith.constant 0 : i32
    %c0_i32_0 = arith.constant 0 : i32
    return %arg0, %c0_i32 : i32, i32
  }
  func.func @transform_1(%arg0: i32) -> (i32, i32) {
    %c0_i32 = arith.constant 0 : i32
    %c0_i32_0 = arith.constant 0 : i32
    %c0_i32_1 = arith.constant 0 : i32
    return %c0_i32, %c0_i32_0 : i32, i32
  }
  func.func @transform_2(%arg0: i32) -> (i32, i32) {
    %c0_i32 = arith.constant 0 : i32
    %c0_i32_0 = arith.constant 0 : i32
    %c0_i32_1 = arith.constant 0 : i32
    return %c0_i32, %c0_i32_0 : i32, i32
  }
  func.func @transform_3(%arg0: i32) -> (i32, i32) {
    %c0_i32 = arith.constant 0 : i32
    %c0_i32_0 = arith.constant 0 : i32
    return %arg0, %c0_i32 : i32, i32
  }
}

module attributes {stable_mosaic.version = 11 : i64} {
  func.func @_head_kernel(%arg0: i32, %arg1: memref<16x1152xbf16, #tpu.memory_space<vmem>>, %arg2: memref<1152x128xbf16, #tpu.memory_space<vmem>>, %arg3: memref<1x128xf32, #tpu.memory_space<vmem>>, %arg4: memref<128x128xbf16, #tpu.memory_space<vmem>>, %arg5: memref<1x128xf32, #tpu.memory_space<vmem>>, %arg6: memref<16x128xf32, #tpu.memory_space<vmem>>) attributes {dimension_semantics = [#tpu.dimension_semantics<parallel>], iteration_bounds = array<i64: 1>, scalar_prefetch = 0 : i64, scratch_operands = 0 : i64, tpu.core_type = #tpu.core_type<tc>, window_params = [{transform_indices = @transform_0, window_bounds = array<i64: 16, 1152>}, {pipeline_mode = #tpu.pipeline_mode<synchronous>, transform_indices = @transform_1, window_bounds = array<i64: 1152, 128>}, {pipeline_mode = #tpu.pipeline_mode<synchronous>, transform_indices = @transform_2, window_bounds = array<i64: 1, 128>}, {pipeline_mode = #tpu.pipeline_mode<synchronous>, transform_indices = @transform_3, window_bounds = array<i64: 128, 128>}, {pipeline_mode = #tpu.pipeline_mode<synchronous>, transform_indices = @transform_4, window_bounds = array<i64: 1, 128>}, {transform_indices = @transform_5, window_bounds = array<i64: 16, 128>}]} {
    %c0 = arith.constant 0 : index
    %c0_0 = arith.constant 0 : index
    %0 = vector.load %arg1[%c0, %c0_0] : memref<16x1152xbf16, #tpu.memory_space<vmem>>, vector<16x1152xbf16>
    %c0_1 = arith.constant 0 : index
    %c0_2 = arith.constant 0 : index
    %1 = vector.load %arg2[%c0_1, %c0_2] : memref<1152x128xbf16, #tpu.memory_space<vmem>>, vector<1152x128xbf16>
    %cst = arith.constant dense<0.000000e+00> : vector<16x128xf32>
    %2 = tpu.matmul %0, %1, %cst {dimension_numbers = #tpu.dot_dimension_numbers<[1], [0], [0], [1], [0, 0, 1, 1], [], []>} : vector<16x1152xbf16>, vector<1152x128xbf16>, vector<16x128xf32> -> vector<16x128xf32>
    %c0_3 = arith.constant 0 : index
    %c0_4 = arith.constant 0 : index
    %3 = vector.load %arg3[%c0_3, %c0_4] : memref<1x128xf32, #tpu.memory_space<vmem>>, vector<1x128xf32>
    %4 = vector.broadcast %3 : vector<1x128xf32> to vector<16x128xf32>
    %5 = arith.addf %2, %4 : vector<16x128xf32>
    %cst_5 = arith.constant 0.000000e+00 : f32
    %6 = vector.broadcast %cst_5 : f32 to vector<16x128xf32>
    %7 = arith.maximumf %5, %6 : vector<16x128xf32>
    %8 = arith.truncf %7 : vector<16x128xf32> to vector<16x128xbf16>
    %c0_6 = arith.constant 0 : index
    %c0_7 = arith.constant 0 : index
    %9 = vector.load %arg4[%c0_6, %c0_7] : memref<128x128xbf16, #tpu.memory_space<vmem>>, vector<128x128xbf16>
    %cst_8 = arith.constant dense<0.000000e+00> : vector<16x128xf32>
    %10 = tpu.matmul %8, %9, %cst_8 {dimension_numbers = #tpu.dot_dimension_numbers<[1], [0], [0], [1], [0, 0, 1, 1], [], []>} : vector<16x128xbf16>, vector<128x128xbf16>, vector<16x128xf32> -> vector<16x128xf32>
    %c0_9 = arith.constant 0 : index
    %c0_10 = arith.constant 0 : index
    %11 = vector.load %arg5[%c0_9, %c0_10] : memref<1x128xf32, #tpu.memory_space<vmem>>, vector<1x128xf32>
    %12 = vector.broadcast %11 : vector<1x128xf32> to vector<16x128xf32>
    %13 = arith.addf %10, %12 : vector<16x128xf32>
    %c0_11 = arith.constant 0 : index
    %c0_12 = arith.constant 0 : index
    %14 = vector.load %arg6[%c0_11, %c0_12] : memref<16x128xf32, #tpu.memory_space<vmem>>, vector<16x128xf32>
    tpu.vector_store %arg6[%c0_11, %c0_12], %13 {strides = array<i32>} : memref<16x128xf32, #tpu.memory_space<vmem>>, vector<16x128xf32>,
    return
  }
  func.func @transform_0(%arg0: i32) -> (i32, i32) {
    %c0_i32 = arith.constant 0 : i32
    %c0_i32_0 = arith.constant 0 : i32
    return %arg0, %c0_i32 : i32, i32
  }
  func.func @transform_1(%arg0: i32) -> (i32, i32) {
    %c0_i32 = arith.constant 0 : i32
    %c0_i32_0 = arith.constant 0 : i32
    %c0_i32_1 = arith.constant 0 : i32
    return %c0_i32, %c0_i32_0 : i32, i32
  }
  func.func @transform_2(%arg0: i32) -> (i32, i32) {
    %c0_i32 = arith.constant 0 : i32
    %c0_i32_0 = arith.constant 0 : i32
    %c0_i32_1 = arith.constant 0 : i32
    return %c0_i32, %c0_i32_0 : i32, i32
  }
  func.func @transform_3(%arg0: i32) -> (i32, i32) {
    %c0_i32 = arith.constant 0 : i32
    %c0_i32_0 = arith.constant 0 : i32
    %c0_i32_1 = arith.constant 0 : i32
    return %c0_i32, %c0_i32_0 : i32, i32
  }
  func.func @transform_4(%arg0: i32) -> (i32, i32) {
    %c0_i32 = arith.constant 0 : i32
    %c0_i32_0 = arith.constant 0 : i32
    %c0_i32_1 = arith.constant 0 : i32
    return %c0_i32, %c0_i32_0 : i32, i32
  }
  func.func @transform_5(%arg0: i32) -> (i32, i32) {
    %c0_i32 = arith.constant 0 : i32
    %c0_i32_0 = arith.constant 0 : i32
    return %arg0, %c0_i32 : i32, i32
  }
}

</mosaic_0001>

<bundles_post_ra>
// kernel: forward.10
= control target key start
LH: loop header
LB: loop body
LE: loop exit
PB: predicated region body
PF: predicated region fallthrough
CT: control target
= control target key end

     0   :  { %vm273_vm0 = vcmask 1041408   ;;  %s1929_s0 = inlined_call_operand.vmem [shape: f32[2,12288], index: 0, kind: input, shape index: {}]   ;;  %s1930_s1 = inlined_call_operand.vmem [shape: f32[2,12288], index: 1, kind: output, shape index: {}]  }
   0x1   :  { %v1083_v0 = vld [vmem:[%s1929_s0] sm:$0xff]  ;;  %v1088_v1 = vld [vmem:[%s1929_s0 + $0x8] sm:$0xff]  ;;  %v1095_v2 = vld [vmem:[%s1929_s0 + $0x10] sm:$0xff] }
   0x2   :  { %56 = vst [vmem:[#allocation1] ss:$4 sm:$0xff] %v1083_v0  ;;  %v1100_v3 = vld [vmem:[%s1929_s0 + $0x18] sm:$0xff]  ;;  %v1112_v20 = vld [vmem:[%s1929_s0 + $0x20] sm:$0xff]  ;;  %v1118_v22 = vld [vmem:[%s1929_s0 + $0x28] sm:$0xff] }
   0x3   :  { %58 = vst [vmem:[#allocation1 + $0x20] ss:$4 sm:$0xff] %v1088_v1  ;;  %v1130_v42 = vld [vmem:[%s1929_s0 + $0x30] sm:$0xff]  ;;  %v1135_v43 = vld [vmem:[%s1929_s0 + $0x38] sm:$0xff]  ;;  %v1148_v63 = vld [vmem:[%s1929_s0 + $0x40] sm:$0xff] }
   0x9   :  { %v59_v4 = vld.sshfl [vmem:[#allocation1] sm:$0xff pattern:$0x73625140]  ;;  %v60_v5 = vld.sshfl [vmem:[#allocation1 + $0x8] sm:$0xff pattern:$0x73625140] }
   0xa   :  { %v61_v6 = vld.sshfl [vmem:[#allocation1 + $0x10] sm:$0xff pattern:$0x73625140]  ;;  %v62_v7 = vld.sshfl [vmem:[#allocation1 + $0x18] sm:$0xff pattern:$0x73625140] }
   0xb   :  { %v63_v8 = vld.sshfl [vmem:[#allocation1 + $0x20] sm:$0xff pattern:$0x73625140]  ;;  %v64_v9 = vld.sshfl [vmem:[#allocation1 + $0x28] sm:$0xff pattern:$0x73625140] }
   0xc   :  { %v65_v10 = vld.sshfl [vmem:[#allocation1 + $0x30] sm:$0xff pattern:$0x73625140]  ;;  %v66_v11 = vld.sshfl [vmem:[#allocation1 + $0x38] sm:$0xff pattern:$0x73625140] }
   0xd   :  { %67 = vst [vmem:[#allocation1] ss:$4 sm:$0xff] %v1095_v2  ;;  %v274_v12 = vsel %vm273_vm0, %v59_v4, 0.0  ;;  %v275_v13 = vsel %vm273_vm0, %v60_v5, 0.0  ;;  %v277_v14 = vsel %vm273_vm0, %v61_v6, 0.0  ;;  %v279_v16 = vsel %vm273_vm0, %v62_v7, 0.0 }
   0xe   :  { %68 = vst [vmem:[#allocation1 + $0x20] ss:$4 sm:$0xff] %v1100_v3  ;;  %v276_v15 = vadd.f32 %v275_v13, %v274_v12  ;;  %v281_v18 = vsel %vm273_vm0, %v63_v8, 0.0  ;;  %v283_v21 = vsel %vm273_vm0, %v64_v9, 0.0  ;;  %v285_v25 = vsel %vm273_vm0, %v65_v10, 0.0  ;;  %v1153_v4 = vld [vmem:[%s1929_s0 + $0x48] sm:$0xff] }
   0xf   :  { %v287_v26 = vsel %vm273_vm0, %v66_v11, 0.0 }
  0x10   :  { %v278_v17 = vadd.f32 %v277_v14, %v276_v15 }
  0x12   :  { %v280_v19 = vadd.f32 %v279_v16, %v278_v17 }
  0x14   :  { %v69_v23 = vld.sshfl [vmem:[#allocation1] sm:$0xff pattern:$0x73625140]  ;;  %v282_v24 = vadd.f32 %v281_v18, %v280_v19  ;;  %v70_v27 = vld.sshfl [vmem:[#allocation1 + $0x8] sm:$0xff pattern:$0x73625140] }
  0x15   :  { %v71_v28 = vld.sshfl [vmem:[#allocation1 + $0x10] sm:$0xff pattern:$0x73625140]  ;;  %v72_v29 = vld.sshfl [vmem:[#allocation1 + $0x18] sm:$0xff pattern:$0x73625140] }
  0x16   :  { %v73_v30 = vld.sshfl [vmem:[#allocation1 + $0x20] sm:$0xff pattern:$0x73625140]  ;;  %v284_v31 = vadd.f32 %v283_v21, %v282_v24  ;;  %v74_v32 = vld.sshfl [vmem:[#allocation1 + $0x28] sm:$0xff pattern:$0x73625140] }
  0x17   :  { %v75_v33 = vld.sshfl [vmem:[#allocation1 + $0x30] sm:$0xff pattern:$0x73625140]  ;;  %v76_v34 = vld.sshfl [vmem:[#allocation1 + $0x38] sm:$0xff pattern:$0x73625140] }
  0x18   :  { %77 = vst [vmem:[#allocation1] ss:$4 sm:$0xff] %v1112_v20  ;;  %v286_v35 = vadd.f32 %v285_v25, %v284_v31  ;;  %v289_v36 = vsel %vm273_vm0, %v69_v23, 0.0  ;;  %v291_v38 = vsel %vm273_vm0, %v70_v27, 0.0  ;;  %v293_v40 = vsel %vm273_vm0, %v71_v28, 0.0  ;;  %v1170_v27 = vld [vmem:[%s1929_s0 + $0x58] sm:$0xff] }
  0x19   :  { %78 = vst [vmem:[#allocation1 + $0x20] ss:$4 sm:$0xff] %v1118_v22  ;;  %v295_v44 = vsel %vm273_vm0, %v72_v29, 0.0  ;;  %v297_v45 = vsel %vm273_vm0, %v73_v30, 0.0  ;;  %v299_v56 = vsel %vm273_vm0, %v74_v32, 0.0  ;;  %v301_v58 = vsel %vm273_vm0, %v75_v33, 0.0 }
  0x1a   :  { %v288_v37 = vadd.f32 %v287_v26, %v286_v35  ;;  %v303_v60 = vsel %vm273_vm0, %v76_v34, 0.0  ;;  %v1165_v26 = vld [vmem:[%s1929_s0 + $0x50] sm:$0xff] }
  0x1c   :  { %v290_v39 = vadd.f32 %v289_v36, %v288_v37 }
  0x1e   :  { %v292_v41 = vadd.f32 %v291_v38, %v290_v39 }
  0x1f   :  { %v79_v46 = vld.sshfl [vmem:[#allocation1] sm:$0xff pattern:$0x73625140]  ;;  %v80_v47 = vld.sshfl [vmem:[#allocation1 + $0x8] sm:$0xff pattern:$0x73625140] }
  0x20   :  { %v81_v48 = vld.sshfl [vmem:[#allocation1 + $0x10] sm:$0xff pattern:$0x73625140]  ;;  %v294_v49 = vadd.f32 %v293_v40, %v292_v41  ;;  %v82_v50 = vld.sshfl [vmem:[#allocation1 + $0x18] sm:$0xff pattern:$0x73625140] }
  0x21   :  { %v83_v51 = vld.sshfl [vmem:[#allocation1 + $0x20] sm:$0xff pattern:$0x73625140]  ;;  %v84_v52 = vld.sshfl [vmem:[#allocation1 + $0x28] sm:$0xff pattern:$0x73625140] }
  0x22   :  { %v85_v53 = vld.sshfl [vmem:[#allocation1 + $0x30] sm:$0xff pattern:$0x73625140]  ;;  %v296_v54 = vadd.f32 %v295_v44, %v294_v49  ;;  %v86_v55 = vld.sshfl [vmem:[#allocation1 + $0x38] sm:$0xff pattern:$0x73625140] }
  0x23   :  { %87 = vst [vmem:[#allocation1] ss:$4 sm:$0xff] %v1130_v42  ;;  %v305_v62 = vsel %vm273_vm0, %v79_v46, 0.0  ;;  %v307_v6 = vsel %vm273_vm0, %v80_v47, 0.0  ;;  %v309_v7 = vsel %vm273_vm0, %v81_v48, 0.0  ;;  %v311_v18 = vsel %vm273_vm0, %v82_v50, 0.0 }
  0x24   :  { %88 = vst [vmem:[#allocation1 + $0x20] ss:$4 sm:$0xff] %v1135_v43  ;;  %v298_v57 = vadd.f32 %v297_v45, %v296_v54  ;;  %v313_v21 = vsel %vm273_vm0, %v83_v51, 0.0  ;;  %v315_v24 = vsel %vm273_vm0, %v84_v52, 0.0  ;;  %v317_v28 = vsel %vm273_vm0, %v85_v53, 0.0  ;;  %v1183_v49 = vld [vmem:[%s1929_s0 + $0x60] sm:$0xff] }
  0x25   :  { %v319_v29 = vsel %vm273_vm0, %v86_v55, 0.0  ;;  %v1188_v50 = vld [vmem:[%s1929_s0 + $0x68] sm:$0xff] }
  0x26   :  { %v300_v59 = vadd.f32 %v299_v56, %v298_v57 }
  0x28   :  { %v302_v61 = vadd.f32 %v301_v58, %v300_v59 }
  0x2a   :  { %v304_v5 = vadd.f32 %v303_v60, %v302_v61  ;;  %v89_v8 = vld.sshfl [vmem:[#allocation1] sm:$0xff pattern:$0x73625140]  ;;  %v90_v9 = vld.sshfl [vmem:[#allocation1 + $0x8] sm:$0xff pattern:$0x73625140] }
  0x2b   :  { %v91_v10 = vld.sshfl [vmem:[#allocation1 + $0x10] sm:$0xff pattern:$0x73625140]  ;;  %v92_v11 = vld.sshfl [vmem:[#allocation1 + $0x18] sm:$0xff pattern:$0x73625140] }
  0x2c   :  { %v93_v12 = vld.sshfl [vmem:[#allocation1 + $0x20] sm:$0xff pattern:$0x73625140]  ;;  %v306_v13 = vadd.f32 %v305_v62, %v304_v5  ;;  %v94_v14 = vld.sshfl [vmem:[#allocation1 + $0x28] sm:$0xff pattern:$0x73625140] }
  0x2d   :  { %v95_v15 = vld.sshfl [vmem:[#allocation1 + $0x30] sm:$0xff pattern:$0x73625140]  ;;  %v96_v16 = vld.sshfl [vmem:[#allocation1 + $0x38] sm:$0xff pattern:$0x73625140] }
  0x2e   :  { %97 = vst [vmem:[#allocation1] ss:$4 sm:$0xff] %v1148_v63  ;;  %v308_v17 = vadd.f32 %v307_v6, %v306_v13  ;;  %v321_v40 = vsel %vm273_vm0, %v89_v8, 0.0  ;;  %v323_v44 = vsel %vm273_vm0, %v90_v9, 0.0  ;;  %v325_v46 = vsel %vm273_vm0, %v91_v10, 0.0  ;;  %v1209_v13 = vld [vmem:[%s1929_s0 + $0x78] sm:$0xff] }
  0x2f   :  { %98 = vst [vmem:[#allocation1 + $0x20] ss:$4 sm:$0xff] %v1153_v4  ;;  %v327_v48 = vsel %vm273_vm0, %v92_v11, 0.0  ;;  %v329_v52 = vsel %vm273_vm0, %v93_v12, 0.0  ;;  %v331_v53 = vsel %vm273_vm0, %v94_v14, 0.0  ;;  %v333_v6 = vsel %vm273_vm0, %v95_v15, 0.0 }
  0x30   :  { %v310_v19 = vadd.f32 %v309_v7, %v308_v17  ;;  %v335_v8 = vsel %vm273_vm0, %v96_v16, 0.0  ;;  %v1204_v12 = vld [vmem:[%s1929_s0 + $0x70] sm:$0xff] }
  0x32   :  { %v312_v23 = vadd.f32 %v311_v18, %v310_v19 }
  0x34   :  { %v314_v25 = vadd.f32 %v313_v21, %v312_v23 }
  0x35   :  { %v99_v30 = vld.sshfl [vmem:[#allocation1] sm:$0xff pattern:$0x73625140]  ;;  %v100_v31 = vld.sshfl [vmem:[#allocation1 + $0x8] sm:$0xff pattern:$0x73625140] }
  0x36   :  { %v101_v32 = vld.sshfl [vmem:[#allocation1 + $0x10] sm:$0xff pattern:$0x73625140]  ;;  %v316_v33 = vadd.f32 %v315_v24, %v314_v25  ;;  %v102_v34 = vld.sshfl [vmem:[#allocation1 + $0x18] sm:$0xff pattern:$0x73625140] }
  0x37   :  { %v103_v35 = vld.sshfl [vmem:[#allocation1 + $0x20] sm:$0xff pattern:$0x73625140]  ;;  %v104_v36 = vld.sshfl [vmem:[#allocation1 + $0x28] sm:$0xff pattern:$0x73625140] }
  0x38   :  { %v105_v37 = vld.sshfl [vmem:[#allocation1 + $0x30] sm:$0xff pattern:$0x73625140]  ;;  %v318_v38 = vadd.f32 %v317_v28, %v316_v33  ;;  %v106_v39 = vld.sshfl [vmem:[#allocation1 + $0x38] sm:$0xff pattern:$0x73625140] }
  0x39   :  { %107 = vst [vmem:[#allocation1] ss:$4 sm:$0xff] %v1165_v26  ;;  %v337_v10 = vsel %vm273_vm0, %v99_v30, 0.0  ;;  %v339_v14 = vsel %vm273_vm0, %v100_v31, 0.0  ;;  %v341_v15 = vsel %vm273_vm0, %v101_v32, 0.0  ;;  %v343_v30 = vsel %vm273_vm0, %v102_v34, 0.0 }
  0x3a   :  { %108 = vst [vmem:[#allocation1 + $0x20] ss:$4 sm:$0xff] %v1170_v27  ;;  %v320_v41 = vadd.f32 %v319_v29, %v318_v38  ;;  %v345_v32 = vsel %vm273_vm0, %v103_v35, 0.0  ;;  %v347_v38 = vsel %vm273_vm0, %v104_v36, 0.0  ;;  %v1241_v34 = vld [vmem:[%s1929_s0 + $0x88] sm:$0xff] }
  0x3c   :  { %v322_v45 = vadd.f32 %v321_v40, %v320_v41  ;;  %v349_v41 = vsel %vm273_vm0, %v105_v37, 0.0 }
  0x3e   :  { %v324_v47 = vadd.f32 %v323_v44, %v322_v45  ;;  %v1236_v44 = vld [vmem:[%s1929_s0 + $0x80] sm:$0xff] }
  0x40   :  { %v326_v51 = vadd.f32 %v325_v46, %v324_v47  ;;  %v109_v54 = vld.sshfl [vmem:[#allocation1] sm:$0xff pattern:$0x73625140]  ;;  %v110_v55 = vld.sshfl [vmem:[#allocation1 + $0x8] sm:$0xff pattern:$0x73625140] }
  0x41   :  { %v111_v56 = vld.sshfl [vmem:[#allocation1 + $0x10] sm:$0xff pattern:$0x73625140]  ;;  %v112_v57 = vld.sshfl [vmem:[#allocation1 + $0x18] sm:$0xff pattern:$0x73625140] }
  0x42   :  { %v113_v58 = vld.sshfl [vmem:[#allocation1 + $0x20] sm:$0xff pattern:$0x73625140]  ;;  %v328_v59 = vadd.f32 %v327_v48, %v326_v51  ;;  %v114_v60 = vld.sshfl [vmem:[#allocation1 + $0x28] sm:$0xff pattern:$0x73625140] }
  0x43   :  { %v1192_v61 = vld.sshfl [vmem:[#allocation1 + $0x30] sm:$0xff pattern:$0x73625140]  ;;  %v1194_v62 = vld.sshfl [vmem:[#allocation1 + $0x38] sm:$0xff pattern:$0x73625140] }
  0x44   :  { %117 = vst [vmem:[#allocation1] ss:$4 sm:$0xff] %v1183_v49  ;;  %v330_v5 = vadd.f32 %v329_v52, %v328_v59  ;;  %v351_v46 = vsel %vm273_vm0, %v106_v39, 0.0  ;;  %v353_v35 = vsel %vm273_vm0, %v109_v54, 0.0  ;;  %v355_v54 = vsel %vm273_vm0, %v110_v55, 0.0 }
  0x45   :  { %118 = vst [vmem:[#allocation1 + $0x20] ss:$4 sm:$0xff] %v1188_v50  ;;  %v363_v55 = vsel %vm273_vm0, %v114_v60, 0.0 }
  0x46   :  { %v332_v7 = vadd.f32 %v331_v53, %v330_v5 }
  0x48   :  { %v334_v9 = vadd.f32 %v333_v6, %v332_v7  ;;  %v357_v7 = vsel %vm273_vm0, %v111_v56, 0.0 }
  0x4a   :  { %v336_v11 = vadd.f32 %v335_v8, %v334_v9  ;;  %v359_v9 = vsel %vm273_vm0, %v112_v57, 0.0 }
  0x4b   :  { %v119_v17 = vld.sshfl [vmem:[#allocation1] sm:$0xff pattern:$0x73625140]  ;;  %v1213_v16 = vld.sshfl [vmem:[#allocation1 + $0x8] sm:$0xff pattern:$0x73625140] }
  0x4c   :  { %v1215_v18 = vld.sshfl [vmem:[#allocation1 + $0x10] sm:$0xff pattern:$0x73625140]  ;;  %v338_v19 = vadd.f32 %v337_v10, %v336_v11  ;;  %v1217_v21 = vld.sshfl [vmem:[#allocation1 + $0x18] sm:$0xff pattern:$0x73625140] }
  0x4d   :  { %v1219_v23 = vld.sshfl [vmem:[#allocation1 + $0x20] sm:$0xff pattern:$0x73625140]  ;;  %v1221_v24 = vld.sshfl [vmem:[#allocation1 + $0x28] sm:$0xff pattern:$0x73625140] }
  0x4e   :  { %v1223_v25 = vld.sshfl [vmem:[#allocation1 + $0x30] sm:$0xff pattern:$0x73625140]  ;;  %v340_v28 = vadd.f32 %v339_v14, %v338_v19  ;;  %v1225_v29 = vld.sshfl [vmem:[#allocation1 + $0x38] sm:$0xff pattern:$0x73625140] }
  0x4f   :  { %127 = vst [vmem:[#allocation1] ss:$4 sm:$0xff] %v1204_v12  ;;  %v1269_v11 = vld [vmem:[%s1929_s0 + $0x90] sm:$0xff]  ;;  %v1274_v14 = vld [vmem:[%s1929_s0 + $0x98] sm:$0xff] }
  0x50   :  { %128 = vst [vmem:[#allocation1 + $0x20] ss:$4 sm:$0xff] %v1209_v13  ;;  %v342_v31 = vadd.f32 %v341_v15, %v340_v28  ;;  %v361_v15 = vsel %vm273_vm0, %v113_v58, 0.0  ;;  %v365_v58 = vsel %vm273_vm0, %v1192_v61, 0.0  ;;  %v1311_v61 = vld [vmem:[%s1929_s0 + $0xa8] sm:$0xff] }
  0x51   :  { %1942 = vst [vmem:[#allocation3_spill] sm:$0xff] %v1311_v61 }
  0x52   :  { %v344_v33 = vadd.f32 %v343_v30, %v342_v31 }
  0x54   :  { %v346_v40 = vadd.f32 %v345_v32, %v344_v33 }
  0x56   :  { %v348_v45 = vadd.f32 %v347_v38, %v346_v40  ;;  %v1245_v47 = vld.sshfl [vmem:[#allocation1] sm:$0xff pattern:$0x73625140]  ;;  %v1247_v36 = vld.sshfl [vmem:[#allocation1 + $0x8] sm:$0xff pattern:$0x73625140] }
  0x57   :  { %v1249_v37 = vld.sshfl [vmem:[#allocation1 + $0x10] sm:$0xff pattern:$0x73625140]  ;;  %v1251_v48 = vld.sshfl [vmem:[#allocation1 + $0x18] sm:$0xff pattern:$0x73625140] }
  0x58   :  { %v1253_v51 = vld.sshfl [vmem:[#allocation1 + $0x20] sm:$0xff pattern:$0x73625140]  ;;  %v350_v52 = vadd.f32 %v349_v41, %v348_v45  ;;  %v1255_v53 = vld.sshfl [vmem:[#allocation1 + $0x28] sm:$0xff pattern:$0x73625140] }
  0x59   :  { %v1257_v59 = vld.sshfl [vmem:[#allocation1 + $0x30] sm:$0xff pattern:$0x73625140]  ;;  %v1259_v5 = vld.sshfl [vmem:[#allocation1 + $0x38] sm:$0xff pattern:$0x73625140] }
  0x5a   :  { %137 = vst [vmem:[#allocation1] ss:$4 sm:$0xff] %v1236_v44  ;;  %v352_v39 = vadd.f32 %v351_v46, %v350_v52  ;;  %v367_v41 = vsel %vm273_vm0, %v1194_v62, 0.0  ;;  %v369_v46 = vsel %vm273_vm0, %v119_v17, 0.0  ;;  %v371_v52 = vsel %vm273_vm0, %v1213_v16, 0.0 }
  0x5b   :  { %138 = vst [vmem:[#allocation1 + $0x20] ss:$4 sm:$0xff] %v1241_v34  ;;  %v373_v62 = vsel %vm273_vm0, %v1215_v18, 0.0  ;;  %v375_v17 = vsel %vm273_vm0, %v1217_v21, 0.0  ;;  %v377_v21 = vsel %vm273_vm0, %v1219_v23, 0.0  ;;  %v383_v23 = vsel %vm273_vm0, %v1225_v29, 0.0 }
  0x5c   :  { %v354_v6 = vadd.f32 %v353_v35, %v352_v39  ;;  %v1306_v39 = vld [vmem:[%s1929_s0 + $0xa0] sm:$0xff]  ;;  %v387_v29 = vsel %vm273_vm0, %v1247_v36, 0.0  ;;  %v397_v36 = vsel %vm273_vm0, %v1257_v59, 0.0 }
  0x5d   :  { %1941 = vst [vmem:[#allocation2_spill] sm:$0xff] %v1306_v39 }
  0x5e   :  { %v356_v8 = vadd.f32 %v355_v54, %v354_v6 }
  0x60   :  { %v358_v10 = vadd.f32 %v357_v7, %v356_v8 }
  0x61   :  { %v1278_v19 = vld.sshfl [vmem:[#allocation1] sm:$0xff pattern:$0x73625140]  ;;  %v1280_v56 = vld.sshfl [vmem:[#allocation1 + $0x8] sm:$0xff pattern:$0x73625140] }
  0x62   :  { %v1282_v57 = vld.sshfl [vmem:[#allocation1 + $0x10] sm:$0xff pattern:$0x73625140]  ;;  %v360_v28 = vadd.f32 %v359_v9, %v358_v10  ;;  %v1284_v30 = vld.sshfl [vmem:[#allocation1 + $0x18] sm:$0xff pattern:$0x73625140] }
  0x63   :  { %v1286_v31 = vld.sshfl [vmem:[#allocation1 + $0x20] sm:$0xff pattern:$0x73625140]  ;;  %v1288_v32 = vld.sshfl [vmem:[#allocation1 + $0x28] sm:$0xff pattern:$0x73625140] }
  0x64   :  { %v1290_v33 = vld.sshfl [vmem:[#allocation1 + $0x30] sm:$0xff pattern:$0x73625140]  ;;  %v362_v38 = vadd.f32 %v361_v15, %v360_v28  ;;  %v1292_v40 = vld.sshfl [vmem:[#allocation1 + $0x38] sm:$0xff pattern:$0x73625140] }
  0x65   :  { %147 = vst [vmem:[#allocation1] ss:$4 sm:$0xff] %v1269_v11  ;;  %v407_v59 = vsel %vm273_vm0, %v1284_v30, 0.0 }
  0x66   :  { %148 = vst [vmem:[#allocation1 + $0x20] ss:$4 sm:$0xff] %v1274_v14  ;;  %v364_v60 = vadd.f32 %v363_v55, %v362_v38 }
  0x68   :  { %v366_v45 = vadd.f32 %v365_v58, %v364_v60  ;;  %v379_v58 = vsel %vm273_vm0, %v1221_v24, 0.0  ;;  %v385_v24 = vsel %vm273_vm0, %v1245_v47, 0.0 }
  0x6a   :  { %v368_v35 = vadd.f32 %v367_v41, %v366_v45  ;;  %v381_v41 = vsel %vm273_vm0, %v1223_v25, 0.0 }
  0x6c   :  { %v370_v54 = vadd.f32 %v369_v46, %v368_v35  ;;  %v1317_v6 = vld.sshfl [vmem:[#allocation1] sm:$0xff pattern:$0x73625140]  ;;  %v1319_v16 = vld.sshfl [vmem:[#allocation1 + $0x8] sm:$0xff pattern:$0x73625140] }
  0x6d   :  { %v1321_v7 = vld.sshfl [vmem:[#allocation1 + $0x10] sm:$0xff pattern:$0x73625140]  ;;  %v1323_v8 = vld.sshfl [vmem:[#allocation1 + $0x18] sm:$0xff pattern:$0x73625140] }
  0x6e   :  { %v1325_v9 = vld.sshfl [vmem:[#allocation1 + $0x20] sm:$0xff pattern:$0x73625140]  ;;  %v372_v10 = vadd.f32 %v371_v52, %v370_v54  ;;  %v1327_v15 = vld.sshfl [vmem:[#allocation1 + $0x28] sm:$0xff pattern:$0x73625140] }
  0x6f   :  { %v1329_v55 = vld.sshfl [vmem:[#allocation1 + $0x30] sm:$0xff pattern:$0x73625140]  ;;  %v1331_v28 = vld.sshfl [vmem:[#allocation1 + $0x38] sm:$0xff pattern:$0x73625140] }
  0x70   :  { %157 = vst [vmem:[#allocation1] ss:$4 sm:$0xff] %v1306_v39  ;;  %v374_v18 = vadd.f32 %v373_v62, %v372_v10  ;;  %v1344_v46 = vld [vmem:[%s1929_s0 + $0xb0] sm:$0xff]  ;;  %v1349_v35 = vld [vmem:[%s1929_s0 + $0xb8] sm:$0xff]  ;;  %v417_v30 = vsel %vm273_vm0, %v1317_v6, 0.0  ;;  %v427_v6 = vsel %vm273_vm0, %v1327_v15, 0.0 }
  0x71   :  { %158 = vst [vmem:[#allocation1 + $0x20] ss:$4 sm:$0xff] %v1311_v61 }
  0x72   :  { %v376_v38 = vadd.f32 %v375_v17, %v374_v18  ;;  %1943 = vst [vmem:[#allocation4_spill] sm:$0xff] %v1344_v46 }
  0x74   :  { %v378_v60 = vadd.f32 %v377_v21, %v376_v38 }
  0x76   :  { %v380_v45 = vadd.f32 %v379_v58, %v378_v60  ;;  %v389_v60 = vsel %vm273_vm0, %v1249_v37, 0.0  ;;  %v399_v37 = vsel %vm273_vm0, %v1259_v5, 0.0  ;;  %v409_v5 = vsel %vm273_vm0, %v1286_v31, 0.0 }
  0x77   :  { %v159_v52 = vld.sshfl [vmem:[#allocation1] sm:$0xff pattern:$0x73625140]  ;;  %v160_v54 = vld.sshfl [vmem:[#allocation1 + $0x8] sm:$0xff pattern:$0x73625140] }
  0x78   :  { %v161_v25 = vld.sshfl [vmem:[#allocation1 + $0x10] sm:$0xff pattern:$0x73625140]  ;;  %v382_v62 = vadd.f32 %v381_v41, %v380_v45  ;;  %v162_v17 = vld.sshfl [vmem:[#allocation1 + $0x18] sm:$0xff pattern:$0x73625140] }
  0x79   :  { %v163_v10 = vld.sshfl [vmem:[#allocation1 + $0x20] sm:$0xff pattern:$0x73625140]  ;;  %v164_v18 = vld.sshfl [vmem:[#allocation1 + $0x28] sm:$0xff pattern:$0x73625140] }
  0x7a   :  { %v1355_v21 = vld.sshfl [vmem:[#allocation1 + $0x30] sm:$0xff pattern:$0x73625140]  ;;  %v384_v38 = vadd.f32 %v383_v23, %v382_v62  ;;  %v1357_v58 = vld.sshfl [vmem:[#allocation1 + $0x38] sm:$0xff pattern:$0x73625140] }
  0x7b   :  { %167 = vst [vmem:[#allocation1] ss:$4 sm:$0xff] %v1344_v46  ;;  %v391_v45 = vsel %vm273_vm0, %v1251_v48, 0.0  ;;  %v393_v23 = vsel %vm273_vm0, %v1253_v51, 0.0  ;;  %v395_v46 = vsel %vm273_vm0, %v1255_v53, 0.0  ;;  %v401_v48 = vsel %vm273_vm0, %v1278_v19, 0.0 }
  0x7c   :  { %168 = vst [vmem:[#allocation1 + $0x20] ss:$4 sm:$0xff] %v1349_v35  ;;  %v386_v47 = vadd.f32 %v385_v24, %v384_v38  ;;  %v403_v51 = vsel %vm273_vm0, %v1280_v56, 0.0  ;;  %v405_v53 = vsel %vm273_vm0, %v1282_v57, 0.0  ;;  %v411_v19 = vsel %vm273_vm0, %v1288_v32, 0.0 }
  0x7d   :  { %v413_v56 = vsel %vm273_vm0, %v1290_v33, 0.0  ;;  %v415_v57 = vsel %vm273_vm0, %v1292_v40, 0.0  ;;  %v419_v31 = vsel %vm273_vm0, %v1319_v16, 0.0  ;;  %v421_v32 = vsel %vm273_vm0, %v1321_v7, 0.0 }
  0x7e   :  { %v388_v41 = vadd.f32 %v387_v29, %v386_v47  ;;  %v423_v33 = vsel %vm273_vm0, %v1323_v8, 0.0  ;;  %v425_v40 = vsel %vm273_vm0, %v1325_v9, 0.0  ;;  %v429_v16 = vsel %vm273_vm0, %v1329_v55, 0.0 }
  0x7f   :  { %v431_v7 = vsel %vm273_vm0, %v1331_v28, 0.0  ;;  %v437_v9 = vsel %vm273_vm0, %v161_v25, 0.0  ;;  %v439_v15 = vsel %vm273_vm0, %v162_v17, 0.0  ;;  %v445_v28 = vsel %vm273_vm0, %v1355_v21, 0.0 }
  0x80   :  { %v390_v61 = vadd.f32 %v389_v60, %v388_v41 }
  0x82   :  { %v392_v62 = vadd.f32 %v391_v45, %v390_v61  ;;  %v171_v17 = vld.sshfl [vmem:[#allocation1 + $0x10] sm:$0xff pattern:$0x73625140] }
  0x84   :  { %v394_v39 = vadd.f32 %v393_v23, %v392_v62 }
  0x86   :  { %v396_v24 = vadd.f32 %v395_v46, %v394_v39 }
  0x88   :  { %v398_v38 = vadd.f32 %v397_v36, %v396_v24 }
  0x8a   :  { %v400_v29 = vadd.f32 %v399_v37, %v398_v38 }
  0x8c   :  { %v402_v61 = vadd.f32 %v401_v48, %v400_v29 }
  0x8e   :  { %v404_v47 = vadd.f32 %v403_v51, %v402_v61  ;;  %v433_v51 = vsel %vm273_vm0, %v159_v52, 0.0  ;;  %v435_v61 = vsel %vm273_vm0, %v160_v54, 0.0  ;;  %v169_v52 = vld.sshfl [vmem:[#allocation1] sm:$0xff pattern:$0x73625140]  ;;  %v447_v54 = vsel %vm273_vm0, %v1357_v58, 0.0 }
  0x90   :  { %v406_v39 = vadd.f32 %v405_v53, %v404_v47 }
  0x92   :  { %v408_v46 = vadd.f32 %v407_v59, %v406_v39  ;;  %v441_v39 = vsel %vm273_vm0, %v163_v10, 0.0 }
  0x94   :  { %v410_v60 = vadd.f32 %v409_v5, %v408_v46  ;;  %v443_v5 = vsel %vm273_vm0, %v164_v18, 0.0  ;;  %v453_v18 = vsel %vm273_vm0, %v171_v17, 0.0 }
  0x96   :  { %v412_v41 = vadd.f32 %v411_v19, %v410_v60  ;;  %v170_v60 = vld.sshfl [vmem:[#allocation1 + $0x8] sm:$0xff pattern:$0x73625140] }
  0x97   :  { %v451_v10 = vsel %vm273_vm0, %v170_v60, 0.0 }
  0x98   :  { %v414_v45 = vadd.f32 %v413_v56, %v412_v41  ;;  %v449_v56 = vsel %vm273_vm0, %v169_v52, 0.0 }
  0x9a   :  { %v416_v23 = vadd.f32 %v415_v57, %v414_v45  ;;  %v172_v57 = vld.sshfl [vmem:[#allocation1 + $0x18] sm:$0xff pattern:$0x73625140] }
  0x9b   :  { %v455_v21 = vsel %vm273_vm0, %v172_v57, 0.0 }
  0x9c   :  { %v418_v62 = vadd.f32 %v417_v30, %v416_v23  ;;  %v173_v30 = vld.sshfl [vmem:[#allocation1 + $0x20] sm:$0xff pattern:$0x73625140] }
  0x9d   :  { %v457_v58 = vsel %vm273_vm0, %v173_v30, 0.0 }
  0x9e   :  { %v420_v36 = vadd.f32 %v419_v31, %v418_v62  ;;  %v174_v31 = vld.sshfl [vmem:[#allocation1 + $0x28] sm:$0xff pattern:$0x73625140] }
  0xa0   :  { %v422_v24 = vadd.f32 %v421_v32, %v420_v36  ;;  %v175_v32 = vld.sshfl [vmem:[#allocation1 + $0x30] sm:$0xff pattern:$0x73625140] }
  0xa2   :  { %v424_v37 = vadd.f32 %v423_v33, %v422_v24  ;;  %v459_v33 = vsel %vm273_vm0, %v174_v31, 0.0  ;;  %v176_v24 = vld.sshfl [vmem:[#allocation1 + $0x38] sm:$0xff pattern:$0x73625140] }
  0xa4   :  { %v426_v38 = vadd.f32 %v425_v40, %v424_v37  ;;  %v461_v37 = vsel %vm273_vm0, %v175_v32, 0.0 }
  0xa6   :  { %v428_v48 = vadd.f32 %v427_v6, %v426_v38  ;;  %v463_v38 = vsel %vm273_vm0, %v176_v24, 0.0 }
  0xa8   :  { %v430_v29 = vadd.f32 %v429_v16, %v428_v48 }
  0xaa   :  { %v432_v8 = vadd.f32 %v431_v7, %v430_v29  ;;  %v1067_v7 = vmov 12288.0  }
  0xab   :  { %1059 = vrcp.f32 %v1067_v7 }
  0xac   :  { %v434_v53 = vadd.f32 %v433_v51, %v432_v8 }
  0xae   :  { %v436_v47 = vadd.f32 %v435_v61, %v434_v53 }
  0xb0   :  { %v438_v59 = vadd.f32 %v437_v9, %v436_v47  ;;  %v1068_v9 = vmov 269488144  }
  0xb1   :  { %v1060_v29 = vpop.eup %1059  ;;  %v1425_v47 = vunpack.c.l.s4 %v1068_v9 }
  0xb2   :  { %v440_v55 = vadd.f32 %v439_v15, %v438_v59  ;;  %v468_v51 = vmul.f32 12288.0, %v1060_v29  ;;  %vm472_vm1 = vweird.f32 %v1060_v29 }
  0xb3   :  { %v1934_v59 = vunpack.c.0.s8 %v1425_v47 }
  0xb4   :  { %v442_v46 = vadd.f32 %v441_v39, %v440_v55  ;;  %v469_v8 = vsub.f32 1.0, %v468_v51 }
  0xb6   :  { %v444_v19 = vadd.f32 %v443_v5, %v442_v46  ;;  %v470_v61 = vmul.f32 %v1060_v29, %v469_v8 }
  0xb8   :  { %v446_v25 = vadd.f32 %v445_v28, %v444_v19  ;;  %v471_v53 = vadd.f32 %v1060_v29, %v470_v61 }
  0xba   :  { %v448_v41 = vadd.f32 %v447_v54, %v446_v25  ;;  %v473_v15 = vsel %vm472_vm1, %v1060_v29, %v471_v53 }
  0xbc   :  { %v450_v45 = vadd.f32 %v449_v56, %v448_v41 }
  0xbe   :  { %v452_v23 = vadd.f32 %v451_v10, %v450_v45 }
  0xc0   :  { %v454_v62 = vadd.f32 %v453_v18, %v452_v23 }
  0xc2   :  { %v456_v36 = vadd.f32 %v455_v21, %v454_v62 }
  0xc4   :  { %v458_v40 = vadd.f32 %v457_v58, %v456_v36 }
  0xc6   :  { %v460_v6 = vadd.f32 %v459_v33, %v458_v40 }
  0xc8   :  { %v462_v16 = vadd.f32 %v461_v37, %v460_v6 }
  0xca   :  { %v464_v48 = vadd.f32 %v463_v38, %v462_v16 }
  0xcc   :  { %465 = vadd.xlane.f32.xlu0 %v464_v48 }
 0x13f   :  { %v466_v39 = vpop.xlane.xlu0 %465 }
 0x140   :  { %v474_v55 = vmul.f32 %v473_v15, %v466_v39 }
 0x142   :  { %v1430_v5 = vperm.slane %v474_v55, %v1934_v59 }
 0x144   :  { %v1434_v46 = vsub.f32 %v1083_v0, %v1430_v5  ;;  %v1438_v28 = vsub.f32 %v1088_v1, %v1430_v5  ;;  %v1446_v54 = vsub.f32 %v1095_v2, %v1430_v5  ;;  %v1450_v0 = vsub.f32 %v1100_v3, %v1430_v5 }
 0x145   :  { %v1461_v31 = vsub.f32 %v1112_v20, %v1430_v5  ;;  %v1466_v58 = vsub.f32 %v1118_v22, %v1430_v5  ;;  %v1479_v39 = vsub.f32 %v1130_v42, %v1430_v5 }
 0x146   :  { %v505_v52 = vmul.f32 %v1434_v46, %v1434_v46  ;;  %v506_v19 = vmul.f32 %v1438_v28, %v1438_v28  ;;  %v507_v17 = vmul.f32 %v1446_v54, %v1446_v54  ;;  %v508_v57 = vmul.f32 %v1450_v0, %v1450_v0 }
 0x147   :  { %v509_v20 = vmul.f32 %v1461_v31, %v1461_v31  ;;  %v510_v7 = vmul.f32 %v1466_v58, %v1466_v58  ;;  %v511_v42 = vmul.f32 %v1479_v39, %v1479_v39 }
 0x148   :  { %553 = vst [vmem:[#allocation1] ss:$4 sm:$0xff] %v505_v52  ;;  %v1483_v52 = vsub.f32 %v1135_v43, %v1430_v5 }
 0x149   :  { %555 = vst [vmem:[#allocation1 + $0x20] ss:$4 sm:$0xff] %v506_v19 }
 0x14a   :  { %v512_v43 = vmul.f32 %v1483_v52, %v1483_v52 }
 0x14f   :  { %v556_v60 = vld.sshfl [vmem:[#allocation1] sm:$0xff pattern:$0x73625140]  ;;  %v557_v25 = vld.sshfl [vmem:[#allocation1 + $0x8] sm:$0xff pattern:$0x73625140] }
 0x150   :  { %v558_v1 = vld.sshfl [vmem:[#allocation1 + $0x10] sm:$0xff pattern:$0x73625140]  ;;  %v559_v56 = vld.sshfl [vmem:[#allocation1 + $0x18] sm:$0xff pattern:$0x73625140] }
 0x151   :  { %v560_v41 = vld.sshfl [vmem:[#allocation1 + $0x20] sm:$0xff pattern:$0x73625140]  ;;  %v561_v10 = vld.sshfl [vmem:[#allocation1 + $0x28] sm:$0xff pattern:$0x73625140] }
 0x152   :  { %v562_v45 = vld.sshfl [vmem:[#allocation1 + $0x30] sm:$0xff pattern:$0x73625140]  ;;  %v563_v18 = vld.sshfl [vmem:[#allocation1 + $0x38] sm:$0xff pattern:$0x73625140] }
 0x153   :  { %564 = vst [vmem:[#allocation1] ss:$4 sm:$0xff] %v507_v17  ;;  %v770_v2 = vsel %vm273_vm0, %v556_v60, 0.0  ;;  %v771_v3 = vsel %vm273_vm0, %v557_v25, 0.0  ;;  %v773_v23 = vsel %vm273_vm0, %v558_v1, 0.0  ;;  %v775_v62 = vsel %vm273_vm0, %v559_v56, 0.0 }
 0x154   :  { %565 = vst [vmem:[#allocation1 + $0x20] ss:$4 sm:$0xff] %v508_v57  ;;  %v772_v30 = vadd.f32 %v771_v3, %v770_v2  ;;  %v777_v36 = vsel %vm273_vm0, %v560_v41, 0.0  ;;  %v779_v33 = vsel %vm273_vm0, %v561_v10, 0.0  ;;  %v781_v8 = vsel %vm273_vm0, %v562_v45, 0.0 }
 0x155   :  { %v783_v53 = vsel %vm273_vm0, %v563_v18, 0.0 }
 0x156   :  { %v774_v21 = vadd.f32 %v773_v23, %v772_v30 }
 0x158   :  { %v776_v32 = vadd.f32 %v775_v62, %v774_v21 }
 0x15a   :  { %v566_v24 = vld.sshfl [vmem:[#allocation1] sm:$0xff pattern:$0x73625140]  ;;  %v567_v40 = vld.sshfl [vmem:[#allocation1 + $0x8] sm:$0xff pattern:$0x73625140]  ;;  %v778_v38 = vadd.f32 %v777_v36, %v776_v32  ;;  %v1496_v36 = vsub.f32 %v1148_v63, %v1430_v5 }
 0x15b   :  { %v568_v37 = vld.sshfl [vmem:[#allocation1 + $0x10] sm:$0xff pattern:$0x73625140]  ;;  %v569_v6 = vld.sshfl [vmem:[#allocation1 + $0x18] sm:$0xff pattern:$0x73625140] }
 0x15c   :  { %v570_v16 = vld.sshfl [vmem:[#allocation1 + $0x20] sm:$0xff pattern:$0x73625140]  ;;  %v571_v48 = vld.sshfl [vmem:[#allocation1 + $0x28] sm:$0xff pattern:$0x73625140]  ;;  %v780_v51 = vadd.f32 %v779_v33, %v778_v38  ;;  %v513_v63 = vmul.f32 %v1496_v36, %v1496_v36 }
 0x15d   :  { %v572_v22 = vld.sshfl [vmem:[#allocation1 + $0x30] sm:$0xff pattern:$0x73625140]  ;;  %v573_v29 = vld.sshfl [vmem:[#allocation1 + $0x38] sm:$0xff pattern:$0x73625140] }
 0x15e   :  { %574 = vst [vmem:[#allocation1] ss:$4 sm:$0xff] %v509_v20  ;;  %v782_v61 = vadd.f32 %v781_v8, %v780_v51  ;;  %v785_v15 = vsel %vm273_vm0, %v566_v24, 0.0  ;;  %v787_v19 = vsel %vm273_vm0, %v567_v40, 0.0  ;;  %v789_v60 = vsel %vm273_vm0, %v568_v37, 0.0 }
 0x15f   :  { %575 = vst [vmem:[#allocation1 + $0x20] ss:$4 sm:$0xff] %v510_v7  ;;  %v791_v25 = vsel %vm273_vm0, %v569_v6, 0.0  ;;  %v793_v23 = vsel %vm273_vm0, %v570_v16, 0.0  ;;  %v795_v62 = vsel %vm273_vm0, %v571_v48, 0.0  ;;  %v797_v33 = vsel %vm273_vm0, %v572_v22, 0.0 }
 0x160   :  { %v784_v9 = vadd.f32 %v783_v53, %v782_v61  ;;  %v1501_v24 = vsub.f32 %v1153_v4, %v1430_v5  ;;  %v799_v37 = vsel %vm273_vm0, %v573_v29, 0.0 }
 0x162   :  { %v786_v55 = vadd.f32 %v785_v15, %v784_v9  ;;  %v514_v22 = vmul.f32 %v1501_v24, %v1501_v24 }
 0x164   :  { %v788_v17 = vadd.f32 %v787_v19, %v786_v55 }
 0x165   :  { %v576_v1 = vld.sshfl [vmem:[#allocation1] sm:$0xff pattern:$0x73625140]  ;;  %v577_v56 = vld.sshfl [vmem:[#allocation1 + $0x8] sm:$0xff pattern:$0x73625140] }
 0x166   :  { %v578_v41 = vld.sshfl [vmem:[#allocation1 + $0x10] sm:$0xff pattern:$0x73625140]  ;;  %v579_v10 = vld.sshfl [vmem:[#allocation1 + $0x18] sm:$0xff pattern:$0x73625140]  ;;  %v790_v18 = vadd.f32 %v789_v60, %v788_v17  ;;  %v1514_v60 = vsub.f32 %v1165_v26, %v1430_v5 }
 0x167   :  { %v580_v57 = vld.sshfl [vmem:[#allocation1 + $0x20] sm:$0xff pattern:$0x73625140]  ;;  %v581_v45 = vld.sshfl [vmem:[#allocation1 + $0x28] sm:$0xff pattern:$0x73625140] }
 0x168   :  { %v582_v2 = vld.sshfl [vmem:[#allocation1 + $0x30] sm:$0xff pattern:$0x73625140]  ;;  %v583_v3 = vld.sshfl [vmem:[#allocation1 + $0x38] sm:$0xff pattern:$0x73625140]  ;;  %v792_v30 = vadd.f32 %v791_v25, %v790_v18  ;;  %v515_v26 = vmul.f32 %v1514_v60, %v1514_v60 }
 0x169   :  { %584 = vst [vmem:[#allocation1] ss:$4 sm:$0xff] %v511_v42  ;;  %v801_v6 = vsel %vm273_vm0, %v576_v1, 0.0  ;;  %v803_v29 = vsel %vm273_vm0, %v577_v56, 0.0  ;;  %v805_v15 = vsel %vm273_vm0, %v578_v41, 0.0  ;;  %v807_v19 = vsel %vm273_vm0, %v579_v10, 0.0 }
 0x16a   :  { %585 = vst [vmem:[#allocation1 + $0x20] ss:$4 sm:$0xff] %v512_v43  ;;  %v794_v21 = vadd.f32 %v793_v23, %v792_v30  ;;  %v1518_v1 = vsub.f32 %v1170_v27, %v1430_v5  ;;  %v809_v17 = vsel %vm273_vm0, %v580_v57, 0.0  ;;  %v811_v56 = vsel %vm273_vm0, %v581_v45, 0.0 }
 0x16b   :  { %v813_v42 = vsel %vm273_vm0, %v582_v2, 0.0 }
 0x16c   :  { %v796_v32 = vadd.f32 %v795_v62, %v794_v21  ;;  %v516_v57 = vmul.f32 %v1518_v1, %v1518_v1 }
 0x16e   :  { %v798_v40 = vadd.f32 %v797_v33, %v796_v32  ;;  %v815_v32 = vsel %vm273_vm0, %v583_v3, 0.0 }
 0x170   :  { %v586_v38 = vld.sshfl [vmem:[#allocation1] sm:$0xff pattern:$0x73625140]  ;;  %v587_v20 = vld.sshfl [vmem:[#allocation1 + $0x8] sm:$0xff pattern:$0x73625140]  ;;  %v800_v7 = vadd.f32 %v799_v37, %v798_v40 }
 0x171   :  { %v588_v16 = vld.sshfl [vmem:[#allocation1 + $0x10] sm:$0xff pattern:$0x73625140]  ;;  %v589_v48 = vld.sshfl [vmem:[#allocation1 + $0x18] sm:$0xff pattern:$0x73625140] }
 0x172   :  { %v590_v51 = vld.sshfl [vmem:[#allocation1 + $0x20] sm:$0xff pattern:$0x73625140]  ;;  %v591_v8 = vld.sshfl [vmem:[#allocation1 + $0x28] sm:$0xff pattern:$0x73625140]  ;;  %v802_v53 = vadd.f32 %v801_v6, %v800_v7  ;;  %v1541_v6 = vsub.f32 %v1183_v49, %v1430_v5 }
 0x173   :  { %v592_v4 = vld.sshfl [vmem:[#allocation1 + $0x30] sm:$0xff pattern:$0x73625140]  ;;  %v593_v61 = vld.sshfl [vmem:[#allocation1 + $0x38] sm:$0xff pattern:$0x73625140] }
 0x174   :  { %594 = vst [vmem:[#allocation1] ss:$4 sm:$0xff] %v513_v63  ;;  %v804_v9 = vadd.f32 %v803_v29, %v802_v53  ;;  %v817_v40 = vsel %vm273_vm0, %v586_v38, 0.0  ;;  %v819_v7 = vsel %vm273_vm0, %v587_v20, 0.0  ;;  %v1546_v63 = vsub.f32 %v1188_v50, %v1430_v5 }
 0x175   :  { %595 = vst [vmem:[#allocation1 + $0x20] ss:$4 sm:$0xff] %v514_v22  ;;  %v821_v53 = vsel %vm273_vm0, %v588_v16, 0.0  ;;  %v823_v29 = vsel %vm273_vm0, %v589_v48, 0.0  ;;  %v517_v20 = vmul.f32 %v1541_v6, %v1541_v6 }
 0x176   :  { %v806_v55 = vadd.f32 %v805_v15, %v804_v9  ;;  %v518_v16 = vmul.f32 %v1546_v63, %v1546_v63 }
 0x178   :  { %v808_v25 = vadd.f32 %v807_v19, %v806_v55 }
 0x17a   :  { %v810_v43 = vadd.f32 %v809_v17, %v808_v25  ;;  %v825_v17 = vsel %vm273_vm0, %v590_v51, 0.0 }
 0x17b   :  { %v596_v18 = vld.sshfl [vmem:[#allocation1] sm:$0xff pattern:$0x73625140]  ;;  %v597_v41 = vld.sshfl [vmem:[#allocation1 + $0x8] sm:$0xff pattern:$0x73625140] }
 0x17c   :  { %v598_v30 = vld.sshfl [vmem:[#allocation1 + $0x10] sm:$0xff pattern:$0x73625140]  ;;  %v1523_v10 = vld.sshfl [vmem:[#allocation1 + $0x18] sm:$0xff pattern:$0x73625140]  ;;  %v812_v27 = vadd.f32 %v811_v56, %v810_v43 }
 0x17d   :  { %v1527_v23 = vld.sshfl [vmem:[#allocation1 + $0x20] sm:$0xff pattern:$0x73625140]  ;;  %v1529_v21 = vld.sshfl [vmem:[#allocation1 + $0x28] sm:$0xff pattern:$0x73625140] }
 0x17e   :  { %v1533_v45 = vld.sshfl [vmem:[#allocation1 + $0x30] sm:$0xff pattern:$0x73625140]  ;;  %v1535_v2 = vld.sshfl [vmem:[#allocation1 + $0x38] sm:$0xff pattern:$0x73625140]  ;;  %v814_v62 = vadd.f32 %v813_v42, %v812_v27  ;;  %v1575_v27 = vsub.f32 %v1204_v12, %v1430_v5 }
 0x17f   :  { %604 = vst [vmem:[#allocation1] ss:$4 sm:$0xff] %v515_v26  ;;  %v827_v42 = vsel %vm273_vm0, %v591_v8, 0.0  ;;  %v829_v26 = vsel %vm273_vm0, %v592_v4, 0.0  ;;  %v833_v51 = vsel %vm273_vm0, %v596_v18, 0.0 }
 0x180   :  { %605 = vst [vmem:[#allocation1 + $0x20] ss:$4 sm:$0xff] %v516_v57  ;;  %v816_v33 = vadd.f32 %v815_v32, %v814_v62  ;;  %v1579_v62 = vsub.f32 %v1209_v13, %v1430_v5  ;;  %v831_v32 = vsel %vm273_vm0, %v593_v61, 0.0 }
 0x182   :  { %v818_v37 = vadd.f32 %v817_v40, %v816_v33  ;;  %v835_v33 = vsel %vm273_vm0, %v597_v41, 0.0  ;;  %v520_v18 = vmul.f32 %v1579_v62, %v1579_v62 }
 0x184   :  { %v820_v22 = vadd.f32 %v819_v7, %v818_v37  ;;  %v519_v7 = vmul.f32 %v1575_v27, %v1575_v27 }
 0x186   :  { %v1550_v3 = vld.sshfl [vmem:[#allocation1] sm:$0xff pattern:$0x73625140]  ;;  %v1552_v9 = vld.sshfl [vmem:[#allocation1 + $0x8] sm:$0xff pattern:$0x73625140]  ;;  %v822_v49 = vadd.f32 %v821_v53, %v820_v22 }
 0x187   :  { %v1554_v38 = vld.sshfl [vmem:[#allocation1 + $0x10] sm:$0xff pattern:$0x73625140]  ;;  %v1556_v15 = vld.sshfl [vmem:[#allocation1 + $0x18] sm:$0xff pattern:$0x73625140] }
 0x188   :  { %v1560_v55 = vld.sshfl [vmem:[#allocation1 + $0x20] sm:$0xff pattern:$0x73625140]  ;;  %v1562_v50 = vld.sshfl [vmem:[#allocation1 + $0x28] sm:$0xff pattern:$0x73625140]  ;;  %v824_v25 = vadd.f32 %v823_v29, %v822_v49 }
 0x189   :  { %v1566_v48 = vld.sshfl [vmem:[#allocation1 + $0x30] sm:$0xff pattern:$0x73625140]  ;;  %v1568_v19 = vld.sshfl [vmem:[#allocation1 + $0x38] sm:$0xff pattern:$0x73625140] }
 0x18a   :  { %614 = vst [vmem:[#allocation1] ss:$4 sm:$0xff] %v517_v20  ;;  %v826_v56 = vadd.f32 %v825_v17, %v824_v25  ;;  %v837_v49 = vsel %vm273_vm0, %v598_v30, 0.0  ;;  %v1609_v17 = vsub.f32 %v1236_v44, %v1430_v5  ;;  %v843_v30 = vsel %vm273_vm0, %v1529_v21, 0.0 }
 0x18b   :  { %615 = vst [vmem:[#allocation1 + $0x20] ss:$4 sm:$0xff] %v518_v16  ;;  %v839_v16 = vsel %vm273_vm0, %v1523_v10, 0.0 }
 0x18c   :  { %v828_v43 = vadd.f32 %v827_v42, %v826_v56  ;;  %v841_v56 = vsel %vm273_vm0, %v1527_v23, 0.0  ;;  %v1615_v42 = vsub.f32 %v1241_v34, %v1430_v5  ;;  %v521_v34 = vmul.f32 %v1609_v17, %v1609_v17 }
 0x18e   :  { %v830_v57 = vadd.f32 %v829_v26, %v828_v43  ;;  %v845_v26 = vsel %vm273_vm0, %v1533_v45, 0.0  ;;  %v522_v21 = vmul.f32 %v1615_v42, %v1615_v42 }
 0x190   :  { %v832_v4 = vadd.f32 %v831_v32, %v830_v57 }
 0x191   :  { %v1584_v40 = vld.sshfl [vmem:[#allocation1] sm:$0xff pattern:$0x73625140]  ;;  %v1586_v8 = vld.sshfl [vmem:[#allocation1 + $0x8] sm:$0xff pattern:$0x73625140] }
 0x192   :  { %v1588_v37 = vld.sshfl [vmem:[#allocation1 + $0x10] sm:$0xff pattern:$0x73625140]  ;;  %v1590_v12 = vld.sshfl [vmem:[#allocation1 + $0x18] sm:$0xff pattern:$0x73625140]  ;;  %v834_v61 = vadd.f32 %v833_v51, %v832_v4 }
 0x193   :  { %v1594_v13 = vld.sshfl [vmem:[#allocation1 + $0x20] sm:$0xff pattern:$0x73625140]  ;;  %v1596_v22 = vld.sshfl [vmem:[#allocation1 + $0x28] sm:$0xff pattern:$0x73625140] }
 0x194   :  { %v1600_v41 = vld.sshfl [vmem:[#allocation1 + $0x30] sm:$0xff pattern:$0x73625140]  ;;  %v1602_v53 = vld.sshfl [vmem:[#allocation1 + $0x38] sm:$0xff pattern:$0x73625140]  ;;  %v836_v29 = vadd.f32 %v835_v33, %v834_v61 }
 0x195   :  { %624 = vst [vmem:[#allocation1] ss:$4 sm:$0xff] %v519_v7  ;;  %v847_v61 = vsel %vm273_vm0, %v1535_v2, 0.0  ;;  %v853_v2 = vsel %vm273_vm0, %v1554_v38, 0.0 }
 0x196   :  { %625 = vst [vmem:[#allocation1 + $0x20] ss:$4 sm:$0xff] %v520_v18  ;;  %v838_v20 = vadd.f32 %v837_v49, %v836_v29  ;;  %v849_v29 = vsel %vm273_vm0, %v1550_v3, 0.0  ;;  %v857_v3 = vsel %vm273_vm0, %v1560_v55, 0.0 }
 0x198   :  { %v840_v25 = vadd.f32 %v839_v16, %v838_v20  ;;  %v851_v20 = vsel %vm273_vm0, %v1552_v9, 0.0  ;;  %v1649_v16 = vsub.f32 %v1269_v11, %v1430_v5 }
 0x19a   :  { %v842_v43 = vadd.f32 %v841_v56, %v840_v25  ;;  %1944 = vst [vmem:[#allocation5_spill] sm:$0xff] %v1649_v16  ;;  %v1653_v56 = vsub.f32 %v1274_v14, %v1430_v5  ;;  %v523_v14 = vmul.f32 %v1649_v16, %v1649_v16 }
 0x19c   :  { %v1621_v10 = vld.sshfl [vmem:[#allocation1] sm:$0xff pattern:$0x73625140]  ;;  %v1623_v57 = vld.sshfl [vmem:[#allocation1 + $0x8] sm:$0xff pattern:$0x73625140]  ;;  %v844_v23 = vadd.f32 %v843_v30, %v842_v43  ;;  %v524_v55 = vmul.f32 %v1653_v56, %v1653_v56 }
 0x19d   :  { %v1625_v44 = vld.sshfl [vmem:[#allocation1 + $0x10] sm:$0xff pattern:$0x73625140]  ;;  %v1627_v32 = vld.sshfl [vmem:[#allocation1 + $0x18] sm:$0xff pattern:$0x73625140] }
 0x19e   :  { %v1631_v51 = vld.sshfl [vmem:[#allocation1 + $0x20] sm:$0xff pattern:$0x73625140]  ;;  %v1633_v33 = vld.sshfl [vmem:[#allocation1 + $0x28] sm:$0xff pattern:$0x73625140]  ;;  %v846_v7 = vadd.f32 %v845_v26, %v844_v23 }
 0x19f   :  { %v1637_v45 = vld.sshfl [vmem:[#allocation1 + $0x30] sm:$0xff pattern:$0x73625140]  ;;  %v1639_v4 = vld.sshfl [vmem:[#allocation1 + $0x38] sm:$0xff pattern:$0x73625140] }
 0x1a0   :  { %634 = vst [vmem:[#allocation1] ss:$4 sm:$0xff] %v521_v34  ;;  %v848_v18 = vadd.f32 %v847_v61, %v846_v7  ;;  %v855_v43 = vsel %vm273_vm0, %v1556_v15, 0.0 }
 0x1a1   :  { %635 = vst [vmem:[#allocation1 + $0x20] ss:$4 sm:$0xff] %v522_v21 }
 0x1a2   :  { %v850_v49 = vadd.f32 %v849_v29, %v848_v18  ;;  %1945 = vst [vmem:[#allocation6_spill] sm:$0xff] %v1653_v56  ;;  %v859_v18 = vsel %vm273_vm0, %v1562_v50, 0.0  ;;  %v865_v50 = vsel %vm273_vm0, %v1584_v40, 0.0 }
 0x1a4   :  { %v852_v25 = vadd.f32 %v851_v20, %v850_v49  ;;  %v861_v49 = vsel %vm273_vm0, %v1566_v48, 0.0 }
 0x1a6   :  { %v854_v11 = vadd.f32 %v853_v2, %v852_v25  ;;  %v1946_v25 = vld [vmem:[#allocation2_spill] sm:$0xff] }
 0x1a7   :  { %v1661_v30 = vld.sshfl [vmem:[#allocation1] sm:$0xff pattern:$0x73625140]  ;;  %v1663_v9 = vld.sshfl [vmem:[#allocation1 + $0x8] sm:$0xff pattern:$0x73625140]  ;;  %v1687_v2 = vsub.f32 %v1946_v25, %v1430_v5 }
 0x1a8   :  { %v1665_v26 = vld.sshfl [vmem:[#allocation1 + $0x10] sm:$0xff pattern:$0x73625140]  ;;  %v1667_v23 = vld.sshfl [vmem:[#allocation1 + $0x18] sm:$0xff pattern:$0x73625140]  ;;  %v856_v15 = vadd.f32 %v855_v43, %v854_v11 }
 0x1a9   :  { %v1671_v34 = vld.sshfl [vmem:[#allocation1 + $0x20] sm:$0xff pattern:$0x73625140]  ;;  %v1673_v38 = vld.sshfl [vmem:[#allocation1 + $0x28] sm:$0xff pattern:$0x73625140] }
 0x1aa   :  { %v1677_v21 = vld.sshfl [vmem:[#allocation1 + $0x30] sm:$0xff pattern:$0x73625140]  ;;  %v1679_v7 = vld.sshfl [vmem:[#allocation1 + $0x38] sm:$0xff pattern:$0x73625140]  ;;  %v858_v61 = vadd.f32 %v857_v3, %v856_v15 }
 0x1ab   :  { %644 = vst [vmem:[#allocation1] ss:$4 sm:$0xff] %v523_v14  ;;  %v863_v43 = vsel %vm273_vm0, %v1568_v19, 0.0  ;;  %v1948_v11 = vld [vmem:[#allocation3_spill] sm:$0xff]  ;;  %v867_v15 = vsel %vm273_vm0, %v1586_v8, 0.0 }
 0x1ac   :  { %645 = vst [vmem:[#allocation1 + $0x20] ss:$4 sm:$0xff] %v524_v55  ;;  %v860_v29 = vadd.f32 %v859_v18, %v858_v61  ;;  %v1693_v14 = vsub.f32 %v1948_v11, %v1430_v5  ;;  %v869_v11 = vsel %vm273_vm0, %v1588_v37, 0.0  ;;  %v875_v37 = vsel %vm273_vm0, %v1596_v22, 0.0 }
 0x1ad   :  { %1947 = vst [vmem:[#allocation2_spill] sm:$0xff] %v1687_v2 }
 0x1ae   :  { %v862_v20 = vadd.f32 %v861_v49, %v860_v29  ;;  %1949 = vst [vmem:[#allocation3_spill] sm:$0xff] %v1693_v14  ;;  %v525_v29 = vmul.f32 %v1687_v2, %v1687_v2  ;;  %v526_v40 = vmul.f32 %v1693_v14, %v1693_v14  ;;  %v873_v2 = vsel %vm273_vm0, %v1594_v13, 0.0  ;;  %v1950_v14 = vld [vmem:[#allocation4_spill] sm:$0xff] }
 0x1af   :  { %v1727_v56 = vsub.f32 %v1950_v14, %v1430_v5 }
 0x1b0   :  { %v864_v3 = vadd.f32 %v863_v43, %v862_v20 }
 0x1b1   :  { %1951 = vst [vmem:[#allocation4_spill] sm:$0xff] %v1727_v56 }
 0x1b2   :  { %v1699_v48 = vld.sshfl [vmem:[#allocation1] sm:$0xff pattern:$0x73625140]  ;;  %v1701_v55 = vld.sshfl [vmem:[#allocation1 + $0x8] sm:$0xff pattern:$0x73625140]  ;;  %v866_v19 = vadd.f32 %v865_v50, %v864_v3 }
 0x1b3   :  { %v1703_v61 = vld.sshfl [vmem:[#allocation1 + $0x10] sm:$0xff pattern:$0x73625140]  ;;  %v1705_v18 = vld.sshfl [vmem:[#allocation1 + $0x18] sm:$0xff pattern:$0x73625140] }
 0x1b4   :  { %v1709_v49 = vld.sshfl [vmem:[#allocation1 + $0x20] sm:$0xff pattern:$0x73625140]  ;;  %v1711_v20 = vld.sshfl [vmem:[#allocation1 + $0x28] sm:$0xff pattern:$0x73625140]  ;;  %v868_v43 = vadd.f32 %v867_v15, %v866_v19  ;;  %v1731_v15 = vsub.f32 %v1349_v35, %v1430_v5  ;;  %v527_v35 = vmul.f32 %v1727_v56, %v1727_v56 }
 0x1b5   :  { %v1715_v8 = vld.sshfl [vmem:[#allocation1 + $0x30] sm:$0xff pattern:$0x73625140]  ;;  %v1717_v25 = vld.sshfl [vmem:[#allocation1 + $0x38] sm:$0xff pattern:$0x73625140] }
 0x1b6   :  { %654 = vst [vmem:[#allocation1] ss:$4 sm:$0xff] %v525_v29  ;;  %v870_v3 = vadd.f32 %v869_v11, %v868_v43  ;;  %v871_v50 = vsel %vm273_vm0, %v1590_v12, 0.0  ;;  %v877_v19 = vsel %vm273_vm0, %v1600_v41, 0.0  ;;  %v879_v12 = vsel %vm273_vm0, %v1602_v53, 0.0 }
 0x1b7   :  { %655 = vst [vmem:[#allocation1 + $0x20] ss:$4 sm:$0xff] %v526_v40  ;;  %v528_v53 = vmul.f32 %v1731_v15, %v1731_v15  ;;  %v881_v11 = vsel %vm273_vm0, %v1621_v10, 0.0  ;;  %v891_v10 = vsel %vm273_vm0, %v1633_v33, 0.0  ;;  %v901_v33 = vsel %vm273_vm0, %v1665_v26, 0.0 }
 0x1b8   :  { %v872_v59 = vadd.f32 %v871_v50, %v870_v3  ;;  %1952 = vst [vmem:[#allocation7_spill] sm:$0xff] %v1731_v15  ;;  %v883_v50 = vsel %vm273_vm0, %v1623_v57, 0.0  ;;  %v887_v15 = vsel %vm273_vm0, %v1627_v32, 0.0  ;;  %v893_v57 = vsel %vm273_vm0, %v1637_v45, 0.0 }
 0x1b9   :  { %v897_v32 = vsel %vm273_vm0, %v1661_v30, 0.0  ;;  %v903_v45 = vsel %vm273_vm0, %v1667_v23, 0.0  ;;  %v907_v30 = vsel %vm273_vm0, %v1673_v38, 0.0  ;;  %v911_v26 = vsel %vm273_vm0, %v1679_v7, 0.0 }
 0x1ba   :  { %v874_v16 = vadd.f32 %v873_v2, %v872_v59  ;;  %v913_v23 = vsel %vm273_vm0, %v1699_v48, 0.0  ;;  %v917_v38 = vsel %vm273_vm0, %v1703_v61, 0.0  ;;  %v921_v7 = vsel %vm273_vm0, %v1709_v49, 0.0 }
 0x1bb   :  { %v923_v48 = vsel %vm273_vm0, %v1711_v20, 0.0  ;;  %v927_v61 = vsel %vm273_vm0, %v1717_v25, 0.0 }
 0x1bc   :  { %v876_v14 = vadd.f32 %v875_v37, %v874_v16 }
 0x1bd   :  { %v1739_v29 = vld.sshfl [vmem:[#allocation1] sm:$0xff pattern:$0x73625140]  ;;  %v1741_v13 = vld.sshfl [vmem:[#allocation1 + $0x8] sm:$0xff pattern:$0x73625140] }
 0x1be   :  { %v1743_v40 = vld.sshfl [vmem:[#allocation1 + $0x10] sm:$0xff pattern:$0x73625140]  ;;  %v1745_v59 = vld.sshfl [vmem:[#allocation1 + $0x18] sm:$0xff pattern:$0x73625140]  ;;  %v878_v41 = vadd.f32 %v877_v19, %v876_v14 }
 0x1bf   :  { %v1749_v5 = vld.sshfl [vmem:[#allocation1 + $0x20] sm:$0xff pattern:$0x73625140]  ;;  %v1751_v22 = vld.sshfl [vmem:[#allocation1 + $0x28] sm:$0xff pattern:$0x73625140] }
 0x1c0   :  { %v1755_v2 = vld.sshfl [vmem:[#allocation1 + $0x30] sm:$0xff pattern:$0x73625140]  ;;  %v1757_v43 = vld.sshfl [vmem:[#allocation1 + $0x38] sm:$0xff pattern:$0x73625140]  ;;  %v880_v16 = vadd.f32 %v879_v12, %v878_v41 }
 0x1c1   :  { %664 = vst [vmem:[#allocation1] ss:$4 sm:$0xff] %v527_v35  ;;  %v885_v19 = vsel %vm273_vm0, %v1625_v44, 0.0  ;;  %v889_v12 = vsel %vm273_vm0, %v1631_v51, 0.0  ;;  %v895_v44 = vsel %vm273_vm0, %v1639_v4, 0.0  ;;  %v899_v51 = vsel %vm273_vm0, %v1663_v9, 0.0 }
 0x1c2   :  { %665 = vst [vmem:[#allocation1 + $0x20] ss:$4 sm:$0xff] %v528_v53  ;;  %v882_v3 = vadd.f32 %v881_v11, %v880_v16  ;;  %v905_v4 = vsel %vm273_vm0, %v1671_v34, 0.0  ;;  %v909_v9 = vsel %vm273_vm0, %v1677_v21, 0.0  ;;  %v915_v34 = vsel %vm273_vm0, %v1701_v55, 0.0 }
 0x1c3   :  { %v919_v21 = vsel %vm273_vm0, %v1705_v18, 0.0  ;;  %v925_v55 = vsel %vm273_vm0, %v1715_v8, 0.0  ;;  %v929_v18 = vsel %vm273_vm0, %v1739_v29, 0.0  ;;  %v931_v49 = vsel %vm273_vm0, %v1741_v13, 0.0 }
 0x1c4   :  { %v884_v37 = vadd.f32 %v883_v50, %v882_v3  ;;  %v933_v20 = vsel %vm273_vm0, %v1743_v40, 0.0  ;;  %v935_v8 = vsel %vm273_vm0, %v1745_v59, 0.0  ;;  %v937_v25 = vsel %vm273_vm0, %v1749_v5, 0.0 }
 0x1c5   :  { %v939_v29 = vsel %vm273_vm0, %v1751_v22, 0.0  ;;  %v941_v13 = vsel %vm273_vm0, %v1755_v2, 0.0  ;;  %v943_v40 = vsel %vm273_vm0, %v1757_v43, 0.0 }
 0x1c6   :  { %v886_v14 = vadd.f32 %v885_v19, %v884_v37 }
 0x1c8   :  { %v888_v56 = vadd.f32 %v887_v15, %v886_v14 }
 0x1ca   :  { %v890_v35 = vadd.f32 %v889_v12, %v888_v56 }
 0x1cc   :  { %v892_v41 = vadd.f32 %v891_v10, %v890_v35 }
 0x1ce   :  { %v894_v53 = vadd.f32 %v893_v57, %v892_v41 }
 0x1d0   :  { %v896_v16 = vadd.f32 %v895_v44, %v894_v53 }
 0x1d2   :  { %v898_v15 = vadd.f32 %v897_v32, %v896_v16 }
 0x1d4   :  { %v900_v56 = vadd.f32 %v899_v51, %v898_v15 }
 0x1d6   :  { %v902_v11 = vadd.f32 %v901_v33, %v900_v56 }
 0x1d8   :  { %v904_v3 = vadd.f32 %v903_v45, %v902_v11  ;;  %v666_v45 = vld.sshfl [vmem:[#allocation1] sm:$0xff pattern:$0x73625140] }
 0x1d9   :  { %v945_v59 = vsel %vm273_vm0, %v666_v45, 0.0 }
 0x1da   :  { %v906_v50 = vadd.f32 %v905_v4, %v904_v3  ;;  %v667_v4 = vld.sshfl [vmem:[#allocation1 + $0x8] sm:$0xff pattern:$0x73625140] }
 0x1db   :  { %v947_v5 = vsel %vm273_vm0, %v667_v4, 0.0 }
 0x1dc   :  { %v908_v37 = vadd.f32 %v907_v30, %v906_v50  ;;  %v668_v30 = vld.sshfl [vmem:[#allocation1 + $0x10] sm:$0xff pattern:$0x73625140] }
 0x1dd   :  { %v949_v22 = vsel %vm273_vm0, %v668_v30, 0.0 }
 0x1de   :  { %v910_v19 = vadd.f32 %v909_v9, %v908_v37  ;;  %v669_v9 = vld.sshfl [vmem:[#allocation1 + $0x18] sm:$0xff pattern:$0x73625140] }
 0x1df   :  { %v951_v2 = vsel %vm273_vm0, %v669_v9, 0.0 }
 0x1e0   :  { %v912_v14 = vadd.f32 %v911_v26, %v910_v19  ;;  %v670_v26 = vld.sshfl [vmem:[#allocation1 + $0x20] sm:$0xff pattern:$0x73625140] }
 0x1e1   :  { %v953_v43 = vsel %vm273_vm0, %v670_v26, 0.0 }
 0x1e2   :  { %v914_v12 = vadd.f32 %v913_v23, %v912_v14  ;;  %v671_v23 = vld.sshfl [vmem:[#allocation1 + $0x28] sm:$0xff pattern:$0x73625140] }
 0x1e4   :  { %v916_v35 = vadd.f32 %v915_v34, %v914_v12  ;;  %v672_v34 = vld.sshfl [vmem:[#allocation1 + $0x30] sm:$0xff pattern:$0x73625140] }
 0x1e6   :  { %v918_v10 = vadd.f32 %v917_v38, %v916_v35  ;;  %v955_v38 = vsel %vm273_vm0, %v671_v23, 0.0 }
 0x1e8   :  { %v920_v41 = vadd.f32 %v919_v21, %v918_v10  ;;  %v673_v10 = vld.sshfl [vmem:[#allocation1 + $0x38] sm:$0xff pattern:$0x73625140] }
 0x1ea   :  { %v922_v57 = vadd.f32 %v921_v7, %v920_v41  ;;  %v957_v41 = vsel %vm273_vm0, %v672_v34, 0.0 }
 0x1ec   :  { %v924_v53 = vadd.f32 %v923_v48, %v922_v57  ;;  %v959_v57 = vsel %vm273_vm0, %v673_v10, 0.0  ;;  %v1958_v10 = vld [vmem:[#allocation4_spill] sm:$0xff] }
 0x1ee   :  { %v926_v44 = vadd.f32 %v925_v55, %v924_v53  ;;  %v1069_v53 = vmov 12287.0  }
 0x1ef   :  { %1061 = vrcp.f32 %v1069_v53 }
 0x1f0   :  { %v928_v16 = vadd.f32 %v927_v61, %v926_v44 }
 0x1f2   :  { %v930_v32 = vadd.f32 %v929_v18, %v928_v16 }
 0x1f4   :  { %v932_v15 = vadd.f32 %v931_v49, %v930_v32 }
 0x1f5   :  { %v1062_v55 = vpop.eup %1061 }
 0x1f6   :  { %v934_v51 = vadd.f32 %v933_v20, %v932_v15  ;;  %v964_v44 = vmul.f32 12287.0, %v1062_v55  ;;  %vm968_vm2 = vweird.f32 %v1062_v55 }
 0x1f8   :  { %v936_v56 = vadd.f32 %v935_v8, %v934_v51  ;;  %v965_v61 = vsub.f32 1.0, %v964_v44 }
 0x1fa   :  { %v938_v33 = vadd.f32 %v937_v25, %v936_v56  ;;  %v966_v16 = vmul.f32 %v1062_v55, %v965_v61 }
 0x1fc   :  { %v940_v11 = vadd.f32 %v939_v29, %v938_v33  ;;  %v967_v18 = vadd.f32 %v1062_v55, %v966_v16 }
 0x1fe   :  { %v942_v3 = vadd.f32 %v941_v13, %v940_v11  ;;  %v969_v32 = vsel %vm968_vm2, %v1062_v55, %v967_v18 }
 0x200   :  { %v944_v50 = vadd.f32 %v943_v40, %v942_v3  ;;  %v1953_v40 = vunpack.c.0.s8 %v1425_v47 }
 0x202   :  { %v946_v37 = vadd.f32 %v945_v59, %v944_v50 }
 0x204   :  { %v948_v19 = vadd.f32 %v947_v5, %v946_v37 }
 0x206   :  { %v950_v14 = vadd.f32 %v949_v22, %v948_v19 }
 0x208   :  { %v952_v12 = vadd.f32 %v951_v2, %v950_v14 }
 0x20a   :  { %v954_v35 = vadd.f32 %v953_v43, %v952_v12 }
 0x20c   :  { %v956_v21 = vadd.f32 %v955_v38, %v954_v35 }
 0x20e   :  { %v958_v7 = vadd.f32 %v957_v41, %v956_v21  ;;  %v1959_v41 = vld [vmem:[#allocation7_spill] sm:$0xff] }
 0x210   :  { %v960_v48 = vadd.f32 %v959_v57, %v958_v7 }
 0x212   :  { %961 = vadd.xlane.f32.xlu0 %v960_v48 }
 0x285   :  { %v962_v49 = vpop.xlane.xlu0 %961 }
 0x286   :  { %v970_v15 = vmul.f32 %v969_v32, %v962_v49 }
 0x288   :  { %1063 = vrsqrt.f32 %v970_v15  ;;  %vm978_vm3 = vcmp.eq.f32.partialorder %v970_v15, inf  ;;  %v981_v11 = vand.u32 2147483648, %v970_v15  ;;  %vm980_vm4 = vcmp.eq.f32.partialorder %v970_v15, 0.0 }
 0x28e   :  { %v1064_v20 = vpop.eup %1063 }
 0x28f   :  { %v972_v51 = vmul.f32 %v1064_v20, %v970_v15 }
 0x291   :  { %v973_v8 = vmul.f32 %v1064_v20, %v972_v51 }
 0x293   :  { %v974_v56 = vmul.f32 0.5, %v973_v8 }
 0x295   :  { %v975_v25 = vsub.f32 1.5, %v974_v56 }
 0x297   :  { %v976_v33 = vmul.f32 %v1064_v20, %v975_v25 }
 0x299   :  { %v977_v29 = vmul.f32 %v976_v33, %v970_v15 }
 0x29b   :  { %v979_v13 = vsel %vm978_vm3, %v970_v15, %v977_v29 }
 0x29c   :  { %v982_v45 = vsel %vm980_vm4, %v981_v11, %v979_v13 }
 0x29d   :  { %v983_v3 = vadd.f32 1e-07, %v982_v45 }
 0x29f   :  { %v988_v4 = vperm.slane %v983_v3, %v1953_v40 }
 0x2a1   :  { %1065 = vrcp.f32 %v988_v4  ;;  %v1001_v37 = vand.u32 2147483648, %v988_v4  ;;  %v999_v9 = vand.u32 2147483647, %v988_v4  ;;  %vm995_vm6 = vweird.f32 %v988_v4 }
 0x2a3   :  { %v1002_v22 = vor.u32 1.1754944e-38, %v1001_v37  ;;  %vm1000_vm8 = vcmp.eq.f32.partialorder %v999_v9, 8.507059e+37 }
 0x2a7   :  { %v1066_v50 = vpop.eup %1065 }
 0x2a8   :  { %v991_v59 = vmul.f32 %v1066_v50, %v988_v4  ;;  %vm996_vm5 = vweird.f32 %v1066_v50 }
 0x2a9   :  { %vm997_vm7 = vmor %vm995_vm6, %vm996_vm5 }
 0x2aa   :  { %v992_v30 = vsub.f32 1.0, %v991_v59 }
 0x2ac   :  { %v993_v5 = vmul.f32 %v1066_v50, %v992_v30 }
 0x2ae   :  { %v994_v19 = vadd.f32 %v1066_v50, %v993_v5 }
 0x2b0   :  { %v998_v26 = vsel %vm997_vm7, %v1066_v50, %v994_v19 }
 0x2b1   :  { %v1003_v14 = vsel %vm1000_vm8, %v1002_v22, %v998_v26 }
 0x2b2   :  { %v1004_v2 = vmul.f32 %v1003_v14, %v1434_v46  ;;  %v1005_v47 = vmul.f32 %v1003_v14, %v1438_v28  ;;  %v1006_v23 = vmul.f32 %v1003_v14, %v1446_v54  ;;  %v1007_v12 = vmul.f32 %v1003_v14, %v1450_v0 }
 0x2b3   :  { %v1008_v43 = vmul.f32 %v1003_v14, %v1461_v31  ;;  %v1009_v34 = vmul.f32 %v1003_v14, %v1466_v58  ;;  %v1010_v46 = vmul.f32 %v1003_v14, %v1479_v39  ;;  %v1011_v28 = vmul.f32 %v1003_v14, %v1483_v52 }
 0x2b4   :  { %1028 = vst [vmem:[%s1930_s1] sm:$0xff] %v1004_v2  ;;  %v1012_v54 = vmul.f32 %v1003_v14, %v1496_v36  ;;  %v1013_v0 = vmul.f32 %v1003_v14, %v1501_v24  ;;  %v1014_v31 = vmul.f32 %v1003_v14, %v1514_v60  ;;  %v1015_v58 = vmul.f32 %v1003_v14, %v1518_v1 }
 0x2b5   :  { %1029 = vst [vmem:[%s1930_s1 + $0x8] sm:$0xff] %v1005_v47  ;;  %v1016_v39 = vmul.f32 %v1003_v14, %v1541_v6  ;;  %v1017_v52 = vmul.f32 %v1003_v14, %v1546_v63  ;;  %v1018_v36 = vmul.f32 %v1003_v14, %v1575_v27  ;;  %v1019_v24 = vmul.f32 %v1003_v14, %v1579_v62  ;;  %v1954_v6 = vld [vmem:[#allocation5_spill] sm:$0xff]  ;;  %v1955_v27 = vld [vmem:[#allocation6_spill] sm:$0xff] }
 0x2b6   :  { %1030 = vst [vmem:[%s1930_s1 + $0x10] sm:$0xff] %v1006_v23  ;;  %v1020_v60 = vmul.f32 %v1003_v14, %v1609_v17  ;;  %v1021_v1 = vmul.f32 %v1003_v14, %v1615_v42  ;;  %v1022_v63 = vmul.f32 %v1003_v14, %v1954_v6  ;;  %v1023_v62 = vmul.f32 %v1003_v14, %v1955_v27  ;;  %v1956_v17 = vld [vmem:[#allocation2_spill] sm:$0xff]  ;;  %v1957_v42 = vld [vmem:[#allocation3_spill] sm:$0xff] }
 0x2b7   :  { %1031 = vst [vmem:[%s1930_s1 + $0x18] sm:$0xff] %v1007_v12  ;;  %v1024_v35 = vmul.f32 %v1003_v14, %v1956_v17  ;;  %v1025_v38 = vmul.f32 %v1003_v14, %v1957_v42  ;;  %v1026_v21 = vmul.f32 %v1003_v14, %v1958_v10  ;;  %v1027_v7 = vmul.f32 %v1003_v14, %v1959_v41 }
 0x2b8   :  { %1032 = vst [vmem:[%s1930_s1 + $0x20] sm:$0xff] %v1008_v43 }
 0x2b9   :  { %1033 = vst [vmem:[%s1930_s1 + $0x28] sm:$0xff] %v1009_v34 }
 0x2ba   :  { %1034 = vst [vmem:[%s1930_s1 + $0x30] sm:$0xff] %v1010_v46 }
 0x2bb   :  { %1035 = vst [vmem:[%s1930_s1 + $0x38] sm:$0xff] %v1011_v28 }
 0x2bc   :  { %1036 = vst [vmem:[%s1930_s1 + $0x40] sm:$0xff] %v1012_v54 }
 0x2bd   :  { %1037 = vst [vmem:[%s1930_s1 + $0x48] sm:$0xff] %v1013_v0 }
 0x2be   :  { %1038 = vst [vmem:[%s1930_s1 + $0x50] sm:$0xff] %v1014_v31 }
 0x2bf   :  { %1039 = vst [vmem:[%s1930_s1 + $0x58] sm:$0xff] %v1015_v58 }
 0x2c0   :  { %1040 = vst [vmem:[%s1930_s1 + $0x60] sm:$0xff] %v1016_v39 }
 0x2c1   :  { %1041 = vst [vmem:[%s1930_s1 + $0x68] sm:$0xff] %v1017_v52 }
 0x2c2   :  { %1042 = vst [vmem:[%s1930_s1 + $0x70] sm:$0xff] %v1018_v36 }
 0x2c3   :  { %1043 = vst [vmem:[%s1930_s1 + $0x78] sm:$0xff] %v1019_v24 }
 0x2c4   :  { %1044 = vst [vmem:[%s1930_s1 + $0x80] sm:$0xff] %v1020_v60 }
 0x2c5   :  { %1045 = vst [vmem:[%s1930_s1 + $0x88] sm:$0xff] %v1021_v1 }
 0x2c6   :  { %1046 = vst [vmem:[%s1930_s1 + $0x90] sm:$0xff] %v1022_v63 }
 0x2c7   :  { %1047 = vst [vmem:[%s1930_s1 + $0x98] sm:$0xff] %v1023_v62 }
 0x2c8   :  { %1048 = vst [vmem:[%s1930_s1 + $0xa0] sm:$0xff] %v1024_v35 }
 0x2c9   :  { %1049 = vst [vmem:[%s1930_s1 + $0xa8] sm:$0xff] %v1025_v38 }
 0x2ca   :  { %1050 = vst [vmem:[%s1930_s1 + $0xb0] sm:$0xff] %v1026_v21 }
 0x2cb   :  { %1051 = vst [vmem:[%s1930_s1 + $0xb8] sm:$0xff] %v1027_v7 }

// kernel: forward.11
= control target key start
LH: loop header
LB: loop body
LE: loop exit
PB: predicated region body
PF: predicated region fallthrough
CT: control target
= control target key end

     0   :  { %s1198_s12 = smov 0   ;;  %s1496_s0 = inlined_call_operand.vmem [shape: bf16[2048,27], index: 0, kind: input, shape index: {}]   ;;  %s1497_s1 = inlined_call_operand.vmem [shape: bf16[27,16], index: 1, kind: input, shape index: {}]   ;;  %s1498_s2 = inlined_call_operand.vmem [shape: f32[1,16], index: 2, kind: input, shape index: {}]   ;;  %s1499_s3 = inlined_call_operand.vmem [shape: bf16[2048,16], index: 3, kind: output, shape index: {}]  }
   0x1 LB: > { %s940_s13 = sadd.s32 4294967295, %s1175_s12   ;;  %p944_p0 = scmp.ge.s32.totalorder %s1175_s12, 1  ;;  %s1175_s12 = sphi %s1198_s12, %s13_s12  }
   0x2   : > { %p138_p1 = scmp.lt.s32.totalorder %s1175_s12, 5 }
   0x4   : > { %p139_p2 = pnand %p944_p0, %p138_p1 }
   0x5   : > { %s945_s18 = sshll.u32 (!%p139_p2), %s940_s13, 6 }
   0x6   : > { %142 = sbr.rel (%p139_p2) target bundleno = 285 (0x11d), region = 32  ;;  %p163_p3 = scmp.lt.s32.totalorder (!%p139_p2), %s945_s18, 255 }
   0xb   : > { %v1083_v0 = vld [vmem:[%s1497_s1 + $0x8] sm:$0xf]  ;;  %v1152_v1 = vld [vmem:[%s1497_s1 + $0x8] sm:$0x30]  ;;  %vm515_vm0 = vcmask 1044480   ;;  %vm516_vm1 = vcmask 1045504  }
   0xc   : > { %v1084_v2 = vor.u32 %v1152_v1, %v1083_v0  ;;  %v1177_v3 = vmov 65535   ;;  %s1501_s18 = smov (!%p163_p3, %s945_s18), 255  ;;  %v1151_v7 = vld [vmem:[%s1497_s1] sm:$0xff]  ;;  %vm418_vm2 = vcmask 220160   ;;  %vm819_vm3 = vcmask 125952  }
   0xd   : > { %v517_v4 = vsel %vm515_vm0, 4294967295, %v1177_v3  ;;  %s946_s21 = sshll.u32 %s1501_s18, 2  ;;  %v1292_v40 = vld [vmem:[%s1498_s2] ss:$0 sm:$0xff] }
   0xe   : > { %v518_v5 = vsel %vm516_vm1, %v517_v4, 0  ;;  %s1223_s24 = scalar_lea.vmem %s1496_s0, %s946_s21  ;;  %s1301_s29 = scalar_lea.vmem %s1499_s3, %s946_s21 }
   0xf   : > { %v520_v6 = vand.u32 %v1084_v2, %v518_v5  ;;  %v1119_v8 = vld [vmem:[%s1223_s24] sm:$0xff]  ;;  %v1120_v12 = vld [vmem:[%s1223_s24 + $0x8] sm:$0xff]  ;;  %v1121_v16 = vld [vmem:[%s1223_s24 + $0x10] sm:$0xff] }
  0x10   : > { %v1127_v9 = vld [vmem:[%s1223_s24 + $0x40] sm:$0xff]  ;;  %v1128_v13 = vld [vmem:[%s1223_s24 + $0x48] sm:$0xff]  ;;  %v1129_v17 = vld [vmem:[%s1223_s24 + $0x50] sm:$0xff] }
  0x11   : > { %528 = vmatpush.bf16.msra.mxu0 %v520_v6  ;;  %1153 = vmatpush.bf16.msra.mxu1 %v520_v6  ;;  %v1135_v10 = vld [vmem:[%s1223_s24 + $0x80] sm:$0xff]  ;;  %v1136_v14 = vld [vmem:[%s1223_s24 + $0x88] sm:$0xff]  ;;  %v1137_v18 = vld [vmem:[%s1223_s24 + $0x90] sm:$0xff] }
  0x12   : > { %1154 = vmatpush.bf16.msra.mxu2 %v520_v6  ;;  %1155 = vmatpush.bf16.msra.mxu3 %v520_v6  ;;  %v1143_v11 = vld [vmem:[%s1223_s24 + $0xc0] sm:$0xff]  ;;  %v1144_v15 = vld [vmem:[%s1223_s24 + $0xc8] sm:$0xff]  ;;  %v1145_v19 = vld [vmem:[%s1223_s24 + $0xd0] sm:$0xff] }
  0x13   : > { %v1122_v20 = vld [vmem:[%s1223_s24 + $0x18] sm:$0xff]  ;;  %v1123_v24 = vld [vmem:[%s1223_s24 + $0x20] sm:$0xff]  ;;  %v1124_v28 = vld [vmem:[%s1223_s24 + $0x28] sm:$0xff] }
  0x14   : > { %v1130_v21 = vld [vmem:[%s1223_s24 + $0x58] sm:$0xff]  ;;  %v1131_v25 = vld [vmem:[%s1223_s24 + $0x60] sm:$0xff]  ;;  %v1132_v29 = vld [vmem:[%s1223_s24 + $0x68] sm:$0xff] }
  0x15   : > { %529 = vmatpush.bf16.msra.mxu0 %v1151_v7  ;;  %1156 = vmatpush.bf16.msra.mxu1 %v1151_v7  ;;  %v1138_v22 = vld [vmem:[%s1223_s24 + $0x98] sm:$0xff]  ;;  %v1139_v26 = vld [vmem:[%s1223_s24 + $0xa0] sm:$0xff]  ;;  %v1140_v30 = vld [vmem:[%s1223_s24 + $0xa8] sm:$0xff] }
  0x16   : > { %1157 = vmatpush.bf16.msra.mxu2 %v1151_v7  ;;  %1158 = vmatpush.bf16.msra.mxu3 %v1151_v7  ;;  %v1146_v23 = vld [vmem:[%s1223_s24 + $0xd8] sm:$0xff]  ;;  %v1147_v27 = vld [vmem:[%s1223_s24 + $0xe0] sm:$0xff]  ;;  %v1148_v31 = vld [vmem:[%s1223_s24 + $0xe8] sm:$0xff] }
  0x17   : > { %v1125_v32 = vld [vmem:[%s1223_s24 + $0x30] sm:$0xff]  ;;  %v1126_v36 = vld [vmem:[%s1223_s24 + $0x38] sm:$0xff] }
  0x18   : > { %1085 = vmatmul.msk.bf16.vlgmr.msra.gmra.mxu0 %vm418_vm2, %v1119_v8  ;;  %1093 = vmatmul.msk.bf16.vlgmr.msra.gmra.mxu1 %vm418_vm2, %v1127_v9  ;;  %v1133_v33 = vld [vmem:[%s1223_s24 + $0x70] sm:$0xff]  ;;  %v1134_v37 = vld [vmem:[%s1223_s24 + $0x78] sm:$0xff] }
  0x19   : > { %1101 = vmatmul.msk.bf16.vlgmr.msra.gmra.mxu2 %vm418_vm2, %v1135_v10  ;;  %1109 = vmatmul.msk.bf16.vlgmr.msra.gmra.mxu3 %vm418_vm2, %v1143_v11  ;;  %v1141_v34 = vld [vmem:[%s1223_s24 + $0xb0] sm:$0xff]  ;;  %v1142_v38 = vld [vmem:[%s1223_s24 + $0xb8] sm:$0xff] }
  0x1a   : > { %v1149_v35 = vld [vmem:[%s1223_s24 + $0xf0] sm:$0xff]  ;;  %v1150_v39 = vld [vmem:[%s1223_s24 + $0xf8] sm:$0xff] }
  0x28   : > { %1086 = vmatmul.msk.bf16.gmra.mxu0 %vm418_vm2, %v1120_v12  ;;  %1094 = vmatmul.msk.bf16.gmra.mxu1 %vm418_vm2, %v1128_v13 }
  0x29   : > { %1102 = vmatmul.msk.bf16.gmra.mxu2 %vm418_vm2, %v1136_v14  ;;  %1110 = vmatmul.msk.bf16.gmra.mxu3 %vm418_vm2, %v1144_v15 }
  0x38   : > { %1087 = vmatmul.msk.bf16.gmra.mxu0 %vm418_vm2, %v1121_v16  ;;  %1095 = vmatmul.msk.bf16.gmra.mxu1 %vm418_vm2, %v1129_v17 }
  0x39   : > { %1103 = vmatmul.msk.bf16.gmra.mxu2 %vm418_vm2, %v1137_v18  ;;  %1111 = vmatmul.msk.bf16.gmra.mxu3 %vm418_vm2, %v1145_v19 }
  0x48   : > { %1088 = vmatmul.msk.bf16.gmra.mxu0 %vm418_vm2, %v1122_v20  ;;  %1096 = vmatmul.msk.bf16.gmra.mxu1 %vm418_vm2, %v1130_v21 }
  0x49   : > { %1104 = vmatmul.msk.bf16.gmra.mxu2 %vm418_vm2, %v1138_v22  ;;  %1112 = vmatmul.msk.bf16.gmra.mxu3 %vm418_vm2, %v1146_v23 }
  0x58   : > { %1089 = vmatmul.msk.bf16.gmra.mxu0 %vm418_vm2, %v1123_v24  ;;  %1097 = vmatmul.msk.bf16.gmra.mxu1 %vm418_vm2, %v1131_v25 }
  0x59   : > { %1105 = vmatmul.msk.bf16.gmra.mxu2 %vm418_vm2, %v1139_v26  ;;  %1113 = vmatmul.msk.bf16.gmra.mxu3 %vm418_vm2, %v1147_v27 }
  0x68   : > { %1090 = vmatmul.msk.bf16.gmra.mxu0 %vm418_vm2, %v1124_v28  ;;  %1098 = vmatmul.msk.bf16.gmra.mxu1 %vm418_vm2, %v1132_v29 }
  0x69   : > { %1106 = vmatmul.msk.bf16.gmra.mxu2 %vm418_vm2, %v1140_v30  ;;  %1114 = vmatmul.msk.bf16.gmra.mxu3 %vm418_vm2, %v1148_v31 }
  0x78   : > { %1091 = vmatmul.msk.bf16.gmra.mxu0 %vm418_vm2, %v1125_v32  ;;  %1099 = vmatmul.msk.bf16.gmra.mxu1 %vm418_vm2, %v1133_v33 }
  0x79   : > { %1107 = vmatmul.msk.bf16.gmra.mxu2 %vm418_vm2, %v1141_v34  ;;  %1115 = vmatmul.msk.bf16.gmra.mxu3 %vm418_vm2, %v1149_v35 }
  0x88   : > { %1092 = vmatmul.msk.bf16.gmra.mxu0 %vm418_vm2, %v1126_v36  ;;  %1100 = vmatmul.msk.bf16.gmra.mxu1 %vm418_vm2, %v1134_v37 }
  0x89   : > { %1108 = vmatmul.msk.bf16.gmra.mxu2 %vm418_vm2, %v1142_v38  ;;  %1116 = vmatmul.msk.bf16.gmra.mxu3 %vm418_vm2, %v1150_v39 }
  0x95   : > { %v531_v41 = vpop.f32.mrf.mxu0  ;;  %v571_v42 = vpop.f32.mrf.mxu1 }
  0x96   : > { %v532_v43 = vadd.f32 %v1292_v40, %v531_v41  ;;  %v572_v44 = vadd.f32 %v1292_v40, %v571_v42 }
  0x98   : > { %v691_v45 = vmax.f32 %v532_v43, 0.0  ;;  %v707_v46 = vmax.f32 %v572_v44, 0.0 }
  0x9a   : > { %v755_v47 = vpack.c.bf16 %v691_v45, %v691_v45  ;;  %v771_v48 = vpack.c.bf16 %v707_v46, %v707_v46 }
  0x9c   : > { %820 = vst.msk [vmem:[%s1301_s29] sm:$0xf] %vm819_vm3, %v755_v47  ;;  %v611_v49 = vpop.f32.mrf.mxu2  ;;  %v651_v50 = vpop.f32.mrf.mxu3 }
  0x9d   : > { %836 = vst.msk [vmem:[%s1301_s29 + $0x40] sm:$0xf] %vm819_vm3, %v771_v48  ;;  %v612_v51 = vadd.f32 %v1292_v40, %v611_v49  ;;  %v652_v52 = vadd.f32 %v1292_v40, %v651_v50  ;;  %v533_v53 = vpop.f32.mrf.mxu0  ;;  %v573_v54 = vpop.f32.mrf.mxu1 }
  0x9e   : > { %v534_v55 = vadd.f32 %v1292_v40, %v533_v53  ;;  %v574_v56 = vadd.f32 %v1292_v40, %v573_v54 }
  0x9f   : > { %v723_v57 = vmax.f32 %v612_v51, 0.0  ;;  %v739_v58 = vmax.f32 %v652_v52, 0.0 }
  0xa0   : > { %v692_v59 = vmax.f32 %v534_v55, 0.0  ;;  %v708_v60 = vmax.f32 %v574_v56, 0.0 }
  0xa1   : > { %v787_v61 = vpack.c.bf16 %v723_v57, %v723_v57  ;;  %v803_v62 = vpack.c.bf16 %v739_v58, %v739_v58 }
  0xa2   : > { %v756_v63 = vpack.c.bf16 %v692_v59, %v692_v59  ;;  %v772_v0 = vpack.c.bf16 %v708_v60, %v708_v60 }
  0xa3   : > { %852 = vst.msk [vmem:[%s1301_s29 + $0x80] sm:$0xf] %vm819_vm3, %v787_v61 }
  0xa4   : > { %868 = vst.msk [vmem:[%s1301_s29 + $0xc0] sm:$0xf] %vm819_vm3, %v803_v62  ;;  %v613_v1 = vpop.f32.mrf.mxu2  ;;  %v653_v2 = vpop.f32.mrf.mxu3 }
  0xa5   : > { %821 = vst.msk [vmem:[%s1301_s29 + $0x4] sm:$0xf] %vm819_vm3, %v756_v63  ;;  %v614_v3 = vadd.f32 %v1292_v40, %v613_v1  ;;  %v654_v4 = vadd.f32 %v1292_v40, %v653_v2  ;;  %v536_v5 = vpop.f32.mrf.mxu0  ;;  %v576_v6 = vpop.f32.mrf.mxu1 }
  0xa6   : > { %837 = vst.msk [vmem:[%s1301_s29 + $0x44] sm:$0xf] %vm819_vm3, %v772_v0  ;;  %v537_v7 = vadd.f32 %v1292_v40, %v536_v5  ;;  %v577_v8 = vadd.f32 %v1292_v40, %v576_v6 }
  0xa7   : > { %v724_v9 = vmax.f32 %v614_v3, 0.0  ;;  %v740_v10 = vmax.f32 %v654_v4, 0.0 }
  0xa8   : > { %v693_v11 = vmax.f32 %v537_v7, 0.0  ;;  %v709_v12 = vmax.f32 %v577_v8, 0.0 }
  0xa9   : > { %v788_v13 = vpack.c.bf16 %v724_v9, %v724_v9  ;;  %v804_v14 = vpack.c.bf16 %v740_v10, %v740_v10 }
  0xaa   : > { %v757_v15 = vpack.c.bf16 %v693_v11, %v693_v11  ;;  %v773_v16 = vpack.c.bf16 %v709_v12, %v709_v12 }
  0xab   : > { %853 = vst.msk [vmem:[%s1301_s29 + $0x84] sm:$0xf] %vm819_vm3, %v788_v13 }
  0xac   : > { %869 = vst.msk [vmem:[%s1301_s29 + $0xc4] sm:$0xf] %vm819_vm3, %v804_v14  ;;  %v616_v17 = vpop.f32.mrf.mxu2  ;;  %v656_v18 = vpop.f32.mrf.mxu3 }
  0xad   : > { %822 = vst.msk [vmem:[%s1301_s29 + $0x8] sm:$0xf] %vm819_vm3, %v757_v15  ;;  %v617_v19 = vadd.f32 %v1292_v40, %v616_v17  ;;  %v657_v20 = vadd.f32 %v1292_v40, %v656_v18  ;;  %v538_v21 = vpop.f32.mrf.mxu0  ;;  %v578_v22 = vpop.f32.mrf.mxu1 }
  0xae   : > { %838 = vst.msk [vmem:[%s1301_s29 + $0x48] sm:$0xf] %vm819_vm3, %v773_v16  ;;  %v539_v23 = vadd.f32 %v1292_v40, %v538_v21  ;;  %v579_v24 = vadd.f32 %v1292_v40, %v578_v22 }
  0xaf   : > { %v725_v25 = vmax.f32 %v617_v19, 0.0  ;;  %v741_v26 = vmax.f32 %v657_v20, 0.0 }
  0xb0   : > { %v694_v27 = vmax.f32 %v539_v23, 0.0  ;;  %v710_v28 = vmax.f32 %v579_v24, 0.0 }
  0xb1   : > { %v789_v29 = vpack.c.bf16 %v725_v25, %v725_v25  ;;  %v805_v30 = vpack.c.bf16 %v741_v26, %v741_v26 }
  0xb2   : > { %v758_v31 = vpack.c.bf16 %v694_v27, %v694_v27  ;;  %v774_v32 = vpack.c.bf16 %v710_v28, %v710_v28 }
  0xb3   : > { %854 = vst.msk [vmem:[%s1301_s29 + $0x88] sm:$0xf] %vm819_vm3, %v789_v29 }
  0xb4   : > { %870 = vst.msk [vmem:[%s1301_s29 + $0xc8] sm:$0xf] %vm819_vm3, %v805_v30  ;;  %v618_v33 = vpop.f32.mrf.mxu2  ;;  %v658_v34 = vpop.f32.mrf.mxu3 }
  0xb5   : > { %823 = vst.msk [vmem:[%s1301_s29 + $0xc] sm:$0xf] %vm819_vm3, %v758_v31  ;;  %v619_v35 = vadd.f32 %v1292_v40, %v618_v33  ;;  %v659_v36 = vadd.f32 %v1292_v40, %v658_v34  ;;  %v541_v37 = vpop.f32.mrf.mxu0  ;;  %v581_v38 = vpop.f32.mrf.mxu1 }
  0xb6   : > { %839 = vst.msk [vmem:[%s1301_s29 + $0x4c] sm:$0xf] %vm819_vm3, %v774_v32  ;;  %v542_v39 = vadd.f32 %v1292_v40, %v541_v37  ;;  %v582_v41 = vadd.f32 %v1292_v40, %v581_v38 }
  0xb7   : > { %v726_v42 = vmax.f32 %v619_v35, 0.0  ;;  %v742_v43 = vmax.f32 %v659_v36, 0.0 }
  0xb8   : > { %v695_v44 = vmax.f32 %v542_v39, 0.0  ;;  %v711_v45 = vmax.f32 %v582_v41, 0.0 }
  0xb9   : > { %v790_v46 = vpack.c.bf16 %v726_v42, %v726_v42  ;;  %v806_v47 = vpack.c.bf16 %v742_v43, %v742_v43 }
  0xba   : > { %v759_v48 = vpack.c.bf16 %v695_v44, %v695_v44  ;;  %v775_v49 = vpack.c.bf16 %v711_v45, %v711_v45 }
  0xbb   : > { %855 = vst.msk [vmem:[%s1301_s29 + $0x8c] sm:$0xf] %vm819_vm3, %v790_v46 }
  0xbc   : > { %871 = vst.msk [vmem:[%s1301_s29 + $0xcc] sm:$0xf] %vm819_vm3, %v806_v47  ;;  %v621_v50 = vpop.f32.mrf.mxu2  ;;  %v661_v51 = vpop.f32.mrf.mxu3 }
  0xbd   : > { %824 = vst.msk [vmem:[%s1301_s29 + $0x10] sm:$0xf] %vm819_vm3, %v759_v48  ;;  %v622_v52 = vadd.f32 %v1292_v40, %v621_v50  ;;  %v662_v53 = vadd.f32 %v1292_v40, %v661_v51  ;;  %v543_v54 = vpop.f32.mrf.mxu0  ;;  %v583_v55 = vpop.f32.mrf.mxu1 }
  0xbe   : > { %840 = vst.msk [vmem:[%s1301_s29 + $0x50] sm:$0xf] %vm819_vm3, %v775_v49  ;;  %v544_v56 = vadd.f32 %v1292_v40, %v543_v54  ;;  %v584_v57 = vadd.f32 %v1292_v40, %v583_v55 }
  0xbf   : > { %v727_v58 = vmax.f32 %v622_v52, 0.0  ;;  %v743_v59 = vmax.f32 %v662_v53, 0.0 }
  0xc0   : > { %v696_v60 = vmax.f32 %v544_v56, 0.0  ;;  %v712_v61 = vmax.f32 %v584_v57, 0.0 }
  0xc1   : > { %v791_v62 = vpack.c.bf16 %v727_v58, %v727_v58  ;;  %v807_v63 = vpack.c.bf16 %v743_v59, %v743_v59 }
  0xc2   : > { %v760_v0 = vpack.c.bf16 %v696_v60, %v696_v60  ;;  %v776_v1 = vpack.c.bf16 %v712_v61, %v712_v61 }
  0xc3   : > { %856 = vst.msk [vmem:[%s1301_s29 + $0x90] sm:$0xf] %vm819_vm3, %v791_v62 }
  0xc4   : > { %872 = vst.msk [vmem:[%s1301_s29 + $0xd0] sm:$0xf] %vm819_vm3, %v807_v63  ;;  %v623_v2 = vpop.f32.mrf.mxu2  ;;  %v663_v3 = vpop.f32.mrf.mxu3 }
  0xc5   : > { %825 = vst.msk [vmem:[%s1301_s29 + $0x14] sm:$0xf] %vm819_vm3, %v760_v0  ;;  %v624_v4 = vadd.f32 %v1292_v40, %v623_v2  ;;  %v664_v5 = vadd.f32 %v1292_v40, %v663_v3  ;;  %v546_v6 = vpop.f32.mrf.mxu0  ;;  %v586_v7 = vpop.f32.mrf.mxu1 }
  0xc6   : > { %841 = vst.msk [vmem:[%s1301_s29 + $0x54] sm:$0xf] %vm819_vm3, %v776_v1  ;;  %v547_v8 = vadd.f32 %v1292_v40, %v546_v6  ;;  %v587_v9 = vadd.f32 %v1292_v40, %v586_v7 }
  0xc7   : > { %v728_v10 = vmax.f32 %v624_v4, 0.0  ;;  %v744_v11 = vmax.f32 %v664_v5, 0.0 }
  0xc8   : > { %v697_v12 = vmax.f32 %v547_v8, 0.0  ;;  %v713_v13 = vmax.f32 %v587_v9, 0.0 }
  0xc9   : > { %v792_v14 = vpack.c.bf16 %v728_v10, %v728_v10  ;;  %v808_v15 = vpack.c.bf16 %v744_v11, %v744_v11 }
  0xca   : > { %v761_v16 = vpack.c.bf16 %v697_v12, %v697_v12  ;;  %v777_v17 = vpack.c.bf16 %v713_v13, %v713_v13 }
  0xcb   : > { %857 = vst.msk [vmem:[%s1301_s29 + $0x94] sm:$0xf] %vm819_vm3, %v792_v14 }
  0xcc   : > { %873 = vst.msk [vmem:[%s1301_s29 + $0xd4] sm:$0xf] %vm819_vm3, %v808_v15  ;;  %v626_v18 = vpop.f32.mrf.mxu2  ;;  %v666_v19 = vpop.f32.mrf.mxu3 }
  0xcd   : > { %826 = vst.msk [vmem:[%s1301_s29 + $0x18] sm:$0xf] %vm819_vm3, %v761_v16  ;;  %v627_v20 = vadd.f32 %v1292_v40, %v626_v18  ;;  %v667_v21 = vadd.f32 %v1292_v40, %v666_v19  ;;  %v548_v22 = vpop.f32.mrf.mxu0  ;;  %v588_v23 = vpop.f32.mrf.mxu1 }
  0xce   : > { %842 = vst.msk [vmem:[%s1301_s29 + $0x58] sm:$0xf] %vm819_vm3, %v777_v17  ;;  %v549_v24 = vadd.f32 %v1292_v40, %v548_v22  ;;  %v589_v25 = vadd.f32 %v1292_v40, %v588_v23 }
  0xcf   : > { %v729_v26 = vmax.f32 %v627_v20, 0.0  ;;  %v745_v27 = vmax.f32 %v667_v21, 0.0 }
  0xd0   : > { %v698_v28 = vmax.f32 %v549_v24, 0.0  ;;  %v714_v29 = vmax.f32 %v589_v25, 0.0 }
  0xd1   : > { %v793_v30 = vpack.c.bf16 %v729_v26, %v729_v26  ;;  %v809_v31 = vpack.c.bf16 %v745_v27, %v745_v27 }
  0xd2   : > { %v762_v32 = vpack.c.bf16 %v698_v28, %v698_v28  ;;  %v778_v33 = vpack.c.bf16 %v714_v29, %v714_v29 }
  0xd3   : > { %858 = vst.msk [vmem:[%s1301_s29 + $0x98] sm:$0xf] %vm819_vm3, %v793_v30 }
  0xd4   : > { %874 = vst.msk [vmem:[%s1301_s29 + $0xd8] sm:$0xf] %vm819_vm3, %v809_v31  ;;  %v628_v34 = vpop.f32.mrf.mxu2  ;;  %v668_v35 = vpop.f32.mrf.mxu3 }
  0xd5   : > { %827 = vst.msk [vmem:[%s1301_s29 + $0x1c] sm:$0xf] %vm819_vm3, %v762_v32  ;;  %v629_v36 = vadd.f32 %v1292_v40, %v628_v34  ;;  %v669_v37 = vadd.f32 %v1292_v40, %v668_v35  ;;  %v551_v38 = vpop.f32.mrf.mxu0  ;;  %v591_v39 = vpop.f32.mrf.mxu1 }
  0xd6   : > { %843 = vst.msk [vmem:[%s1301_s29 + $0x5c] sm:$0xf] %vm819_vm3, %v778_v33  ;;  %v552_v41 = vadd.f32 %v1292_v40, %v551_v38  ;;  %v592_v42 = vadd.f32 %v1292_v40, %v591_v39 }
  0xd7   : > { %v730_v43 = vmax.f32 %v629_v36, 0.0  ;;  %v746_v44 = vmax.f32 %v669_v37, 0.0 }
  0xd8   : > { %v699_v45 = vmax.f32 %v552_v41, 0.0  ;;  %v715_v46 = vmax.f32 %v592_v42, 0.0 }
  0xd9   : > { %v794_v47 = vpack.c.bf16 %v730_v43, %v730_v43  ;;  %v810_v48 = vpack.c.bf16 %v746_v44, %v746_v44 }
  0xda   : > { %v763_v49 = vpack.c.bf16 %v699_v45, %v699_v45  ;;  %v779_v50 = vpack.c.bf16 %v715_v46, %v715_v46 }
  0xdb   : > { %859 = vst.msk [vmem:[%s1301_s29 + $0x9c] sm:$0xf] %vm819_vm3, %v794_v47 }
  0xdc   : > { %875 = vst.msk [vmem:[%s1301_s29 + $0xdc] sm:$0xf] %vm819_vm3, %v810_v48  ;;  %v631_v51 = vpop.f32.mrf.mxu2  ;;  %v671_v52 = vpop.f32.mrf.mxu3 }
  0xdd   : > { %828 = vst.msk [vmem:[%s1301_s29 + $0x20] sm:$0xf] %vm819_vm3, %v763_v49  ;;  %v632_v53 = vadd.f32 %v1292_v40, %v631_v51  ;;  %v672_v54 = vadd.f32 %v1292_v40, %v671_v52  ;;  %v553_v55 = vpop.f32.mrf.mxu0  ;;  %v593_v56 = vpop.f32.mrf.mxu1 }
  0xde   : > { %844 = vst.msk [vmem:[%s1301_s29 + $0x60] sm:$0xf] %vm819_vm3, %v779_v50  ;;  %v554_v57 = vadd.f32 %v1292_v40, %v553_v55  ;;  %v594_v58 = vadd.f32 %v1292_v40, %v593_v56 }
  0xdf   : > { %v731_v59 = vmax.f32 %v632_v53, 0.0  ;;  %v747_v60 = vmax.f32 %v672_v54, 0.0 }
  0xe0   : > { %v700_v61 = vmax.f32 %v554_v57, 0.0  ;;  %v716_v62 = vmax.f32 %v594_v58, 0.0 }
  0xe1   : > { %v795_v63 = vpack.c.bf16 %v731_v59, %v731_v59  ;;  %v811_v0 = vpack.c.bf16 %v747_v60, %v747_v60 }
  0xe2   : > { %v764_v1 = vpack.c.bf16 %v700_v61, %v700_v61  ;;  %v780_v2 = vpack.c.bf16 %v716_v62, %v716_v62 }
  0xe3   : > { %860 = vst.msk [vmem:[%s1301_s29 + $0xa0] sm:$0xf] %vm819_vm3, %v795_v63 }
  0xe4   : > { %876 = vst.msk [vmem:[%s1301_s29 + $0xe0] sm:$0xf] %vm819_vm3, %v811_v0  ;;  %v633_v3 = vpop.f32.mrf.mxu2  ;;  %v673_v4 = vpop.f32.mrf.mxu3 }
  0xe5   : > { %829 = vst.msk [vmem:[%s1301_s29 + $0x24] sm:$0xf] %vm819_vm3, %v764_v1  ;;  %v634_v5 = vadd.f32 %v1292_v40, %v633_v3  ;;  %v674_v6 = vadd.f32 %v1292_v40, %v673_v4  ;;  %v556_v7 = vpop.f32.mrf.mxu0  ;;  %v596_v8 = vpop.f32.mrf.mxu1 }
  0xe6   : > { %845 = vst.msk [vmem:[%s1301_s29 + $0x64] sm:$0xf] %vm819_vm3, %v780_v2  ;;  %v557_v9 = vadd.f32 %v1292_v40, %v556_v7  ;;  %v597_v10 = vadd.f32 %v1292_v40, %v596_v8 }
  0xe7   : > { %v732_v11 = vmax.f32 %v634_v5, 0.0  ;;  %v748_v12 = vmax.f32 %v674_v6, 0.0 }
  0xe8   : > { %v701_v13 = vmax.f32 %v557_v9, 0.0  ;;  %v717_v14 = vmax.f32 %v597_v10, 0.0 }
  0xe9   : > { %v796_v15 = vpack.c.bf16 %v732_v11, %v732_v11  ;;  %v812_v16 = vpack.c.bf16 %v748_v12, %v748_v12 }
  0xea   : > { %v765_v17 = vpack.c.bf16 %v701_v13, %v701_v13  ;;  %v781_v18 = vpack.c.bf16 %v717_v14, %v717_v14 }
  0xeb   : > { %861 = vst.msk [vmem:[%s1301_s29 + $0xa4] sm:$0xf] %vm819_vm3, %v796_v15 }
  0xec   : > { %877 = vst.msk [vmem:[%s1301_s29 + $0xe4] sm:$0xf] %vm819_vm3, %v812_v16  ;;  %v636_v19 = vpop.f32.mrf.mxu2  ;;  %v676_v20 = vpop.f32.mrf.mxu3 }
  0xed   : > { %830 = vst.msk [vmem:[%s1301_s29 + $0x28] sm:$0xf] %vm819_vm3, %v765_v17  ;;  %v637_v21 = vadd.f32 %v1292_v40, %v636_v19  ;;  %v677_v22 = vadd.f32 %v1292_v40, %v676_v20  ;;  %v558_v23 = vpop.f32.mrf.mxu0  ;;  %v598_v24 = vpop.f32.mrf.mxu1 }
  0xee   : > { %846 = vst.msk [vmem:[%s1301_s29 + $0x68] sm:$0xf] %vm819_vm3, %v781_v18  ;;  %v559_v25 = vadd.f32 %v1292_v40, %v558_v23  ;;  %v599_v26 = vadd.f32 %v1292_v40, %v598_v24 }
  0xef   : > { %v733_v27 = vmax.f32 %v637_v21, 0.0  ;;  %v749_v28 = vmax.f32 %v677_v22, 0.0 }
  0xf0   : > { %v702_v29 = vmax.f32 %v559_v25, 0.0  ;;  %v718_v30 = vmax.f32 %v599_v26, 0.0 }
  0xf1   : > { %v797_v31 = vpack.c.bf16 %v733_v27, %v733_v27  ;;  %v813_v32 = vpack.c.bf16 %v749_v28, %v749_v28 }
  0xf2   : > { %v766_v33 = vpack.c.bf16 %v702_v29, %v702_v29  ;;  %v782_v34 = vpack.c.bf16 %v718_v30, %v718_v30 }
  0xf3   : > { %862 = vst.msk [vmem:[%s1301_s29 + $0xa8] sm:$0xf] %vm819_vm3, %v797_v31 }
  0xf4   : > { %878 = vst.msk [vmem:[%s1301_s29 + $0xe8] sm:$0xf] %vm819_vm3, %v813_v32  ;;  %v638_v35 = vpop.f32.mrf.mxu2  ;;  %v678_v36 = vpop.f32.mrf.mxu3 }
  0xf5   : > { %831 = vst.msk [vmem:[%s1301_s29 + $0x2c] sm:$0xf] %vm819_vm3, %v766_v33  ;;  %v639_v37 = vadd.f32 %v1292_v40, %v638_v35  ;;  %v679_v38 = vadd.f32 %v1292_v40, %v678_v36  ;;  %v561_v39 = vpop.f32.mrf.mxu0  ;;  %v601_v41 = vpop.f32.mrf.mxu1 }
  0xf6   : > { %847 = vst.msk [vmem:[%s1301_s29 + $0x6c] sm:$0xf] %vm819_vm3, %v782_v34  ;;  %v562_v42 = vadd.f32 %v1292_v40, %v561_v39  ;;  %v602_v43 = vadd.f32 %v1292_v40, %v601_v41 }
  0xf7   : > { %v734_v44 = vmax.f32 %v639_v37, 0.0  ;;  %v750_v45 = vmax.f32 %v679_v38, 0.0 }
  0xf8   : > { %v703_v46 = vmax.f32 %v562_v42, 0.0  ;;  %v719_v47 = vmax.f32 %v602_v43, 0.0 }
  0xf9   : > { %v798_v48 = vpack.c.bf16 %v734_v44, %v734_v44  ;;  %v814_v49 = vpack.c.bf16 %v750_v45, %v750_v45 }
  0xfa   : > { %v767_v50 = vpack.c.bf16 %v703_v46, %v703_v46  ;;  %v783_v51 = vpack.c.bf16 %v719_v47, %v719_v47 }
  0xfb   : > { %863 = vst.msk [vmem:[%s1301_s29 + $0xac] sm:$0xf] %vm819_vm3, %v798_v48 }
  0xfc   : > { %879 = vst.msk [vmem:[%s1301_s29 + $0xec] sm:$0xf] %vm819_vm3, %v814_v49  ;;  %v641_v52 = vpop.f32.mrf.mxu2  ;;  %v681_v53 = vpop.f32.mrf.mxu3 }
  0xfd   : > { %832 = vst.msk [vmem:[%s1301_s29 + $0x30] sm:$0xf] %vm819_vm3, %v767_v50  ;;  %v642_v54 = vadd.f32 %v1292_v40, %v641_v52  ;;  %v682_v55 = vadd.f32 %v1292_v40, %v681_v53  ;;  %v563_v56 = vpop.f32.mrf.mxu0  ;;  %v603_v57 = vpop.f32.mrf.mxu1 }
  0xfe   : > { %848 = vst.msk [vmem:[%s1301_s29 + $0x70] sm:$0xf] %vm819_vm3, %v783_v51  ;;  %v564_v58 = vadd.f32 %v1292_v40, %v563_v56  ;;  %v604_v59 = vadd.f32 %v1292_v40, %v603_v57 }
  0xff   : > { %v735_v60 = vmax.f32 %v642_v54, 0.0  ;;  %v751_v61 = vmax.f32 %v682_v55, 0.0 }
 0x100   : > { %v704_v62 = vmax.f32 %v564_v58, 0.0  ;;  %v720_v63 = vmax.f32 %v604_v59, 0.0 }
 0x101   : > { %v799_v0 = vpack.c.bf16 %v735_v60, %v735_v60  ;;  %v815_v1 = vpack.c.bf16 %v751_v61, %v751_v61 }
 0x102   : > { %v768_v2 = vpack.c.bf16 %v704_v62, %v704_v62  ;;  %v784_v3 = vpack.c.bf16 %v720_v63, %v720_v63 }
 0x103   : > { %864 = vst.msk [vmem:[%s1301_s29 + $0xb0] sm:$0xf] %vm819_vm3, %v799_v0 }
 0x104   : > { %880 = vst.msk [vmem:[%s1301_s29 + $0xf0] sm:$0xf] %vm819_vm3, %v815_v1  ;;  %v643_v4 = vpop.f32.mrf.mxu2  ;;  %v683_v5 = vpop.f32.mrf.mxu3 }
 0x105   : > { %833 = vst.msk [vmem:[%s1301_s29 + $0x34] sm:$0xf] %vm819_vm3, %v768_v2  ;;  %v644_v6 = vadd.f32 %v1292_v40, %v643_v4  ;;  %v684_v7 = vadd.f32 %v1292_v40, %v683_v5  ;;  %v566_v8 = vpop.f32.mrf.mxu0  ;;  %v606_v9 = vpop.f32.mrf.mxu1 }
 0x106   : > { %849 = vst.msk [vmem:[%s1301_s29 + $0x74] sm:$0xf] %vm819_vm3, %v784_v3  ;;  %v567_v10 = vadd.f32 %v1292_v40, %v566_v8  ;;  %v607_v11 = vadd.f32 %v1292_v40, %v606_v9 }
 0x107   : > { %v736_v12 = vmax.f32 %v644_v6, 0.0  ;;  %v752_v13 = vmax.f32 %v684_v7, 0.0 }
 0x108   : > { %v705_v14 = vmax.f32 %v567_v10, 0.0  ;;  %v721_v15 = vmax.f32 %v607_v11, 0.0 }
 0x109   : > { %v800_v16 = vpack.c.bf16 %v736_v12, %v736_v12  ;;  %v816_v17 = vpack.c.bf16 %v752_v13, %v752_v13 }
 0x10a   : > { %v769_v18 = vpack.c.bf16 %v705_v14, %v705_v14  ;;  %v785_v19 = vpack.c.bf16 %v721_v15, %v721_v15 }
 0x10b   : > { %865 = vst.msk [vmem:[%s1301_s29 + $0xb4] sm:$0xf] %vm819_vm3, %v800_v16 }
 0x10c   : > { %881 = vst.msk [vmem:[%s1301_s29 + $0xf4] sm:$0xf] %vm819_vm3, %v816_v17  ;;  %v646_v20 = vpop.f32.mrf.mxu2  ;;  %v686_v21 = vpop.f32.mrf.mxu3 }
 0x10d   : > { %834 = vst.msk [vmem:[%s1301_s29 + $0x38] sm:$0xf] %vm819_vm3, %v769_v18  ;;  %v647_v22 = vadd.f32 %v1292_v40, %v646_v20  ;;  %v687_v23 = vadd.f32 %v1292_v40, %v686_v21  ;;  %v568_v24 = vpop.f32.mrf.mxu0  ;;  %v608_v25 = vpop.f32.mrf.mxu1 }
 0x10e   : > { %850 = vst.msk [vmem:[%s1301_s29 + $0x78] sm:$0xf] %vm819_vm3, %v785_v19  ;;  %v569_v26 = vadd.f32 %v1292_v40, %v568_v24  ;;  %v609_v27 = vadd.f32 %v1292_v40, %v608_v25 }
 0x10f   : > { %v737_v28 = vmax.f32 %v647_v22, 0.0  ;;  %v753_v29 = vmax.f32 %v687_v23, 0.0 }
 0x110   : > { %v706_v30 = vmax.f32 %v569_v26, 0.0  ;;  %v722_v31 = vmax.f32 %v609_v27, 0.0 }
 0x111   : > { %v801_v32 = vpack.c.bf16 %v737_v28, %v737_v28  ;;  %v817_v33 = vpack.c.bf16 %v753_v29, %v753_v29 }
 0x112   : > { %v770_v34 = vpack.c.bf16 %v706_v30, %v706_v30  ;;  %v786_v35 = vpack.c.bf16 %v722_v31, %v722_v31 }
 0x113   : > { %866 = vst.msk [vmem:[%s1301_s29 + $0xb8] sm:$0xf] %vm819_vm3, %v801_v32 }
 0x114   : > { %882 = vst.msk [vmem:[%s1301_s29 + $0xf8] sm:$0xf] %vm819_vm3, %v817_v33  ;;  %v648_v36 = vpop.f32.mrf.mxu2  ;;  %v688_v37 = vpop.f32.mrf.mxu3 }
 0x115   : > { %835 = vst.msk [vmem:[%s1301_s29 + $0x3c] sm:$0xf] %vm819_vm3, %v770_v34  ;;  %v649_v38 = vadd.f32 %v1292_v40, %v648_v36  ;;  %v689_v39 = vadd.f32 %v1292_v40, %v688_v37 }
 0x116   : > { %851 = vst.msk [vmem:[%s1301_s29 + $0x7c] sm:$0xf] %vm819_vm3, %v786_v35 }
 0x117   : > { %v738_v41 = vmax.f32 %v649_v38, 0.0  ;;  %v754_v42 = vmax.f32 %v689_v39, 0.0 }
 0x119   : > { %v802_v43 = vpack.c.bf16 %v738_v41, %v738_v41  ;;  %v818_v44 = vpack.c.bf16 %v754_v42, %v754_v42 }
 0x11b   : > { %867 = vst.msk [vmem:[%s1301_s29 + $0xbc] sm:$0xf] %vm819_vm3, %v802_v43 }
 0x11c   : > { %883 = vst.msk [vmem:[%s1301_s29 + $0xfc] sm:$0xf] %vm819_vm3, %v818_v44 }
 0x11d PF: > { %s13_s12 = sadd.s32 1, %s1175_s12  }
 0x11e   : > { %p10_p4 = scmp.ge.s32.totalorder %s13_s12, 6  }
 0x120   :  { %12 = sbr.rel (!%p10_p4) target bundleno = 1 (0x1), region = 62 }

// kernel: forward.12
= control target key start
LH: loop header
LB: loop body
LE: loop exit
PB: predicated region body
PF: predicated region fallthrough
CT: control target
= control target key end

     0   :  { %vm410_vm0 = vcmask 130048   ;;  %vm922_vm1 = vcmask 257024   ;;  %s2153_s1 = inlined_call_operand.vmem [shape: bf16[144,32], index: 1, kind: input, shape index: {}]   ;;  %s2154_s0 = inlined_call_operand.vmem [shape: bf16[464,144], index: 0, kind: input, shape index: {}]   ;;  %s2155_s2 = inlined_call_operand.vmem [shape: f32[1,32], index: 2, kind: input, shape index: {}]   ;;  %s2156_s3 = inlined_call_operand.vmem [shape: bf16[464,32], index: 3, kind: output, shape index: {}]  }
   0x1   :  { %v1347_v0 = vld [vmem:[%s2153_s1 + $0x38] sm:$0xff]  ;;  %v1348_v1 = vld [vmem:[%s2153_s1 + $0x40] sm:$0xff]  ;;  %v989_v3 = vld [vmem:[%s2154_s0 + $0x8] sm:$0xf0] }
   0x2   :  { %v1282_v2 = vld [vmem:[%s2154_s0 + $0x4] sm:$0xf]  ;;  %498 = vmatpush.bf16.msra.mxu0 %v1347_v0  ;;  %1349 = vmatpush.bf16.msra.mxu2 %v1347_v0  ;;  %v1346_v5 = vld [vmem:[%s2153_s1 + $0x30] sm:$0xff]  ;;  %v1345_v6 = vld [vmem:[%s2153_s1 + $0x28] sm:$0xff] }
   0x3   :  { %v992_v4 = vor.u32 %v1282_v2, %v989_v3  ;;  %659 = vmatpush.bf16.msra.mxu1 %v1348_v1  ;;  %1357 = vmatpush.bf16.msra.mxu3 %v1348_v1  ;;  %v1344_v7 = vld [vmem:[%s2153_s1 + $0x20] sm:$0xff]  ;;  %v1343_v8 = vld [vmem:[%s2153_s1 + $0x18] sm:$0xff]  ;;  %v1284_v9 = vld [vmem:[%s2154_s0 + $0x14] sm:$0xf] }
   0x4   :  { %v997_v10 = vld [vmem:[%s2154_s0 + $0x18] sm:$0xf0]  ;;  %v1342_v12 = vld [vmem:[%s2153_s1 + $0x10] sm:$0xff]  ;;  %v1341_v13 = vld [vmem:[%s2153_s1 + $0x8] sm:$0xff] }
   0x5   :  { %v1000_v11 = vor.u32 %v1284_v9, %v997_v10  ;;  %v1314_v14 = vld [vmem:[%s2154_s0 + $0x104] sm:$0xf]  ;;  %v1117_v15 = vld [vmem:[%s2154_s0 + $0x108] sm:$0xf0]  ;;  %v987_v18 = vld [vmem:[%s2154_s0] sm:$0xf] }
   0x6   :  { %1253 = vmatmul.msk.bf16.vlgmr.msra.gmra.mxu1 %vm410_vm0, %v992_v4  ;;  %499 = vmatpush.bf16.msra.mxu0 %v1346_v5  ;;  %v1120_v16 = vor.u32 %v1314_v14, %v1117_v15  ;;  %v1340_v17 = vld [vmem:[%s2153_s1] sm:$0xff]  ;;  %v1283_v19 = vld [vmem:[%s2154_s0 + $0x4] sm:$0xf0]  ;;  %v1005_v25 = vld [vmem:[%s2154_s0 + $0x28] sm:$0xf0] }
   0x7   :  { %1350 = vmatpush.bf16.msra.mxu2 %v1346_v5  ;;  %v1099_v20 = vld [vmem:[%s2154_s0 + $0xe0] sm:$0xf]  ;;  %v1311_v21 = vld [vmem:[%s2154_s0 + $0xe4] sm:$0xf0]  ;;  %v988_v22 = vor.u32 %v1283_v19, %v987_v18  ;;  %v1286_v24 = vld [vmem:[%s2154_s0 + $0x24] sm:$0xf] }
   0x8   :  { %1269 = vmatmul.msk.bf16.vlgmr.msra.gmra.mxu3 %vm410_vm0, %v1120_v16  ;;  %v1100_v23 = vor.u32 %v1311_v21, %v1099_v20  ;;  %v1008_v26 = vor.u32 %v1286_v24, %v1005_v25  ;;  %v1316_v27 = vld [vmem:[%s2154_s0 + $0x114] sm:$0xf]  ;;  %v1125_v28 = vld [vmem:[%s2154_s0 + $0x118] sm:$0xf0]  ;;  %v995_v30 = vld [vmem:[%s2154_s0 + $0x10] sm:$0xf] }
   0x9   :  { %v1128_v29 = vor.u32 %v1316_v27, %v1125_v28  ;;  %v1285_v31 = vld [vmem:[%s2154_s0 + $0x14] sm:$0xf0]  ;;  %v1107_v32 = vld [vmem:[%s2154_s0 + $0xf0] sm:$0xf]  ;;  %v1288_v36 = vld [vmem:[%s2154_s0 + $0x34] sm:$0xf] }
   0xa   :  { %500 = vmatpush.bf16.msra.mxu0 %v1345_v6  ;;  %v1313_v33 = vld [vmem:[%s2154_s0 + $0xf4] sm:$0xf0]  ;;  %v996_v34 = vor.u32 %v1285_v31, %v995_v30  ;;  %v1013_v37 = vld [vmem:[%s2154_s0 + $0x38] sm:$0xf0]  ;;  %v1318_v39 = vld [vmem:[%s2154_s0 + $0x124] sm:$0xf] }
   0xb   :  { %1351 = vmatpush.bf16.msra.mxu2 %v1345_v6  ;;  %v1108_v35 = vor.u32 %v1313_v33, %v1107_v32  ;;  %v1016_v38 = vor.u32 %v1288_v36, %v1013_v37  ;;  %v1133_v40 = vld [vmem:[%s2154_s0 + $0x128] sm:$0xf0]  ;;  %v1003_v42 = vld [vmem:[%s2154_s0 + $0x20] sm:$0xf]  ;;  %v1287_v43 = vld [vmem:[%s2154_s0 + $0x24] sm:$0xf0] }
   0xc   :  { %v1136_v41 = vor.u32 %v1318_v39, %v1133_v40  ;;  %v1115_v44 = vld [vmem:[%s2154_s0 + $0x100] sm:$0xf]  ;;  %v1315_v45 = vld [vmem:[%s2154_s0 + $0x104] sm:$0xf0]  ;;  %v1004_v46 = vor.u32 %v1287_v43, %v1003_v42  ;;  %v1290_v48 = vld [vmem:[%s2154_s0 + $0x44] sm:$0xf] }
   0xd   :  { %v1116_v47 = vor.u32 %v1315_v45, %v1115_v44  ;;  %v1021_v49 = vld [vmem:[%s2154_s0 + $0x48] sm:$0xf0]  ;;  %v1320_v51 = vld [vmem:[%s2154_s0 + $0x134] sm:$0xf]  ;;  %v1141_v52 = vld [vmem:[%s2154_s0 + $0x138] sm:$0xf0] }
   0xe   :  { %501 = vmatpush.bf16.msra.mxu0 %v1344_v7  ;;  %v1024_v50 = vor.u32 %v1290_v48, %v1021_v49  ;;  %v1144_v53 = vor.u32 %v1320_v51, %v1141_v52  ;;  %v1011_v54 = vld [vmem:[%s2154_s0 + $0x30] sm:$0xf]  ;;  %v1289_v55 = vld [vmem:[%s2154_s0 + $0x34] sm:$0xf0]  ;;  %v1292_v60 = vld [vmem:[%s2154_s0 + $0x54] sm:$0xf] }
   0xf   :  { %1352 = vmatpush.bf16.msra.mxu2 %v1344_v7  ;;  %v1123_v56 = vld [vmem:[%s2154_s0 + $0x110] sm:$0xf]  ;;  %v1317_v57 = vld [vmem:[%s2154_s0 + $0x114] sm:$0xf0]  ;;  %v1012_v58 = vor.u32 %v1289_v55, %v1011_v54  ;;  %v1029_v61 = vld [vmem:[%s2154_s0 + $0x58] sm:$0xf0] }
  0x10   :  { %v1124_v59 = vor.u32 %v1317_v57, %v1123_v56  ;;  %v1032_v62 = vor.u32 %v1292_v60, %v1029_v61  ;;  %v1322_v63 = vld [vmem:[%s2154_s0 + $0x144] sm:$0xf]  ;;  %v1149_v0 = vld [vmem:[%s2154_s0 + $0x148] sm:$0xf0]  ;;  %v1019_v2 = vld [vmem:[%s2154_s0 + $0x40] sm:$0xf] }
  0x11   :  { %v1152_v1 = vor.u32 %v1322_v63, %v1149_v0  ;;  %v1291_v3 = vld [vmem:[%s2154_s0 + $0x44] sm:$0xf0]  ;;  %v1131_v4 = vld [vmem:[%s2154_s0 + $0x120] sm:$0xf]  ;;  %v1037_v9 = vld [vmem:[%s2154_s0 + $0x68] sm:$0xf0] }
  0x12   :  { %502 = vmatpush.bf16.msra.mxu0 %v1343_v8  ;;  %v1319_v5 = vld [vmem:[%s2154_s0 + $0x124] sm:$0xf0]  ;;  %v1020_v6 = vor.u32 %v1291_v3, %v1019_v2  ;;  %v1293_v14 = vld [vmem:[%s2154_s0 + $0x54] sm:$0xf0]  ;;  %v1139_v16 = vld [vmem:[%s2154_s0 + $0x130] sm:$0xf] }
  0x13   :  { %1353 = vmatpush.bf16.msra.mxu2 %v1343_v8  ;;  %v1132_v7 = vor.u32 %v1319_v5, %v1131_v4  ;;  %v1294_v8 = vld [vmem:[%s2154_s0 + $0x64] sm:$0xf]  ;;  %v1296_v20 = vld [vmem:[%s2154_s0 + $0x74] sm:$0xf]  ;;  %v1045_v21 = vld [vmem:[%s2154_s0 + $0x78] sm:$0xf0] }
  0x14   :  { %v1040_v10 = vor.u32 %v1294_v8, %v1037_v9  ;;  %v1165_v24 = vld [vmem:[%s2154_s0 + $0x168] sm:$0xf0]  ;;  %v1035_v25 = vld [vmem:[%s2154_s0 + $0x60] sm:$0xf]  ;;  %v1298_v32 = vld [vmem:[%s2154_s0 + $0x84] sm:$0xf] }
  0x15   :  { %v1147_v28 = vld [vmem:[%s2154_s0 + $0x140] sm:$0xf]  ;;  %v1053_v33 = vld [vmem:[%s2154_s0 + $0x88] sm:$0xf0]  ;;  %v1328_v36 = vld [vmem:[%s2154_s0 + $0x174] sm:$0xf] }
  0x16   :  { %1254 = vmatmul.msk.bf16.gmra.mxu1 %vm410_vm0, %v1000_v11  ;;  %503 = vmatpush.bf16.msra.mxu0 %v1342_v12  ;;  %v1324_v11 = vld [vmem:[%s2154_s0 + $0x154] sm:$0xf]  ;;  %v1173_v37 = vld [vmem:[%s2154_s0 + $0x178] sm:$0xf0]  ;;  %v1297_v39 = vld [vmem:[%s2154_s0 + $0x74] sm:$0xf0] }
  0x17   :  { %1354 = vmatpush.bf16.msra.mxu2 %v1342_v12  ;;  %v1157_v12 = vld [vmem:[%s2154_s0 + $0x158] sm:$0xf0]  ;;  %v1176_v40 = vor.u32 %v1328_v36, %v1173_v37  ;;  %v1155_v42 = vld [vmem:[%s2154_s0 + $0x150] sm:$0xf]  ;;  %v1325_v43 = vld [vmem:[%s2154_s0 + $0x154] sm:$0xf0] }
  0x18   :  { %1270 = vmatmul.msk.bf16.gmra.mxu3 %vm410_vm0, %v1128_v29  ;;  %v1160_v15 = vor.u32 %v1324_v11, %v1157_v12  ;;  %v1323_v29 = vld [vmem:[%s2154_s0 + $0x144] sm:$0xf0]  ;;  %v1156_v45 = vor.u32 %v1325_v43, %v1155_v42  ;;  %v1181_v51 = vld [vmem:[%s2154_s0 + $0x188] sm:$0xf0]  ;;  %v1051_v52 = vld [vmem:[%s2154_s0 + $0x80] sm:$0xf] }
  0x19   :  { %v1148_v31 = vor.u32 %v1323_v29, %v1147_v28  ;;  %v1643_v56 = vld [vmem:[%s2155_s2] ss:$0 sm:$0xff]  ;;  %v1302_v63 = vld [vmem:[%s2154_s0 + $0xa4] sm:$0xf]  ;;  %v1069_v0 = vld [vmem:[%s2154_s0 + $0xa8] sm:$0xf0] }
  0x1a   :  { %504 = vmatpush.bf16.msra.mxu0 %v1341_v13  ;;  %v1163_v57 = vld [vmem:[%s2154_s0 + $0x160] sm:$0xf]  ;;  %v1072_v3 = vor.u32 %v1302_v63, %v1069_v0  ;;  %v1332_v12 = vld [vmem:[%s2154_s0 + $0x194] sm:$0xf]  ;;  %v1077_v28 = vld [vmem:[%s2154_s0 + $0xb8] sm:$0xf0] }
  0x1b   :  { %1355 = vmatpush.bf16.msra.mxu2 %v1341_v13  ;;  %v1027_v13 = vld [vmem:[%s2154_s0 + $0x50] sm:$0xf]  ;;  %v1067_v42 = vld [vmem:[%s2154_s0 + $0xa0] sm:$0xf]  ;;  %v1303_v43 = vld [vmem:[%s2154_s0 + $0xa4] sm:$0xf0] }
  0x1c   :  { %v1028_v18 = vor.u32 %v1293_v14, %v1027_v13  ;;  %v1189_v13 = vld [vmem:[%s2154_s0 + $0x198] sm:$0xf0]  ;;  %v1059_v14 = vld [vmem:[%s2154_s0 + $0x90] sm:$0xf] }
  0x1e   :  { %505 = vmatpush.bf16.msra.mxu0 %v1340_v17 }
  0x1f   :  { %1356 = vmatpush.bf16.msra.mxu2 %v1340_v17  ;;  %v1321_v17 = vld [vmem:[%s2154_s0 + $0x134] sm:$0xf0] }
  0x20   :  { %v1140_v19 = vor.u32 %v1321_v17, %v1139_v16  ;;  %v1192_v16 = vor.u32 %v1332_v12, %v1189_v13  ;;  %v1075_v13 = vld [vmem:[%s2154_s0 + $0xb0] sm:$0xf] }
  0x21   :  { %506 = vmatmul.bf16.vlgmr.msra.gmra.mxu0 %v988_v22  ;;  %v1048_v22 = vor.u32 %v1296_v20, %v1045_v21  ;;  %v1329_v20 = vld [vmem:[%s2154_s0 + $0x174] sm:$0xf0] }
  0x22   :  { %576 = vmatmul.bf16.vlgmr.msra.gmra.mxu2 %v1100_v23  ;;  %v1326_v23 = vld [vmem:[%s2154_s0 + $0x164] sm:$0xf] }
  0x23   :  { %v1168_v27 = vor.u32 %v1326_v23, %v1165_v24 }
  0x26   :  { %1255 = vmatmul.msk.bf16.gmra.mxu1 %vm410_vm0, %v1008_v26  ;;  %v1295_v26 = vld [vmem:[%s2154_s0 + $0x64] sm:$0xf0] }
  0x27   :  { %v1036_v30 = vor.u32 %v1295_v26, %v1035_v25 }
  0x28   :  { %1271 = vmatmul.msk.bf16.gmra.mxu3 %vm410_vm0, %v1136_v41 }
  0x31   :  { %511 = vmatmul.bf16.gmra.mxu0 %v996_v34  ;;  %v1056_v34 = vor.u32 %v1298_v32, %v1053_v33 }
  0x32   :  { %581 = vmatmul.bf16.gmra.mxu2 %v1108_v35 }
  0x36   :  { %1256 = vmatmul.msk.bf16.gmra.mxu1 %vm410_vm0, %v1016_v38  ;;  %v1043_v38 = vld [vmem:[%s2154_s0 + $0x70] sm:$0xf] }
  0x37   :  { %v1044_v44 = vor.u32 %v1297_v39, %v1043_v38 }
  0x38   :  { %1272 = vmatmul.msk.bf16.gmra.mxu3 %vm410_vm0, %v1144_v53  ;;  %v1299_v53 = vld [vmem:[%s2154_s0 + $0x84] sm:$0xf0] }
  0x41   :  { %516 = vmatmul.bf16.gmra.mxu0 %v1004_v46  ;;  %v1300_v46 = vld [vmem:[%s2154_s0 + $0x94] sm:$0xf] }
  0x42   :  { %586 = vmatmul.bf16.gmra.mxu2 %v1116_v47  ;;  %v1061_v47 = vld [vmem:[%s2154_s0 + $0x98] sm:$0xf0] }
  0x43   :  { %v1064_v48 = vor.u32 %v1300_v46, %v1061_v47  ;;  %v1179_v47 = vld [vmem:[%s2154_s0 + $0x180] sm:$0xf] }
  0x46   :  { %1257 = vmatmul.msk.bf16.gmra.mxu1 %vm410_vm0, %v1024_v50  ;;  %v1330_v50 = vld [vmem:[%s2154_s0 + $0x184] sm:$0xf] }
  0x47   :  { %v1184_v54 = vor.u32 %v1330_v50, %v1181_v51  ;;  %v1068_v51 = vor.u32 %v1303_v43, %v1067_v42 }
  0x48   :  { %1273 = vmatmul.msk.bf16.gmra.mxu3 %vm410_vm0, %v1152_v1 }
  0x51   :  { %521 = vmatmul.bf16.gmra.mxu0 %v1012_v58  ;;  %v1327_v58 = vld [vmem:[%s2154_s0 + $0x164] sm:$0xf0] }
  0x52   :  { %591 = vmatmul.bf16.gmra.mxu2 %v1124_v59  ;;  %v1052_v59 = vor.u32 %v1299_v53, %v1051_v52  ;;  %v1164_v61 = vor.u32 %v1327_v58, %v1163_v57  ;;  %v1085_v57 = vld [vmem:[%s2154_s0 + $0xc8] sm:$0xf0] }
  0x56   :  { %1258 = vmatmul.msk.bf16.gmra.mxu1 %vm410_vm0, %v1032_v62 }
  0x58   :  { %1274 = vmatmul.msk.bf16.gmra.mxu3 %vm410_vm0, %v1160_v15  ;;  %v1301_v15 = vld [vmem:[%s2154_s0 + $0x94] sm:$0xf0] }
  0x59   :  { %v1060_v23 = vor.u32 %v1301_v15, %v1059_v14  ;;  %v1305_v14 = vld [vmem:[%s2154_s0 + $0xb4] sm:$0xf0] }
  0x61   :  { %526 = vmatmul.bf16.gmra.mxu0 %v1020_v6 }
  0x62   :  { %596 = vmatmul.bf16.gmra.mxu2 %v1132_v7 }
  0x66   :  { %1259 = vmatmul.msk.bf16.gmra.mxu1 %vm410_vm0, %v1040_v10 }
  0x68   :  { %1275 = vmatmul.msk.bf16.gmra.mxu3 %vm410_vm0, %v1168_v27  ;;  %v1304_v27 = vld [vmem:[%s2154_s0 + $0xb4] sm:$0xf] }
  0x71   :  { %531 = vmatmul.bf16.gmra.mxu0 %v1028_v18 }
  0x72   :  { %601 = vmatmul.bf16.gmra.mxu2 %v1140_v19  ;;  %v1171_v19 = vld [vmem:[%s2154_s0 + $0x170] sm:$0xf] }
  0x73   :  { %v1172_v25 = vor.u32 %v1329_v20, %v1171_v19 }
  0x76   :  { %1260 = vmatmul.msk.bf16.gmra.mxu1 %vm410_vm0, %v1048_v22 }
  0x78   :  { %1276 = vmatmul.msk.bf16.gmra.mxu3 %vm410_vm0, %v1176_v40  ;;  %v1334_v40 = vld [vmem:[%s2154_s0 + $0x1a4] sm:$0xf] }
  0x81   :  { %536 = vmatmul.bf16.gmra.mxu0 %v1036_v30 }
  0x82   :  { %606 = vmatmul.bf16.gmra.mxu2 %v1148_v31  ;;  %v1080_v31 = vor.u32 %v1304_v27, %v1077_v28  ;;  %v1308_v28 = vld [vmem:[%s2154_s0 + $0xd4] sm:$0xf] }
  0x83   :  { %v661_v35 = vpop.f32.mrf.mxu1 }
  0x86   :  { %1261 = vmatmul.msk.bf16.gmra.mxu1 %vm410_vm0, %v1056_v34 }
  0x88   :  { %1277 = vmatmul.msk.bf16.gmra.mxu3 %vm410_vm0, %v1184_v54 }
  0x8b   :  { %v663_v41 = vpop.f32.mrf.mxu1  ;;  %v1659_v1 = vpop.f32.mrf.mxu3 }
  0x91   :  { %541 = vmatmul.bf16.gmra.mxu0 %v1044_v44 }
  0x92   :  { %611 = vmatmul.bf16.gmra.mxu2 %v1156_v45 }
  0x93   :  { %v666_v49 = vpop.f32.mrf.mxu1  ;;  %v1671_v10 = vpop.f32.mrf.mxu3 }
  0x96   :  { %1262 = vmatmul.msk.bf16.gmra.mxu1 %vm410_vm0, %v1064_v48  ;;  %v1331_v48 = vld [vmem:[%s2154_s0 + $0x184] sm:$0xf0] }
  0x97   :  { %v1180_v53 = vor.u32 %v1331_v48, %v1179_v47  ;;  %v1338_v48 = vld [vmem:[%s2154_s0 + $0x1c4] sm:$0xf] }
  0x98   :  { %1278 = vmatmul.msk.bf16.gmra.mxu3 %vm410_vm0, %v1192_v16 }
  0x9b   :  { %v668_v55 = vpop.f32.mrf.mxu1  ;;  %v1707_v29 = vpop.f32.mrf.mxu3 }
  0x9e   :  { %v507_v60 = vpop.f32.mrf.mxu0 }
  0x9f   :  { %v508_v62 = vadd.f32 %v1643_v56, %v507_v60 }
  0xa1   :  { %v662_v2 = vadd.f32 %v661_v35, %v508_v62  ;;  %546 = vmatmul.bf16.gmra.mxu0 %v1052_v59 }
  0xa2   :  { %616 = vmatmul.bf16.gmra.mxu2 %v1164_v61 }
  0xa3   :  { %v806_v4 = vmax.f32 %v662_v2, 0.0  ;;  %v1661_v5 = vpop.f32.mrf.mxu1  ;;  %v1719_v38 = vpop.f32.mrf.mxu3 }
  0xa5   :  { %v864_v6 = vpack.c.bf16 %v806_v4, %v806_v4  ;;  %v1663_v7 = vpop.f32.mrf.mxu2 }
  0xa6   :  { %1263 = vmatmul.msk.bf16.gmra.mxu1 %vm410_vm0, %v1072_v3  ;;  %v509_v8 = vpop.f32.mrf.mxu0 }
  0xa7   :  { %923 = vst.msk [vmem:[%s2156_s3] sm:$0xf] %vm922_vm1, %v864_v6  ;;  %v510_v9 = vadd.f32 %v1643_v56, %v509_v8 }
  0xa9   :  { %v664_v11 = vadd.f32 %v663_v41, %v510_v9  ;;  %v1197_v41 = vld [vmem:[%s2154_s0 + $0x1a8] sm:$0xf0]  ;;  %v1336_v9 = vld [vmem:[%s2154_s0 + $0x1b4] sm:$0xf] }
  0xaa   :  { %v1200_v44 = vor.u32 %v1334_v40, %v1197_v41 }
  0xab   :  { %v807_v17 = vmax.f32 %v664_v11, 0.0  ;;  %v1685_v18 = vpop.f32.mrf.mxu1  ;;  %v1755_v58 = vpop.f32.mrf.mxu3  ;;  %v1205_v11 = vld [vmem:[%s2154_s0 + $0x1b8] sm:$0xf0] }
  0xac   :  { %1279 = vmatmul.msk.bf16.gmra.mxu3 %vm410_vm0, %v1200_v44 }
  0xad   :  { %v865_v21 = vpack.c.bf16 %v807_v17, %v807_v17  ;;  %v1694_v22 = vpop.f32.mrf.mxu2  ;;  %v1187_v17 = vld [vmem:[%s2154_s0 + $0x190] sm:$0xf] }
  0xae   :  { %v512_v24 = vpop.f32.mrf.mxu0 }
  0xaf   :  { %924 = vst.msk [vmem:[%s2156_s3 + $0x4] sm:$0xf] %vm922_vm1, %v865_v21  ;;  %v513_v26 = vadd.f32 %v1643_v56, %v512_v24 }
  0xb1   :  { %v667_v30 = vadd.f32 %v666_v49, %v513_v26  ;;  %551 = vmatmul.bf16.gmra.mxu0 %v1060_v23  ;;  %v1076_v23 = vor.u32 %v1305_v14, %v1075_v13 }
  0xb2   :  { %621 = vmatmul.bf16.gmra.mxu2 %v1172_v25 }
  0xb3   :  { %v808_v32 = vmax.f32 %v667_v30, 0.0  ;;  %v1709_v33 = vpop.f32.mrf.mxu1  ;;  %v1093_v30 = vld [vmem:[%s2154_s0 + $0xd8] sm:$0xf0] }
  0xb5   :  { %v866_v34 = vpack.c.bf16 %v808_v32, %v808_v32  ;;  %v1711_v35 = vpop.f32.mrf.mxu2 }
  0xb6   :  { %1264 = vmatmul.msk.bf16.gmra.mxu1 %vm410_vm0, %v1080_v31  ;;  %v514_v36 = vpop.f32.mrf.mxu0 }
  0xb7   :  { %925 = vst.msk [vmem:[%s2156_s3 + $0x8] sm:$0xf] %vm922_vm1, %v866_v34  ;;  %v515_v37 = vadd.f32 %v1643_v56, %v514_v36 }
  0xb9   :  { %v669_v39 = vadd.f32 %v668_v55, %v515_v37  ;;  %v1306_v55 = vld [vmem:[%s2154_s0 + $0xc4] sm:$0xf]  ;;  %v1096_v37 = vor.u32 %v1308_v28, %v1093_v30 }
  0xba   :  { %v1088_v60 = vor.u32 %v1306_v55, %v1085_v57  ;;  %v1195_v55 = vld [vmem:[%s2154_s0 + $0x1a0] sm:$0xf]  ;;  %v1335_v57 = vld [vmem:[%s2154_s0 + $0x1a4] sm:$0xf0] }
  0xbb   :  { %v809_v45 = vmax.f32 %v669_v39, 0.0  ;;  %v1733_v46 = vpop.f32.mrf.mxu1 }
  0xbd   :  { %v867_v49 = vpack.c.bf16 %v809_v45, %v809_v45  ;;  %v1742_v50 = vpop.f32.mrf.mxu2 }
  0xbe   :  { %v517_v52 = vpop.f32.mrf.mxu0 }
  0xbf   :  { %926 = vst.msk [vmem:[%s2156_s3 + $0xc] sm:$0xf] %vm922_vm1, %v867_v49  ;;  %v518_v54 = vadd.f32 %v1643_v56, %v517_v52  ;;  %v1213_v49 = vld [vmem:[%s2154_s0 + $0x1c8] sm:$0xf0]  ;;  %v1083_v52 = vld [vmem:[%s2154_s0 + $0xc0] sm:$0xf] }
  0xc1   :  { %v672_v59 = vadd.f32 %v1661_v5, %v518_v54  ;;  %556 = vmatmul.bf16.gmra.mxu0 %v1068_v51  ;;  %v1767_v5 = vpop.f32.mrf.mxu3 }
  0xc2   :  { %626 = vmatmul.bf16.gmra.mxu2 %v1180_v53  ;;  %v1307_v53 = vld [vmem:[%s2154_s0 + $0xc4] sm:$0xf0] }
  0xc3   :  { %v810_v61 = vmax.f32 %v672_v59, 0.0  ;;  %v1758_v62 = vpop.f32.mrf.mxu1 }
  0xc5   :  { %v868_v63 = vpack.c.bf16 %v810_v61, %v810_v61  ;;  %v587_v0 = vpop.f32.mrf.mxu2 }
  0xc6   :  { %v588_v2 = vadd.f32 %v1643_v56, %v587_v0  ;;  %1265 = vmatmul.msk.bf16.gmra.mxu1 %vm410_vm0, %v1088_v60  ;;  %v519_v3 = vpop.f32.mrf.mxu0  ;;  %v1084_v0 = vor.u32 %v1307_v53, %v1083_v52 }
  0xc7   :  { %927 = vst.msk [vmem:[%s2156_s3 + $0x10] sm:$0xf] %vm922_vm1, %v868_v63  ;;  %v520_v4 = vadd.f32 %v1643_v56, %v519_v3 }
  0xc8   :  { %v742_v6 = vadd.f32 %v1659_v1, %v588_v2  ;;  %v1208_v1 = vor.u32 %v1336_v9, %v1205_v11  ;;  %v1101_v9 = vld [vmem:[%s2154_s0 + $0xe8] sm:$0xf0] }
  0xc9   :  { %v674_v8 = vadd.f32 %v1685_v18, %v520_v4  ;;  %v1333_v18 = vld [vmem:[%s2154_s0 + $0x194] sm:$0xf0]  ;;  %v1810_v34 = vpop.f32.mrf.mxu3  ;;  %v1196_v4 = vor.u32 %v1335_v57, %v1195_v55 }
  0xca   :  { %v838_v12 = vmax.f32 %v742_v6, 0.0  ;;  %1280 = vmatmul.msk.bf16.gmra.mxu3 %vm410_vm0, %v1208_v1  ;;  %v1188_v26 = vor.u32 %v1333_v18, %v1187_v17 }
  0xcb   :  { %v811_v15 = vmax.f32 %v674_v8, 0.0  ;;  %v1783_v16 = vpop.f32.mrf.mxu1  ;;  %v1310_v8 = vld [vmem:[%s2154_s0 + $0xe4] sm:$0xf] }
  0xcc   :  { %v896_v19 = vpack.c.bf16 %v838_v12, %v838_v12  ;;  %v1104_v14 = vor.u32 %v1310_v8, %v1101_v9 }
  0xcd   :  { %v869_v20 = vpack.c.bf16 %v811_v15, %v811_v15  ;;  %v589_v21 = vpop.f32.mrf.mxu2 }
  0xce   :  { %955 = vst.msk [vmem:[%s2156_s3 + $0x80] sm:$0xf] %vm922_vm1, %v896_v19  ;;  %v590_v24 = vadd.f32 %v1643_v56, %v589_v21  ;;  %v522_v25 = vpop.f32.mrf.mxu0 }
  0xcf   :  { %928 = vst.msk [vmem:[%s2156_s3 + $0x14] sm:$0xf] %vm922_vm1, %v869_v20  ;;  %v523_v27 = vadd.f32 %v1643_v56, %v522_v25 }
  0xd0   :  { %v744_v31 = vadd.f32 %v1671_v10, %v590_v24 }
  0xd1   :  { %v677_v32 = vadd.f32 %v1709_v33, %v523_v27  ;;  %561 = vmatmul.bf16.gmra.mxu0 %v1076_v23  ;;  %v1847_v59 = vpop.f32.mrf.mxu3  ;;  %v1309_v27 = vld [vmem:[%s2154_s0 + $0xd4] sm:$0xf0] }
  0xd2   :  { %v839_v36 = vmax.f32 %v744_v31, 0.0  ;;  %631 = vmatmul.bf16.gmra.mxu2 %v1188_v26  ;;  %v1091_v26 = vld [vmem:[%s2154_s0 + $0xd0] sm:$0xf] }
  0xd3   :  { %v812_v39 = vmax.f32 %v677_v32, 0.0  ;;  %v1812_v40 = vpop.f32.mrf.mxu1  ;;  %v1203_v31 = vld [vmem:[%s2154_s0 + $0x1b0] sm:$0xf] }
  0xd4   :  { %v897_v41 = vpack.c.bf16 %v839_v36, %v839_v36 }
  0xd5   :  { %v870_v42 = vpack.c.bf16 %v812_v39, %v812_v39  ;;  %v592_v43 = vpop.f32.mrf.mxu2 }
  0xd6   :  { %956 = vst.msk [vmem:[%s2156_s3 + $0x84] sm:$0xf] %vm922_vm1, %v897_v41  ;;  %v593_v10 = vadd.f32 %v1643_v56, %v592_v43  ;;  %1266 = vmatmul.msk.bf16.gmra.mxu1 %vm410_vm0, %v1096_v37  ;;  %v524_v33 = vpop.f32.mrf.mxu0  ;;  %v1092_v37 = vor.u32 %v1309_v27, %v1091_v26 }
  0xd7   :  { %929 = vst.msk [vmem:[%s2156_s3 + $0x18] sm:$0xf] %vm922_vm1, %v870_v42  ;;  %v525_v44 = vadd.f32 %v1643_v56, %v524_v33  ;;  %v1109_v33 = vld [vmem:[%s2154_s0 + $0xf8] sm:$0xf0] }
  0xd8   :  { %v747_v45 = vadd.f32 %v1707_v29, %v593_v10  ;;  %v1216_v29 = vor.u32 %v1338_v48, %v1213_v49  ;;  %v1312_v10 = vld [vmem:[%s2154_s0 + $0xf4] sm:$0xf] }
  0xd9   :  { %v679_v47 = vadd.f32 %v1733_v46, %v525_v44  ;;  %v1870_v20 = vpop.f32.mrf.mxu3  ;;  %v1112_v49 = vor.u32 %v1312_v10, %v1109_v33 }
  0xda   :  { %v840_v51 = vmax.f32 %v747_v45, 0.0  ;;  %1281 = vmatmul.msk.bf16.gmra.mxu3 %vm410_vm0, %v1216_v29 }
  0xdb   :  { %v813_v54 = vmax.f32 %v679_v47, 0.0  ;;  %v1839_v46 = vpop.f32.mrf.mxu1 }
  0xdc   :  { %v898_v60 = vpack.c.bf16 %v840_v51, %v840_v51 }
  0xdd   :  { %v871_v61 = vpack.c.bf16 %v813_v54, %v813_v54  ;;  %v594_v63 = vpop.f32.mrf.mxu2 }
  0xde   :  { %957 = vst.msk [vmem:[%s2156_s3 + $0x88] sm:$0xf] %vm922_vm1, %v898_v60  ;;  %v595_v2 = vadd.f32 %v1643_v56, %v594_v63  ;;  %v527_v3 = vpop.f32.mrf.mxu0 }
  0xdf   :  { %930 = vst.msk [vmem:[%s2156_s3 + $0x1c] sm:$0xf] %vm922_vm1, %v871_v61  ;;  %v528_v6 = vadd.f32 %v1643_v56, %v527_v3  ;;  %v1211_v3 = vld [vmem:[%s2154_s0 + $0x1c0] sm:$0xf] }
  0xe0   :  { %v749_v11 = vadd.f32 %v1719_v38, %v595_v2 }
  0xe1   :  { %v682_v12 = vadd.f32 %v1758_v62, %v528_v6  ;;  %566 = vmatmul.bf16.gmra.mxu0 %v1084_v0  ;;  %v1915_v44 = vpop.f32.mrf.mxu3 }
  0xe2   :  { %v841_v13 = vmax.f32 %v749_v11, 0.0  ;;  %636 = vmatmul.bf16.gmra.mxu2 %v1196_v4  ;;  %v1339_v4 = vld [vmem:[%s2154_s0 + $0x1c4] sm:$0xf0] }
  0xe3   :  { %v814_v1 = vmax.f32 %v682_v12, 0.0  ;;  %v1868_v15 = vpop.f32.mrf.mxu1  ;;  %v1212_v11 = vor.u32 %v1339_v4, %v1211_v3 }
  0xe4   :  { %v899_v17 = vpack.c.bf16 %v841_v13, %v841_v13 }
  0xe5   :  { %v872_v18 = vpack.c.bf16 %v814_v1, %v814_v1  ;;  %v597_v19 = vpop.f32.mrf.mxu2 }
  0xe6   :  { %958 = vst.msk [vmem:[%s2156_s3 + $0x8c] sm:$0xf] %vm922_vm1, %v899_v17  ;;  %v598_v38 = vadd.f32 %v1643_v56, %v597_v19  ;;  %1267 = vmatmul.msk.bf16.gmra.mxu1 %vm410_vm0, %v1104_v14  ;;  %v529_v62 = vpop.f32.mrf.mxu0 }
  0xe7   :  { %931 = vst.msk [vmem:[%s2156_s3 + $0x20] sm:$0xf] %vm922_vm1, %v872_v18  ;;  %v530_v21 = vadd.f32 %v1643_v56, %v529_v62 }
  0xe8   :  { %v752_v23 = vadd.f32 %v1755_v58, %v598_v38  ;;  %v1337_v58 = vld [vmem:[%s2154_s0 + $0x1b4] sm:$0xf0] }
  0xe9   :  { %v684_v24 = vadd.f32 %v1783_v16, %v530_v21  ;;  %v1204_v42 = vor.u32 %v1337_v58, %v1203_v31  ;;  %v766_v61 = vpop.f32.mrf.mxu3 }
  0xea   :  { %v842_v25 = vmax.f32 %v752_v23, 0.0 }
  0xeb   :  { %v815_v28 = vmax.f32 %v684_v24, 0.0  ;;  %v1891_v30 = vpop.f32.mrf.mxu1 }
  0xec   :  { %v900_v16 = vpack.c.bf16 %v842_v25, %v842_v25 }
  0xed   :  { %v873_v32 = vpack.c.bf16 %v815_v28, %v815_v28  ;;  %v599_v36 = vpop.f32.mrf.mxu2 }
  0xee   :  { %959 = vst.msk [vmem:[%s2156_s3 + $0x90] sm:$0xf] %vm922_vm1, %v900_v16  ;;  %v600_v39 = vadd.f32 %v1643_v56, %v599_v36  ;;  %v532_v41 = vpop.f32.mrf.mxu0 }
  0xef   :  { %932 = vst.msk [vmem:[%s2156_s3 + $0x24] sm:$0xf] %vm922_vm1, %v873_v32  ;;  %v533_v43 = vadd.f32 %v1643_v56, %v532_v41 }
  0xf0   :  { %v754_v45 = vadd.f32 %v1767_v5, %v600_v39 }
  0xf1   :  { %v687_v47 = vadd.f32 %v1812_v40, %v533_v43  ;;  %571 = vmatmul.bf16.gmra.mxu0 %v1092_v37  ;;  %v768_v19 = vpop.f32.mrf.mxu3 }
  0xf2   :  { %v843_v48 = vmax.f32 %v754_v45, 0.0  ;;  %641 = vmatmul.bf16.gmra.mxu2 %v1204_v42 }
  0xf3   :  { %v816_v51 = vmax.f32 %v687_v47, 0.0  ;;  %v696_v52 = vpop.f32.mrf.mxu1 }
  0xf4   :  { %v901_v53 = vpack.c.bf16 %v843_v48, %v843_v48 }
  0xf5   :  { %v874_v29 = vpack.c.bf16 %v816_v51, %v816_v51  ;;  %v602_v54 = vpop.f32.mrf.mxu2 }
  0xf6   :  { %960 = vst.msk [vmem:[%s2156_s3 + $0x94] sm:$0xf] %vm922_vm1, %v901_v53  ;;  %v603_v55 = vadd.f32 %v1643_v56, %v602_v54  ;;  %1268 = vmatmul.msk.bf16.gmra.mxu1 %vm410_vm0, %v1112_v49  ;;  %v534_v5 = vpop.f32.mrf.mxu0 }
  0xf7   :  { %933 = vst.msk [vmem:[%s2156_s3 + $0x28] sm:$0xf] %vm922_vm1, %v874_v29  ;;  %v535_v40 = vadd.f32 %v1643_v56, %v534_v5 }
  0xf8   :  { %v757_v57 = vadd.f32 %v1810_v34, %v603_v55 }
  0xf9   :  { %v689_v60 = vadd.f32 %v1839_v46, %v535_v40  ;;  %v771_v32 = vpop.f32.mrf.mxu3 }
  0xfa   :  { %v844_v63 = vmax.f32 %v757_v57, 0.0 }
  0xfb   :  { %v817_v0 = vmax.f32 %v689_v60, 0.0  ;;  %v698_v2 = vpop.f32.mrf.mxu1 }
  0xfc   :  { %v902_v6 = vpack.c.bf16 %v844_v63, %v844_v63 }
  0xfd   :  { %v875_v8 = vpack.c.bf16 %v817_v0, %v817_v0  ;;  %v604_v9 = vpop.f32.mrf.mxu2 }
  0xfe   :  { %961 = vst.msk [vmem:[%s2156_s3 + $0x98] sm:$0xf] %vm922_vm1, %v902_v6  ;;  %v605_v34 = vadd.f32 %v1643_v56, %v604_v9  ;;  %v537_v46 = vpop.f32.mrf.mxu0 }
  0xff   :  { %934 = vst.msk [vmem:[%s2156_s3 + $0x2c] sm:$0xf] %vm922_vm1, %v875_v8  ;;  %v538_v12 = vadd.f32 %v1643_v56, %v537_v46 }
 0x100   :  { %v759_v13 = vadd.f32 %v1847_v59, %v605_v34 }
 0x101   :  { %v692_v14 = vadd.f32 %v1868_v15, %v538_v12  ;;  %v773_v49 = vpop.f32.mrf.mxu3 }
 0x102   :  { %v845_v1 = vmax.f32 %v759_v13, 0.0  ;;  %646 = vmatmul.bf16.gmra.mxu2 %v1212_v11 }
 0x103   :  { %v818_v17 = vmax.f32 %v692_v14, 0.0  ;;  %v701_v18 = vpop.f32.mrf.mxu1 }
 0x104   :  { %v903_v38 = vpack.c.bf16 %v845_v1, %v845_v1 }
 0x105   :  { %v876_v62 = vpack.c.bf16 %v818_v17, %v818_v17  ;;  %v607_v21 = vpop.f32.mrf.mxu2 }
 0x106   :  { %962 = vst.msk [vmem:[%s2156_s3 + $0x9c] sm:$0xf] %vm922_vm1, %v903_v38  ;;  %v608_v23 = vadd.f32 %v1643_v56, %v607_v21  ;;  %v539_v24 = vpop.f32.mrf.mxu0 }
 0x107   :  { %935 = vst.msk [vmem:[%s2156_s3 + $0x30] sm:$0xf] %vm922_vm1, %v876_v62  ;;  %v540_v59 = vadd.f32 %v1643_v56, %v539_v24 }
 0x108   :  { %v762_v15 = vadd.f32 %v1870_v20, %v608_v23 }
 0x109   :  { %v694_v25 = vadd.f32 %v1891_v30, %v540_v59 }
 0x10a   :  { %v846_v26 = vmax.f32 %v762_v15, 0.0 }
 0x10b   :  { %v819_v27 = vmax.f32 %v694_v25, 0.0  ;;  %v703_v28 = vpop.f32.mrf.mxu1 }
 0x10c   :  { %v904_v31 = vpack.c.bf16 %v846_v26, %v846_v26 }
 0x10d   :  { %v877_v58 = vpack.c.bf16 %v819_v27, %v819_v27  ;;  %v609_v16 = vpop.f32.mrf.mxu2 }
 0x10e   :  { %963 = vst.msk [vmem:[%s2156_s3 + $0xa0] sm:$0xf] %vm922_vm1, %v904_v31  ;;  %v610_v36 = vadd.f32 %v1643_v56, %v609_v16  ;;  %v542_v37 = vpop.f32.mrf.mxu0 }
 0x10f   :  { %936 = vst.msk [vmem:[%s2156_s3 + $0x34] sm:$0xf] %vm922_vm1, %v877_v58  ;;  %v543_v20 = vadd.f32 %v1643_v56, %v542_v37 }
 0x110   :  { %v764_v30 = vadd.f32 %v1915_v44, %v610_v36 }
 0x111   :  { %v697_v39 = vadd.f32 %v696_v52, %v543_v20 }
 0x112   :  { %v847_v41 = vmax.f32 %v764_v30, 0.0 }
 0x113   :  { %v820_v42 = vmax.f32 %v697_v39, 0.0  ;;  %v706_v43 = vpop.f32.mrf.mxu1 }
 0x114   :  { %v905_v10 = vpack.c.bf16 %v847_v41, %v847_v41 }
 0x115   :  { %v878_v33 = vpack.c.bf16 %v820_v42, %v820_v42  ;;  %v612_v45 = vpop.f32.mrf.mxu2 }
 0x116   :  { %964 = vst.msk [vmem:[%s2156_s3 + $0xa4] sm:$0xf] %vm922_vm1, %v905_v10  ;;  %v613_v47 = vadd.f32 %v1643_v56, %v612_v45  ;;  %v544_v48 = vpop.f32.mrf.mxu0 }
 0x117   :  { %937 = vst.msk [vmem:[%s2156_s3 + $0x38] sm:$0xf] %vm922_vm1, %v878_v33  ;;  %v545_v44 = vadd.f32 %v1643_v56, %v544_v48 }
 0x118   :  { %v767_v51 = vadd.f32 %v766_v61, %v613_v47 }
 0x119   :  { %v699_v52 = vadd.f32 %v698_v2, %v545_v44  ;;  %v776_v2 = vpop.f32.mrf.mxu3 }
 0x11a   :  { %v848_v53 = vmax.f32 %v767_v51, 0.0 }
 0x11b   :  { %v821_v29 = vmax.f32 %v699_v52, 0.0  ;;  %v708_v54 = vpop.f32.mrf.mxu1 }
 0x11c   :  { %v906_v55 = vpack.c.bf16 %v848_v53, %v848_v53 }
 0x11d   :  { %v879_v5 = vpack.c.bf16 %v821_v29, %v821_v29  ;;  %v614_v40 = vpop.f32.mrf.mxu2 }
 0x11e   :  { %965 = vst.msk [vmem:[%s2156_s3 + $0xa8] sm:$0xf] %vm922_vm1, %v906_v55  ;;  %v615_v57 = vadd.f32 %v1643_v56, %v614_v40  ;;  %v547_v60 = vpop.f32.mrf.mxu0 }
 0x11f   :  { %938 = vst.msk [vmem:[%s2156_s3 + $0x3c] sm:$0xf] %vm922_vm1, %v879_v5  ;;  %v548_v61 = vadd.f32 %v1643_v56, %v547_v60 }
 0x120   :  { %v769_v63 = vadd.f32 %v768_v19, %v615_v57 }
 0x121   :  { %v702_v0 = vadd.f32 %v701_v18, %v548_v61  ;;  %v778_v19 = vpop.f32.mrf.mxu3 }
 0x122   :  { %v849_v3 = vmax.f32 %v769_v63, 0.0 }
 0x123   :  { %v822_v4 = vmax.f32 %v702_v0, 0.0  ;;  %v711_v6 = vpop.f32.mrf.mxu1 }
 0x124   :  { %v907_v8 = vpack.c.bf16 %v849_v3, %v849_v3 }
 0x125   :  { %v880_v9 = vpack.c.bf16 %v822_v4, %v822_v4  ;;  %v617_v34 = vpop.f32.mrf.mxu2 }
 0x126   :  { %966 = vst.msk [vmem:[%s2156_s3 + $0xac] sm:$0xf] %vm922_vm1, %v907_v8  ;;  %v618_v46 = vadd.f32 %v1643_v56, %v617_v34  ;;  %v549_v11 = vpop.f32.mrf.mxu0 }
 0x127   :  { %939 = vst.msk [vmem:[%s2156_s3 + $0x40] sm:$0xf] %vm922_vm1, %v880_v9  ;;  %v550_v12 = vadd.f32 %v1643_v56, %v549_v11 }
 0x128   :  { %v772_v13 = vadd.f32 %v771_v32, %v618_v46 }
 0x129   :  { %v704_v14 = vadd.f32 %v703_v28, %v550_v12  ;;  %v781_v32 = vpop.f32.mrf.mxu3 }
 0x12a   :  { %v850_v1 = vmax.f32 %v772_v13, 0.0 }
 0x12b   :  { %v823_v17 = vmax.f32 %v704_v14, 0.0  ;;  %v713_v18 = vpop.f32.mrf.mxu1 }
 0x12c   :  { %v908_v38 = vpack.c.bf16 %v850_v1, %v850_v1 }
 0x12d   :  { %v881_v62 = vpack.c.bf16 %v823_v17, %v823_v17  ;;  %v619_v21 = vpop.f32.mrf.mxu2 }
 0x12e   :  { %967 = vst.msk [vmem:[%s2156_s3 + $0xb0] sm:$0xf] %vm922_vm1, %v908_v38  ;;  %v620_v23 = vadd.f32 %v1643_v56, %v619_v21  ;;  %v552_v24 = vpop.f32.mrf.mxu0 }
 0x12f   :  { %940 = vst.msk [vmem:[%s2156_s3 + $0x44] sm:$0xf] %vm922_vm1, %v881_v62  ;;  %v553_v59 = vadd.f32 %v1643_v56, %v552_v24 }
 0x130   :  { %v774_v15 = vadd.f32 %v773_v49, %v620_v23 }
 0x131   :  { %v707_v25 = vadd.f32 %v706_v43, %v553_v59  ;;  %v783_v49 = vpop.f32.mrf.mxu3 }
 0x132   :  { %v851_v26 = vmax.f32 %v774_v15, 0.0 }
 0x133   :  { %v824_v27 = vmax.f32 %v707_v25, 0.0  ;;  %v716_v28 = vpop.f32.mrf.mxu1 }
 0x134   :  { %v909_v31 = vpack.c.bf16 %v851_v26, %v851_v26 }
 0x135   :  { %v882_v58 = vpack.c.bf16 %v824_v27, %v824_v27  ;;  %v622_v16 = vpop.f32.mrf.mxu2 }
 0x136   :  { %968 = vst.msk [vmem:[%s2156_s3 + $0xb4] sm:$0xf] %vm922_vm1, %v909_v31  ;;  %v623_v36 = vadd.f32 %v1643_v56, %v622_v16  ;;  %v554_v37 = vpop.f32.mrf.mxu0 }
 0x137   :  { %941 = vst.msk [vmem:[%s2156_s3 + $0x48] sm:$0xf] %vm922_vm1, %v882_v58  ;;  %v555_v20 = vadd.f32 %v1643_v56, %v554_v37 }
 0x138   :  { %v777_v30 = vadd.f32 %v776_v2, %v623_v36 }
 0x139   :  { %v709_v39 = vadd.f32 %v708_v54, %v555_v20  ;;  %v786_v2 = vpop.f32.mrf.mxu3 }
 0x13a   :  { %v852_v41 = vmax.f32 %v777_v30, 0.0 }
 0x13b   :  { %v825_v42 = vmax.f32 %v709_v39, 0.0  ;;  %v718_v43 = vpop.f32.mrf.mxu1 }
 0x13c   :  { %v910_v10 = vpack.c.bf16 %v852_v41, %v852_v41  ;;  %v578_v41 = vadd.f32 %v1643_v56, %v1663_v7 }
 0x13d   :  { %v883_v33 = vpack.c.bf16 %v825_v42, %v825_v42  ;;  %v624_v45 = vpop.f32.mrf.mxu2 }
 0x13e   :  { %969 = vst.msk [vmem:[%s2156_s3 + $0xb8] sm:$0xf] %vm922_vm1, %v910_v10  ;;  %v625_v47 = vadd.f32 %v1643_v56, %v624_v45  ;;  %v557_v48 = vpop.f32.mrf.mxu0 }
 0x13f   :  { %942 = vst.msk [vmem:[%s2156_s3 + $0x4c] sm:$0xf] %vm922_vm1, %v883_v33  ;;  %v558_v44 = vadd.f32 %v1643_v56, %v557_v48 }
 0x140   :  { %v779_v51 = vadd.f32 %v778_v19, %v625_v47 }
 0x141   :  { %v712_v52 = vadd.f32 %v711_v6, %v558_v44  ;;  %v788_v19 = vpop.f32.mrf.mxu3 }
 0x142   :  { %v853_v53 = vmax.f32 %v779_v51, 0.0 }
 0x143   :  { %v826_v29 = vmax.f32 %v712_v52, 0.0  ;;  %v721_v54 = vpop.f32.mrf.mxu1 }
 0x144   :  { %v911_v55 = vpack.c.bf16 %v853_v53, %v853_v53 }
 0x145   :  { %v884_v5 = vpack.c.bf16 %v826_v29, %v826_v29  ;;  %v627_v40 = vpop.f32.mrf.mxu2 }
 0x146   :  { %970 = vst.msk [vmem:[%s2156_s3 + $0xbc] sm:$0xf] %vm922_vm1, %v911_v55  ;;  %v628_v57 = vadd.f32 %v1643_v56, %v627_v40  ;;  %v559_v60 = vpop.f32.mrf.mxu0  ;;  %v580_v55 = vadd.f32 %v1643_v56, %v1694_v22 }
 0x147   :  { %943 = vst.msk [vmem:[%s2156_s3 + $0x50] sm:$0xf] %vm922_vm1, %v884_v5  ;;  %v560_v61 = vadd.f32 %v1643_v56, %v559_v60 }
 0x148   :  { %v782_v63 = vadd.f32 %v781_v32, %v628_v57 }
 0x149   :  { %v714_v0 = vadd.f32 %v713_v18, %v560_v61  ;;  %v791_v32 = vpop.f32.mrf.mxu3 }
 0x14a   :  { %v854_v3 = vmax.f32 %v782_v63, 0.0 }
 0x14b   :  { %v827_v4 = vmax.f32 %v714_v0, 0.0  ;;  %v723_v6 = vpop.f32.mrf.mxu1 }
 0x14c   :  { %v912_v8 = vpack.c.bf16 %v854_v3, %v854_v3 }
 0x14d   :  { %v885_v9 = vpack.c.bf16 %v827_v4, %v827_v4  ;;  %v629_v34 = vpop.f32.mrf.mxu2 }
 0x14e   :  { %971 = vst.msk [vmem:[%s2156_s3 + $0xc0] sm:$0xf] %vm922_vm1, %v912_v8  ;;  %v630_v46 = vadd.f32 %v1643_v56, %v629_v34  ;;  %v562_v11 = vpop.f32.mrf.mxu0 }
 0x14f   :  { %944 = vst.msk [vmem:[%s2156_s3 + $0x54] sm:$0xf] %vm922_vm1, %v885_v9  ;;  %v563_v12 = vadd.f32 %v1643_v56, %v562_v11 }
 0x150   :  { %v784_v13 = vadd.f32 %v783_v49, %v630_v46  ;;  %v583_v46 = vadd.f32 %v1643_v56, %v1711_v35 }
 0x151   :  { %v717_v14 = vadd.f32 %v716_v28, %v563_v12  ;;  %v793_v52 = vpop.f32.mrf.mxu3 }
 0x152   :  { %v855_v1 = vmax.f32 %v784_v13, 0.0 }
 0x153   :  { %v828_v17 = vmax.f32 %v717_v14, 0.0  ;;  %v726_v18 = vpop.f32.mrf.mxu1 }
 0x154   :  { %v913_v38 = vpack.c.bf16 %v855_v1, %v855_v1 }
 0x155   :  { %v886_v62 = vpack.c.bf16 %v828_v17, %v828_v17  ;;  %v632_v21 = vpop.f32.mrf.mxu2 }
 0x156   :  { %972 = vst.msk [vmem:[%s2156_s3 + $0xc4] sm:$0xf] %vm922_vm1, %v913_v38  ;;  %v633_v23 = vadd.f32 %v1643_v56, %v632_v21  ;;  %v564_v24 = vpop.f32.mrf.mxu0 }
 0x157   :  { %945 = vst.msk [vmem:[%s2156_s3 + $0x58] sm:$0xf] %vm922_vm1, %v886_v62  ;;  %v565_v59 = vadd.f32 %v1643_v56, %v564_v24 }
 0x158   :  { %v787_v15 = vadd.f32 %v786_v2, %v633_v23 }
 0x159   :  { %v719_v25 = vadd.f32 %v718_v43, %v565_v59  ;;  %v796_v34 = vpop.f32.mrf.mxu3  ;;  %v585_v59 = vadd.f32 %v1643_v56, %v1742_v50 }
 0x15a   :  { %v856_v26 = vmax.f32 %v787_v15, 0.0 }
 0x15b   :  { %v829_v27 = vmax.f32 %v719_v25, 0.0  ;;  %v2063_v28 = vpop.f32.mrf.mxu1 }
 0x15c   :  { %v914_v31 = vpack.c.bf16 %v856_v26, %v856_v26 }
 0x15d   :  { %v887_v58 = vpack.c.bf16 %v829_v27, %v829_v27  ;;  %v634_v16 = vpop.f32.mrf.mxu2 }
 0x15e   :  { %973 = vst.msk [vmem:[%s2156_s3 + $0xc8] sm:$0xf] %vm922_vm1, %v914_v31  ;;  %v635_v36 = vadd.f32 %v1643_v56, %v634_v16  ;;  %v567_v37 = vpop.f32.mrf.mxu0 }
 0x15f   :  { %946 = vst.msk [vmem:[%s2156_s3 + $0x5c] sm:$0xf] %vm922_vm1, %v887_v58  ;;  %v568_v20 = vadd.f32 %v1643_v56, %v567_v37 }
 0x160   :  { %v789_v30 = vadd.f32 %v788_v19, %v635_v36 }
 0x161   :  { %v722_v39 = vadd.f32 %v721_v54, %v568_v20  ;;  %v798_v26 = vpop.f32.mrf.mxu3 }
 0x162   :  { %v857_v42 = vmax.f32 %v789_v30, 0.0 }
 0x163   :  { %v830_v43 = vmax.f32 %v722_v39, 0.0  ;;  %v731_v10 = vpop.f32.mrf.mxu1 }
 0x164   :  { %v915_v33 = vpack.c.bf16 %v857_v42, %v857_v42  ;;  %v732_v45 = vadd.f32 %v731_v10, %v578_v41 }
 0x165   :  { %v888_v47 = vpack.c.bf16 %v830_v43, %v830_v43  ;;  %v637_v48 = vpop.f32.mrf.mxu2 }
 0x166   :  { %974 = vst.msk [vmem:[%s2156_s3 + $0xcc] sm:$0xf] %vm922_vm1, %v915_v33  ;;  %v834_v44 = vmax.f32 %v732_v45, 0.0  ;;  %v638_v49 = vadd.f32 %v1643_v56, %v637_v48  ;;  %v569_v51 = vpop.f32.mrf.mxu0 }
 0x167   :  { %947 = vst.msk [vmem:[%s2156_s3 + $0x60] sm:$0xf] %vm922_vm1, %v888_v47  ;;  %v570_v7 = vadd.f32 %v1643_v56, %v569_v51 }
 0x168   :  { %v892_v53 = vpack.c.bf16 %v834_v44, %v834_v44  ;;  %v792_v29 = vadd.f32 %v791_v32, %v638_v49 }
 0x169   :  { %v724_v54 = vadd.f32 %v723_v6, %v570_v7  ;;  %v801_v39 = vpop.f32.mrf.mxu3 }
 0x16a   :  { %951 = vst.msk [vmem:[%s2156_s3 + $0x70] sm:$0xf] %vm922_vm1, %v892_v53  ;;  %v858_v5 = vmax.f32 %v792_v29, 0.0 }
 0x16b   :  { %v831_v40 = vmax.f32 %v724_v54, 0.0  ;;  %v733_v57 = vpop.f32.mrf.mxu1 }
 0x16c   :  { %v916_v60 = vpack.c.bf16 %v858_v5, %v858_v5  ;;  %v734_v61 = vadd.f32 %v733_v57, %v580_v55 }
 0x16d   :  { %v889_v63 = vpack.c.bf16 %v831_v40, %v831_v40  ;;  %v639_v0 = vpop.f32.mrf.mxu2 }
 0x16e   :  { %975 = vst.msk [vmem:[%s2156_s3 + $0xd0] sm:$0xf] %vm922_vm1, %v916_v60  ;;  %v835_v2 = vmax.f32 %v734_v61, 0.0  ;;  %v640_v22 = vadd.f32 %v1643_v56, %v639_v0  ;;  %v572_v3 = vpop.f32.mrf.mxu0 }
 0x16f   :  { %948 = vst.msk [vmem:[%s2156_s3 + $0x64] sm:$0xf] %vm922_vm1, %v889_v63  ;;  %v573_v4 = vadd.f32 %v1643_v56, %v572_v3 }
 0x170   :  { %v893_v6 = vpack.c.bf16 %v835_v2, %v835_v2  ;;  %v794_v8 = vadd.f32 %v793_v52, %v640_v22 }
 0x171   :  { %v727_v9 = vadd.f32 %v726_v18, %v573_v4  ;;  %v803_v48 = vpop.f32.mrf.mxu3 }
 0x172   :  { %952 = vst.msk [vmem:[%s2156_s3 + $0x74] sm:$0xf] %vm922_vm1, %v893_v6  ;;  %v859_v11 = vmax.f32 %v794_v8, 0.0 }
 0x173   :  { %v832_v12 = vmax.f32 %v727_v9, 0.0  ;;  %v736_v13 = vpop.f32.mrf.mxu1 }
 0x174   :  { %v917_v14 = vpack.c.bf16 %v859_v11, %v859_v11  ;;  %v737_v1 = vadd.f32 %v736_v13, %v583_v46 }
 0x175   :  { %v890_v17 = vpack.c.bf16 %v832_v12, %v832_v12  ;;  %v642_v19 = vpop.f32.mrf.mxu2 }
 0x176   :  { %976 = vst.msk [vmem:[%s2156_s3 + $0xd4] sm:$0xf] %vm922_vm1, %v917_v14  ;;  %v836_v18 = vmax.f32 %v737_v1, 0.0  ;;  %v643_v35 = vadd.f32 %v1643_v56, %v642_v19  ;;  %v574_v38 = vpop.f32.mrf.mxu0 }
 0x177   :  { %949 = vst.msk [vmem:[%s2156_s3 + $0x68] sm:$0xf] %vm922_vm1, %v890_v17  ;;  %v575_v62 = vadd.f32 %v1643_v56, %v574_v38 }
 0x178   :  { %v894_v21 = vpack.c.bf16 %v836_v18, %v836_v18  ;;  %v797_v23 = vadd.f32 %v796_v34, %v643_v35 }
 0x179   :  { %v729_v24 = vadd.f32 %v2063_v28, %v575_v62 }
 0x17a   :  { %953 = vst.msk [vmem:[%s2156_s3 + $0x78] sm:$0xf] %vm922_vm1, %v894_v21  ;;  %v860_v15 = vmax.f32 %v797_v23, 0.0 }
 0x17b   :  { %v833_v25 = vmax.f32 %v729_v24, 0.0  ;;  %v738_v27 = vpop.f32.mrf.mxu1 }
 0x17c   :  { %v918_v31 = vpack.c.bf16 %v860_v15, %v860_v15  ;;  %v739_v58 = vadd.f32 %v738_v27, %v585_v59 }
 0x17d   :  { %v891_v16 = vpack.c.bf16 %v833_v25, %v833_v25  ;;  %v644_v32 = vpop.f32.mrf.mxu2 }
 0x17e   :  { %977 = vst.msk [vmem:[%s2156_s3 + $0xd8] sm:$0xf] %vm922_vm1, %v918_v31  ;;  %v837_v28 = vmax.f32 %v739_v58, 0.0  ;;  %v645_v50 = vadd.f32 %v1643_v56, %v644_v32 }
 0x17f   :  { %950 = vst.msk [vmem:[%s2156_s3 + $0x6c] sm:$0xf] %vm922_vm1, %v891_v16 }
 0x180   :  { %v895_v36 = vpack.c.bf16 %v837_v28, %v837_v28  ;;  %v799_v37 = vadd.f32 %v798_v26, %v645_v50 }
 0x182   :  { %954 = vst.msk [vmem:[%s2156_s3 + $0x7c] sm:$0xf] %vm922_vm1, %v895_v36  ;;  %v861_v20 = vmax.f32 %v799_v37, 0.0 }
 0x184   :  { %v919_v30 = vpack.c.bf16 %v861_v20, %v861_v20 }
 0x185   :  { %v647_v41 = vpop.f32.mrf.mxu2 }
 0x186   :  { %978 = vst.msk [vmem:[%s2156_s3 + $0xdc] sm:$0xf] %vm922_vm1, %v919_v30  ;;  %v648_v42 = vadd.f32 %v1643_v56, %v647_v41 }
 0x188   :  { %v802_v43 = vadd.f32 %v801_v39, %v648_v42 }
 0x18a   :  { %v862_v10 = vmax.f32 %v802_v43, 0.0 }
 0x18c   :  { %v920_v33 = vpack.c.bf16 %v862_v10, %v862_v10 }
 0x18d   :  { %v649_v45 = vpop.f32.mrf.mxu2 }
 0x18e   :  { %979 = vst.msk [vmem:[%s2156_s3 + $0xe0] sm:$0xf] %vm922_vm1, %v920_v33  ;;  %v650_v47 = vadd.f32 %v1643_v56, %v649_v45 }
 0x190   :  { %v804_v44 = vadd.f32 %v803_v48, %v650_v47 }
 0x192   :  { %v863_v49 = vmax.f32 %v804_v44, 0.0 }
 0x194   :  { %v921_v51 = vpack.c.bf16 %v863_v49, %v863_v49 }
 0x196   :  { %980 = vst.msk [vmem:[%s2156_s3 + $0xe4] sm:$0xf] %vm922_vm1, %v921_v51 }

// kernel: forward.13
= control target key start
LH: loop header
LB: loop body
LE: loop exit
PB: predicated region body
PF: predicated region fallthrough
CT: control target
= control target key end

     0   :  { %vm296_vm0 = vcmask 261120   ;;  %vm478_vm1 = vcmask 519168   ;;  %s1004_s1 = inlined_call_operand.vmem [shape: bf16[288,64], index: 1, kind: input, shape index: {}]   ;;  %s1005_s0 = inlined_call_operand.vmem [shape: bf16[112,288], index: 0, kind: input, shape index: {}]   ;;  %s1006_s2 = inlined_call_operand.vmem [shape: f32[1,64], index: 2, kind: input, shape index: {}]   ;;  %s1007_s3 = inlined_call_operand.vmem [shape: bf16[112,64], index: 3, kind: output, shape index: {}]  }
   0x1   :  { %v688_v0 = vld [vmem:[%s1004_s1 + $0x38] sm:$0xff]  ;;  %v698_v1 = vld [vmem:[%s1004_s1 + $0x88] sm:$0xff]  ;;  %v687_v3 = vld [vmem:[%s1004_s1 + $0x30] sm:$0xff] }
   0x2   :  { %v696_v2 = vld [vmem:[%s1004_s1 + $0x78] sm:$0xff]  ;;  %318 = vmatpush.bf16.msra.mxu0 %v688_v0  ;;  %699 = vmatpush.bf16.msra.mxu3 %v688_v0  ;;  %v697_v4 = vld [vmem:[%s1004_s1 + $0x80] sm:$0xff]  ;;  %v695_v5 = vld [vmem:[%s1004_s1 + $0x70] sm:$0xff] }
   0x3   :  { %412 = vmatpush.bf16.msra.mxu2 %v698_v1  ;;  %362 = vmatpush.bf16.msra.mxu1 %v696_v2  ;;  %v507_v6 = vld [vmem:[%s1005_s0 + $0x8] sm:$0xf]  ;;  %v662_v7 = vld [vmem:[%s1005_s0 + $0x10] sm:$0xf0]  ;;  %v685_v11 = vld [vmem:[%s1004_s1 + $0x20] sm:$0xff] }
   0x4   :  { %v508_v8 = vor.u32 %v662_v7, %v507_v6  ;;  %v686_v9 = vld [vmem:[%s1004_s1 + $0x28] sm:$0xff]  ;;  %v693_v12 = vld [vmem:[%s1004_s1 + $0x60] sm:$0xff]  ;;  %v684_v13 = vld [vmem:[%s1004_s1 + $0x18] sm:$0xff] }
   0x5   :  { %v694_v10 = vld [vmem:[%s1004_s1 + $0x68] sm:$0xff]  ;;  %v692_v14 = vld [vmem:[%s1004_s1 + $0x58] sm:$0xff]  ;;  %v683_v15 = vld [vmem:[%s1004_s1 + $0x10] sm:$0xff] }
   0x6   :  { %319 = vmatpush.bf16.msra.mxu0 %v687_v3  ;;  %700 = vmatpush.bf16.msra.mxu3 %v687_v3  ;;  %v691_v16 = vld [vmem:[%s1004_s1 + $0x50] sm:$0xff]  ;;  %v519_v17 = vld [vmem:[%s1005_s0 + $0x20] sm:$0xf]  ;;  %v665_v18 = vld [vmem:[%s1005_s0 + $0x28] sm:$0xf0] }
   0x7   :  { %413 = vmatpush.bf16.msra.mxu2 %v697_v4  ;;  %363 = vmatpush.bf16.msra.mxu1 %v695_v5  ;;  %v520_v19 = vor.u32 %v665_v18, %v519_v17  ;;  %v682_v20 = vld [vmem:[%s1004_s1 + $0x8] sm:$0xff]  ;;  %v681_v22 = vld [vmem:[%s1004_s1] sm:$0xff]  ;;  %v559_v26 = vld [vmem:[%s1005_s0 + $0x78] sm:$0xf] }
   0x8   :  { %v690_v21 = vld [vmem:[%s1004_s1 + $0x48] sm:$0xff]  ;;  %v689_v23 = vld [vmem:[%s1004_s1 + $0x40] sm:$0xff]  ;;  %v501_v29 = vld [vmem:[%s1005_s0 + $0xc] sm:$0xf0] }
   0x9   :  { %v499_v24 = vld [vmem:[%s1005_s0] sm:$0xf]  ;;  %v661_v25 = vld [vmem:[%s1005_s0 + $0x8] sm:$0xf0]  ;;  %v676_v27 = vld [vmem:[%s1005_s0 + $0x80] sm:$0xf0] }
   0xa   :  { %653 = vmatmul.msk.bf16.vlgmr.msra.gmra.mxu2 %vm296_vm0, %v508_v8  ;;  %320 = vmatpush.bf16.msra.mxu0 %v686_v9  ;;  %v660_v28 = vld [vmem:[%s1005_s0 + $0x4] sm:$0xf]  ;;  %v500_v30 = vor.u32 %v661_v25, %v499_v24  ;;  %v560_v31 = vor.u32 %v676_v27, %v559_v26  ;;  %v531_v33 = vld [vmem:[%s1005_s0 + $0x38] sm:$0xf]  ;;  %v571_v38 = vld [vmem:[%s1005_s0 + $0x90] sm:$0xf] }
   0xb   :  { %701 = vmatpush.bf16.msra.mxu3 %v686_v9  ;;  %364 = vmatpush.bf16.msra.mxu1 %v694_v10  ;;  %v504_v32 = vor.u32 %v660_v28, %v501_v29  ;;  %v668_v34 = vld [vmem:[%s1005_s0 + $0x40] sm:$0xf0]  ;;  %v511_v36 = vld [vmem:[%s1005_s0 + $0x18] sm:$0xf]  ;;  %v679_v39 = vld [vmem:[%s1005_s0 + $0x98] sm:$0xf0] }
   0xc   :  { %v532_v35 = vor.u32 %v668_v34, %v531_v33  ;;  %v664_v37 = vld [vmem:[%s1005_s0 + $0x20] sm:$0xf0]  ;;  %v663_v40 = vld [vmem:[%s1005_s0 + $0x1c] sm:$0xf]  ;;  %v513_v41 = vld [vmem:[%s1005_s0 + $0x24] sm:$0xf0]  ;;  %v572_v43 = vor.u32 %v679_v39, %v571_v38 }
   0xd   :  { %v512_v42 = vor.u32 %v664_v37, %v511_v36  ;;  %v516_v44 = vor.u32 %v663_v40, %v513_v41  ;;  %v543_v45 = vld [vmem:[%s1005_s0 + $0x50] sm:$0xf]  ;;  %v671_v46 = vld [vmem:[%s1005_s0 + $0x58] sm:$0xf0]  ;;  %v561_v51 = vld [vmem:[%s1005_s0 + $0x84] sm:$0xf0] }
   0xe   :  { %321 = vmatpush.bf16.msra.mxu0 %v685_v11  ;;  %v544_v47 = vor.u32 %v671_v46, %v543_v45  ;;  %v523_v48 = vld [vmem:[%s1005_s0 + $0x30] sm:$0xf]  ;;  %v667_v49 = vld [vmem:[%s1005_s0 + $0x38] sm:$0xf0]  ;;  %v666_v52 = vld [vmem:[%s1005_s0 + $0x34] sm:$0xf] }
   0xf   :  { %702 = vmatpush.bf16.msra.mxu3 %v685_v11  ;;  %365 = vmatpush.bf16.msra.mxu1 %v693_v12  ;;  %v675_v50 = vld [vmem:[%s1005_s0 + $0x7c] sm:$0xf]  ;;  %v525_v53 = vld [vmem:[%s1005_s0 + $0x3c] sm:$0xf0]  ;;  %v524_v54 = vor.u32 %v667_v49, %v523_v48  ;;  %v555_v57 = vld [vmem:[%s1005_s0 + $0x68] sm:$0xf] }
  0x10   :  { %v564_v55 = vor.u32 %v675_v50, %v561_v51  ;;  %v528_v56 = vor.u32 %v666_v52, %v525_v53  ;;  %v674_v58 = vld [vmem:[%s1005_s0 + $0x70] sm:$0xf0]  ;;  %v535_v60 = vld [vmem:[%s1005_s0 + $0x48] sm:$0xf]  ;;  %v573_v63 = vld [vmem:[%s1005_s0 + $0x9c] sm:$0xf0] }
  0x11   :  { %v556_v59 = vor.u32 %v674_v58, %v555_v57  ;;  %v670_v61 = vld [vmem:[%s1005_s0 + $0x50] sm:$0xf0]  ;;  %v669_v0 = vld [vmem:[%s1005_s0 + $0x4c] sm:$0xf]  ;;  %v537_v1 = vld [vmem:[%s1005_s0 + $0x54] sm:$0xf0] }
  0x12   :  { %322 = vmatpush.bf16.msra.mxu0 %v684_v13  ;;  %v678_v62 = vld [vmem:[%s1005_s0 + $0x94] sm:$0xf]  ;;  %v540_v4 = vor.u32 %v669_v0, %v537_v1  ;;  %v677_v6 = vld [vmem:[%s1005_s0 + $0x88] sm:$0xf0]  ;;  %v547_v8 = vld [vmem:[%s1005_s0 + $0x60] sm:$0xf] }
  0x13   :  { %703 = vmatpush.bf16.msra.mxu3 %v684_v13  ;;  %366 = vmatpush.bf16.msra.mxu1 %v692_v14  ;;  %v576_v3 = vor.u32 %v678_v62, %v573_v63  ;;  %v673_v9 = vld [vmem:[%s1005_s0 + $0x68] sm:$0xf0]  ;;  %v549_v11 = vld [vmem:[%s1005_s0 + $0x6c] sm:$0xf0] }
  0x16   :  { %323 = vmatpush.bf16.msra.mxu0 %v683_v15 }
  0x17   :  { %704 = vmatpush.bf16.msra.mxu3 %v683_v15  ;;  %367 = vmatpush.bf16.msra.mxu1 %v691_v16  ;;  %v680_v15 = vld [vmem:[%s1005_s0 + $0xa0] sm:$0xf0] }
  0x1a   :  { %654 = vmatmul.msk.bf16.gmra.mxu2 %vm296_vm0, %v520_v19  ;;  %324 = vmatpush.bf16.msra.mxu0 %v682_v20  ;;  %v926_v19 = vld [vmem:[%s1006_s2] ss:$0 sm:$0xff] }
  0x1b   :  { %705 = vmatpush.bf16.msra.mxu3 %v682_v20  ;;  %368 = vmatpush.bf16.msra.mxu1 %v690_v21 }
  0x1e   :  { %325 = vmatpush.bf16.msra.mxu0 %v681_v22 }
  0x1f   :  { %706 = vmatpush.bf16.msra.mxu3 %v681_v22  ;;  %369 = vmatpush.bf16.msra.mxu1 %v689_v23 }
  0x21   :  { %326 = vmatmul.bf16.vlgmr.msra.gmra.mxu0 %v500_v30 }
  0x22   :  { %351 = vmatmul.bf16.vlgmr.msra.gmra.mxu3 %v560_v31  ;;  %370 = vmatmul.bf16.vlgmr.msra.gmra.mxu1 %v504_v32 }
  0x23   :  { %707 = vmatpush.bf16.msrb.mxu3 %v696_v2  ;;  %v536_v2 = vor.u32 %v670_v61, %v535_v60 }
  0x27   :  { %708 = vmatpush.bf16.msrb.mxu3 %v695_v5  ;;  %v567_v5 = vld [vmem:[%s1005_s0 + $0x80] sm:$0xf] }
  0x28   :  { %v568_v7 = vor.u32 %v677_v6, %v567_v5 }
  0x2a   :  { %655 = vmatmul.msk.bf16.gmra.mxu2 %vm296_vm0, %v532_v35 }
  0x2b   :  { %709 = vmatpush.bf16.msrb.mxu3 %v694_v10  ;;  %v672_v10 = vld [vmem:[%s1005_s0 + $0x64] sm:$0xf] }
  0x2c   :  { %v552_v13 = vor.u32 %v672_v10, %v549_v11 }
  0x2f   :  { %710 = vmatpush.bf16.msrb.mxu3 %v693_v12  ;;  %v548_v12 = vor.u32 %v673_v9, %v547_v8 }
  0x31   :  { %331 = vmatmul.bf16.gmra.mxu0 %v512_v42 }
  0x32   :  { %356 = vmatmul.bf16.gmra.mxu3 %v572_v43  ;;  %375 = vmatmul.bf16.gmra.mxu1 %v516_v44 }
  0x33   :  { %711 = vmatpush.bf16.msrb.mxu3 %v692_v14  ;;  %v579_v14 = vld [vmem:[%s1005_s0 + $0x98] sm:$0xf] }
  0x37   :  { %712 = vmatpush.bf16.msrb.mxu3 %v691_v16  ;;  %v580_v16 = vor.u32 %v680_v15, %v579_v14 }
  0x3a   :  { %656 = vmatmul.msk.bf16.gmra.mxu2 %vm296_vm0, %v544_v47 }
  0x3b   :  { %713 = vmatpush.bf16.msrb.mxu3 %v690_v21 }
  0x3f   :  { %714 = vmatpush.bf16.msrb.mxu3 %v689_v23 }
  0x41   :  { %336 = vmatmul.bf16.gmra.mxu0 %v524_v54 }
  0x42   :  { %395 = vmatmul.bf16.vlgmr.msrb.gmra.mxu3 %v564_v55  ;;  %380 = vmatmul.bf16.gmra.mxu1 %v528_v56 }
  0x4a   :  { %657 = vmatmul.msk.bf16.gmra.mxu2 %vm296_vm0, %v556_v59 }
  0x51   :  { %341 = vmatmul.bf16.gmra.mxu0 %v536_v2 }
  0x52   :  { %400 = vmatmul.bf16.gmra.mxu3 %v576_v3  ;;  %385 = vmatmul.bf16.gmra.mxu1 %v540_v4 }
  0x5a   :  { %658 = vmatmul.msk.bf16.gmra.mxu2 %vm296_vm0, %v568_v7 }
  0x61   :  { %346 = vmatmul.bf16.gmra.mxu0 %v548_v12 }
  0x62   :  { %390 = vmatmul.bf16.gmra.mxu1 %v552_v13 }
  0x6a   :  { %659 = vmatmul.msk.bf16.gmra.mxu2 %vm296_vm0, %v580_v16 }
  0x8d   :  { %v415_v17 = vpop.f32.mrf.mxu2 }
  0x95   :  { %v417_v18 = vpop.f32.mrf.mxu2 }
  0x9d   :  { %v420_v20 = vpop.f32.mrf.mxu2 }
  0x9e   :  { %v327_v21 = vpop.f32.mrf.mxu0 }
  0x9f   :  { %v328_v22 = vadd.f32 %v926_v19, %v327_v21  ;;  %v371_v23 = vpop.f32.mrf.mxu1 }
  0xa1   :  { %v372_v24 = vadd.f32 %v371_v23, %v328_v22 }
  0xa3   :  { %v416_v25 = vadd.f32 %v415_v17, %v372_v24 }
  0xa5   :  { %v450_v26 = vmax.f32 %v416_v25, 0.0  ;;  %v422_v27 = vpop.f32.mrf.mxu2  ;;  %v352_v33 = vpop.f32.mrf.mxu3 }
  0xa6   :  { %v329_v28 = vpop.f32.mrf.mxu0  ;;  %v353_v23 = vadd.f32 %v926_v19, %v352_v33 }
  0xa7   :  { %v464_v29 = vpack.c.bf16 %v450_v26, %v450_v26  ;;  %v330_v30 = vadd.f32 %v926_v19, %v329_v28  ;;  %v373_v31 = vpop.f32.mrf.mxu1 }
  0xa9   :  { %479 = vst.msk [vmem:[%s1007_s3] sm:$0xf] %vm478_vm1, %v464_v29  ;;  %v374_v32 = vadd.f32 %v373_v31, %v330_v30 }
  0xab   :  { %v418_v34 = vadd.f32 %v417_v18, %v374_v32 }
  0xad   :  { %v451_v35 = vmax.f32 %v418_v34, 0.0  ;;  %v425_v36 = vpop.f32.mrf.mxu2  ;;  %v354_v43 = vpop.f32.mrf.mxu3 }
  0xae   :  { %v332_v37 = vpop.f32.mrf.mxu0  ;;  %v355_v33 = vadd.f32 %v926_v19, %v354_v43 }
  0xaf   :  { %v465_v38 = vpack.c.bf16 %v451_v35, %v451_v35  ;;  %v333_v39 = vadd.f32 %v926_v19, %v332_v37  ;;  %v376_v40 = vpop.f32.mrf.mxu1 }
  0xb1   :  { %480 = vst.msk [vmem:[%s1007_s3 + $0x4] sm:$0xf] %vm478_vm1, %v465_v38  ;;  %v377_v41 = vadd.f32 %v376_v40, %v333_v39 }
  0xb3   :  { %v421_v42 = vadd.f32 %v420_v20, %v377_v41 }
  0xb5   :  { %v452_v44 = vmax.f32 %v421_v42, 0.0  ;;  %v427_v45 = vpop.f32.mrf.mxu2  ;;  %v944_v55 = vpop.f32.mrf.mxu3 }
  0xb6   :  { %v334_v46 = vpop.f32.mrf.mxu0 }
  0xb7   :  { %v466_v47 = vpack.c.bf16 %v452_v44, %v452_v44  ;;  %v335_v48 = vadd.f32 %v926_v19, %v334_v46  ;;  %v378_v49 = vpop.f32.mrf.mxu1 }
  0xb9   :  { %481 = vst.msk [vmem:[%s1007_s3 + $0x8] sm:$0xf] %vm478_vm1, %v466_v47  ;;  %v379_v50 = vadd.f32 %v378_v49, %v335_v48 }
  0xbb   :  { %v423_v51 = vadd.f32 %v422_v27, %v379_v50  ;;  %v358_v50 = vadd.f32 %v926_v19, %v944_v55 }
  0xbd   :  { %v453_v52 = vmax.f32 %v423_v51, 0.0  ;;  %v430_v53 = vpop.f32.mrf.mxu2  ;;  %v952_v3 = vpop.f32.mrf.mxu3 }
  0xbe   :  { %v337_v54 = vpop.f32.mrf.mxu0  ;;  %v360_v55 = vadd.f32 %v926_v19, %v952_v3 }
  0xbf   :  { %v467_v56 = vpack.c.bf16 %v453_v52, %v453_v52  ;;  %v338_v57 = vadd.f32 %v926_v19, %v337_v54  ;;  %v381_v58 = vpop.f32.mrf.mxu1 }
  0xc1   :  { %482 = vst.msk [vmem:[%s1007_s3 + $0xc] sm:$0xf] %vm478_vm1, %v467_v56  ;;  %v382_v59 = vadd.f32 %v381_v58, %v338_v57 }
  0xc3   :  { %v426_v60 = vadd.f32 %v425_v36, %v382_v59 }
  0xc5   :  { %v454_v61 = vmax.f32 %v426_v60, 0.0  ;;  %v432_v62 = vpop.f32.mrf.mxu2  ;;  %v396_v13 = vpop.f32.mrf.mxu3 }
  0xc6   :  { %v339_v63 = vpop.f32.mrf.mxu0  ;;  %v397_v25 = vadd.f32 %v396_v13, %v353_v23 }
  0xc7   :  { %v468_v0 = vpack.c.bf16 %v454_v61, %v454_v61  ;;  %v340_v1 = vadd.f32 %v926_v19, %v339_v63  ;;  %v383_v2 = vpop.f32.mrf.mxu1 }
  0xc9   :  { %483 = vst.msk [vmem:[%s1007_s3 + $0x10] sm:$0xf] %vm478_vm1, %v468_v0  ;;  %v384_v4 = vadd.f32 %v383_v2, %v340_v1 }
  0xcb   :  { %v428_v5 = vadd.f32 %v427_v45, %v384_v4 }
  0xcd   :  { %v455_v6 = vmax.f32 %v428_v5, 0.0  ;;  %v435_v7 = vpop.f32.mrf.mxu2  ;;  %v398_v26 = vpop.f32.mrf.mxu3 }
  0xce   :  { %v342_v8 = vpop.f32.mrf.mxu0  ;;  %v399_v39 = vadd.f32 %v398_v26, %v355_v33 }
  0xcf   :  { %v469_v9 = vpack.c.bf16 %v455_v6, %v455_v6  ;;  %v343_v10 = vadd.f32 %v926_v19, %v342_v8  ;;  %v386_v11 = vpop.f32.mrf.mxu1 }
  0xd1   :  { %484 = vst.msk [vmem:[%s1007_s3 + $0x14] sm:$0xf] %vm478_vm1, %v469_v9  ;;  %v387_v12 = vadd.f32 %v386_v11, %v343_v10 }
  0xd3   :  { %v431_v14 = vadd.f32 %v430_v53, %v387_v12 }
  0xd5   :  { %v456_v15 = vmax.f32 %v431_v14, 0.0  ;;  %v437_v16 = vpop.f32.mrf.mxu2  ;;  %v401_v45 = vpop.f32.mrf.mxu3 }
  0xd6   :  { %v344_v17 = vpop.f32.mrf.mxu0  ;;  %v402_v53 = vadd.f32 %v401_v45, %v358_v50 }
  0xd7   :  { %v470_v18 = vpack.c.bf16 %v456_v15, %v456_v15  ;;  %v345_v20 = vadd.f32 %v926_v19, %v344_v17  ;;  %v388_v21 = vpop.f32.mrf.mxu1 }
  0xd9   :  { %485 = vst.msk [vmem:[%s1007_s3 + $0x18] sm:$0xf] %vm478_vm1, %v470_v18  ;;  %v389_v22 = vadd.f32 %v388_v21, %v345_v20 }
  0xdb   :  { %v433_v24 = vadd.f32 %v432_v62, %v389_v22 }
  0xdd   :  { %v457_v27 = vmax.f32 %v433_v24, 0.0  ;;  %v440_v28 = vpop.f32.mrf.mxu2  ;;  %v403_v60 = vpop.f32.mrf.mxu3 }
  0xde   :  { %v441_v29 = vadd.f32 %v440_v28, %v397_v25  ;;  %v347_v30 = vpop.f32.mrf.mxu0  ;;  %v404_v62 = vadd.f32 %v403_v60, %v360_v55 }
  0xdf   :  { %v471_v31 = vpack.c.bf16 %v457_v27, %v457_v27  ;;  %v348_v32 = vadd.f32 %v926_v19, %v347_v30  ;;  %v391_v34 = vpop.f32.mrf.mxu1 }
  0xe0   :  { %v460_v35 = vmax.f32 %v441_v29, 0.0 }
  0xe1   :  { %486 = vst.msk [vmem:[%s1007_s3 + $0x1c] sm:$0xf] %vm478_vm1, %v471_v31  ;;  %v392_v36 = vadd.f32 %v391_v34, %v348_v32 }
  0xe2   :  { %v474_v37 = vpack.c.bf16 %v460_v35, %v460_v35 }
  0xe3   :  { %v436_v38 = vadd.f32 %v435_v7, %v392_v36 }
  0xe4   :  { %489 = vst.msk [vmem:[%s1007_s3 + $0x28] sm:$0xf] %vm478_vm1, %v474_v37 }
  0xe5   :  { %v458_v40 = vmax.f32 %v436_v38, 0.0  ;;  %v442_v41 = vpop.f32.mrf.mxu2 }
  0xe6   :  { %v443_v42 = vadd.f32 %v442_v41, %v399_v39  ;;  %v349_v44 = vpop.f32.mrf.mxu0 }
  0xe7   :  { %v472_v46 = vpack.c.bf16 %v458_v40, %v458_v40  ;;  %v350_v47 = vadd.f32 %v926_v19, %v349_v44  ;;  %v393_v48 = vpop.f32.mrf.mxu1 }
  0xe8   :  { %v461_v49 = vmax.f32 %v443_v42, 0.0 }
  0xe9   :  { %487 = vst.msk [vmem:[%s1007_s3 + $0x20] sm:$0xf] %vm478_vm1, %v472_v46  ;;  %v394_v43 = vadd.f32 %v393_v48, %v350_v47 }
  0xea   :  { %v475_v51 = vpack.c.bf16 %v461_v49, %v461_v49 }
  0xeb   :  { %v438_v52 = vadd.f32 %v437_v16, %v394_v43 }
  0xec   :  { %490 = vst.msk [vmem:[%s1007_s3 + $0x2c] sm:$0xf] %vm478_vm1, %v475_v51 }
  0xed   :  { %v459_v54 = vmax.f32 %v438_v52, 0.0  ;;  %v445_v56 = vpop.f32.mrf.mxu2 }
  0xee   :  { %v446_v57 = vadd.f32 %v445_v56, %v402_v53 }
  0xef   :  { %v473_v58 = vpack.c.bf16 %v459_v54, %v459_v54 }
  0xf0   :  { %v462_v59 = vmax.f32 %v446_v57, 0.0 }
  0xf1   :  { %488 = vst.msk [vmem:[%s1007_s3 + $0x24] sm:$0xf] %vm478_vm1, %v473_v58 }
  0xf2   :  { %v476_v61 = vpack.c.bf16 %v462_v59, %v462_v59 }
  0xf4   :  { %491 = vst.msk [vmem:[%s1007_s3 + $0x30] sm:$0xf] %vm478_vm1, %v476_v61 }
  0xf5   :  { %v447_v63 = vpop.f32.mrf.mxu2 }
  0xf6   :  { %v448_v0 = vadd.f32 %v447_v63, %v404_v62 }
  0xf8   :  { %v463_v1 = vmax.f32 %v448_v0, 0.0 }
  0xfa   :  { %v477_v2 = vpack.c.bf16 %v463_v1, %v463_v1 }
  0xfc   :  { %492 = vst.msk [vmem:[%s1007_s3 + $0x34] sm:$0xf] %vm478_vm1, %v477_v2 }

// kernel: forward.14
= control target key start
LH: loop header
LB: loop body
LE: loop exit
PB: predicated region body
PF: predicated region fallthrough
CT: control target
= control target key end

     0   :  { %vm369_vm0 = vcmask 523264   ;;  %s932_s1 = inlined_call_operand.vmem [shape: bf16[576,128], index: 1, kind: input, shape index: {}]   ;;  %s933_s2 = inlined_call_operand.vmem [shape: f32[1,128], index: 2, kind: input, shape index: {}]   ;;  %s934_s0 = inlined_call_operand.vmem [shape: bf16[32,576], index: 0, kind: input, shape index: {}]   ;;  %s935_s3 = inlined_call_operand.vmem [shape: bf16[32,128], index: 3, kind: output, shape index: {}]  }
   0x1   :  { %v690_v0 = vld [vmem:[%s932_s1 + $0x38] sm:$0xff]  ;;  %v689_v4 = vld [vmem:[%s932_s1 + $0x30] sm:$0xff]  ;;  %v688_v8 = vld [vmem:[%s932_s1 + $0x28] sm:$0xff] }
   0x2   :  { %v698_v1 = vld [vmem:[%s932_s1 + $0x78] sm:$0xff]  ;;  %376 = vmatpush.bf16.msra.mxu0 %v690_v0  ;;  %v697_v5 = vld [vmem:[%s932_s1 + $0x70] sm:$0xff]  ;;  %v696_v9 = vld [vmem:[%s932_s1 + $0x68] sm:$0xff] }
   0x3   :  { %v706_v2 = vld [vmem:[%s932_s1 + $0xb8] sm:$0xff]  ;;  %395 = vmatpush.bf16.msra.mxu1 %v698_v1  ;;  %v705_v6 = vld [vmem:[%s932_s1 + $0xb0] sm:$0xff]  ;;  %v704_v10 = vld [vmem:[%s932_s1 + $0xa8] sm:$0xff] }
   0x4   :  { %v714_v3 = vld [vmem:[%s932_s1 + $0xf8] sm:$0xff]  ;;  %414 = vmatpush.bf16.msra.mxu2 %v706_v2  ;;  %v713_v7 = vld [vmem:[%s932_s1 + $0xf0] sm:$0xff]  ;;  %v712_v11 = vld [vmem:[%s932_s1 + $0xe8] sm:$0xff] }
   0x5   :  { %433 = vmatpush.bf16.msra.mxu3 %v714_v3  ;;  %v687_v12 = vld [vmem:[%s932_s1 + $0x20] sm:$0xff]  ;;  %v686_v16 = vld [vmem:[%s932_s1 + $0x18] sm:$0xff]  ;;  %v685_v20 = vld [vmem:[%s932_s1 + $0x10] sm:$0xff] }
   0x6   :  { %377 = vmatpush.bf16.msra.mxu0 %v689_v4  ;;  %v695_v13 = vld [vmem:[%s932_s1 + $0x60] sm:$0xff]  ;;  %v694_v17 = vld [vmem:[%s932_s1 + $0x58] sm:$0xff]  ;;  %v693_v21 = vld [vmem:[%s932_s1 + $0x50] sm:$0xff] }
   0x7   :  { %396 = vmatpush.bf16.msra.mxu1 %v697_v5  ;;  %v703_v14 = vld [vmem:[%s932_s1 + $0xa0] sm:$0xff]  ;;  %v702_v18 = vld [vmem:[%s932_s1 + $0x98] sm:$0xff]  ;;  %v701_v22 = vld [vmem:[%s932_s1 + $0x90] sm:$0xff] }
   0x8   :  { %415 = vmatpush.bf16.msra.mxu2 %v705_v6  ;;  %v711_v15 = vld [vmem:[%s932_s1 + $0xe0] sm:$0xff]  ;;  %v710_v19 = vld [vmem:[%s932_s1 + $0xd8] sm:$0xff]  ;;  %v709_v23 = vld [vmem:[%s932_s1 + $0xd0] sm:$0xff] }
   0x9   :  { %434 = vmatpush.bf16.msra.mxu3 %v713_v7  ;;  %v684_v24 = vld [vmem:[%s932_s1 + $0x8] sm:$0xff]  ;;  %v683_v28 = vld [vmem:[%s932_s1] sm:$0xff]  ;;  %v675_v33 = vld [vmem:[%s934_s0 + $0x10] sm:$0xf0] }
   0xa   :  { %378 = vmatpush.bf16.msra.mxu0 %v688_v8  ;;  %v692_v25 = vld [vmem:[%s932_s1 + $0x48] sm:$0xff]  ;;  %v691_v29 = vld [vmem:[%s932_s1 + $0x40] sm:$0xff]  ;;  %v491_v35 = vld [vmem:[%s934_s0 + $0x14] sm:$0xf0] }
   0xb   :  { %397 = vmatpush.bf16.msra.mxu1 %v696_v9  ;;  %v700_v26 = vld [vmem:[%s932_s1 + $0x88] sm:$0xff]  ;;  %v699_v30 = vld [vmem:[%s932_s1 + $0x80] sm:$0xff]  ;;  %v676_v37 = vld [vmem:[%s934_s0 + $0x18] sm:$0xf0] }
   0xc   :  { %416 = vmatpush.bf16.msra.mxu2 %v704_v10  ;;  %v708_v27 = vld [vmem:[%s932_s1 + $0xc8] sm:$0xff]  ;;  %v707_v31 = vld [vmem:[%s932_s1 + $0xc0] sm:$0xff]  ;;  %v718_v40 = vld [vmem:[%s932_s1 + $0x118] sm:$0xff] }
   0xd   :  { %435 = vmatpush.bf16.msra.mxu3 %v712_v11  ;;  %v489_v32 = vld [vmem:[%s934_s0] sm:$0xf]  ;;  %v673_v34 = vld [vmem:[%s934_s0 + $0x4] sm:$0xf]  ;;  %v497_v36 = vld [vmem:[%s934_s0 + $0x8] sm:$0xf] }
   0xe   :  { %379 = vmatpush.bf16.msra.mxu0 %v687_v12  ;;  %v674_v38 = vld [vmem:[%s934_s0 + $0xc] sm:$0xf]  ;;  %v499_v39 = vld [vmem:[%s934_s0 + $0x1c] sm:$0xf0]  ;;  %v490_v41 = vor.u32 %v675_v33, %v489_v32  ;;  %v494_v42 = vor.u32 %v673_v34, %v491_v35  ;;  %v498_v43 = vor.u32 %v676_v37, %v497_v36  ;;  %v717_v45 = vld [vmem:[%s932_s1 + $0x110] sm:$0xff] }
   0xf   :  { %398 = vmatpush.bf16.msra.mxu1 %v695_v13  ;;  %v502_v44 = vor.u32 %v674_v38, %v499_v39  ;;  %v716_v46 = vld [vmem:[%s932_s1 + $0x108] sm:$0xff]  ;;  %v715_v47 = vld [vmem:[%s932_s1 + $0x100] sm:$0xff]  ;;  %v680_v49 = vld [vmem:[%s934_s0 + $0x38] sm:$0xf0] }
  0x10   :  { %417 = vmatpush.bf16.msra.mxu2 %v703_v14  ;;  %v509_v48 = vld [vmem:[%s934_s0 + $0x28] sm:$0xf]  ;;  %v678_v50 = vld [vmem:[%s934_s0 + $0x2c] sm:$0xf]  ;;  %v511_v51 = vld [vmem:[%s934_s0 + $0x3c] sm:$0xf0] }
  0x11   :  { %436 = vmatpush.bf16.msra.mxu3 %v711_v15  ;;  %v517_v52 = vld [vmem:[%s934_s0 + $0x30] sm:$0xf]  ;;  %v681_v53 = vld [vmem:[%s934_s0 + $0x40] sm:$0xf0]  ;;  %v679_v54 = vld [vmem:[%s934_s0 + $0x34] sm:$0xf]  ;;  %v510_v56 = vor.u32 %v680_v49, %v509_v48  ;;  %v514_v57 = vor.u32 %v678_v50, %v511_v51 }
  0x12   :  { %380 = vmatpush.bf16.msra.mxu0 %v686_v16  ;;  %v519_v55 = vld [vmem:[%s934_s0 + $0x44] sm:$0xf0]  ;;  %v518_v58 = vor.u32 %v681_v53, %v517_v52  ;;  %v505_v60 = vld [vmem:[%s934_s0 + $0x10] sm:$0xf]  ;;  %v677_v61 = vld [vmem:[%s934_s0 + $0x20] sm:$0xf0] }
  0x13   :  { %399 = vmatpush.bf16.msra.mxu1 %v694_v17  ;;  %v522_v59 = vor.u32 %v679_v54, %v519_v55  ;;  %v525_v62 = vld [vmem:[%s934_s0 + $0x38] sm:$0xf]  ;;  %v682_v63 = vld [vmem:[%s934_s0 + $0x48] sm:$0xf0]  ;;  %v506_v0 = vor.u32 %v677_v61, %v505_v60  ;;  %v734_v12 = vld [vmem:[%s933_s2] ss:$0 sm:$0xff] }
  0x14   :  { %418 = vmatpush.bf16.msra.mxu2 %v702_v18  ;;  %v526_v1 = vor.u32 %v682_v63, %v525_v62 }
  0x15   :  { %437 = vmatpush.bf16.msra.mxu3 %v710_v19 }
  0x16   :  { %381 = vmatpush.bf16.msra.mxu0 %v685_v20 }
  0x17   :  { %400 = vmatpush.bf16.msra.mxu1 %v693_v21 }
  0x18   :  { %419 = vmatpush.bf16.msra.mxu2 %v701_v22 }
  0x19   :  { %438 = vmatpush.bf16.msra.mxu3 %v709_v23 }
  0x1a   :  { %382 = vmatpush.bf16.msra.mxu0 %v684_v24 }
  0x1b   :  { %401 = vmatpush.bf16.msra.mxu1 %v692_v25 }
  0x1c   :  { %420 = vmatpush.bf16.msra.mxu2 %v700_v26 }
  0x1d   :  { %439 = vmatpush.bf16.msra.mxu3 %v708_v27 }
  0x1e   :  { %383 = vmatpush.bf16.msra.mxu0 %v683_v28 }
  0x1f   :  { %402 = vmatpush.bf16.msra.mxu1 %v691_v29 }
  0x20   :  { %421 = vmatpush.bf16.msra.mxu2 %v699_v30 }
  0x21   :  { %440 = vmatpush.bf16.msra.mxu3 %v707_v31  ;;  %384 = vmatmul.bf16.vlgmr.msra.gmra.mxu0 %v490_v41 }
  0x22   :  { %456 = vmatpush.bf16.msrb.mxu0 %v718_v40  ;;  %403 = vmatmul.bf16.vlgmr.msra.gmra.mxu1 %v494_v42 }
  0x23   :  { %730 = vmatpush.bf16.msrb.mxu1 %v718_v40  ;;  %422 = vmatmul.bf16.vlgmr.msra.gmra.mxu2 %v498_v43 }
  0x24   :  { %441 = vmatmul.bf16.vlgmr.msra.gmra.mxu3 %v502_v44 }
  0x26   :  { %457 = vmatpush.bf16.msrb.mxu0 %v717_v45 }
  0x27   :  { %731 = vmatpush.bf16.msrb.mxu1 %v717_v45 }
  0x2a   :  { %458 = vmatpush.bf16.msrb.mxu0 %v716_v46 }
  0x2b   :  { %732 = vmatpush.bf16.msrb.mxu1 %v716_v46 }
  0x2e   :  { %459 = vmatpush.bf16.msrb.mxu0 %v715_v47 }
  0x2f   :  { %733 = vmatpush.bf16.msrb.mxu1 %v715_v47 }
  0x31   :  { %389 = vmatmul.bf16.gmra.mxu0 %v510_v56 }
  0x32   :  { %408 = vmatmul.bf16.gmra.mxu1 %v514_v57 }
  0x33   :  { %427 = vmatmul.bf16.gmra.mxu2 %v518_v58 }
  0x34   :  { %446 = vmatmul.bf16.gmra.mxu3 %v522_v59 }
  0x41   :  { %671 = vmatmul.msk.bf16.vlgmr.msrb.gmra.mxu0 %vm369_vm0, %v506_v0 }
  0x42   :  { %672 = vmatmul.msk.bf16.vlgmr.msrb.gmra.mxu1 %vm369_vm0, %v526_v1 }
  0x9e   :  { %v385_v2 = vpop.f32.mrf.mxu0 }
  0x9f   :  { %v404_v3 = vpop.f32.mrf.mxu1  ;;  %v386_v16 = vadd.f32 %v734_v12, %v385_v2 }
  0xa1   :  { %v405_v21 = vadd.f32 %v404_v3, %v386_v16 }
  0xa6   :  { %v423_v4 = vpop.f32.mrf.mxu2  ;;  %v387_v6 = vpop.f32.mrf.mxu0 }
  0xa7   :  { %v442_v5 = vpop.f32.mrf.mxu3  ;;  %v406_v7 = vpop.f32.mrf.mxu1  ;;  %v388_v19 = vadd.f32 %v734_v12, %v387_v6  ;;  %v424_v26 = vadd.f32 %v423_v4, %v405_v21 }
  0xa9   :  { %v407_v27 = vadd.f32 %v406_v7, %v388_v19  ;;  %v443_v32 = vadd.f32 %v442_v5, %v424_v26 }
  0xae   :  { %v425_v8 = vpop.f32.mrf.mxu2  ;;  %v390_v9 = vpop.f32.mrf.mxu0 }
  0xaf   :  { %v409_v10 = vpop.f32.mrf.mxu1  ;;  %v444_v11 = vpop.f32.mrf.mxu3  ;;  %v391_v17 = vadd.f32 %v734_v12, %v390_v9  ;;  %v426_v30 = vadd.f32 %v425_v8, %v407_v27 }
  0xb1   :  { %v410_v22 = vadd.f32 %v409_v10, %v391_v17  ;;  %v445_v35 = vadd.f32 %v444_v11, %v426_v30 }
  0xb6   :  { %v428_v13 = vpop.f32.mrf.mxu2  ;;  %v392_v14 = vpop.f32.mrf.mxu0 }
  0xb7   :  { %v411_v15 = vpop.f32.mrf.mxu1  ;;  %v447_v18 = vpop.f32.mrf.mxu3  ;;  %v393_v20 = vadd.f32 %v734_v12, %v392_v14  ;;  %v429_v28 = vadd.f32 %v428_v13, %v410_v22 }
  0xb9   :  { %v412_v29 = vadd.f32 %v411_v15, %v393_v20  ;;  %v448_v33 = vadd.f32 %v447_v18, %v429_v28 }
  0xbe   :  { %v430_v23 = vpop.f32.mrf.mxu2  ;;  %v461_v24 = vpop.f32.mrf.mxu0 }
  0xbf   :  { %v466_v25 = vpop.f32.mrf.mxu1  ;;  %v431_v31 = vadd.f32 %v430_v23, %v412_v29  ;;  %v449_v34 = vpop.f32.mrf.mxu3  ;;  %v462_v37 = vadd.f32 %v461_v24, %v443_v32 }
  0xc0   :  { %v467_v38 = vadd.f32 %v466_v25, %v448_v33 }
  0xc1   :  { %v450_v36 = vadd.f32 %v449_v34, %v431_v31  ;;  %v471_v43 = vmax.f32 %v462_v37, 0.0 }
  0xc2   :  { %v473_v44 = vmax.f32 %v467_v38, 0.0 }
  0xc6   :  { %v463_v39 = vpop.f32.mrf.mxu0 }
  0xc7   :  { %v468_v40 = vpop.f32.mrf.mxu1  ;;  %v464_v41 = vadd.f32 %v463_v39, %v445_v35 }
  0xc8   :  { %v469_v42 = vadd.f32 %v468_v40, %v450_v36 }
  0xc9   :  { %v472_v45 = vmax.f32 %v464_v41, 0.0 }
  0xca   :  { %v474_v46 = vmax.f32 %v469_v42, 0.0 }
  0xcb   :  { %v722_v47 = vpack.c.bf16 %v472_v45, %v471_v43 }
  0xcc   :  { %v727_v48 = vpack.c.bf16 %v474_v46, %v473_v44 }
  0xcd   :  { %723 = vst [vmem:[%s935_s3] sm:$0xff] %v722_v47  }
  0xce   :  { %729 = vst [vmem:[%s935_s3 + $0x8] sm:$0xff] %v727_v48  }

// kernel: forward.15
= control target key start
LH: loop header
LB: loop body
LE: loop exit
PB: predicated region body
PF: predicated region fallthrough
CT: control target
= control target key end

     0   :  { %s1233_s12 = smov 0   ;;  %s1537_s0 = inlined_call_operand.vmem [shape: bf16[4096,72], index: 0, kind: input, shape index: {}]   ;;  %s1538_s1 = inlined_call_operand.vmem [shape: bf16[72,16], index: 1, kind: input, shape index: {}]   ;;  %s1539_s2 = inlined_call_operand.vmem [shape: f32[1,16], index: 2, kind: input, shape index: {}]   ;;  %s1540_s3 = inlined_call_operand.vmem [shape: bf16[4096,16], index: 3, kind: output, shape index: {}]  }
   0x1 LB: > { %s958_s13 = sadd.s32 4294967295, %s1211_s12   ;;  %p962_p0 = scmp.ge.s32.totalorder %s1211_s12, 1  ;;  %s1211_s12 = sphi %s1233_s12, %s13_s12  }
   0x2   : > { %p138_p1 = scmp.lt.s32.totalorder %s1211_s12, 9 }
   0x4   : > { %p139_p2 = pnand %p962_p0, %p138_p1 }
   0x5   : > { %s963_s16 = sshll.u32 (!%p139_p2), %s958_s13, 6 }
   0x6   : > { %142 = sbr.rel (%p139_p2) target bundleno = 297 (0x129), region = 32  ;;  %p163_p3 = scmp.lt.s32.totalorder (!%p139_p2), %s963_s16, 511 }
   0xb   : > { %v247_v0 = vld [vmem:[%s1538_s1 + $0x20] sm:$0xf]  ;;  %vm536_vm0 = vcmask 1043456   ;;  %v1180_v4 = vld [vmem:[%s1538_s1 + $0x18] sm:$0xff]  ;;  %v1179_v5 = vld [vmem:[%s1538_s1 + $0x10] sm:$0xff]  ;;  %s1542_s16 = smov (!%p163_p3, %s963_s16), 511 }
   0xc   : > { %v429_v1 = vunpack.c.l.b16 %v247_v0  ;;  %v1178_v6 = vld [vmem:[%s1538_s1 + $0x8] sm:$0xff]  ;;  %s964_s23 = sshll.u32 %s1542_s16, 2  ;;  %v1177_v7 = vld [vmem:[%s1538_s1] sm:$0xff]  ;;  %vm439_vm1 = vcmask 588800   ;;  %vm837_vm2 = vcmask 125952  }
   0xd   : > { %s1264_s28 = scalar_lea.vmem %s1537_s0, %s964_s23  ;;  %v1333_v40 = vld [vmem:[%s1539_s2] ss:$0 sm:$0xff]  ;;  %s1342_s6 = scalar_lea.vmem %s1540_s3, %s964_s23 }
   0xe   : > { %v434_v2 = vpack.c.b16 %v429_v1, %v429_v1  ;;  %v1145_v8 = vld [vmem:[%s1264_s28] sm:$0xff]  ;;  %v1146_v12 = vld [vmem:[%s1264_s28 + $0x8] sm:$0xff]  ;;  %v1147_v16 = vld [vmem:[%s1264_s28 + $0x10] sm:$0xff] }
   0xf   : > { %v1153_v9 = vld [vmem:[%s1264_s28 + $0x40] sm:$0xff]  ;;  %v1154_v13 = vld [vmem:[%s1264_s28 + $0x48] sm:$0xff]  ;;  %v1155_v17 = vld [vmem:[%s1264_s28 + $0x50] sm:$0xff] }
  0x10   : > { %v538_v3 = vsel %vm536_vm0, %v434_v2, 0  ;;  %v1161_v10 = vld [vmem:[%s1264_s28 + $0x80] sm:$0xff]  ;;  %v1162_v14 = vld [vmem:[%s1264_s28 + $0x88] sm:$0xff]  ;;  %v1163_v18 = vld [vmem:[%s1264_s28 + $0x90] sm:$0xff] }
  0x11   : > { %543 = vmatpush.bf16.msra.mxu0 %v538_v3  ;;  %1181 = vmatpush.bf16.msra.mxu1 %v538_v3  ;;  %v1169_v11 = vld [vmem:[%s1264_s28 + $0xc0] sm:$0xff]  ;;  %v1170_v15 = vld [vmem:[%s1264_s28 + $0xc8] sm:$0xff]  ;;  %v1171_v19 = vld [vmem:[%s1264_s28 + $0xd0] sm:$0xff] }
  0x12   : > { %1182 = vmatpush.bf16.msra.mxu2 %v538_v3  ;;  %1183 = vmatpush.bf16.msra.mxu3 %v538_v3  ;;  %v1148_v20 = vld [vmem:[%s1264_s28 + $0x18] sm:$0xff]  ;;  %v1149_v24 = vld [vmem:[%s1264_s28 + $0x20] sm:$0xff]  ;;  %v1150_v28 = vld [vmem:[%s1264_s28 + $0x28] sm:$0xff] }
  0x13   : > { %v1156_v21 = vld [vmem:[%s1264_s28 + $0x58] sm:$0xff]  ;;  %v1157_v25 = vld [vmem:[%s1264_s28 + $0x60] sm:$0xff]  ;;  %v1158_v29 = vld [vmem:[%s1264_s28 + $0x68] sm:$0xff] }
  0x14   : > { %v1164_v22 = vld [vmem:[%s1264_s28 + $0x98] sm:$0xff]  ;;  %v1165_v26 = vld [vmem:[%s1264_s28 + $0xa0] sm:$0xff]  ;;  %v1166_v30 = vld [vmem:[%s1264_s28 + $0xa8] sm:$0xff] }
  0x15   : > { %544 = vmatpush.bf16.msra.mxu0 %v1180_v4  ;;  %1184 = vmatpush.bf16.msra.mxu1 %v1180_v4  ;;  %v1172_v23 = vld [vmem:[%s1264_s28 + $0xd8] sm:$0xff]  ;;  %v1173_v27 = vld [vmem:[%s1264_s28 + $0xe0] sm:$0xff]  ;;  %v1174_v31 = vld [vmem:[%s1264_s28 + $0xe8] sm:$0xff] }
  0x16   : > { %1185 = vmatpush.bf16.msra.mxu2 %v1180_v4  ;;  %1186 = vmatpush.bf16.msra.mxu3 %v1180_v4  ;;  %v1151_v32 = vld [vmem:[%s1264_s28 + $0x30] sm:$0xff]  ;;  %v1152_v36 = vld [vmem:[%s1264_s28 + $0x38] sm:$0xff] }
  0x17   : > { %v1159_v33 = vld [vmem:[%s1264_s28 + $0x70] sm:$0xff]  ;;  %v1160_v37 = vld [vmem:[%s1264_s28 + $0x78] sm:$0xff] }
  0x18   : > { %v1167_v34 = vld [vmem:[%s1264_s28 + $0xb0] sm:$0xff]  ;;  %v1168_v38 = vld [vmem:[%s1264_s28 + $0xb8] sm:$0xff] }
  0x19   : > { %545 = vmatpush.bf16.msra.mxu0 %v1179_v5  ;;  %1187 = vmatpush.bf16.msra.mxu1 %v1179_v5  ;;  %v1175_v35 = vld [vmem:[%s1264_s28 + $0xf0] sm:$0xff]  ;;  %v1176_v39 = vld [vmem:[%s1264_s28 + $0xf8] sm:$0xff] }
  0x1a   : > { %1188 = vmatpush.bf16.msra.mxu2 %v1179_v5  ;;  %1189 = vmatpush.bf16.msra.mxu3 %v1179_v5 }
  0x1d   : > { %546 = vmatpush.bf16.msra.mxu0 %v1178_v6  ;;  %1190 = vmatpush.bf16.msra.mxu1 %v1178_v6 }
  0x1e   : > { %1191 = vmatpush.bf16.msra.mxu2 %v1178_v6  ;;  %1192 = vmatpush.bf16.msra.mxu3 %v1178_v6 }
  0x21   : > { %547 = vmatpush.bf16.msra.mxu0 %v1177_v7  ;;  %1193 = vmatpush.bf16.msra.mxu1 %v1177_v7 }
  0x22   : > { %1194 = vmatpush.bf16.msra.mxu2 %v1177_v7  ;;  %1195 = vmatpush.bf16.msra.mxu3 %v1177_v7 }
  0x24   : > { %1111 = vmatmul.msk.bf16.vlgmr.msra.gmra.mxu0 %vm439_vm1, %v1145_v8  ;;  %1119 = vmatmul.msk.bf16.vlgmr.msra.gmra.mxu1 %vm439_vm1, %v1153_v9 }
  0x25   : > { %1127 = vmatmul.msk.bf16.vlgmr.msra.gmra.mxu2 %vm439_vm1, %v1161_v10  ;;  %1135 = vmatmul.msk.bf16.vlgmr.msra.gmra.mxu3 %vm439_vm1, %v1169_v11 }
  0x34   : > { %1112 = vmatmul.msk.bf16.gmra.mxu0 %vm439_vm1, %v1146_v12  ;;  %1120 = vmatmul.msk.bf16.gmra.mxu1 %vm439_vm1, %v1154_v13 }
  0x35   : > { %1128 = vmatmul.msk.bf16.gmra.mxu2 %vm439_vm1, %v1162_v14  ;;  %1136 = vmatmul.msk.bf16.gmra.mxu3 %vm439_vm1, %v1170_v15 }
  0x44   : > { %1113 = vmatmul.msk.bf16.gmra.mxu0 %vm439_vm1, %v1147_v16  ;;  %1121 = vmatmul.msk.bf16.gmra.mxu1 %vm439_vm1, %v1155_v17 }
  0x45   : > { %1129 = vmatmul.msk.bf16.gmra.mxu2 %vm439_vm1, %v1163_v18  ;;  %1137 = vmatmul.msk.bf16.gmra.mxu3 %vm439_vm1, %v1171_v19 }
  0x54   : > { %1114 = vmatmul.msk.bf16.gmra.mxu0 %vm439_vm1, %v1148_v20  ;;  %1122 = vmatmul.msk.bf16.gmra.mxu1 %vm439_vm1, %v1156_v21 }
  0x55   : > { %1130 = vmatmul.msk.bf16.gmra.mxu2 %vm439_vm1, %v1164_v22  ;;  %1138 = vmatmul.msk.bf16.gmra.mxu3 %vm439_vm1, %v1172_v23 }
  0x64   : > { %1115 = vmatmul.msk.bf16.gmra.mxu0 %vm439_vm1, %v1149_v24  ;;  %1123 = vmatmul.msk.bf16.gmra.mxu1 %vm439_vm1, %v1157_v25 }
  0x65   : > { %1131 = vmatmul.msk.bf16.gmra.mxu2 %vm439_vm1, %v1165_v26  ;;  %1139 = vmatmul.msk.bf16.gmra.mxu3 %vm439_vm1, %v1173_v27 }
  0x74   : > { %1116 = vmatmul.msk.bf16.gmra.mxu0 %vm439_vm1, %v1150_v28  ;;  %1124 = vmatmul.msk.bf16.gmra.mxu1 %vm439_vm1, %v1158_v29 }
  0x75   : > { %1132 = vmatmul.msk.bf16.gmra.mxu2 %vm439_vm1, %v1166_v30  ;;  %1140 = vmatmul.msk.bf16.gmra.mxu3 %vm439_vm1, %v1174_v31 }
  0x84   : > { %1117 = vmatmul.msk.bf16.gmra.mxu0 %vm439_vm1, %v1151_v32  ;;  %1125 = vmatmul.msk.bf16.gmra.mxu1 %vm439_vm1, %v1159_v33 }
  0x85   : > { %1133 = vmatmul.msk.bf16.gmra.mxu2 %vm439_vm1, %v1167_v34  ;;  %1141 = vmatmul.msk.bf16.gmra.mxu3 %vm439_vm1, %v1175_v35 }
  0x94   : > { %1118 = vmatmul.msk.bf16.gmra.mxu0 %vm439_vm1, %v1152_v36  ;;  %1126 = vmatmul.msk.bf16.gmra.mxu1 %vm439_vm1, %v1160_v37 }
  0x95   : > { %1134 = vmatmul.msk.bf16.gmra.mxu2 %vm439_vm1, %v1168_v38  ;;  %1142 = vmatmul.msk.bf16.gmra.mxu3 %vm439_vm1, %v1176_v39 }
  0xa1   : > { %v549_v41 = vpop.f32.mrf.mxu0  ;;  %v589_v42 = vpop.f32.mrf.mxu1 }
  0xa2   : > { %v550_v43 = vadd.f32 %v1333_v40, %v549_v41  ;;  %v590_v44 = vadd.f32 %v1333_v40, %v589_v42 }
  0xa4   : > { %v709_v45 = vmax.f32 %v550_v43, 0.0  ;;  %v725_v46 = vmax.f32 %v590_v44, 0.0 }
  0xa6   : > { %v773_v47 = vpack.c.bf16 %v709_v45, %v709_v45  ;;  %v789_v48 = vpack.c.bf16 %v725_v46, %v725_v46 }
  0xa8   : > { %838 = vst.msk [vmem:[%s1342_s6] sm:$0xf] %vm837_vm2, %v773_v47  ;;  %v629_v49 = vpop.f32.mrf.mxu2  ;;  %v669_v50 = vpop.f32.mrf.mxu3 }
  0xa9   : > { %854 = vst.msk [vmem:[%s1342_s6 + $0x40] sm:$0xf] %vm837_vm2, %v789_v48  ;;  %v630_v51 = vadd.f32 %v1333_v40, %v629_v49  ;;  %v670_v52 = vadd.f32 %v1333_v40, %v669_v50  ;;  %v551_v53 = vpop.f32.mrf.mxu0  ;;  %v591_v54 = vpop.f32.mrf.mxu1 }
  0xaa   : > { %v552_v55 = vadd.f32 %v1333_v40, %v551_v53  ;;  %v592_v56 = vadd.f32 %v1333_v40, %v591_v54 }
  0xab   : > { %v741_v57 = vmax.f32 %v630_v51, 0.0  ;;  %v757_v58 = vmax.f32 %v670_v52, 0.0 }
  0xac   : > { %v710_v59 = vmax.f32 %v552_v55, 0.0  ;;  %v726_v60 = vmax.f32 %v592_v56, 0.0 }
  0xad   : > { %v805_v61 = vpack.c.bf16 %v741_v57, %v741_v57  ;;  %v821_v62 = vpack.c.bf16 %v757_v58, %v757_v58 }
  0xae   : > { %v774_v63 = vpack.c.bf16 %v710_v59, %v710_v59  ;;  %v790_v0 = vpack.c.bf16 %v726_v60, %v726_v60 }
  0xaf   : > { %870 = vst.msk [vmem:[%s1342_s6 + $0x80] sm:$0xf] %vm837_vm2, %v805_v61 }
  0xb0   : > { %886 = vst.msk [vmem:[%s1342_s6 + $0xc0] sm:$0xf] %vm837_vm2, %v821_v62  ;;  %v631_v1 = vpop.f32.mrf.mxu2  ;;  %v671_v2 = vpop.f32.mrf.mxu3 }
  0xb1   : > { %839 = vst.msk [vmem:[%s1342_s6 + $0x4] sm:$0xf] %vm837_vm2, %v774_v63  ;;  %v632_v3 = vadd.f32 %v1333_v40, %v631_v1  ;;  %v672_v4 = vadd.f32 %v1333_v40, %v671_v2  ;;  %v554_v5 = vpop.f32.mrf.mxu0  ;;  %v594_v6 = vpop.f32.mrf.mxu1 }
  0xb2   : > { %855 = vst.msk [vmem:[%s1342_s6 + $0x44] sm:$0xf] %vm837_vm2, %v790_v0  ;;  %v555_v7 = vadd.f32 %v1333_v40, %v554_v5  ;;  %v595_v8 = vadd.f32 %v1333_v40, %v594_v6 }
  0xb3   : > { %v742_v9 = vmax.f32 %v632_v3, 0.0  ;;  %v758_v10 = vmax.f32 %v672_v4, 0.0 }
  0xb4   : > { %v711_v11 = vmax.f32 %v555_v7, 0.0  ;;  %v727_v12 = vmax.f32 %v595_v8, 0.0 }
  0xb5   : > { %v806_v13 = vpack.c.bf16 %v742_v9, %v742_v9  ;;  %v822_v14 = vpack.c.bf16 %v758_v10, %v758_v10 }
  0xb6   : > { %v775_v15 = vpack.c.bf16 %v711_v11, %v711_v11  ;;  %v791_v16 = vpack.c.bf16 %v727_v12, %v727_v12 }
  0xb7   : > { %871 = vst.msk [vmem:[%s1342_s6 + $0x84] sm:$0xf] %vm837_vm2, %v806_v13 }
  0xb8   : > { %887 = vst.msk [vmem:[%s1342_s6 + $0xc4] sm:$0xf] %vm837_vm2, %v822_v14  ;;  %v634_v17 = vpop.f32.mrf.mxu2  ;;  %v674_v18 = vpop.f32.mrf.mxu3 }
  0xb9   : > { %840 = vst.msk [vmem:[%s1342_s6 + $0x8] sm:$0xf] %vm837_vm2, %v775_v15  ;;  %v635_v19 = vadd.f32 %v1333_v40, %v634_v17  ;;  %v675_v20 = vadd.f32 %v1333_v40, %v674_v18  ;;  %v556_v21 = vpop.f32.mrf.mxu0  ;;  %v596_v22 = vpop.f32.mrf.mxu1 }
  0xba   : > { %856 = vst.msk [vmem:[%s1342_s6 + $0x48] sm:$0xf] %vm837_vm2, %v791_v16  ;;  %v557_v23 = vadd.f32 %v1333_v40, %v556_v21  ;;  %v597_v24 = vadd.f32 %v1333_v40, %v596_v22 }
  0xbb   : > { %v743_v25 = vmax.f32 %v635_v19, 0.0  ;;  %v759_v26 = vmax.f32 %v675_v20, 0.0 }
  0xbc   : > { %v712_v27 = vmax.f32 %v557_v23, 0.0  ;;  %v728_v28 = vmax.f32 %v597_v24, 0.0 }
  0xbd   : > { %v807_v29 = vpack.c.bf16 %v743_v25, %v743_v25  ;;  %v823_v30 = vpack.c.bf16 %v759_v26, %v759_v26 }
  0xbe   : > { %v776_v31 = vpack.c.bf16 %v712_v27, %v712_v27  ;;  %v792_v32 = vpack.c.bf16 %v728_v28, %v728_v28 }
  0xbf   : > { %872 = vst.msk [vmem:[%s1342_s6 + $0x88] sm:$0xf] %vm837_vm2, %v807_v29 }
  0xc0   : > { %888 = vst.msk [vmem:[%s1342_s6 + $0xc8] sm:$0xf] %vm837_vm2, %v823_v30  ;;  %v636_v33 = vpop.f32.mrf.mxu2  ;;  %v676_v34 = vpop.f32.mrf.mxu3 }
  0xc1   : > { %841 = vst.msk [vmem:[%s1342_s6 + $0xc] sm:$0xf] %vm837_vm2, %v776_v31  ;;  %v637_v35 = vadd.f32 %v1333_v40, %v636_v33  ;;  %v677_v36 = vadd.f32 %v1333_v40, %v676_v34  ;;  %v559_v37 = vpop.f32.mrf.mxu0  ;;  %v599_v38 = vpop.f32.mrf.mxu1 }
  0xc2   : > { %857 = vst.msk [vmem:[%s1342_s6 + $0x4c] sm:$0xf] %vm837_vm2, %v792_v32  ;;  %v560_v39 = vadd.f32 %v1333_v40, %v559_v37  ;;  %v600_v41 = vadd.f32 %v1333_v40, %v599_v38 }
  0xc3   : > { %v744_v42 = vmax.f32 %v637_v35, 0.0  ;;  %v760_v43 = vmax.f32 %v677_v36, 0.0 }
  0xc4   : > { %v713_v44 = vmax.f32 %v560_v39, 0.0  ;;  %v729_v45 = vmax.f32 %v600_v41, 0.0 }
  0xc5   : > { %v808_v46 = vpack.c.bf16 %v744_v42, %v744_v42  ;;  %v824_v47 = vpack.c.bf16 %v760_v43, %v760_v43 }
  0xc6   : > { %v777_v48 = vpack.c.bf16 %v713_v44, %v713_v44  ;;  %v793_v49 = vpack.c.bf16 %v729_v45, %v729_v45 }
  0xc7   : > { %873 = vst.msk [vmem:[%s1342_s6 + $0x8c] sm:$0xf] %vm837_vm2, %v808_v46 }
  0xc8   : > { %889 = vst.msk [vmem:[%s1342_s6 + $0xcc] sm:$0xf] %vm837_vm2, %v824_v47  ;;  %v639_v50 = vpop.f32.mrf.mxu2  ;;  %v679_v51 = vpop.f32.mrf.mxu3 }
  0xc9   : > { %842 = vst.msk [vmem:[%s1342_s6 + $0x10] sm:$0xf] %vm837_vm2, %v777_v48  ;;  %v640_v52 = vadd.f32 %v1333_v40, %v639_v50  ;;  %v680_v53 = vadd.f32 %v1333_v40, %v679_v51  ;;  %v561_v54 = vpop.f32.mrf.mxu0  ;;  %v601_v55 = vpop.f32.mrf.mxu1 }
  0xca   : > { %858 = vst.msk [vmem:[%s1342_s6 + $0x50] sm:$0xf] %vm837_vm2, %v793_v49  ;;  %v562_v56 = vadd.f32 %v1333_v40, %v561_v54  ;;  %v602_v57 = vadd.f32 %v1333_v40, %v601_v55 }
  0xcb   : > { %v745_v58 = vmax.f32 %v640_v52, 0.0  ;;  %v761_v59 = vmax.f32 %v680_v53, 0.0 }
  0xcc   : > { %v714_v60 = vmax.f32 %v562_v56, 0.0  ;;  %v730_v61 = vmax.f32 %v602_v57, 0.0 }
  0xcd   : > { %v809_v62 = vpack.c.bf16 %v745_v58, %v745_v58  ;;  %v825_v63 = vpack.c.bf16 %v761_v59, %v761_v59 }
  0xce   : > { %v778_v0 = vpack.c.bf16 %v714_v60, %v714_v60  ;;  %v794_v1 = vpack.c.bf16 %v730_v61, %v730_v61 }
  0xcf   : > { %874 = vst.msk [vmem:[%s1342_s6 + $0x90] sm:$0xf] %vm837_vm2, %v809_v62 }
  0xd0   : > { %890 = vst.msk [vmem:[%s1342_s6 + $0xd0] sm:$0xf] %vm837_vm2, %v825_v63  ;;  %v641_v2 = vpop.f32.mrf.mxu2  ;;  %v681_v3 = vpop.f32.mrf.mxu3 }
  0xd1   : > { %843 = vst.msk [vmem:[%s1342_s6 + $0x14] sm:$0xf] %vm837_vm2, %v778_v0  ;;  %v642_v4 = vadd.f32 %v1333_v40, %v641_v2  ;;  %v682_v5 = vadd.f32 %v1333_v40, %v681_v3  ;;  %v564_v6 = vpop.f32.mrf.mxu0  ;;  %v604_v7 = vpop.f32.mrf.mxu1 }
  0xd2   : > { %859 = vst.msk [vmem:[%s1342_s6 + $0x54] sm:$0xf] %vm837_vm2, %v794_v1  ;;  %v565_v8 = vadd.f32 %v1333_v40, %v564_v6  ;;  %v605_v9 = vadd.f32 %v1333_v40, %v604_v7 }
  0xd3   : > { %v746_v10 = vmax.f32 %v642_v4, 0.0  ;;  %v762_v11 = vmax.f32 %v682_v5, 0.0 }
  0xd4   : > { %v715_v12 = vmax.f32 %v565_v8, 0.0  ;;  %v731_v13 = vmax.f32 %v605_v9, 0.0 }
  0xd5   : > { %v810_v14 = vpack.c.bf16 %v746_v10, %v746_v10  ;;  %v826_v15 = vpack.c.bf16 %v762_v11, %v762_v11 }
  0xd6   : > { %v779_v16 = vpack.c.bf16 %v715_v12, %v715_v12  ;;  %v795_v17 = vpack.c.bf16 %v731_v13, %v731_v13 }
  0xd7   : > { %875 = vst.msk [vmem:[%s1342_s6 + $0x94] sm:$0xf] %vm837_vm2, %v810_v14 }
  0xd8   : > { %891 = vst.msk [vmem:[%s1342_s6 + $0xd4] sm:$0xf] %vm837_vm2, %v826_v15  ;;  %v644_v18 = vpop.f32.mrf.mxu2  ;;  %v684_v19 = vpop.f32.mrf.mxu3 }
  0xd9   : > { %844 = vst.msk [vmem:[%s1342_s6 + $0x18] sm:$0xf] %vm837_vm2, %v779_v16  ;;  %v645_v20 = vadd.f32 %v1333_v40, %v644_v18  ;;  %v685_v21 = vadd.f32 %v1333_v40, %v684_v19  ;;  %v566_v22 = vpop.f32.mrf.mxu0  ;;  %v606_v23 = vpop.f32.mrf.mxu1 }
  0xda   : > { %860 = vst.msk [vmem:[%s1342_s6 + $0x58] sm:$0xf] %vm837_vm2, %v795_v17  ;;  %v567_v24 = vadd.f32 %v1333_v40, %v566_v22  ;;  %v607_v25 = vadd.f32 %v1333_v40, %v606_v23 }
  0xdb   : > { %v747_v26 = vmax.f32 %v645_v20, 0.0  ;;  %v763_v27 = vmax.f32 %v685_v21, 0.0 }
  0xdc   : > { %v716_v28 = vmax.f32 %v567_v24, 0.0  ;;  %v732_v29 = vmax.f32 %v607_v25, 0.0 }
  0xdd   : > { %v811_v30 = vpack.c.bf16 %v747_v26, %v747_v26  ;;  %v827_v31 = vpack.c.bf16 %v763_v27, %v763_v27 }
  0xde   : > { %v780_v32 = vpack.c.bf16 %v716_v28, %v716_v28  ;;  %v796_v33 = vpack.c.bf16 %v732_v29, %v732_v29 }
  0xdf   : > { %876 = vst.msk [vmem:[%s1342_s6 + $0x98] sm:$0xf] %vm837_vm2, %v811_v30 }
  0xe0   : > { %892 = vst.msk [vmem:[%s1342_s6 + $0xd8] sm:$0xf] %vm837_vm2, %v827_v31  ;;  %v646_v34 = vpop.f32.mrf.mxu2  ;;  %v686_v35 = vpop.f32.mrf.mxu3 }
  0xe1   : > { %845 = vst.msk [vmem:[%s1342_s6 + $0x1c] sm:$0xf] %vm837_vm2, %v780_v32  ;;  %v647_v36 = vadd.f32 %v1333_v40, %v646_v34  ;;  %v687_v37 = vadd.f32 %v1333_v40, %v686_v35  ;;  %v569_v38 = vpop.f32.mrf.mxu0  ;;  %v609_v39 = vpop.f32.mrf.mxu1 }
  0xe2   : > { %861 = vst.msk [vmem:[%s1342_s6 + $0x5c] sm:$0xf] %vm837_vm2, %v796_v33  ;;  %v570_v41 = vadd.f32 %v1333_v40, %v569_v38  ;;  %v610_v42 = vadd.f32 %v1333_v40, %v609_v39 }
  0xe3   : > { %v748_v43 = vmax.f32 %v647_v36, 0.0  ;;  %v764_v44 = vmax.f32 %v687_v37, 0.0 }
  0xe4   : > { %v717_v45 = vmax.f32 %v570_v41, 0.0  ;;  %v733_v46 = vmax.f32 %v610_v42, 0.0 }
  0xe5   : > { %v812_v47 = vpack.c.bf16 %v748_v43, %v748_v43  ;;  %v828_v48 = vpack.c.bf16 %v764_v44, %v764_v44 }
  0xe6   : > { %v781_v49 = vpack.c.bf16 %v717_v45, %v717_v45  ;;  %v797_v50 = vpack.c.bf16 %v733_v46, %v733_v46 }
  0xe7   : > { %877 = vst.msk [vmem:[%s1342_s6 + $0x9c] sm:$0xf] %vm837_vm2, %v812_v47 }
  0xe8   : > { %893 = vst.msk [vmem:[%s1342_s6 + $0xdc] sm:$0xf] %vm837_vm2, %v828_v48  ;;  %v649_v51 = vpop.f32.mrf.mxu2  ;;  %v689_v52 = vpop.f32.mrf.mxu3 }
  0xe9   : > { %846 = vst.msk [vmem:[%s1342_s6 + $0x20] sm:$0xf] %vm837_vm2, %v781_v49  ;;  %v650_v53 = vadd.f32 %v1333_v40, %v649_v51  ;;  %v690_v54 = vadd.f32 %v1333_v40, %v689_v52  ;;  %v571_v55 = vpop.f32.mrf.mxu0  ;;  %v611_v56 = vpop.f32.mrf.mxu1 }
  0xea   : > { %862 = vst.msk [vmem:[%s1342_s6 + $0x60] sm:$0xf] %vm837_vm2, %v797_v50  ;;  %v572_v57 = vadd.f32 %v1333_v40, %v571_v55  ;;  %v612_v58 = vadd.f32 %v1333_v40, %v611_v56 }
  0xeb   : > { %v749_v59 = vmax.f32 %v650_v53, 0.0  ;;  %v765_v60 = vmax.f32 %v690_v54, 0.0 }
  0xec   : > { %v718_v61 = vmax.f32 %v572_v57, 0.0  ;;  %v734_v62 = vmax.f32 %v612_v58, 0.0 }
  0xed   : > { %v813_v63 = vpack.c.bf16 %v749_v59, %v749_v59  ;;  %v829_v0 = vpack.c.bf16 %v765_v60, %v765_v60 }
  0xee   : > { %v782_v1 = vpack.c.bf16 %v718_v61, %v718_v61  ;;  %v798_v2 = vpack.c.bf16 %v734_v62, %v734_v62 }
  0xef   : > { %878 = vst.msk [vmem:[%s1342_s6 + $0xa0] sm:$0xf] %vm837_vm2, %v813_v63 }
  0xf0   : > { %894 = vst.msk [vmem:[%s1342_s6 + $0xe0] sm:$0xf] %vm837_vm2, %v829_v0  ;;  %v651_v3 = vpop.f32.mrf.mxu2  ;;  %v691_v4 = vpop.f32.mrf.mxu3 }
  0xf1   : > { %847 = vst.msk [vmem:[%s1342_s6 + $0x24] sm:$0xf] %vm837_vm2, %v782_v1  ;;  %v652_v5 = vadd.f32 %v1333_v40, %v651_v3  ;;  %v692_v6 = vadd.f32 %v1333_v40, %v691_v4  ;;  %v574_v7 = vpop.f32.mrf.mxu0  ;;  %v614_v8 = vpop.f32.mrf.mxu1 }
  0xf2   : > { %863 = vst.msk [vmem:[%s1342_s6 + $0x64] sm:$0xf] %vm837_vm2, %v798_v2  ;;  %v575_v9 = vadd.f32 %v1333_v40, %v574_v7  ;;  %v615_v10 = vadd.f32 %v1333_v40, %v614_v8 }
  0xf3   : > { %v750_v11 = vmax.f32 %v652_v5, 0.0  ;;  %v766_v12 = vmax.f32 %v692_v6, 0.0 }
  0xf4   : > { %v719_v13 = vmax.f32 %v575_v9, 0.0  ;;  %v735_v14 = vmax.f32 %v615_v10, 0.0 }
  0xf5   : > { %v814_v15 = vpack.c.bf16 %v750_v11, %v750_v11  ;;  %v830_v16 = vpack.c.bf16 %v766_v12, %v766_v12 }
  0xf6   : > { %v783_v17 = vpack.c.bf16 %v719_v13, %v719_v13  ;;  %v799_v18 = vpack.c.bf16 %v735_v14, %v735_v14 }
  0xf7   : > { %879 = vst.msk [vmem:[%s1342_s6 + $0xa4] sm:$0xf] %vm837_vm2, %v814_v15 }
  0xf8   : > { %895 = vst.msk [vmem:[%s1342_s6 + $0xe4] sm:$0xf] %vm837_vm2, %v830_v16  ;;  %v654_v19 = vpop.f32.mrf.mxu2  ;;  %v694_v20 = vpop.f32.mrf.mxu3 }
  0xf9   : > { %848 = vst.msk [vmem:[%s1342_s6 + $0x28] sm:$0xf] %vm837_vm2, %v783_v17  ;;  %v655_v21 = vadd.f32 %v1333_v40, %v654_v19  ;;  %v695_v22 = vadd.f32 %v1333_v40, %v694_v20  ;;  %v576_v23 = vpop.f32.mrf.mxu0  ;;  %v616_v24 = vpop.f32.mrf.mxu1 }
  0xfa   : > { %864 = vst.msk [vmem:[%s1342_s6 + $0x68] sm:$0xf] %vm837_vm2, %v799_v18  ;;  %v577_v25 = vadd.f32 %v1333_v40, %v576_v23  ;;  %v617_v26 = vadd.f32 %v1333_v40, %v616_v24 }
  0xfb   : > { %v751_v27 = vmax.f32 %v655_v21, 0.0  ;;  %v767_v28 = vmax.f32 %v695_v22, 0.0 }
  0xfc   : > { %v720_v29 = vmax.f32 %v577_v25, 0.0  ;;  %v736_v30 = vmax.f32 %v617_v26, 0.0 }
  0xfd   : > { %v815_v31 = vpack.c.bf16 %v751_v27, %v751_v27  ;;  %v831_v32 = vpack.c.bf16 %v767_v28, %v767_v28 }
  0xfe   : > { %v784_v33 = vpack.c.bf16 %v720_v29, %v720_v29  ;;  %v800_v34 = vpack.c.bf16 %v736_v30, %v736_v30 }
  0xff   : > { %880 = vst.msk [vmem:[%s1342_s6 + $0xa8] sm:$0xf] %vm837_vm2, %v815_v31 }
 0x100   : > { %896 = vst.msk [vmem:[%s1342_s6 + $0xe8] sm:$0xf] %vm837_vm2, %v831_v32  ;;  %v656_v35 = vpop.f32.mrf.mxu2  ;;  %v696_v36 = vpop.f32.mrf.mxu3 }
 0x101   : > { %849 = vst.msk [vmem:[%s1342_s6 + $0x2c] sm:$0xf] %vm837_vm2, %v784_v33  ;;  %v657_v37 = vadd.f32 %v1333_v40, %v656_v35  ;;  %v697_v38 = vadd.f32 %v1333_v40, %v696_v36  ;;  %v579_v39 = vpop.f32.mrf.mxu0  ;;  %v619_v41 = vpop.f32.mrf.mxu1 }
 0x102   : > { %865 = vst.msk [vmem:[%s1342_s6 + $0x6c] sm:$0xf] %vm837_vm2, %v800_v34  ;;  %v580_v42 = vadd.f32 %v1333_v40, %v579_v39  ;;  %v620_v43 = vadd.f32 %v1333_v40, %v619_v41 }
 0x103   : > { %v752_v44 = vmax.f32 %v657_v37, 0.0  ;;  %v768_v45 = vmax.f32 %v697_v38, 0.0 }
 0x104   : > { %v721_v46 = vmax.f32 %v580_v42, 0.0  ;;  %v737_v47 = vmax.f32 %v620_v43, 0.0 }
 0x105   : > { %v816_v48 = vpack.c.bf16 %v752_v44, %v752_v44  ;;  %v832_v49 = vpack.c.bf16 %v768_v45, %v768_v45 }
 0x106   : > { %v785_v50 = vpack.c.bf16 %v721_v46, %v721_v46  ;;  %v801_v51 = vpack.c.bf16 %v737_v47, %v737_v47 }
 0x107   : > { %881 = vst.msk [vmem:[%s1342_s6 + $0xac] sm:$0xf] %vm837_vm2, %v816_v48 }
 0x108   : > { %897 = vst.msk [vmem:[%s1342_s6 + $0xec] sm:$0xf] %vm837_vm2, %v832_v49  ;;  %v659_v52 = vpop.f32.mrf.mxu2  ;;  %v699_v53 = vpop.f32.mrf.mxu3 }
 0x109   : > { %850 = vst.msk [vmem:[%s1342_s6 + $0x30] sm:$0xf] %vm837_vm2, %v785_v50  ;;  %v660_v54 = vadd.f32 %v1333_v40, %v659_v52  ;;  %v700_v55 = vadd.f32 %v1333_v40, %v699_v53  ;;  %v581_v56 = vpop.f32.mrf.mxu0  ;;  %v621_v57 = vpop.f32.mrf.mxu1 }
 0x10a   : > { %866 = vst.msk [vmem:[%s1342_s6 + $0x70] sm:$0xf] %vm837_vm2, %v801_v51  ;;  %v582_v58 = vadd.f32 %v1333_v40, %v581_v56  ;;  %v622_v59 = vadd.f32 %v1333_v40, %v621_v57 }
 0x10b   : > { %v753_v60 = vmax.f32 %v660_v54, 0.0  ;;  %v769_v61 = vmax.f32 %v700_v55, 0.0 }
 0x10c   : > { %v722_v62 = vmax.f32 %v582_v58, 0.0  ;;  %v738_v63 = vmax.f32 %v622_v59, 0.0 }
 0x10d   : > { %v817_v0 = vpack.c.bf16 %v753_v60, %v753_v60  ;;  %v833_v1 = vpack.c.bf16 %v769_v61, %v769_v61 }
 0x10e   : > { %v786_v2 = vpack.c.bf16 %v722_v62, %v722_v62  ;;  %v802_v3 = vpack.c.bf16 %v738_v63, %v738_v63 }
 0x10f   : > { %882 = vst.msk [vmem:[%s1342_s6 + $0xb0] sm:$0xf] %vm837_vm2, %v817_v0 }
 0x110   : > { %898 = vst.msk [vmem:[%s1342_s6 + $0xf0] sm:$0xf] %vm837_vm2, %v833_v1  ;;  %v661_v4 = vpop.f32.mrf.mxu2  ;;  %v701_v5 = vpop.f32.mrf.mxu3 }
 0x111   : > { %851 = vst.msk [vmem:[%s1342_s6 + $0x34] sm:$0xf] %vm837_vm2, %v786_v2  ;;  %v662_v6 = vadd.f32 %v1333_v40, %v661_v4  ;;  %v702_v7 = vadd.f32 %v1333_v40, %v701_v5  ;;  %v584_v8 = vpop.f32.mrf.mxu0  ;;  %v624_v9 = vpop.f32.mrf.mxu1 }
 0x112   : > { %867 = vst.msk [vmem:[%s1342_s6 + $0x74] sm:$0xf] %vm837_vm2, %v802_v3  ;;  %v585_v10 = vadd.f32 %v1333_v40, %v584_v8  ;;  %v625_v11 = vadd.f32 %v1333_v40, %v624_v9 }
 0x113   : > { %v754_v12 = vmax.f32 %v662_v6, 0.0  ;;  %v770_v13 = vmax.f32 %v702_v7, 0.0 }
 0x114   : > { %v723_v14 = vmax.f32 %v585_v10, 0.0  ;;  %v739_v15 = vmax.f32 %v625_v11, 0.0 }
 0x115   : > { %v818_v16 = vpack.c.bf16 %v754_v12, %v754_v12  ;;  %v834_v17 = vpack.c.bf16 %v770_v13, %v770_v13 }
 0x116   : > { %v787_v18 = vpack.c.bf16 %v723_v14, %v723_v14  ;;  %v803_v19 = vpack.c.bf16 %v739_v15, %v739_v15 }
 0x117   : > { %883 = vst.msk [vmem:[%s1342_s6 + $0xb4] sm:$0xf] %vm837_vm2, %v818_v16 }
 0x118   : > { %899 = vst.msk [vmem:[%s1342_s6 + $0xf4] sm:$0xf] %vm837_vm2, %v834_v17  ;;  %v664_v20 = vpop.f32.mrf.mxu2  ;;  %v704_v21 = vpop.f32.mrf.mxu3 }
 0x119   : > { %852 = vst.msk [vmem:[%s1342_s6 + $0x38] sm:$0xf] %vm837_vm2, %v787_v18  ;;  %v665_v22 = vadd.f32 %v1333_v40, %v664_v20  ;;  %v705_v23 = vadd.f32 %v1333_v40, %v704_v21  ;;  %v586_v24 = vpop.f32.mrf.mxu0  ;;  %v626_v25 = vpop.f32.mrf.mxu1 }
 0x11a   : > { %868 = vst.msk [vmem:[%s1342_s6 + $0x78] sm:$0xf] %vm837_vm2, %v803_v19  ;;  %v587_v26 = vadd.f32 %v1333_v40, %v586_v24  ;;  %v627_v27 = vadd.f32 %v1333_v40, %v626_v25 }
 0x11b   : > { %v755_v28 = vmax.f32 %v665_v22, 0.0  ;;  %v771_v29 = vmax.f32 %v705_v23, 0.0 }
 0x11c   : > { %v724_v30 = vmax.f32 %v587_v26, 0.0  ;;  %v740_v31 = vmax.f32 %v627_v27, 0.0 }
 0x11d   : > { %v819_v32 = vpack.c.bf16 %v755_v28, %v755_v28  ;;  %v835_v33 = vpack.c.bf16 %v771_v29, %v771_v29 }
 0x11e   : > { %v788_v34 = vpack.c.bf16 %v724_v30, %v724_v30  ;;  %v804_v35 = vpack.c.bf16 %v740_v31, %v740_v31 }
 0x11f   : > { %884 = vst.msk [vmem:[%s1342_s6 + $0xb8] sm:$0xf] %vm837_vm2, %v819_v32 }
 0x120   : > { %900 = vst.msk [vmem:[%s1342_s6 + $0xf8] sm:$0xf] %vm837_vm2, %v835_v33  ;;  %v666_v36 = vpop.f32.mrf.mxu2  ;;  %v706_v37 = vpop.f32.mrf.mxu3 }
 0x121   : > { %853 = vst.msk [vmem:[%s1342_s6 + $0x3c] sm:$0xf] %vm837_vm2, %v788_v34  ;;  %v667_v38 = vadd.f32 %v1333_v40, %v666_v36  ;;  %v707_v39 = vadd.f32 %v1333_v40, %v706_v37 }
 0x122   : > { %869 = vst.msk [vmem:[%s1342_s6 + $0x7c] sm:$0xf] %vm837_vm2, %v804_v35 }
 0x123   : > { %v756_v41 = vmax.f32 %v667_v38, 0.0  ;;  %v772_v42 = vmax.f32 %v707_v39, 0.0 }
 0x125   : > { %v820_v43 = vpack.c.bf16 %v756_v41, %v756_v41  ;;  %v836_v44 = vpack.c.bf16 %v772_v42, %v772_v42 }
 0x127   : > { %885 = vst.msk [vmem:[%s1342_s6 + $0xbc] sm:$0xf] %vm837_vm2, %v820_v43 }
 0x128   : > { %901 = vst.msk [vmem:[%s1342_s6 + $0xfc] sm:$0xf] %vm837_vm2, %v836_v44 }
 0x129 PF: > { %s13_s12 = sadd.s32 1, %s1211_s12  }
 0x12a   : > { %p10_p4 = scmp.ge.s32.totalorder %s13_s12, 10  }
 0x12c   :  { %12 = sbr.rel (!%p10_p4) target bundleno = 1 (0x1), region = 62 }

// kernel: forward.16
= control target key start
LH: loop header
LB: loop body
LE: loop exit
PB: predicated region body
PF: predicated region fallthrough
CT: control target
= control target key end

     0   :  { %s1747_s12 = smov 0   ;;  %s2228_s0 = inlined_call_operand.vmem [shape: bf16[1024,144], index: 0, kind: input, shape index: {}]   ;;  %s2229_s1 = inlined_call_operand.vmem [shape: bf16[144,32], index: 1, kind: input, shape index: {}]   ;;  %s2230_s2 = inlined_call_operand.vmem [shape: f32[1,32], index: 2, kind: input, shape index: {}]   ;;  %s2231_s3 = inlined_call_operand.vmem [shape: bf16[1024,32], index: 3, kind: output, shape index: {}]  }
   0x1 LB: > { %s1290_s13 = sadd.s32 4294967295, %s1725_s12   ;;  %p1294_p0 = scmp.ge.s32.totalorder %s1725_s12, 1  ;;  %s1725_s12 = sphi %s1747_s12, %s13_s12  }
   0x2   : > { %p139_p1 = scmp.lt.s32.totalorder %s1725_s12, 3 }
   0x4   : > { %p140_p2 = pnand %p1294_p0, %p139_p1 }
   0x5   : > { %s1295_s18 = sshll.u32 (!%p140_p2), %s1290_s13, 6 }
   0x6   : > { %143 = sbr.rel (%p140_p2) target bundleno = 432 (0x1b0), region = 32  ;;  %p165_p3 = scmp.lt.s32.totalorder (!%p140_p2), %s1295_s18, 127 }
   0xb   : > { %v1698_v0 = vld [vmem:[%s2229_s1 + $0x38] sm:$0xff]  ;;  %v1699_v1 = vld [vmem:[%s2229_s1 + $0x40] sm:$0xff]  ;;  %v1697_v2 = vld [vmem:[%s2229_s1 + $0x30] sm:$0xff]  ;;  %s2233_s18 = smov (!%p165_p3, %s1295_s18), 127  ;;  %vm606_vm0 = vcmask 130048   ;;  %vm1169_vm1 = vcmask 257024  }
   0xc   : > { %703 = vmatpush.bf16.msra.mxu0 %v1698_v0  ;;  %1700 = vmatpush.bf16.msra.mxu2 %v1698_v0  ;;  %s1626_s21 = sshll.u32 %s2233_s18, 3  ;;  %v1696_v3 = vld [vmem:[%s2229_s1 + $0x28] sm:$0xff]  ;;  %v1695_v7 = vld [vmem:[%s2229_s1 + $0x20] sm:$0xff]  ;;  %v1694_v11 = vld [vmem:[%s2229_s1 + $0x18] sm:$0xff]  ;;  %s1299_s13 = sshll.u32 %s2233_s18, 2 }
   0xd   : > { %879 = vmatpush.bf16.msra.mxu1 %v1699_v1  ;;  %1708 = vmatpush.bf16.msra.mxu3 %v1699_v1  ;;  %s1770_s24 = scalar_lea.vmem %s2228_s0, %s1626_s21  ;;  %v1693_v12 = vld [vmem:[%s2229_s1 + $0x10] sm:$0xff]  ;;  %v1692_v16 = vld [vmem:[%s2229_s1 + $0x8] sm:$0xff]  ;;  %v1691_v19 = vld [vmem:[%s2229_s1] sm:$0xff]  ;;  %s1904_s16 = scalar_lea.vmem %s2231_s3, %s1299_s13 }
   0xe   : > { %v1627_v4 = vld [vmem:[%s1770_s24 + $0x4] sm:$0xf]  ;;  %v1304_v5 = vld [vmem:[%s1770_s24 + $0x8] sm:$0xf0]  ;;  %v1661_v8 = vld [vmem:[%s1770_s24 + $0x114] sm:$0xf] }
   0xf   : > { %v1307_v6 = vor.u32 %v1627_v4, %v1304_v5  ;;  %v1440_v9 = vld [vmem:[%s1770_s24 + $0x118] sm:$0xf0]  ;;  %v1629_v13 = vld [vmem:[%s1770_s24 + $0x14] sm:$0xf]  ;;  %v1663_v17 = vld [vmem:[%s1770_s24 + $0x124] sm:$0xf] }
  0x10   : > { %704 = vmatpush.bf16.msra.mxu0 %v1697_v2  ;;  %1701 = vmatpush.bf16.msra.mxu2 %v1697_v2  ;;  %v1443_v10 = vor.u32 %v1661_v8, %v1440_v9  ;;  %v1312_v14 = vld [vmem:[%s1770_s24 + $0x18] sm:$0xf0]  ;;  %v1448_v18 = vld [vmem:[%s1770_s24 + $0x128] sm:$0xf0]  ;;  %v1302_v20 = vld [vmem:[%s1770_s24] sm:$0xf] }
  0x11   : > { %1592 = vmatmul.msk.bf16.vlgmr.msra.gmra.mxu1 %vm606_vm0, %v1307_v6  ;;  %v1315_v15 = vor.u32 %v1629_v13, %v1312_v14  ;;  %v1628_v21 = vld [vmem:[%s1770_s24 + $0x4] sm:$0xf0]  ;;  %v1451_v22 = vor.u32 %v1663_v17, %v1448_v18  ;;  %v1430_v23 = vld [vmem:[%s1770_s24 + $0x100] sm:$0xf]  ;;  %v1631_v27 = vld [vmem:[%s1770_s24 + $0x24] sm:$0xf] }
  0x12   : > { %1609 = vmatmul.msk.bf16.vlgmr.msra.gmra.mxu3 %vm606_vm0, %v1443_v10  ;;  %v1660_v24 = vld [vmem:[%s1770_s24 + $0x104] sm:$0xf0]  ;;  %v1303_v25 = vor.u32 %v1628_v21, %v1302_v20  ;;  %v1320_v28 = vld [vmem:[%s1770_s24 + $0x28] sm:$0xf0]  ;;  %v1665_v30 = vld [vmem:[%s1770_s24 + $0x134] sm:$0xf] }
  0x13   : > { %v1431_v26 = vor.u32 %v1660_v24, %v1430_v23  ;;  %v1323_v29 = vor.u32 %v1631_v27, %v1320_v28  ;;  %v1456_v31 = vld [vmem:[%s1770_s24 + $0x138] sm:$0xf0]  ;;  %v1310_v32 = vld [vmem:[%s1770_s24 + $0x10] sm:$0xf]  ;;  %v1630_v33 = vld [vmem:[%s1770_s24 + $0x14] sm:$0xf0] }
  0x14   : > { %705 = vmatpush.bf16.msra.mxu0 %v1696_v3  ;;  %1702 = vmatpush.bf16.msra.mxu2 %v1696_v3  ;;  %v1459_v34 = vor.u32 %v1665_v30, %v1456_v31  ;;  %v1438_v35 = vld [vmem:[%s1770_s24 + $0x110] sm:$0xf]  ;;  %v1662_v36 = vld [vmem:[%s1770_s24 + $0x114] sm:$0xf0]  ;;  %v1311_v37 = vor.u32 %v1630_v33, %v1310_v32  ;;  %v1633_v39 = vld [vmem:[%s1770_s24 + $0x34] sm:$0xf] }
  0x15   : > { %v1439_v38 = vor.u32 %v1662_v36, %v1438_v35  ;;  %v1328_v40 = vld [vmem:[%s1770_s24 + $0x38] sm:$0xf0]  ;;  %v1667_v42 = vld [vmem:[%s1770_s24 + $0x144] sm:$0xf]  ;;  %v1464_v43 = vld [vmem:[%s1770_s24 + $0x148] sm:$0xf0] }
  0x16   : > { %v1331_v41 = vor.u32 %v1633_v39, %v1328_v40  ;;  %v1318_v44 = vld [vmem:[%s1770_s24 + $0x20] sm:$0xf]  ;;  %v1632_v45 = vld [vmem:[%s1770_s24 + $0x24] sm:$0xf0]  ;;  %v1467_v46 = vor.u32 %v1667_v42, %v1464_v43  ;;  %v1635_v51 = vld [vmem:[%s1770_s24 + $0x44] sm:$0xf] }
  0x17   : > { %v1446_v47 = vld [vmem:[%s1770_s24 + $0x120] sm:$0xf]  ;;  %v1664_v48 = vld [vmem:[%s1770_s24 + $0x124] sm:$0xf0]  ;;  %v1319_v49 = vor.u32 %v1632_v45, %v1318_v44  ;;  %v1336_v52 = vld [vmem:[%s1770_s24 + $0x48] sm:$0xf0] }
  0x18   : > { %706 = vmatpush.bf16.msra.mxu0 %v1695_v7  ;;  %1703 = vmatpush.bf16.msra.mxu2 %v1695_v7  ;;  %v1447_v50 = vor.u32 %v1664_v48, %v1446_v47  ;;  %v1339_v53 = vor.u32 %v1635_v51, %v1336_v52  ;;  %v1669_v54 = vld [vmem:[%s1770_s24 + $0x154] sm:$0xf]  ;;  %v1472_v55 = vld [vmem:[%s1770_s24 + $0x158] sm:$0xf0]  ;;  %v1326_v56 = vld [vmem:[%s1770_s24 + $0x30] sm:$0xf] }
  0x19   : > { %v1634_v57 = vld [vmem:[%s1770_s24 + $0x34] sm:$0xf0]  ;;  %v1475_v58 = vor.u32 %v1669_v54, %v1472_v55  ;;  %v1454_v59 = vld [vmem:[%s1770_s24 + $0x130] sm:$0xf]  ;;  %v1637_v63 = vld [vmem:[%s1770_s24 + $0x54] sm:$0xf] }
  0x1a   : > { %v1666_v60 = vld [vmem:[%s1770_s24 + $0x134] sm:$0xf0]  ;;  %v1327_v61 = vor.u32 %v1634_v57, %v1326_v56  ;;  %v1344_v0 = vld [vmem:[%s1770_s24 + $0x58] sm:$0xf0]  ;;  %v1671_v2 = vld [vmem:[%s1770_s24 + $0x164] sm:$0xf] }
  0x1b   : > { %v1455_v62 = vor.u32 %v1666_v60, %v1454_v59  ;;  %v1347_v1 = vor.u32 %v1637_v63, %v1344_v0  ;;  %v1480_v3 = vld [vmem:[%s1770_s24 + $0x168] sm:$0xf0]  ;;  %v1334_v4 = vld [vmem:[%s1770_s24 + $0x40] sm:$0xf]  ;;  %v1636_v5 = vld [vmem:[%s1770_s24 + $0x44] sm:$0xf0] }
  0x1c   : > { %707 = vmatpush.bf16.msra.mxu0 %v1694_v11  ;;  %1704 = vmatpush.bf16.msra.mxu2 %v1694_v11  ;;  %v1483_v6 = vor.u32 %v1671_v2, %v1480_v3  ;;  %v1462_v7 = vld [vmem:[%s1770_s24 + $0x140] sm:$0xf]  ;;  %v1668_v8 = vld [vmem:[%s1770_s24 + $0x144] sm:$0xf0]  ;;  %v1335_v9 = vor.u32 %v1636_v5, %v1334_v4  ;;  %v1639_v11 = vld [vmem:[%s1770_s24 + $0x64] sm:$0xf] }
  0x1d   : > { %v1463_v10 = vor.u32 %v1668_v8, %v1462_v7  ;;  %v1673_v14 = vld [vmem:[%s1770_s24 + $0x174] sm:$0xf]  ;;  %v1638_v17 = vld [vmem:[%s1770_s24 + $0x54] sm:$0xf0]  ;;  %v1360_v24 = vld [vmem:[%s1770_s24 + $0x78] sm:$0xf0] }
  0x1e   : > { %v1670_v20 = vld [vmem:[%s1770_s24 + $0x154] sm:$0xf0]  ;;  %v1641_v23 = vld [vmem:[%s1770_s24 + $0x74] sm:$0xf]  ;;  %v1496_v27 = vld [vmem:[%s1770_s24 + $0x188] sm:$0xf0] }
  0x1f   : > { %v1350_v28 = vld [vmem:[%s1770_s24 + $0x60] sm:$0xf]  ;;  %v1672_v32 = vld [vmem:[%s1770_s24 + $0x164] sm:$0xf0]  ;;  %v1643_v35 = vld [vmem:[%s1770_s24 + $0x84] sm:$0xf] }
  0x20   : > { %708 = vmatpush.bf16.msra.mxu0 %v1693_v12  ;;  %1705 = vmatpush.bf16.msra.mxu2 %v1693_v12  ;;  %v1352_v12 = vld [vmem:[%s1770_s24 + $0x68] sm:$0xf0]  ;;  %v1478_v31 = vld [vmem:[%s1770_s24 + $0x160] sm:$0xf]  ;;  %v1677_v39 = vld [vmem:[%s1770_s24 + $0x194] sm:$0xf] }
  0x21   : > { %1593 = vmatmul.msk.bf16.gmra.mxu1 %vm606_vm0, %v1315_v15  ;;  %v1355_v13 = vor.u32 %v1639_v11, %v1352_v12  ;;  %v1488_v15 = vld [vmem:[%s1770_s24 + $0x178] sm:$0xf0]  ;;  %v1368_v36 = vld [vmem:[%s1770_s24 + $0x88] sm:$0xf0]  ;;  %v1642_v42 = vld [vmem:[%s1770_s24 + $0x74] sm:$0xf0] }
  0x22   : > { %1610 = vmatmul.msk.bf16.gmra.mxu3 %vm606_vm0, %v1451_v22  ;;  %v1491_v18 = vor.u32 %v1673_v14, %v1488_v15  ;;  %v1504_v40 = vld [vmem:[%s1770_s24 + $0x198] sm:$0xf0]  ;;  %v1486_v44 = vld [vmem:[%s1770_s24 + $0x170] sm:$0xf]  ;;  %v1674_v45 = vld [vmem:[%s1770_s24 + $0x174] sm:$0xf0] }
  0x23   : > { %v1507_v43 = vor.u32 %v1677_v39, %v1504_v40  ;;  %v1487_v47 = vor.u32 %v1674_v45, %v1486_v44  ;;  %v1376_v51 = vld [vmem:[%s1770_s24 + $0x98] sm:$0xf0]  ;;  %v1679_v55 = vld [vmem:[%s1770_s24 + $0x1a4] sm:$0xf]  ;;  %v1512_v56 = vld [vmem:[%s1770_s24 + $0x1a8] sm:$0xf0] }
  0x24   : > { %709 = vmatpush.bf16.msra.mxu0 %v1692_v16  ;;  %1706 = vmatpush.bf16.msra.mxu2 %v1692_v16  ;;  %v1342_v16 = vld [vmem:[%s1770_s24 + $0x50] sm:$0xf]  ;;  %v1366_v57 = vld [vmem:[%s1770_s24 + $0x80] sm:$0xf]  ;;  %v1515_v59 = vor.u32 %v1679_v55, %v1512_v56  ;;  %v1647_v7 = vld [vmem:[%s1770_s24 + $0xa4] sm:$0xf] }
  0x25   : > { %v1343_v21 = vor.u32 %v1638_v17, %v1342_v16  ;;  %v1890_v60 = vld [vmem:[%s2230_s2] ss:$0 sm:$0xff]  ;;  %v1384_v8 = vld [vmem:[%s1770_s24 + $0xa8] sm:$0xf0]  ;;  %v1681_v17 = vld [vmem:[%s1770_s24 + $0x1b4] sm:$0xf] }
  0x26   : > { %v1387_v12 = vor.u32 %v1647_v7, %v1384_v8  ;;  %v1510_v56 = vld [vmem:[%s1770_s24 + $0x1a0] sm:$0xf] }
  0x28   : > { %710 = vmatpush.bf16.msra.mxu0 %v1691_v19  ;;  %1707 = vmatpush.bf16.msra.mxu2 %v1691_v19  ;;  %v1470_v19 = vld [vmem:[%s1770_s24 + $0x150] sm:$0xf] }
  0x29   : > { %v1471_v22 = vor.u32 %v1670_v20, %v1470_v19  ;;  %v1374_v19 = vld [vmem:[%s1770_s24 + $0x90] sm:$0xf]  ;;  %v1646_v20 = vld [vmem:[%s1770_s24 + $0x94] sm:$0xf0] }
  0x2b   : > { %711 = vmatmul.bf16.vlgmr.msra.gmra.mxu0 %v1303_v25  ;;  %791 = vmatmul.bf16.vlgmr.msra.gmra.mxu2 %v1431_v26  ;;  %v1363_v25 = vor.u32 %v1641_v23, %v1360_v24  ;;  %v1675_v26 = vld [vmem:[%s1770_s24 + $0x184] sm:$0xf]  ;;  %v1502_v23 = vld [vmem:[%s1770_s24 + $0x190] sm:$0xf]  ;;  %v1678_v24 = vld [vmem:[%s1770_s24 + $0x194] sm:$0xf0] }
  0x2c   : > { %v1499_v30 = vor.u32 %v1675_v26, %v1496_v27  ;;  %v1375_v27 = vor.u32 %v1646_v20, %v1374_v19 }
  0x31   : > { %1594 = vmatmul.msk.bf16.gmra.mxu1 %vm606_vm0, %v1323_v29  ;;  %v1640_v29 = vld [vmem:[%s1770_s24 + $0x64] sm:$0xf0] }
  0x32   : > { %1611 = vmatmul.msk.bf16.gmra.mxu3 %vm606_vm0, %v1459_v34  ;;  %v1351_v33 = vor.u32 %v1640_v29, %v1350_v28  ;;  %v1479_v34 = vor.u32 %v1672_v32, %v1478_v31  ;;  %v1503_v29 = vor.u32 %v1678_v24, %v1502_v23  ;;  %v1685_v23 = vld [vmem:[%s1770_s24 + $0x1d4] sm:$0xf]  ;;  %v1536_v24 = vld [vmem:[%s1770_s24 + $0x1d8] sm:$0xf0] }
  0x3b   : > { %716 = vmatmul.bf16.gmra.mxu0 %v1311_v37  ;;  %796 = vmatmul.bf16.gmra.mxu2 %v1439_v38  ;;  %v1371_v37 = vor.u32 %v1643_v35, %v1368_v36  ;;  %v1649_v35 = vld [vmem:[%s1770_s24 + $0xb4] sm:$0xf]  ;;  %v1392_v36 = vld [vmem:[%s1770_s24 + $0xb8] sm:$0xf0] }
  0x41   : > { %1595 = vmatmul.msk.bf16.gmra.mxu1 %vm606_vm0, %v1331_v41  ;;  %v1358_v41 = vld [vmem:[%s1770_s24 + $0x70] sm:$0xf] }
  0x42   : > { %1612 = vmatmul.msk.bf16.gmra.mxu3 %vm606_vm0, %v1467_v46  ;;  %v1359_v46 = vor.u32 %v1642_v42, %v1358_v41  ;;  %v1395_v41 = vor.u32 %v1649_v35, %v1392_v36 }
  0x4b   : > { %721 = vmatmul.bf16.gmra.mxu0 %v1319_v49  ;;  %801 = vmatmul.bf16.gmra.mxu2 %v1447_v50  ;;  %v1645_v50 = vld [vmem:[%s1770_s24 + $0x94] sm:$0xf] }
  0x4c   : > { %v1379_v52 = vor.u32 %v1645_v50, %v1376_v51  ;;  %v1382_v51 = vld [vmem:[%s1770_s24 + $0xa0] sm:$0xf] }
  0x51   : > { %1596 = vmatmul.msk.bf16.gmra.mxu1 %vm606_vm0, %v1339_v53 }
  0x52   : > { %1613 = vmatmul.msk.bf16.gmra.mxu3 %vm606_vm0, %v1475_v58  ;;  %v1644_v58 = vld [vmem:[%s1770_s24 + $0x84] sm:$0xf0] }
  0x53   : > { %v1367_v63 = vor.u32 %v1644_v58, %v1366_v57  ;;  %v1680_v57 = vld [vmem:[%s1770_s24 + $0x1a4] sm:$0xf0] }
  0x5b   : > { %726 = vmatmul.bf16.gmra.mxu0 %v1327_v61  ;;  %806 = vmatmul.bf16.gmra.mxu2 %v1455_v62  ;;  %v1494_v61 = vld [vmem:[%s1770_s24 + $0x180] sm:$0xf]  ;;  %v1676_v62 = vld [vmem:[%s1770_s24 + $0x184] sm:$0xf0] }
  0x61   : > { %1597 = vmatmul.msk.bf16.gmra.mxu1 %vm606_vm0, %v1347_v1  ;;  %v1495_v1 = vor.u32 %v1676_v62, %v1494_v61 }
  0x62   : > { %1614 = vmatmul.msk.bf16.gmra.mxu3 %vm606_vm0, %v1483_v6 }
  0x6b   : > { %731 = vmatmul.bf16.gmra.mxu0 %v1335_v9  ;;  %811 = vmatmul.bf16.gmra.mxu2 %v1463_v10 }
  0x71   : > { %1598 = vmatmul.msk.bf16.gmra.mxu1 %vm606_vm0, %v1355_v13 }
  0x72   : > { %1615 = vmatmul.msk.bf16.gmra.mxu3 %vm606_vm0, %v1491_v18  ;;  %v1520_v18 = vld [vmem:[%s1770_s24 + $0x1b8] sm:$0xf0] }
  0x7b   : > { %736 = vmatmul.bf16.gmra.mxu0 %v1343_v21  ;;  %816 = vmatmul.bf16.gmra.mxu2 %v1471_v22  ;;  %v1523_v21 = vor.u32 %v1681_v17, %v1520_v18 }
  0x81   : > { %1599 = vmatmul.msk.bf16.gmra.mxu1 %vm606_vm0, %v1363_v25 }
  0x82   : > { %1616 = vmatmul.msk.bf16.gmra.mxu3 %vm606_vm0, %v1499_v30 }
  0x8b   : > { %741 = vmatmul.bf16.gmra.mxu0 %v1351_v33  ;;  %821 = vmatmul.bf16.gmra.mxu2 %v1479_v34 }
  0x8e   : > { %v881_v38 = vpop.f32.mrf.mxu1 }
  0x91   : > { %1600 = vmatmul.msk.bf16.gmra.mxu1 %vm606_vm0, %v1371_v37 }
  0x92   : > { %1617 = vmatmul.msk.bf16.gmra.mxu3 %vm606_vm0, %v1507_v43 }
  0x95   : > { %v1876_v49 = vpop.f32.mrf.mxu3 }
  0x96   : > { %v883_v48 = vpop.f32.mrf.mxu1 }
  0x9b   : > { %746 = vmatmul.bf16.gmra.mxu0 %v1359_v46  ;;  %826 = vmatmul.bf16.gmra.mxu2 %v1487_v47  ;;  %v1683_v47 = vld [vmem:[%s1770_s24 + $0x1c4] sm:$0xf] }
  0x9d   : > { %v1880_v54 = vpop.f32.mrf.mxu3 }
  0x9e   : > { %v886_v53 = vpop.f32.mrf.mxu1 }
  0xa1   : > { %1601 = vmatmul.msk.bf16.gmra.mxu1 %vm606_vm0, %v1379_v52  ;;  %v1648_v52 = vld [vmem:[%s1770_s24 + $0xa4] sm:$0xf0] }
  0xa2   : > { %1618 = vmatmul.msk.bf16.gmra.mxu3 %vm606_vm0, %v1515_v59 }
  0xa5   : > { %v1896_v4 = vpop.f32.mrf.mxu3 }
  0xa6   : > { %v888_v3 = vpop.f32.mrf.mxu1 }
  0xa8   : > { %v712_v0 = vpop.f32.mrf.mxu0 }
  0xa9   : > { %v713_v2 = vadd.f32 %v1890_v60, %v712_v0  ;;  %v1511_v0 = vor.u32 %v1680_v57, %v1510_v56 }
  0xab   : > { %v882_v5 = vadd.f32 %v881_v38, %v713_v2  ;;  %751 = vmatmul.bf16.gmra.mxu0 %v1367_v63  ;;  %831 = vmatmul.bf16.gmra.mxu2 %v1495_v1 }
  0xad   : > { %v1041_v6 = vmax.f32 %v882_v5, 0.0  ;;  %v1913_v15 = vpop.f32.mrf.mxu3 }
  0xae   : > { %v1906_v10 = vpop.f32.mrf.mxu2  ;;  %v1911_v14 = vpop.f32.mrf.mxu1 }
  0xaf   : > { %v1105_v9 = vpack.c.bf16 %v1041_v6, %v1041_v6 }
  0xb0   : > { %v714_v11 = vpop.f32.mrf.mxu0 }
  0xb1   : > { %1170 = vst.msk [vmem:[%s1904_s16] sm:$0xf] %vm1169_vm1, %v1105_v9  ;;  %v715_v13 = vadd.f32 %v1890_v60, %v714_v11  ;;  %1602 = vmatmul.msk.bf16.gmra.mxu1 %vm606_vm0, %v1387_v12  ;;  %v1651_v9 = vld [vmem:[%s1770_s24 + $0xc4] sm:$0xf]  ;;  %v1400_v11 = vld [vmem:[%s1770_s24 + $0xc8] sm:$0xf0] }
  0xb2   : > { %1619 = vmatmul.msk.bf16.gmra.mxu3 %vm606_vm0, %v1523_v21 }
  0xb3   : > { %v884_v16 = vadd.f32 %v883_v48, %v715_v13  ;;  %v1528_v48 = vld [vmem:[%s1770_s24 + $0x1c8] sm:$0xf0] }
  0xb5   : > { %v1042_v22 = vmax.f32 %v884_v16, 0.0  ;;  %v1928_v32 = vpop.f32.mrf.mxu3 }
  0xb6   : > { %v1922_v26 = vpop.f32.mrf.mxu2  ;;  %v893_v31 = vpop.f32.mrf.mxu1 }
  0xb7   : > { %v1106_v25 = vpack.c.bf16 %v1042_v22, %v1042_v22 }
  0xb8   : > { %v717_v28 = vpop.f32.mrf.mxu0 }
  0xb9   : > { %1171 = vst.msk [vmem:[%s1904_s16 + $0x4] sm:$0xf] %vm1169_vm1, %v1106_v25  ;;  %v718_v30 = vadd.f32 %v1890_v60, %v717_v28  ;;  %v1650_v28 = vld [vmem:[%s1770_s24 + $0xb4] sm:$0xf0] }
  0xbb   : > { %v887_v33 = vadd.f32 %v886_v53, %v718_v30  ;;  %756 = vmatmul.bf16.gmra.mxu0 %v1375_v27  ;;  %836 = vmatmul.bf16.gmra.mxu2 %v1503_v29  ;;  %v1531_v53 = vor.u32 %v1683_v47, %v1528_v48  ;;  %v1390_v27 = vld [vmem:[%s1770_s24 + $0xb0] sm:$0xf]  ;;  %v1539_v29 = vor.u32 %v1685_v23, %v1536_v24 }
  0xbd   : > { %v1043_v34 = vmax.f32 %v887_v33, 0.0  ;;  %v1939_v45 = vpop.f32.mrf.mxu3  ;;  %v1518_v33 = vld [vmem:[%s1770_s24 + $0x1b0] sm:$0xf] }
  0xbe   : > { %v797_v38 = vpop.f32.mrf.mxu2  ;;  %v1936_v43 = vpop.f32.mrf.mxu1 }
  0xbf   : > { %v1107_v37 = vpack.c.bf16 %v1043_v34, %v1043_v34  ;;  %v798_v39 = vadd.f32 %v1890_v60, %v797_v38  ;;  %v1682_v34 = vld [vmem:[%s1770_s24 + $0x1b4] sm:$0xf0] }
  0xc0   : > { %v719_v40 = vpop.f32.mrf.mxu0 }
  0xc1   : > { %1172 = vst.msk [vmem:[%s1904_s16 + $0x8] sm:$0xf] %vm1169_vm1, %v1107_v37  ;;  %v720_v42 = vadd.f32 %v1890_v60, %v719_v40  ;;  %v967_v44 = vadd.f32 %v1876_v49, %v798_v39  ;;  %1603 = vmatmul.msk.bf16.gmra.mxu1 %vm606_vm0, %v1395_v41  ;;  %v1383_v49 = vor.u32 %v1648_v52, %v1382_v51  ;;  %v1408_v51 = vld [vmem:[%s1770_s24 + $0xd8] sm:$0xf0] }
  0xc2   : > { %1620 = vmatmul.msk.bf16.gmra.mxu3 %vm606_vm0, %v1531_v53  ;;  %v1519_v39 = vor.u32 %v1682_v34, %v1518_v33 }
  0xc3   : > { %v889_v46 = vadd.f32 %v888_v3, %v720_v42  ;;  %v1075_v50 = vmax.f32 %v967_v44, 0.0 }
  0xc5   : > { %v1044_v55 = vmax.f32 %v889_v46, 0.0  ;;  %v1139_v58 = vpack.c.bf16 %v1075_v50, %v1075_v50  ;;  %v1958_v5 = vpop.f32.mrf.mxu3  ;;  %v1653_v50 = vld [vmem:[%s1770_s24 + $0xd4] sm:$0xf] }
  0xc6   : > { %v799_v61 = vpop.f32.mrf.mxu2  ;;  %v1955_v2 = vpop.f32.mrf.mxu1 }
  0xc7   : > { %v1108_v59 = vpack.c.bf16 %v1044_v55, %v1044_v55  ;;  %1204 = vst.msk [vmem:[%s1904_s16 + $0x88] sm:$0xf] %vm1169_vm1, %v1139_v58  ;;  %v800_v62 = vadd.f32 %v1890_v60, %v799_v61 }
  0xc8   : > { %v722_v63 = vpop.f32.mrf.mxu0 }
  0xc9   : > { %1173 = vst.msk [vmem:[%s1904_s16 + $0xc] sm:$0xf] %vm1169_vm1, %v1108_v59  ;;  %v723_v1 = vadd.f32 %v1890_v60, %v722_v63  ;;  %v969_v3 = vadd.f32 %v1880_v54, %v800_v62  ;;  %v1687_v62 = vld [vmem:[%s1770_s24 + $0x1e4] sm:$0xf]  ;;  %v1544_v63 = vld [vmem:[%s1770_s24 + $0x1e8] sm:$0xf0] }
  0xcb   : > { %v892_v6 = vadd.f32 %v1911_v14, %v723_v1  ;;  %761 = vmatmul.bf16.gmra.mxu0 %v1383_v49  ;;  %v1076_v7 = vmax.f32 %v969_v3, 0.0  ;;  %841 = vmatmul.bf16.gmra.mxu2 %v1511_v0  ;;  %v1403_v14 = vor.u32 %v1651_v9, %v1400_v11  ;;  %v1398_v1 = vld [vmem:[%s1770_s24 + $0xc0] sm:$0xf]  ;;  %v1652_v3 = vld [vmem:[%s1770_s24 + $0xc4] sm:$0xf0] }
  0xcc   : > { %v1684_v9 = vld [vmem:[%s1770_s24 + $0x1c4] sm:$0xf0] }
  0xcd   : > { %v1045_v8 = vmax.f32 %v892_v6, 0.0  ;;  %v1140_v12 = vpack.c.bf16 %v1076_v7, %v1076_v7  ;;  %v1972_v21 = vpop.f32.mrf.mxu3  ;;  %v1547_v6 = vor.u32 %v1687_v62, %v1544_v63  ;;  %v1657_v63 = vld [vmem:[%s1770_s24 + $0xf4] sm:$0xf] }
  0xce   : > { %v802_v16 = vpop.f32.mrf.mxu2  ;;  %v1969_v19 = vpop.f32.mrf.mxu1 }
  0xcf   : > { %v1109_v13 = vpack.c.bf16 %v1045_v8, %v1045_v8  ;;  %1205 = vst.msk [vmem:[%s1904_s16 + $0x8c] sm:$0xf] %vm1169_vm1, %v1140_v12  ;;  %v803_v54 = vadd.f32 %v1890_v60, %v802_v16  ;;  %v1526_v8 = vld [vmem:[%s1770_s24 + $0x1c0] sm:$0xf] }
  0xd0   : > { %v724_v17 = vpop.f32.mrf.mxu0 }
  0xd1   : > { %1174 = vst.msk [vmem:[%s1904_s16 + $0x10] sm:$0xf] %vm1169_vm1, %v1109_v13  ;;  %v725_v18 = vadd.f32 %v1890_v60, %v724_v17  ;;  %v972_v20 = vadd.f32 %v1896_v4, %v803_v54  ;;  %1604 = vmatmul.msk.bf16.gmra.mxu1 %vm606_vm0, %v1403_v14  ;;  %v1391_v4 = vor.u32 %v1650_v28, %v1390_v27  ;;  %v1416_v27 = vld [vmem:[%s1770_s24 + $0xe8] sm:$0xf0] }
  0xd2   : > { %1621 = vmatmul.msk.bf16.gmra.mxu3 %vm606_vm0, %v1539_v29  ;;  %v1399_v13 = vor.u32 %v1652_v3, %v1398_v1  ;;  %v1527_v54 = vor.u32 %v1684_v9, %v1526_v8 }
  0xd3   : > { %v894_v22 = vadd.f32 %v893_v31, %v725_v18  ;;  %v1077_v25 = vmax.f32 %v972_v20, 0.0 }
  0xd5   : > { %v1046_v30 = vmax.f32 %v894_v22, 0.0  ;;  %v1141_v35 = vpack.c.bf16 %v1077_v25, %v1077_v25  ;;  %v1991_v44 = vpop.f32.mrf.mxu3  ;;  %v1655_v25 = vld [vmem:[%s1770_s24 + $0xe4] sm:$0xf] }
  0xd6   : > { %v804_v37 = vpop.f32.mrf.mxu2  ;;  %v1988_v41 = vpop.f32.mrf.mxu1  ;;  %v1419_v33 = vor.u32 %v1655_v25, %v1416_v27 }
  0xd7   : > { %v1110_v36 = vpack.c.bf16 %v1046_v30, %v1046_v30  ;;  %1206 = vst.msk [vmem:[%s1904_s16 + $0x90] sm:$0xf] %vm1169_vm1, %v1141_v35  ;;  %v805_v31 = vadd.f32 %v1890_v60, %v804_v37 }
  0xd8   : > { %v727_v38 = vpop.f32.mrf.mxu0 }
  0xd9   : > { %1175 = vst.msk [vmem:[%s1904_s16 + $0x14] sm:$0xf] %vm1169_vm1, %v1110_v36  ;;  %v728_v40 = vadd.f32 %v1890_v60, %v727_v38  ;;  %v974_v42 = vadd.f32 %v1913_v15, %v805_v31  ;;  %v1552_v31 = vld [vmem:[%s1770_s24 + $0x1f8] sm:$0xf0] }
  0xdb   : > { %v897_v46 = vadd.f32 %v1936_v43, %v728_v40  ;;  %766 = vmatmul.bf16.gmra.mxu0 %v1391_v4  ;;  %v1078_v47 = vmax.f32 %v974_v42, 0.0  ;;  %846 = vmatmul.bf16.gmra.mxu2 %v1519_v39  ;;  %v1411_v43 = vor.u32 %v1653_v50, %v1408_v51  ;;  %v1689_v4 = vld [vmem:[%s1770_s24 + $0x1f4] sm:$0xf]  ;;  %v1406_v39 = vld [vmem:[%s1770_s24 + $0xd0] sm:$0xf] }
  0xdc   : > { %v1654_v40 = vld [vmem:[%s1770_s24 + $0xd4] sm:$0xf0]  ;;  %v1555_v42 = vor.u32 %v1689_v4, %v1552_v31 }
  0xdd   : > { %v1047_v48 = vmax.f32 %v897_v46, 0.0  ;;  %v1142_v52 = vpack.c.bf16 %v1078_v47, %v1078_v47  ;;  %v2005_v61 = vpop.f32.mrf.mxu3  ;;  %v1534_v47 = vld [vmem:[%s1770_s24 + $0x1d0] sm:$0xf] }
  0xde   : > { %v807_v55 = vpop.f32.mrf.mxu2  ;;  %v2002_v58 = vpop.f32.mrf.mxu1 }
  0xdf   : > { %v1111_v53 = vpack.c.bf16 %v1047_v48, %v1047_v48  ;;  %1207 = vst.msk [vmem:[%s1904_s16 + $0x94] sm:$0xf] %vm1169_vm1, %v1142_v52  ;;  %v808_v15 = vadd.f32 %v1890_v60, %v807_v55  ;;  %v1686_v48 = vld [vmem:[%s1770_s24 + $0x1d4] sm:$0xf0] }
  0xe0   : > { %v729_v56 = vpop.f32.mrf.mxu0 }
  0xe1   : > { %1176 = vst.msk [vmem:[%s1904_s16 + $0x18] sm:$0xf] %vm1169_vm1, %v1111_v53  ;;  %v730_v57 = vadd.f32 %v1890_v60, %v729_v56  ;;  %v977_v59 = vadd.f32 %v1928_v32, %v808_v15  ;;  %1605 = vmatmul.msk.bf16.gmra.mxu1 %vm606_vm0, %v1411_v43  ;;  %v1535_v15 = vor.u32 %v1686_v48, %v1534_v47 }
  0xe2   : > { %1622 = vmatmul.msk.bf16.gmra.mxu3 %vm606_vm0, %v1547_v6 }
  0xe3   : > { %v899_v49 = vadd.f32 %v1955_v2, %v730_v57  ;;  %v1079_v0 = vmax.f32 %v977_v59, 0.0 }
  0xe5   : > { %v1048_v7 = vmax.f32 %v899_v49, 0.0  ;;  %v1143_v11 = vpack.c.bf16 %v1079_v0, %v1079_v0  ;;  %v2026_v22 = vpop.f32.mrf.mxu3  ;;  %v1424_v0 = vld [vmem:[%s1770_s24 + $0xf8] sm:$0xf0] }
  0xe6   : > { %v809_v32 = vpop.f32.mrf.mxu2  ;;  %v2022_v14 = vpop.f32.mrf.mxu1  ;;  %v1427_v8 = vor.u32 %v1657_v63, %v1424_v0 }
  0xe7   : > { %v1112_v12 = vpack.c.bf16 %v1048_v7, %v1048_v7  ;;  %1208 = vst.msk [vmem:[%s1904_s16 + $0x98] sm:$0xf] %vm1169_vm1, %v1143_v11  ;;  %v810_v2 = vadd.f32 %v1890_v60, %v809_v32 }
  0xe8   : > { %v732_v16 = vpop.f32.mrf.mxu0 }
  0xe9   : > { %1177 = vst.msk [vmem:[%s1904_s16 + $0x1c] sm:$0xf] %vm1169_vm1, %v1112_v12  ;;  %v733_v17 = vadd.f32 %v1890_v60, %v732_v16  ;;  %v979_v18 = vadd.f32 %v1939_v45, %v810_v2  ;;  %v1414_v2 = vld [vmem:[%s1770_s24 + $0xe0] sm:$0xf]  ;;  %v1656_v16 = vld [vmem:[%s1770_s24 + $0xe4] sm:$0xf0] }
  0xea   : > { %v1415_v25 = vor.u32 %v1656_v16, %v1414_v2 }
  0xeb   : > { %v902_v20 = vadd.f32 %v1969_v19, %v733_v17  ;;  %771 = vmatmul.bf16.gmra.mxu0 %v1399_v13  ;;  %v1080_v23 = vmax.f32 %v979_v18, 0.0  ;;  %851 = vmatmul.bf16.gmra.mxu2 %v1527_v54  ;;  %v1542_v17 = vld [vmem:[%s1770_s24 + $0x1e0] sm:$0xf]  ;;  %v1688_v18 = vld [vmem:[%s1770_s24 + $0x1e4] sm:$0xf0] }
  0xec   : > { %v1543_v27 = vor.u32 %v1688_v18, %v1542_v17 }
  0xed   : > { %v1049_v24 = vmax.f32 %v902_v20, 0.0  ;;  %v1144_v28 = vpack.c.bf16 %v1080_v23, %v1080_v23  ;;  %v2047_v50 = vpop.f32.mrf.mxu3 }
  0xee   : > { %v812_v30 = vpop.f32.mrf.mxu2  ;;  %v2036_v35 = vpop.f32.mrf.mxu1 }
  0xef   : > { %v1113_v29 = vpack.c.bf16 %v1049_v24, %v1049_v24  ;;  %1209 = vst.msk [vmem:[%s1904_s16 + $0x9c] sm:$0xf] %vm1169_vm1, %v1144_v28  ;;  %v813_v45 = vadd.f32 %v1890_v60, %v812_v30 }
  0xf0   : > { %v734_v19 = vpop.f32.mrf.mxu0 }
  0xf1   : > { %1178 = vst.msk [vmem:[%s1904_s16 + $0x20] sm:$0xf] %vm1169_vm1, %v1113_v29  ;;  %v735_v34 = vadd.f32 %v1890_v60, %v734_v19  ;;  %v982_v36 = vadd.f32 %v1958_v5, %v813_v45  ;;  %1606 = vmatmul.msk.bf16.gmra.mxu1 %vm606_vm0, %v1419_v33 }
  0xf2   : > { %1623 = vmatmul.msk.bf16.gmra.mxu3 %vm606_vm0, %v1555_v42 }
  0xf3   : > { %v904_v37 = vadd.f32 %v1988_v41, %v735_v34  ;;  %v1081_v38 = vmax.f32 %v982_v36, 0.0  ;;  %v1407_v41 = vor.u32 %v1654_v40, %v1406_v39  ;;  %v1659_v36 = vld [vmem:[%s1770_s24 + $0x104] sm:$0xf] }
  0xf5   : > { %v1050_v46 = vmax.f32 %v904_v37, 0.0  ;;  %v1145_v51 = vpack.c.bf16 %v1081_v38, %v1081_v38  ;;  %v2060_v7 = vpop.f32.mrf.mxu3  ;;  %v1432_v37 = vld [vmem:[%s1770_s24 + $0x108] sm:$0xf0] }
  0xf6   : > { %v814_v5 = vpop.f32.mrf.mxu2  ;;  %v913_v43 = vpop.f32.mrf.mxu1  ;;  %v1435_v40 = vor.u32 %v1659_v36, %v1432_v37 }
  0xf7   : > { %v1114_v52 = vpack.c.bf16 %v1050_v46, %v1050_v46  ;;  %1210 = vst.msk [vmem:[%s1904_s16 + $0xa0] sm:$0xf] %vm1169_vm1, %v1145_v51  ;;  %v815_v53 = vadd.f32 %v1890_v60, %v814_v5  ;;  %v1658_v5 = vld [vmem:[%s1770_s24 + $0xf4] sm:$0xf0] }
  0xf8   : > { %v737_v55 = vpop.f32.mrf.mxu0 }
  0xf9   : > { %1179 = vst.msk [vmem:[%s1904_s16 + $0x24] sm:$0xf] %vm1169_vm1, %v1114_v52  ;;  %v738_v56 = vadd.f32 %v1890_v60, %v737_v55  ;;  %v984_v57 = vadd.f32 %v1972_v21, %v815_v53  ;;  %v1422_v52 = vld [vmem:[%s1770_s24 + $0xf0] sm:$0xf]  ;;  %v1690_v55 = vld [vmem:[%s1770_s24 + $0x1f4] sm:$0xf0] }
  0xfa   : > { %v1550_v53 = vld [vmem:[%s1770_s24 + $0x1f0] sm:$0xf] }
  0xfb   : > { %v907_v59 = vadd.f32 %v2002_v58, %v738_v56  ;;  %776 = vmatmul.bf16.gmra.mxu0 %v1407_v41  ;;  %v1082_v49 = vmax.f32 %v984_v57, 0.0  ;;  %856 = vmatmul.bf16.gmra.mxu2 %v1535_v15 }
  0xfd   : > { %v1051_v62 = vmax.f32 %v907_v59, 0.0  ;;  %v1146_v1 = vpack.c.bf16 %v1082_v49, %v1082_v49  ;;  %v2081_v30 = vpop.f32.mrf.mxu3  ;;  %v1423_v59 = vor.u32 %v1658_v5, %v1422_v52  ;;  %v1551_v49 = vor.u32 %v1690_v55, %v1550_v53 }
  0xfe   : > { %v817_v6 = vpop.f32.mrf.mxu2  ;;  %v916_v11 = vpop.f32.mrf.mxu1 }
  0xff   : > { %v1115_v3 = vpack.c.bf16 %v1051_v62, %v1051_v62  ;;  %1211 = vst.msk [vmem:[%s1904_s16 + $0xa4] sm:$0xf] %vm1169_vm1, %v1146_v1  ;;  %v818_v21 = vadd.f32 %v1890_v60, %v817_v6 }
 0x100   : > { %v739_v58 = vpop.f32.mrf.mxu0 }
 0x101   : > { %1180 = vst.msk [vmem:[%s1904_s16 + $0x28] sm:$0xf] %vm1169_vm1, %v1115_v3  ;;  %v740_v9 = vadd.f32 %v1890_v60, %v739_v58  ;;  %v987_v12 = vadd.f32 %v1991_v44, %v818_v21  ;;  %1607 = vmatmul.msk.bf16.gmra.mxu1 %vm606_vm0, %v1427_v8 }
 0x103   : > { %v909_v32 = vadd.f32 %v2022_v14, %v740_v9  ;;  %v1083_v13 = vmax.f32 %v987_v12, 0.0 }
 0x105   : > { %v1052_v54 = vmax.f32 %v909_v32, 0.0  ;;  %v1147_v20 = vpack.c.bf16 %v1083_v13, %v1083_v13  ;;  %v2094_v48 = vpop.f32.mrf.mxu3 }
 0x106   : > { %v819_v24 = vpop.f32.mrf.mxu2  ;;  %v918_v29 = vpop.f32.mrf.mxu1 }
 0x107   : > { %v1116_v23 = vpack.c.bf16 %v1052_v54, %v1052_v54  ;;  %1212 = vst.msk [vmem:[%s1904_s16 + $0xa8] sm:$0xf] %vm1169_vm1, %v1147_v20  ;;  %v820_v44 = vadd.f32 %v1890_v60, %v819_v24 }
 0x108   : > { %v742_v14 = vpop.f32.mrf.mxu0 }
 0x109   : > { %1181 = vst.msk [vmem:[%s1904_s16 + $0x2c] sm:$0xf] %vm1169_vm1, %v1116_v23  ;;  %v743_v28 = vadd.f32 %v1890_v60, %v742_v14  ;;  %v989_v45 = vadd.f32 %v2005_v61, %v820_v44 }
 0x10b   : > { %v912_v19 = vadd.f32 %v2036_v35, %v743_v28  ;;  %781 = vmatmul.bf16.gmra.mxu0 %v1415_v25  ;;  %v1084_v33 = vmax.f32 %v989_v45, 0.0  ;;  %861 = vmatmul.bf16.gmra.mxu2 %v1543_v27 }
 0x10d   : > { %v1053_v34 = vmax.f32 %v912_v19, 0.0  ;;  %v1148_v4 = vpack.c.bf16 %v1084_v33, %v1084_v33  ;;  %v1003_v21 = vpop.f32.mrf.mxu3 }
 0x10e   : > { %v822_v38 = vpop.f32.mrf.mxu2  ;;  %v921_v42 = vpop.f32.mrf.mxu1 }
 0x10f   : > { %v1117_v31 = vpack.c.bf16 %v1053_v34, %v1053_v34  ;;  %1213 = vst.msk [vmem:[%s1904_s16 + $0xac] sm:$0xf] %vm1169_vm1, %v1148_v4  ;;  %v823_v39 = vadd.f32 %v1890_v60, %v822_v38 }
 0x110   : > { %v744_v61 = vpop.f32.mrf.mxu0 }
 0x111   : > { %1182 = vst.msk [vmem:[%s1904_s16 + $0x30] sm:$0xf] %vm1169_vm1, %v1117_v31  ;;  %v745_v35 = vadd.f32 %v1890_v60, %v744_v61  ;;  %v992_v46 = vadd.f32 %v2026_v22, %v823_v39  ;;  %1608 = vmatmul.msk.bf16.gmra.mxu1 %vm606_vm0, %v1435_v40 }
 0x113   : > { %v914_v47 = vadd.f32 %v913_v43, %v745_v35  ;;  %v1085_v51 = vmax.f32 %v992_v46, 0.0 }
 0x115   : > { %v1054_v41 = vmax.f32 %v914_v47, 0.0  ;;  %v1149_v15 = vpack.c.bf16 %v1085_v51, %v1085_v51  ;;  %v1006_v23 = vpop.f32.mrf.mxu3 }
 0x116   : > { %v824_v57 = vpop.f32.mrf.mxu2  ;;  %v923_v63 = vpop.f32.mrf.mxu1 }
 0x117   : > { %v1118_v56 = vpack.c.bf16 %v1054_v41, %v1054_v41  ;;  %1214 = vst.msk [vmem:[%s1904_s16 + $0xb0] sm:$0xf] %vm1169_vm1, %v1149_v15  ;;  %v825_v22 = vadd.f32 %v1890_v60, %v824_v57 }
 0x118   : > { %v747_v43 = vpop.f32.mrf.mxu0 }
 0x119   : > { %1183 = vst.msk [vmem:[%s1904_s16 + $0x34] sm:$0xf] %vm1169_vm1, %v1118_v56  ;;  %v748_v62 = vadd.f32 %v1890_v60, %v747_v43  ;;  %v994_v0 = vadd.f32 %v2047_v50, %v825_v22 }
 0x11b   : > { %v917_v1 = vadd.f32 %v916_v11, %v748_v62  ;;  %786 = vmatmul.bf16.gmra.mxu0 %v1423_v59  ;;  %v1086_v3 = vmax.f32 %v994_v0, 0.0  ;;  %866 = vmatmul.bf16.gmra.mxu2 %v1551_v49 }
 0x11d   : > { %v1055_v6 = vmax.f32 %v917_v1, 0.0  ;;  %v1150_v58 = vpack.c.bf16 %v1086_v3, %v1086_v3  ;;  %v1008_v31 = vpop.f32.mrf.mxu3 }
 0x11e   : > { %v827_v9 = vpop.f32.mrf.mxu2  ;;  %v926_v11 = vpop.f32.mrf.mxu1 }
 0x11f   : > { %v1119_v8 = vpack.c.bf16 %v1055_v6, %v1055_v6  ;;  %1215 = vst.msk [vmem:[%s1904_s16 + $0xb4] sm:$0xf] %vm1169_vm1, %v1150_v58  ;;  %v828_v12 = vadd.f32 %v1890_v60, %v827_v9 }
 0x120   : > { %v749_v32 = vpop.f32.mrf.mxu0 }
 0x121   : > { %1184 = vst.msk [vmem:[%s1904_s16 + $0x38] sm:$0xf] %vm1169_vm1, %v1119_v8  ;;  %v750_v50 = vadd.f32 %v1890_v60, %v749_v32  ;;  %v997_v13 = vadd.f32 %v2060_v7, %v828_v12 }
 0x123   : > { %v919_v2 = vadd.f32 %v918_v29, %v750_v50  ;;  %v1087_v16 = vmax.f32 %v997_v13, 0.0 }
 0x125   : > { %v1056_v54 = vmax.f32 %v919_v2, 0.0  ;;  %v1151_v17 = vpack.c.bf16 %v1087_v16, %v1087_v16  ;;  %v1011_v41 = vpop.f32.mrf.mxu3 }
 0x126   : > { %v829_v20 = vpop.f32.mrf.mxu2  ;;  %v928_v14 = vpop.f32.mrf.mxu1 }
 0x127   : > { %v1120_v18 = vpack.c.bf16 %v1056_v54, %v1056_v54  ;;  %1216 = vst.msk [vmem:[%s1904_s16 + $0xb8] sm:$0xf] %vm1169_vm1, %v1151_v17  ;;  %v830_v24 = vadd.f32 %v1890_v60, %v829_v20 }
 0x128   : > { %v752_v25 = vpop.f32.mrf.mxu0 }
 0x129   : > { %1185 = vst.msk [vmem:[%s1904_s16 + $0x3c] sm:$0xf] %vm1169_vm1, %v1120_v18  ;;  %v753_v44 = vadd.f32 %v1890_v60, %v752_v25  ;;  %v999_v7 = vadd.f32 %v2081_v30, %v830_v24 }
 0x12b   : > { %v922_v27 = vadd.f32 %v921_v42, %v753_v44  ;;  %v1088_v28 = vmax.f32 %v999_v7, 0.0 }
 0x12d   : > { %v1057_v29 = vmax.f32 %v922_v27, 0.0  ;;  %v1152_v45 = vpack.c.bf16 %v1088_v28, %v1088_v28  ;;  %v1013_v3 = vpop.f32.mrf.mxu3 }
 0x12e   : > { %v832_v33 = vpop.f32.mrf.mxu2  ;;  %v931_v4 = vpop.f32.mrf.mxu1 }
 0x12f   : > { %v1121_v19 = vpack.c.bf16 %v1057_v29, %v1057_v29  ;;  %1217 = vst.msk [vmem:[%s1904_s16 + $0xbc] sm:$0xf] %vm1169_vm1, %v1152_v45  ;;  %v833_v34 = vadd.f32 %v1890_v60, %v832_v33 }
 0x130   : > { %v754_v36 = vpop.f32.mrf.mxu0 }
 0x131   : > { %1186 = vst.msk [vmem:[%s1904_s16 + $0x40] sm:$0xf] %vm1169_vm1, %v1121_v19  ;;  %v755_v37 = vadd.f32 %v1890_v60, %v754_v36  ;;  %v1002_v30 = vadd.f32 %v2094_v48, %v833_v34 }
 0x133   : > { %v924_v38 = vadd.f32 %v923_v63, %v755_v37  ;;  %v1089_v39 = vmax.f32 %v1002_v30, 0.0 }
 0x135   : > { %v1058_v61 = vmax.f32 %v924_v38, 0.0  ;;  %v1153_v40 = vpack.c.bf16 %v1089_v39, %v1089_v39  ;;  %v1016_v18 = vpop.f32.mrf.mxu3 }
 0x136   : > { %v834_v42 = vpop.f32.mrf.mxu2  ;;  %v933_v52 = vpop.f32.mrf.mxu1 }
 0x137   : > { %v1122_v35 = vpack.c.bf16 %v1058_v61, %v1058_v61  ;;  %1218 = vst.msk [vmem:[%s1904_s16 + $0xc0] sm:$0xf] %vm1169_vm1, %v1153_v40  ;;  %v835_v46 = vadd.f32 %v1890_v60, %v834_v42 }
 0x138   : > { %v757_v47 = vpop.f32.mrf.mxu0 }
 0x139   : > { %1187 = vst.msk [vmem:[%s1904_s16 + $0x44] sm:$0xf] %vm1169_vm1, %v1122_v35  ;;  %v758_v51 = vadd.f32 %v1890_v60, %v757_v47  ;;  %v1004_v5 = vadd.f32 %v1003_v21, %v835_v46 }
 0x13b   : > { %v927_v48 = vadd.f32 %v926_v11, %v758_v51  ;;  %v1090_v53 = vmax.f32 %v1004_v5, 0.0 }
 0x13d   : > { %v1059_v55 = vmax.f32 %v927_v48, 0.0  ;;  %v1154_v15 = vpack.c.bf16 %v1090_v53, %v1090_v53  ;;  %v1018_v37 = vpop.f32.mrf.mxu3 }
 0x13e   : > { %v837_v57 = vpop.f32.mrf.mxu2  ;;  %v936_v49 = vpop.f32.mrf.mxu1 }
 0x13f   : > { %v1123_v56 = vpack.c.bf16 %v1059_v55, %v1059_v55  ;;  %1219 = vst.msk [vmem:[%s1904_s16 + $0xc4] sm:$0xf] %vm1169_vm1, %v1154_v15  ;;  %v838_v59 = vadd.f32 %v1890_v60, %v837_v57 }
 0x140   : > { %v759_v22 = vpop.f32.mrf.mxu0 }
 0x141   : > { %1188 = vst.msk [vmem:[%s1904_s16 + $0x48] sm:$0xf] %vm1169_vm1, %v1123_v56  ;;  %v760_v43 = vadd.f32 %v1890_v60, %v759_v22  ;;  %v1007_v62 = vadd.f32 %v1006_v23, %v838_v59 }
 0x143   : > { %v929_v63 = vadd.f32 %v928_v14, %v760_v43  ;;  %v1091_v0 = vmax.f32 %v1007_v62, 0.0 }
 0x145   : > { %v1060_v1 = vmax.f32 %v929_v63, 0.0  ;;  %v1155_v6 = vpack.c.bf16 %v1091_v0, %v1091_v0  ;;  %v1021_v5 = vpop.f32.mrf.mxu3 }
 0x146   : > { %v839_v58 = vpop.f32.mrf.mxu2  ;;  %v938_v32 = vpop.f32.mrf.mxu1 }
 0x147   : > { %v1124_v21 = vpack.c.bf16 %v1060_v1, %v1060_v1  ;;  %1220 = vst.msk [vmem:[%s1904_s16 + $0xc8] sm:$0xf] %vm1169_vm1, %v1155_v6  ;;  %v840_v8 = vadd.f32 %v1890_v60, %v839_v58 }
 0x148   : > { %v762_v9 = vpop.f32.mrf.mxu0 }
 0x149   : > { %1189 = vst.msk [vmem:[%s1904_s16 + $0x4c] sm:$0xf] %vm1169_vm1, %v1124_v21  ;;  %v763_v12 = vadd.f32 %v1890_v60, %v762_v9  ;;  %v1009_v50 = vadd.f32 %v1008_v31, %v840_v8 }
 0x14b   : > { %v932_v11 = vadd.f32 %v931_v4, %v763_v12  ;;  %v1092_v13 = vmax.f32 %v1009_v50, 0.0 }
 0x14d   : > { %v1061_v2 = vmax.f32 %v932_v11, 0.0  ;;  %v1156_v16 = vpack.c.bf16 %v1092_v13, %v1092_v13  ;;  %v1023_v0 = vpop.f32.mrf.mxu3 }
 0x14e   : > { %v842_v17 = vpop.f32.mrf.mxu2  ;;  %v941_v25 = vpop.f32.mrf.mxu1 }
 0x14f   : > { %v1125_v54 = vpack.c.bf16 %v1061_v2, %v1061_v2  ;;  %1221 = vst.msk [vmem:[%s1904_s16 + $0xcc] sm:$0xf] %vm1169_vm1, %v1156_v16  ;;  %v843_v20 = vadd.f32 %v1890_v60, %v842_v17 }
 0x150   : > { %v764_v23 = vpop.f32.mrf.mxu0 }
 0x151   : > { %1190 = vst.msk [vmem:[%s1904_s16 + $0x50] sm:$0xf] %vm1169_vm1, %v1125_v54  ;;  %v765_v24 = vadd.f32 %v1890_v60, %v764_v23  ;;  %v1012_v44 = vadd.f32 %v1011_v41, %v843_v20 }
 0x153   : > { %v934_v14 = vadd.f32 %v933_v52, %v765_v24  ;;  %v1093_v7 = vmax.f32 %v1012_v44, 0.0 }
 0x155   : > { %v1062_v27 = vmax.f32 %v934_v14, 0.0  ;;  %v1157_v28 = vpack.c.bf16 %v1093_v7, %v1093_v7  ;;  %v1026_v54 = vpop.f32.mrf.mxu3 }
 0x156   : > { %v844_v45 = vpop.f32.mrf.mxu2  ;;  %v943_v36 = vpop.f32.mrf.mxu1 }
 0x157   : > { %v1126_v29 = vpack.c.bf16 %v1062_v27, %v1062_v27  ;;  %1222 = vst.msk [vmem:[%s1904_s16 + $0xd0] sm:$0xf] %vm1169_vm1, %v1157_v28  ;;  %v845_v19 = vadd.f32 %v1890_v60, %v844_v45 }
 0x158   : > { %v767_v33 = vpop.f32.mrf.mxu0 }
 0x159   : > { %1191 = vst.msk [vmem:[%s1904_s16 + $0x54] sm:$0xf] %vm1169_vm1, %v1126_v29  ;;  %v768_v34 = vadd.f32 %v1890_v60, %v767_v33  ;;  %v1014_v4 = vadd.f32 %v1013_v3, %v845_v19 }
 0x15b   : > { %v937_v31 = vadd.f32 %v936_v49, %v768_v34  ;;  %v1094_v30 = vmax.f32 %v1014_v4, 0.0 }
 0x15d   : > { %v1063_v38 = vmax.f32 %v937_v31, 0.0  ;;  %v1158_v39 = vpack.c.bf16 %v1094_v30, %v1094_v30  ;;  %v1028_v34 = vpop.f32.mrf.mxu3 }
 0x15e   : > { %v847_v40 = vpop.f32.mrf.mxu2  ;;  %v946_v47 = vpop.f32.mrf.mxu1 }
 0x15f   : > { %v1127_v61 = vpack.c.bf16 %v1063_v38, %v1063_v38  ;;  %1223 = vst.msk [vmem:[%s1904_s16 + $0xd4] sm:$0xf] %vm1169_vm1, %v1158_v39  ;;  %v848_v35 = vadd.f32 %v1890_v60, %v847_v40 }
 0x160   : > { %v769_v42 = vpop.f32.mrf.mxu0 }
 0x161   : > { %1192 = vst.msk [vmem:[%s1904_s16 + $0x58] sm:$0xf] %vm1169_vm1, %v1127_v61  ;;  %v770_v46 = vadd.f32 %v1890_v60, %v769_v42  ;;  %v1017_v51 = vadd.f32 %v1016_v18, %v848_v35 }
 0x163   : > { %v939_v52 = vadd.f32 %v938_v32, %v770_v46  ;;  %v1095_v48 = vmax.f32 %v1017_v51, 0.0 }
 0x165   : > { %v1064_v41 = vmax.f32 %v939_v52, 0.0  ;;  %v1159_v53 = vpack.c.bf16 %v1095_v48, %v1095_v48  ;;  %v1031_v51 = vpop.f32.mrf.mxu3 }
 0x166   : > { %v849_v15 = vpop.f32.mrf.mxu2  ;;  %v948_v22 = vpop.f32.mrf.mxu1 }
 0x167   : > { %v1128_v55 = vpack.c.bf16 %v1064_v41, %v1064_v41  ;;  %1224 = vst.msk [vmem:[%s1904_s16 + $0xd8] sm:$0xf] %vm1169_vm1, %v1159_v53  ;;  %v850_v56 = vadd.f32 %v1890_v60, %v849_v15 }
 0x168   : > { %v772_v57 = vpop.f32.mrf.mxu0 }
 0x169   : > { %1193 = vst.msk [vmem:[%s1904_s16 + $0x5c] sm:$0xf] %vm1169_vm1, %v1128_v55  ;;  %v773_v59 = vadd.f32 %v1890_v60, %v772_v57  ;;  %v1019_v43 = vadd.f32 %v1018_v37, %v850_v56  ;;  %v793_v55 = vadd.f32 %v1890_v60, %v1906_v10 }
 0x16b   : > { %v942_v49 = vadd.f32 %v941_v25, %v773_v59  ;;  %v1096_v62 = vmax.f32 %v1019_v43, 0.0 }
 0x16d   : > { %v1065_v63 = vmax.f32 %v942_v49, 0.0  ;;  %v1160_v1 = vpack.c.bf16 %v1096_v62, %v1096_v62  ;;  %v1033_v10 = vpop.f32.mrf.mxu3 }
 0x16e   : > { %v852_v6 = vpop.f32.mrf.mxu2  ;;  %v951_v9 = vpop.f32.mrf.mxu1 }
 0x16f   : > { %v1129_v3 = vpack.c.bf16 %v1065_v63, %v1065_v63  ;;  %1225 = vst.msk [vmem:[%s1904_s16 + $0xdc] sm:$0xf] %vm1169_vm1, %v1160_v1  ;;  %v853_v21 = vadd.f32 %v1890_v60, %v852_v6 }
 0x170   : > { %v774_v58 = vpop.f32.mrf.mxu0 }
 0x171   : > { %1194 = vst.msk [vmem:[%s1904_s16 + $0x60] sm:$0xf] %vm1169_vm1, %v1129_v3  ;;  %v775_v8 = vadd.f32 %v1890_v60, %v774_v58  ;;  %v1022_v12 = vadd.f32 %v1021_v5, %v853_v21  ;;  %v1718_v58 = vld [vmem:[%s2230_s2] ss:$0 sm:$0xff] }
 0x173   : > { %v944_v32 = vadd.f32 %v943_v36, %v775_v8  ;;  %v1097_v50 = vmax.f32 %v1022_v12, 0.0 }
 0x175   : > { %v1066_v11 = vmax.f32 %v944_v32, 0.0  ;;  %v1161_v13 = vpack.c.bf16 %v1097_v50, %v1097_v50 }
 0x176   : > { %v854_v16 = vpop.f32.mrf.mxu2  ;;  %v953_v23 = vpop.f32.mrf.mxu1 }
 0x177   : > { %v1130_v2 = vpack.c.bf16 %v1066_v11, %v1066_v11  ;;  %1226 = vst.msk [vmem:[%s1904_s16 + $0xe0] sm:$0xf] %vm1169_vm1, %v1161_v13  ;;  %v855_v17 = vadd.f32 %v1890_v60, %v854_v16 }
 0x178   : > { %v777_v18 = vpop.f32.mrf.mxu0 }
 0x179   : > { %1195 = vst.msk [vmem:[%s1904_s16 + $0x64] sm:$0xf] %vm1169_vm1, %v1130_v2  ;;  %v778_v20 = vadd.f32 %v1890_v60, %v777_v18  ;;  %v1024_v24 = vadd.f32 %v1023_v0, %v855_v17 }
 0x17b   : > { %v947_v25 = vadd.f32 %v946_v47, %v778_v20  ;;  %v1098_v44 = vmax.f32 %v1024_v24, 0.0  ;;  %v1036_v20 = vpop.f32.mrf.mxu3 }
 0x17d   : > { %v1067_v14 = vmax.f32 %v947_v25, 0.0  ;;  %v1162_v7 = vpack.c.bf16 %v1098_v44, %v1098_v44 }
 0x17e   : > { %v857_v28 = vpop.f32.mrf.mxu2  ;;  %v956_v33 = vpop.f32.mrf.mxu1 }
 0x17f   : > { %v1131_v27 = vpack.c.bf16 %v1067_v14, %v1067_v14  ;;  %1227 = vst.msk [vmem:[%s1904_s16 + $0xe4] sm:$0xf] %vm1169_vm1, %v1162_v7  ;;  %v858_v29 = vadd.f32 %v1890_v60, %v857_v28 }
 0x180   : > { %v779_v45 = vpop.f32.mrf.mxu0 }
 0x181   : > { %1196 = vst.msk [vmem:[%s1904_s16 + $0x68] sm:$0xf] %vm1169_vm1, %v1131_v27  ;;  %v780_v19 = vadd.f32 %v1890_v60, %v779_v45  ;;  %v1027_v36 = vadd.f32 %v1026_v54, %v858_v29 }
 0x183   : > { %v949_v37 = vadd.f32 %v948_v22, %v780_v19  ;;  %v1099_v4 = vmax.f32 %v1027_v36, 0.0 }
 0x185   : > { %v1068_v31 = vmax.f32 %v949_v37, 0.0  ;;  %v1163_v30 = vpack.c.bf16 %v1099_v4, %v1099_v4 }
 0x186   : > { %v859_v39 = vpop.f32.mrf.mxu2  ;;  %v958_v42 = vpop.f32.mrf.mxu1 }
 0x187   : > { %v1132_v38 = vpack.c.bf16 %v1068_v31, %v1068_v31  ;;  %1228 = vst.msk [vmem:[%s1904_s16 + $0xe8] sm:$0xf] %vm1169_vm1, %v1163_v30  ;;  %v860_v61 = vadd.f32 %v1890_v60, %v859_v39 }
 0x188   : > { %v782_v40 = vpop.f32.mrf.mxu0 }
 0x189   : > { %1197 = vst.msk [vmem:[%s1904_s16 + $0x6c] sm:$0xf] %vm1169_vm1, %v1132_v38  ;;  %v783_v35 = vadd.f32 %v1890_v60, %v782_v40  ;;  %v1029_v46 = vadd.f32 %v1028_v34, %v860_v61  ;;  %v1038_v34 = vpop.f32.mrf.mxu3 }
 0x18b   : > { %v952_v47 = vadd.f32 %v951_v9, %v783_v35  ;;  %v1100_v52 = vmax.f32 %v1029_v46, 0.0 }
 0x18d   : > { %v1069_v5 = vmax.f32 %v952_v47, 0.0  ;;  %v1164_v48 = vpack.c.bf16 %v1100_v52, %v1100_v52 }
 0x18e   : > { %v862_v53 = vpop.f32.mrf.mxu2  ;;  %v961_v59 = vpop.f32.mrf.mxu1 }
 0x18f   : > { %v1133_v41 = vpack.c.bf16 %v1069_v5, %v1069_v5  ;;  %1229 = vst.msk [vmem:[%s1904_s16 + $0xec] sm:$0xf] %vm1169_vm1, %v1164_v48  ;;  %v863_v15 = vadd.f32 %v1890_v60, %v862_v53  ;;  %v962_v43 = vadd.f32 %v961_v59, %v793_v55 }
 0x190   : > { %v784_v56 = vpop.f32.mrf.mxu0 }
 0x191   : > { %1198 = vst.msk [vmem:[%s1904_s16 + $0x70] sm:$0xf] %vm1169_vm1, %v1133_v41  ;;  %v785_v57 = vadd.f32 %v1890_v60, %v784_v56  ;;  %v1032_v22 = vadd.f32 %v1031_v51, %v863_v15  ;;  %v1073_v63 = vmax.f32 %v962_v43, 0.0  ;;  %v795_v60 = vadd.f32 %v1718_v58, %v1922_v26 }
 0x193   : > { %v954_v49 = vadd.f32 %v953_v23, %v785_v57  ;;  %v1101_v62 = vmax.f32 %v1032_v22, 0.0  ;;  %v1137_v3 = vpack.c.bf16 %v1073_v63, %v1073_v63 }
 0x195   : > { %v1070_v0 = vmax.f32 %v954_v49, 0.0  ;;  %v1165_v1 = vpack.c.bf16 %v1101_v62, %v1101_v62  ;;  %1202 = vst.msk [vmem:[%s1904_s16 + $0x80] sm:$0xf] %vm1169_vm1, %v1137_v3 }
 0x196   : > { %v864_v21 = vpop.f32.mrf.mxu2  ;;  %v963_v32 = vpop.f32.mrf.mxu1 }
 0x197   : > { %v1134_v6 = vpack.c.bf16 %v1070_v0, %v1070_v0  ;;  %1230 = vst.msk [vmem:[%s1904_s16 + $0xf0] sm:$0xf] %vm1169_vm1, %v1165_v1  ;;  %v865_v8 = vadd.f32 %v1718_v58, %v864_v21  ;;  %v964_v11 = vadd.f32 %v963_v32, %v795_v60 }
 0x198   : > { %v787_v9 = vpop.f32.mrf.mxu0 }
 0x199   : > { %1199 = vst.msk [vmem:[%s1904_s16 + $0x74] sm:$0xf] %vm1169_vm1, %v1134_v6  ;;  %v788_v12 = vadd.f32 %v1718_v58, %v787_v9  ;;  %v1034_v50 = vadd.f32 %v1033_v10, %v865_v8  ;;  %v1074_v16 = vmax.f32 %v964_v11, 0.0 }
 0x19b   : > { %v957_v13 = vadd.f32 %v956_v33, %v788_v12  ;;  %v1102_v2 = vmax.f32 %v1034_v50, 0.0  ;;  %v1138_v17 = vpack.c.bf16 %v1074_v16, %v1074_v16 }
 0x19d   : > { %v1071_v54 = vmax.f32 %v957_v13, 0.0  ;;  %v1166_v26 = vpack.c.bf16 %v1102_v2, %v1102_v2  ;;  %1203 = vst.msk [vmem:[%s1904_s16 + $0x84] sm:$0xf] %vm1169_vm1, %v1138_v17 }
 0x19e   : > { %v867_v23 = vpop.f32.mrf.mxu2 }
 0x19f   : > { %v1135_v18 = vpack.c.bf16 %v1071_v54, %v1071_v54  ;;  %1231 = vst.msk [vmem:[%s1904_s16 + $0xf4] sm:$0xf] %vm1169_vm1, %v1166_v26  ;;  %v868_v24 = vadd.f32 %v1718_v58, %v867_v23 }
 0x1a0   : > { %v789_v25 = vpop.f32.mrf.mxu0 }
 0x1a1   : > { %1200 = vst.msk [vmem:[%s1904_s16 + $0x78] sm:$0xf] %vm1169_vm1, %v1135_v18  ;;  %v790_v44 = vadd.f32 %v1718_v58, %v789_v25  ;;  %v1037_v14 = vadd.f32 %v1036_v20, %v868_v24 }
 0x1a3   : > { %v959_v7 = vadd.f32 %v958_v42, %v790_v44  ;;  %v1103_v27 = vmax.f32 %v1037_v14, 0.0 }
 0x1a5   : > { %v1072_v28 = vmax.f32 %v959_v7, 0.0  ;;  %v1167_v29 = vpack.c.bf16 %v1103_v27, %v1103_v27 }
 0x1a6   : > { %v869_v19 = vpop.f32.mrf.mxu2 }
 0x1a7   : > { %v1136_v45 = vpack.c.bf16 %v1072_v28, %v1072_v28  ;;  %1232 = vst.msk [vmem:[%s1904_s16 + $0xf8] sm:$0xf] %vm1169_vm1, %v1167_v29  ;;  %v870_v33 = vadd.f32 %v1718_v58, %v869_v19 }
 0x1a9   : > { %1201 = vst.msk [vmem:[%s1904_s16 + $0x7c] sm:$0xf] %vm1169_vm1, %v1136_v45  ;;  %v1039_v36 = vadd.f32 %v1038_v34, %v870_v33 }
 0x1ab   : > { %v1104_v37 = vmax.f32 %v1039_v36, 0.0 }
 0x1ad   : > { %v1168_v4 = vpack.c.bf16 %v1104_v37, %v1104_v37 }
 0x1af   : > { %1233 = vst.msk [vmem:[%s1904_s16 + $0xfc] sm:$0xf] %vm1169_vm1, %v1168_v4 }
 0x1b0 PF: > { %s13_s12 = sadd.s32 1, %s1725_s12  }
 0x1b1   : > { %p10_p4 = scmp.ge.s32.totalorder %s13_s12, 4  }
 0x1b3   :  { %12 = sbr.rel (!%p10_p4) target bundleno = 1 (0x1), region = 62 }

// kernel: forward.17
= control target key start
LH: loop header
LB: loop body
LE: loop exit
PB: predicated region body
PF: predicated region fallthrough
CT: control target
= control target key end

     0   :  { %vm410_vm0 = vcmask 261120   ;;  %vm724_vm1 = vcmask 519168   ;;  %s1560_s1 = inlined_call_operand.vmem [shape: bf16[288,64], index: 1, kind: input, shape index: {}]   ;;  %s1561_s0 = inlined_call_operand.vmem [shape: bf16[208,288], index: 0, kind: input, shape index: {}]   ;;  %s1562_s2 = inlined_call_operand.vmem [shape: f32[1,64], index: 2, kind: input, shape index: {}]   ;;  %s1563_s3 = inlined_call_operand.vmem [shape: bf16[208,64], index: 3, kind: output, shape index: {}]  }
   0x1   :  { %v1042_v0 = vld [vmem:[%s1560_s1 + $0x38] sm:$0xff]  ;;  %v1101_v2 = vld [vmem:[%s1560_s1 + $0x88] sm:$0xff]  ;;  %v1041_v3 = vld [vmem:[%s1560_s1 + $0x30] sm:$0xff] }
   0x2   :  { %v1050_v1 = vld [vmem:[%s1560_s1 + $0x78] sm:$0xff]  ;;  %450 = vmatpush.bf16.msra.mxu0 %v1042_v0  ;;  %1053 = vmatpush.bf16.msra.mxu3 %v1042_v0  ;;  %v1049_v4 = vld [vmem:[%s1560_s1 + $0x70] sm:$0xff]  ;;  %v1113_v5 = vld [vmem:[%s1560_s1 + $0x80] sm:$0xff] }
   0x3   :  { %524 = vmatpush.bf16.msra.mxu1 %v1050_v1  ;;  %604 = vmatpush.bf16.msra.mxu2 %v1101_v2  ;;  %v765_v6 = vld [vmem:[%s1561_s0 + $0x8] sm:$0xf]  ;;  %v998_v7 = vld [vmem:[%s1561_s0 + $0x10] sm:$0xf0]  ;;  %v1039_v11 = vld [vmem:[%s1560_s1 + $0x20] sm:$0xff] }
   0x4   :  { %v766_v8 = vor.u32 %v998_v7, %v765_v6  ;;  %v1040_v9 = vld [vmem:[%s1560_s1 + $0x28] sm:$0xff]  ;;  %v1047_v12 = vld [vmem:[%s1560_s1 + $0x60] sm:$0xff]  ;;  %v1038_v13 = vld [vmem:[%s1560_s1 + $0x18] sm:$0xff] }
   0x5   :  { %v1048_v10 = vld [vmem:[%s1560_s1 + $0x68] sm:$0xff]  ;;  %v1046_v14 = vld [vmem:[%s1560_s1 + $0x58] sm:$0xff]  ;;  %v1037_v15 = vld [vmem:[%s1560_s1 + $0x10] sm:$0xff] }
   0x6   :  { %451 = vmatpush.bf16.msra.mxu0 %v1041_v3  ;;  %1054 = vmatpush.bf16.msra.mxu3 %v1041_v3  ;;  %v1045_v16 = vld [vmem:[%s1560_s1 + $0x50] sm:$0xff]  ;;  %v777_v17 = vld [vmem:[%s1561_s0 + $0x20] sm:$0xf]  ;;  %v1001_v18 = vld [vmem:[%s1561_s0 + $0x28] sm:$0xf0] }
   0x7   :  { %525 = vmatpush.bf16.msra.mxu1 %v1049_v4  ;;  %605 = vmatpush.bf16.msra.mxu2 %v1113_v5  ;;  %v778_v19 = vor.u32 %v1001_v18, %v777_v17  ;;  %v1036_v20 = vld [vmem:[%s1560_s1 + $0x8] sm:$0xff]  ;;  %v1035_v22 = vld [vmem:[%s1560_s1] sm:$0xff]  ;;  %v877_v26 = vld [vmem:[%s1561_s0 + $0xf0] sm:$0xf] }
   0x8   :  { %v1044_v21 = vld [vmem:[%s1560_s1 + $0x48] sm:$0xff]  ;;  %v1043_v23 = vld [vmem:[%s1560_s1 + $0x40] sm:$0xff]  ;;  %v1027_v27 = vld [vmem:[%s1561_s0 + $0xf8] sm:$0xf0] }
   0x9   :  { %v757_v24 = vld [vmem:[%s1561_s0] sm:$0xf]  ;;  %v997_v25 = vld [vmem:[%s1561_s0 + $0x8] sm:$0xf0]  ;;  %v996_v28 = vld [vmem:[%s1561_s0 + $0x4] sm:$0xf]  ;;  %v878_v31 = vor.u32 %v1027_v27, %v877_v26 }
   0xa   :  { %983 = vmatmul.msk.bf16.vlgmr.msra.gmra.mxu2 %vm410_vm0, %v766_v8  ;;  %452 = vmatpush.bf16.msra.mxu0 %v1040_v9  ;;  %v759_v29 = vld [vmem:[%s1561_s0 + $0xc] sm:$0xf0]  ;;  %v758_v30 = vor.u32 %v997_v25, %v757_v24  ;;  %v789_v33 = vld [vmem:[%s1561_s0 + $0x38] sm:$0xf]  ;;  %v1004_v34 = vld [vmem:[%s1561_s0 + $0x40] sm:$0xf0] }
   0xb   :  { %1055 = vmatpush.bf16.msra.mxu3 %v1040_v9  ;;  %526 = vmatpush.bf16.msra.mxu1 %v1048_v10  ;;  %v762_v32 = vor.u32 %v996_v28, %v759_v29  ;;  %v790_v35 = vor.u32 %v1004_v34, %v789_v33  ;;  %v769_v36 = vld [vmem:[%s1561_s0 + $0x18] sm:$0xf]  ;;  %v1000_v37 = vld [vmem:[%s1561_s0 + $0x20] sm:$0xf0]  ;;  %v889_v38 = vld [vmem:[%s1561_s0 + $0x108] sm:$0xf] }
   0xc   :  { %v1030_v39 = vld [vmem:[%s1561_s0 + $0x110] sm:$0xf0]  ;;  %v999_v40 = vld [vmem:[%s1561_s0 + $0x1c] sm:$0xf]  ;;  %v771_v41 = vld [vmem:[%s1561_s0 + $0x24] sm:$0xf0]  ;;  %v770_v42 = vor.u32 %v1000_v37, %v769_v36 }
   0xd   :  { %v890_v43 = vor.u32 %v1030_v39, %v889_v38  ;;  %v774_v44 = vor.u32 %v999_v40, %v771_v41  ;;  %v801_v45 = vld [vmem:[%s1561_s0 + $0x50] sm:$0xf]  ;;  %v1007_v46 = vld [vmem:[%s1561_s0 + $0x58] sm:$0xf0]  ;;  %v901_v50 = vld [vmem:[%s1561_s0 + $0x120] sm:$0xf] }
   0xe   :  { %453 = vmatpush.bf16.msra.mxu0 %v1039_v11  ;;  %v802_v47 = vor.u32 %v1007_v46, %v801_v45  ;;  %v781_v48 = vld [vmem:[%s1561_s0 + $0x30] sm:$0xf]  ;;  %v1003_v49 = vld [vmem:[%s1561_s0 + $0x38] sm:$0xf0]  ;;  %v1033_v51 = vld [vmem:[%s1561_s0 + $0x128] sm:$0xf0] }
   0xf   :  { %1056 = vmatpush.bf16.msra.mxu3 %v1039_v11  ;;  %527 = vmatpush.bf16.msra.mxu1 %v1047_v12  ;;  %v1002_v52 = vld [vmem:[%s1561_s0 + $0x34] sm:$0xf]  ;;  %v783_v53 = vld [vmem:[%s1561_s0 + $0x3c] sm:$0xf0]  ;;  %v782_v54 = vor.u32 %v1003_v49, %v781_v48  ;;  %v902_v55 = vor.u32 %v1033_v51, %v901_v50  ;;  %v813_v57 = vld [vmem:[%s1561_s0 + $0x68] sm:$0xf] }
  0x10   :  { %v786_v56 = vor.u32 %v1002_v52, %v783_v53  ;;  %v1010_v58 = vld [vmem:[%s1561_s0 + $0x70] sm:$0xf0]  ;;  %v793_v60 = vld [vmem:[%s1561_s0 + $0x48] sm:$0xf]  ;;  %v1005_v62 = vld [vmem:[%s1561_s0 + $0x4c] sm:$0xf] }
  0x11   :  { %v814_v59 = vor.u32 %v1010_v58, %v813_v57  ;;  %v1006_v61 = vld [vmem:[%s1561_s0 + $0x50] sm:$0xf0]  ;;  %v795_v63 = vld [vmem:[%s1561_s0 + $0x54] sm:$0xf0]  ;;  %v1013_v6 = vld [vmem:[%s1561_s0 + $0x88] sm:$0xf0] }
  0x12   :  { %454 = vmatpush.bf16.msra.mxu0 %v1038_v13  ;;  %v1026_v0 = vld [vmem:[%s1561_s0 + $0xf4] sm:$0xf]  ;;  %v798_v3 = vor.u32 %v1005_v62, %v795_v63  ;;  %v805_v8 = vld [vmem:[%s1561_s0 + $0x60] sm:$0xf]  ;;  %v1009_v9 = vld [vmem:[%s1561_s0 + $0x68] sm:$0xf0] }
  0x13   :  { %1057 = vmatpush.bf16.msra.mxu3 %v1038_v13  ;;  %528 = vmatpush.bf16.msra.mxu1 %v1046_v14  ;;  %v807_v11 = vld [vmem:[%s1561_s0 + $0x6c] sm:$0xf0]  ;;  %v891_v13 = vld [vmem:[%s1561_s0 + $0x114] sm:$0xf0]  ;;  %v1016_v18 = vld [vmem:[%s1561_s0 + $0xa0] sm:$0xf0] }
  0x14   :  { %v837_v17 = vld [vmem:[%s1561_s0 + $0x98] sm:$0xf]  ;;  %v1032_v24 = vld [vmem:[%s1561_s0 + $0x124] sm:$0xf]  ;;  %v903_v25 = vld [vmem:[%s1561_s0 + $0x12c] sm:$0xf0] }
  0x15   :  { %v906_v28 = vor.u32 %v1032_v24, %v903_v25  ;;  %v849_v29 = vld [vmem:[%s1561_s0 + $0xb0] sm:$0xf]  ;;  %v1015_v33 = vld [vmem:[%s1561_s0 + $0x98] sm:$0xf0]  ;;  %v1014_v34 = vld [vmem:[%s1561_s0 + $0x94] sm:$0xf] }
  0x16   :  { %455 = vmatpush.bf16.msra.mxu0 %v1037_v15  ;;  %v897_v36 = vld [vmem:[%s1561_s0 + $0x110] sm:$0xf]  ;;  %v1031_v37 = vld [vmem:[%s1561_s0 + $0x118] sm:$0xf0]  ;;  %v861_v41 = vld [vmem:[%s1561_s0 + $0xc8] sm:$0xf] }
  0x17   :  { %1058 = vmatpush.bf16.msra.mxu3 %v1037_v15  ;;  %529 = vmatpush.bf16.msra.mxu1 %v1045_v16  ;;  %v898_v40 = vor.u32 %v1031_v37, %v897_v36  ;;  %v1018_v45 = vld [vmem:[%s1561_s0 + $0xb0] sm:$0xf0]  ;;  %v1017_v46 = vld [vmem:[%s1561_s0 + $0xac] sm:$0xf]  ;;  %v909_v48 = vld [vmem:[%s1561_s0 + $0x128] sm:$0xf] }
  0x18   :  { %v1034_v49 = vld [vmem:[%s1561_s0 + $0x130] sm:$0xf0]  ;;  %v853_v58 = vld [vmem:[%s1561_s0 + $0xc0] sm:$0xf]  ;;  %v855_v62 = vld [vmem:[%s1561_s0 + $0xcc] sm:$0xf0] }
  0x19   :  { %v910_v53 = vor.u32 %v1034_v49, %v909_v48 }
  0x1a   :  { %984 = vmatmul.msk.bf16.gmra.mxu2 %vm410_vm0, %v778_v19  ;;  %456 = vmatpush.bf16.msra.mxu0 %v1036_v20  ;;  %v838_v19 = vor.u32 %v1016_v18, %v837_v17  ;;  %v865_v18 = vld [vmem:[%s1561_s0 + $0xd8] sm:$0xf] }
  0x1b   :  { %1059 = vmatpush.bf16.msra.mxu3 %v1036_v20  ;;  %530 = vmatpush.bf16.msra.mxu1 %v1044_v21  ;;  %v817_v20 = vld [vmem:[%s1561_s0 + $0x78] sm:$0xf] }
  0x1e   :  { %457 = vmatpush.bf16.msra.mxu0 %v1035_v22 }
  0x1f   :  { %1060 = vmatpush.bf16.msra.mxu3 %v1035_v22  ;;  %531 = vmatpush.bf16.msra.mxu1 %v1043_v23  ;;  %v1011_v22 = vld [vmem:[%s1561_s0 + $0x7c] sm:$0xf] }
  0x21   :  { %458 = vmatmul.bf16.vlgmr.msra.gmra.mxu0 %v758_v30  ;;  %v1019_v30 = vld [vmem:[%s1561_s0 + $0xb8] sm:$0xf0] }
  0x22   :  { %508 = vmatmul.bf16.vlgmr.msra.gmra.mxu3 %v878_v31  ;;  %532 = vmatmul.bf16.vlgmr.msra.gmra.mxu1 %v762_v32  ;;  %v850_v31 = vor.u32 %v1019_v30, %v849_v29  ;;  %v829_v32 = vld [vmem:[%s1561_s0 + $0x90] sm:$0xf] }
  0x23   :  { %1061 = vmatpush.bf16.msrb.mxu3 %v1050_v1  ;;  %v879_v1 = vld [vmem:[%s1561_s0 + $0xfc] sm:$0xf0]  ;;  %v830_v38 = vor.u32 %v1015_v33, %v829_v32 }
  0x27   :  { %1062 = vmatpush.bf16.msrb.mxu3 %v1049_v4  ;;  %v882_v4 = vor.u32 %v1026_v0, %v879_v1 }
  0x2a   :  { %985 = vmatmul.msk.bf16.gmra.mxu2 %vm410_vm0, %v790_v35  ;;  %v831_v35 = vld [vmem:[%s1561_s0 + $0x9c] sm:$0xf0] }
  0x2b   :  { %1063 = vmatpush.bf16.msrb.mxu3 %v1048_v10  ;;  %v1008_v10 = vld [vmem:[%s1561_s0 + $0x64] sm:$0xf]  ;;  %v834_v39 = vor.u32 %v1014_v34, %v831_v35 }
  0x2c   :  { %v810_v15 = vor.u32 %v1008_v10, %v807_v11 }
  0x2f   :  { %1064 = vmatpush.bf16.msrb.mxu3 %v1047_v12  ;;  %v1029_v12 = vld [vmem:[%s1561_s0 + $0x10c] sm:$0xf] }
  0x31   :  { %463 = vmatmul.bf16.gmra.mxu0 %v770_v42  ;;  %v1022_v42 = vld [vmem:[%s1561_s0 + $0xd0] sm:$0xf0] }
  0x32   :  { %513 = vmatmul.bf16.gmra.mxu3 %v890_v43  ;;  %537 = vmatmul.bf16.gmra.mxu1 %v774_v44  ;;  %v862_v43 = vor.u32 %v1022_v42, %v861_v41  ;;  %v841_v44 = vld [vmem:[%s1561_s0 + $0xa8] sm:$0xf] }
  0x33   :  { %1065 = vmatpush.bf16.msrb.mxu3 %v1046_v14  ;;  %v806_v14 = vor.u32 %v1009_v9, %v805_v8  ;;  %v842_v51 = vor.u32 %v1018_v45, %v841_v44  ;;  %v1028_v8 = vld [vmem:[%s1561_s0 + $0x100] sm:$0xf0] }
  0x37   :  { %1066 = vmatpush.bf16.msrb.mxu3 %v1045_v16  ;;  %v894_v16 = vor.u32 %v1029_v12, %v891_v13 }
  0x3a   :  { %986 = vmatmul.msk.bf16.gmra.mxu2 %vm410_vm0, %v802_v47  ;;  %v843_v47 = vld [vmem:[%s1561_s0 + $0xb4] sm:$0xf0] }
  0x3b   :  { %1067 = vmatpush.bf16.msrb.mxu3 %v1044_v21  ;;  %v1012_v21 = vld [vmem:[%s1561_s0 + $0x80] sm:$0xf0]  ;;  %v846_v52 = vor.u32 %v1017_v46, %v843_v47 }
  0x3c   :  { %v818_v26 = vor.u32 %v1012_v21, %v817_v20  ;;  %v1023_v21 = vld [vmem:[%s1561_s0 + $0xdc] sm:$0xf] }
  0x3f   :  { %1068 = vmatpush.bf16.msrb.mxu3 %v1043_v23  ;;  %v819_v23 = vld [vmem:[%s1561_s0 + $0x84] sm:$0xf0] }
  0x40   :  { %v822_v27 = vor.u32 %v1011_v22, %v819_v23  ;;  %v867_v22 = vld [vmem:[%s1561_s0 + $0xe4] sm:$0xf0] }
  0x41   :  { %468 = vmatmul.bf16.gmra.mxu0 %v782_v54  ;;  %v873_v54 = vld [vmem:[%s1561_s0 + $0xe0] sm:$0xf] }
  0x42   :  { %518 = vmatmul.bf16.gmra.mxu3 %v902_v55  ;;  %542 = vmatmul.bf16.gmra.mxu1 %v786_v56  ;;  %v1025_v55 = vld [vmem:[%s1561_s0 + $0xe8] sm:$0xf0] }
  0x43   :  { %1069 = vmatpush.bf16.msra.mxu3 %v1101_v2  ;;  %v794_v2 = vor.u32 %v1006_v61, %v793_v60  ;;  %v874_v57 = vor.u32 %v1025_v55, %v873_v54  ;;  %v1379_v60 = vld [vmem:[%s1562_s2] ss:$0 sm:$0xff]  ;;  %v1020_v61 = vld [vmem:[%s1561_s0 + $0xc4] sm:$0xf] }
  0x47   :  { %1070 = vmatpush.bf16.msra.mxu3 %v1113_v5  ;;  %v825_v5 = vld [vmem:[%s1561_s0 + $0x80] sm:$0xf] }
  0x48   :  { %v826_v7 = vor.u32 %v1013_v6, %v825_v5 }
  0x4a   :  { %987 = vmatmul.msk.bf16.gmra.mxu2 %vm410_vm0, %v814_v59  ;;  %v1021_v59 = vld [vmem:[%s1561_s0 + $0xc8] sm:$0xf0] }
  0x4b   :  { %v854_v0 = vor.u32 %v1021_v59, %v853_v58 }
  0x51   :  { %473 = vmatmul.bf16.gmra.mxu0 %v794_v2  ;;  %v858_v2 = vor.u32 %v1020_v61, %v855_v62 }
  0x52   :  { %547 = vmatmul.bf16.gmra.mxu1 %v798_v3  ;;  %582 = vmatmul.bf16.vlgmr.msrb.gmra.mxu3 %v882_v4 }
  0x5a   :  { %988 = vmatmul.msk.bf16.gmra.mxu2 %vm410_vm0, %v826_v7  ;;  %v885_v7 = vld [vmem:[%s1561_s0 + $0xf8] sm:$0xf] }
  0x5b   :  { %v886_v13 = vor.u32 %v1028_v8, %v885_v7 }
  0x61   :  { %478 = vmatmul.bf16.gmra.mxu0 %v806_v14 }
  0x62   :  { %552 = vmatmul.bf16.gmra.mxu1 %v810_v15  ;;  %587 = vmatmul.bf16.gmra.mxu3 %v894_v16 }
  0x6a   :  { %989 = vmatmul.msk.bf16.gmra.mxu2 %vm410_vm0, %v838_v19  ;;  %v1024_v19 = vld [vmem:[%s1561_s0 + $0xe0] sm:$0xf0] }
  0x71   :  { %483 = vmatmul.bf16.gmra.mxu0 %v818_v26  ;;  %v866_v26 = vor.u32 %v1024_v19, %v865_v18 }
  0x72   :  { %557 = vmatmul.bf16.gmra.mxu1 %v822_v27  ;;  %592 = vmatmul.bf16.gmra.mxu3 %v906_v28  ;;  %v870_v28 = vor.u32 %v1023_v21, %v867_v22 }
  0x7a   :  { %990 = vmatmul.msk.bf16.gmra.mxu2 %vm410_vm0, %v850_v31 }
  0x81   :  { %488 = vmatmul.bf16.gmra.mxu0 %v830_v38 }
  0x82   :  { %562 = vmatmul.bf16.gmra.mxu1 %v834_v39  ;;  %994 = vmatmul.msk.bf16.vlgmr.msra.gmra.mxu3 %vm410_vm0, %v898_v40 }
  0x8a   :  { %991 = vmatmul.msk.bf16.gmra.mxu2 %vm410_vm0, %v862_v43 }
  0x8d   :  { %v607_v50 = vpop.f32.mrf.mxu2 }
  0x91   :  { %493 = vmatmul.bf16.gmra.mxu0 %v842_v51 }
  0x92   :  { %567 = vmatmul.bf16.gmra.mxu1 %v846_v52  ;;  %995 = vmatmul.msk.bf16.gmra.mxu3 %vm410_vm0, %v910_v53 }
  0x95   :  { %v609_v56 = vpop.f32.mrf.mxu2 }
  0x9a   :  { %992 = vmatmul.msk.bf16.gmra.mxu2 %vm410_vm0, %v874_v57 }
  0x9d   :  { %v612_v63 = vpop.f32.mrf.mxu2 }
  0x9e   :  { %v459_v1 = vpop.f32.mrf.mxu0 }
  0x9f   :  { %v460_v3 = vadd.f32 %v1379_v60, %v459_v1  ;;  %v533_v4 = vpop.f32.mrf.mxu1 }
  0xa1   :  { %v534_v5 = vadd.f32 %v533_v4, %v460_v3  ;;  %498 = vmatmul.bf16.gmra.mxu0 %v854_v0 }
  0xa2   :  { %572 = vmatmul.bf16.gmra.mxu1 %v858_v2 }
  0xa3   :  { %v608_v6 = vadd.f32 %v607_v50, %v534_v5 }
  0xa5   :  { %v672_v9 = vmax.f32 %v608_v6, 0.0  ;;  %v1394_v10 = vpop.f32.mrf.mxu3  ;;  %v614_v11 = vpop.f32.mrf.mxu2 }
  0xa6   :  { %v461_v12 = vpop.f32.mrf.mxu0  ;;  %v510_v7 = vadd.f32 %v1379_v60, %v1394_v10 }
  0xa7   :  { %v698_v14 = vpack.c.bf16 %v672_v9, %v672_v9  ;;  %v462_v15 = vadd.f32 %v1379_v60, %v461_v12  ;;  %v535_v16 = vpop.f32.mrf.mxu1 }
  0xa9   :  { %725 = vst.msk [vmem:[%s1563_s3] sm:$0xf] %vm724_vm1, %v698_v14  ;;  %v536_v17 = vadd.f32 %v535_v16, %v462_v15 }
  0xaa   :  { %993 = vmatmul.msk.bf16.gmra.mxu2 %vm410_vm0, %v886_v13 }
  0xab   :  { %v610_v20 = vadd.f32 %v609_v56, %v536_v17 }
  0xad   :  { %v673_v23 = vmax.f32 %v610_v20, 0.0  ;;  %v1414_v24 = vpop.f32.mrf.mxu3  ;;  %v617_v25 = vpop.f32.mrf.mxu2 }
  0xae   :  { %v464_v27 = vpop.f32.mrf.mxu0  ;;  %v512_v10 = vadd.f32 %v1379_v60, %v1414_v24 }
  0xaf   :  { %v699_v29 = vpack.c.bf16 %v673_v23, %v673_v23  ;;  %v465_v30 = vadd.f32 %v1379_v60, %v464_v27  ;;  %v538_v31 = vpop.f32.mrf.mxu1 }
  0xb1   :  { %726 = vst.msk [vmem:[%s1563_s3 + $0x4] sm:$0xf] %vm724_vm1, %v699_v29  ;;  %v539_v32 = vadd.f32 %v538_v31, %v465_v30  ;;  %503 = vmatmul.bf16.gmra.mxu0 %v866_v26 }
  0xb2   :  { %577 = vmatmul.bf16.gmra.mxu1 %v870_v28 }
  0xb3   :  { %v613_v33 = vadd.f32 %v612_v63, %v539_v32 }
  0xb5   :  { %v674_v34 = vmax.f32 %v613_v33, 0.0  ;;  %v1421_v35 = vpop.f32.mrf.mxu3  ;;  %v619_v36 = vpop.f32.mrf.mxu2 }
  0xb6   :  { %v466_v37 = vpop.f32.mrf.mxu0 }
  0xb7   :  { %v700_v38 = vpack.c.bf16 %v674_v34, %v674_v34  ;;  %v467_v39 = vadd.f32 %v1379_v60, %v466_v37  ;;  %v540_v40 = vpop.f32.mrf.mxu1 }
  0xb9   :  { %727 = vst.msk [vmem:[%s1563_s3 + $0x8] sm:$0xf] %vm724_vm1, %v700_v38  ;;  %v541_v41 = vadd.f32 %v540_v40, %v467_v39 }
  0xbb   :  { %v615_v42 = vadd.f32 %v614_v11, %v541_v41 }
  0xbd   :  { %v675_v43 = vmax.f32 %v615_v42, 0.0  ;;  %v1428_v44 = vpop.f32.mrf.mxu3  ;;  %v622_v45 = vpop.f32.mrf.mxu2 }
  0xbe   :  { %v469_v46 = vpop.f32.mrf.mxu0 }
  0xbf   :  { %v701_v47 = vpack.c.bf16 %v675_v43, %v675_v43  ;;  %v470_v48 = vadd.f32 %v1379_v60, %v469_v46  ;;  %v543_v49 = vpop.f32.mrf.mxu1 }
  0xc1   :  { %728 = vst.msk [vmem:[%s1563_s3 + $0xc] sm:$0xf] %vm724_vm1, %v701_v47  ;;  %v544_v50 = vadd.f32 %v543_v49, %v470_v48 }
  0xc3   :  { %v618_v51 = vadd.f32 %v617_v25, %v544_v50 }
  0xc5   :  { %v676_v52 = vmax.f32 %v618_v51, 0.0  ;;  %v1435_v53 = vpop.f32.mrf.mxu3  ;;  %v624_v54 = vpop.f32.mrf.mxu2 }
  0xc6   :  { %v471_v55 = vpop.f32.mrf.mxu0 }
  0xc7   :  { %v702_v56 = vpack.c.bf16 %v676_v52, %v676_v52  ;;  %v472_v57 = vadd.f32 %v1379_v60, %v471_v55  ;;  %v545_v58 = vpop.f32.mrf.mxu1 }
  0xc9   :  { %729 = vst.msk [vmem:[%s1563_s3 + $0x10] sm:$0xf] %vm724_vm1, %v702_v56  ;;  %v546_v59 = vadd.f32 %v545_v58, %v472_v57 }
  0xcb   :  { %v620_v61 = vadd.f32 %v619_v36, %v546_v59 }
  0xcd   :  { %v677_v62 = vmax.f32 %v620_v61, 0.0  ;;  %v1442_v63 = vpop.f32.mrf.mxu3  ;;  %v627_v0 = vpop.f32.mrf.mxu2 }
  0xce   :  { %v474_v1 = vpop.f32.mrf.mxu0 }
  0xcf   :  { %v703_v2 = vpack.c.bf16 %v677_v62, %v677_v62  ;;  %v475_v3 = vadd.f32 %v1379_v60, %v474_v1  ;;  %v548_v4 = vpop.f32.mrf.mxu1 }
  0xd1   :  { %730 = vst.msk [vmem:[%s1563_s3 + $0x14] sm:$0xf] %vm724_vm1, %v703_v2  ;;  %v549_v5 = vadd.f32 %v548_v4, %v475_v3 }
  0xd3   :  { %v623_v6 = vadd.f32 %v622_v45, %v549_v5  ;;  %v515_v5 = vadd.f32 %v1379_v60, %v1421_v35  ;;  %v517_v35 = vadd.f32 %v1379_v60, %v1428_v44 }
  0xd5   :  { %v678_v8 = vmax.f32 %v623_v6, 0.0  ;;  %v583_v9 = vpop.f32.mrf.mxu3  ;;  %v629_v11 = vpop.f32.mrf.mxu2 }
  0xd6   :  { %v1451_v12 = vadd.f32 %v583_v9, %v510_v7  ;;  %v476_v13 = vpop.f32.mrf.mxu0 }
  0xd7   :  { %v704_v14 = vpack.c.bf16 %v678_v8, %v678_v8  ;;  %v477_v15 = vadd.f32 %v1379_v60, %v476_v13  ;;  %v550_v16 = vpop.f32.mrf.mxu1 }
  0xd9   :  { %731 = vst.msk [vmem:[%s1563_s3 + $0x18] sm:$0xf] %vm724_vm1, %v704_v14  ;;  %v551_v17 = vadd.f32 %v550_v16, %v477_v15 }
  0xdb   :  { %v625_v18 = vadd.f32 %v624_v54, %v551_v17 }
  0xdd   :  { %v679_v19 = vmax.f32 %v625_v18, 0.0  ;;  %v585_v20 = vpop.f32.mrf.mxu3  ;;  %v632_v21 = vpop.f32.mrf.mxu2 }
  0xde   :  { %v1460_v22 = vadd.f32 %v585_v20, %v512_v10  ;;  %v479_v23 = vpop.f32.mrf.mxu0 }
  0xdf   :  { %v705_v25 = vpack.c.bf16 %v679_v19, %v679_v19  ;;  %v480_v26 = vadd.f32 %v1379_v60, %v479_v23  ;;  %v553_v27 = vpop.f32.mrf.mxu1 }
  0xe1   :  { %732 = vst.msk [vmem:[%s1563_s3 + $0x1c] sm:$0xf] %vm724_vm1, %v705_v25  ;;  %v554_v28 = vadd.f32 %v553_v27, %v480_v26 }
  0xe3   :  { %v628_v29 = vadd.f32 %v627_v0, %v554_v28 }
  0xe5   :  { %v680_v30 = vmax.f32 %v628_v29, 0.0  ;;  %v588_v31 = vpop.f32.mrf.mxu3  ;;  %v634_v24 = vpop.f32.mrf.mxu2 }
  0xe6   :  { %v481_v32 = vpop.f32.mrf.mxu0  ;;  %v589_v7 = vadd.f32 %v588_v31, %v515_v5 }
  0xe7   :  { %v706_v33 = vpack.c.bf16 %v680_v30, %v680_v30  ;;  %v482_v34 = vadd.f32 %v1379_v60, %v481_v32  ;;  %v555_v36 = vpop.f32.mrf.mxu1  ;;  %v520_v32 = vadd.f32 %v1379_v60, %v1435_v53 }
  0xe9   :  { %733 = vst.msk [vmem:[%s1563_s3 + $0x20] sm:$0xf] %vm724_vm1, %v706_v33  ;;  %v556_v37 = vadd.f32 %v555_v36, %v482_v34 }
  0xeb   :  { %v630_v38 = vadd.f32 %v629_v11, %v556_v37 }
  0xed   :  { %v681_v39 = vmax.f32 %v630_v38, 0.0  ;;  %v590_v40 = vpop.f32.mrf.mxu3  ;;  %v637_v41 = vpop.f32.mrf.mxu2 }
  0xee   :  { %v484_v42 = vpop.f32.mrf.mxu0 }
  0xef   :  { %v707_v43 = vpack.c.bf16 %v681_v39, %v681_v39  ;;  %v485_v45 = vadd.f32 %v1379_v60, %v484_v42  ;;  %v558_v46 = vpop.f32.mrf.mxu1 }
  0xf1   :  { %734 = vst.msk [vmem:[%s1563_s3 + $0x24] sm:$0xf] %vm724_vm1, %v707_v43  ;;  %v559_v47 = vadd.f32 %v558_v46, %v485_v45 }
  0xf3   :  { %v633_v48 = vadd.f32 %v632_v21, %v559_v47  ;;  %v591_v21 = vadd.f32 %v590_v40, %v517_v35  ;;  %v522_v47 = vadd.f32 %v1379_v60, %v1442_v63 }
  0xf5   :  { %v682_v49 = vmax.f32 %v633_v48, 0.0  ;;  %v593_v50 = vpop.f32.mrf.mxu3  ;;  %v639_v51 = vpop.f32.mrf.mxu2 }
  0xf6   :  { %v486_v52 = vpop.f32.mrf.mxu0  ;;  %v594_v36 = vadd.f32 %v593_v50, %v520_v32 }
  0xf7   :  { %v708_v54 = vpack.c.bf16 %v682_v49, %v682_v49  ;;  %v487_v55 = vadd.f32 %v1379_v60, %v486_v52  ;;  %v560_v56 = vpop.f32.mrf.mxu1 }
  0xf9   :  { %735 = vst.msk [vmem:[%s1563_s3 + $0x28] sm:$0xf] %vm724_vm1, %v708_v54  ;;  %v561_v57 = vadd.f32 %v560_v56, %v487_v55 }
  0xfb   :  { %v635_v58 = vadd.f32 %v634_v24, %v561_v57 }
  0xfd   :  { %v683_v59 = vmax.f32 %v635_v58, 0.0  ;;  %v595_v61 = vpop.f32.mrf.mxu3  ;;  %v642_v62 = vpop.f32.mrf.mxu2 }
  0xfe   :  { %v489_v0 = vpop.f32.mrf.mxu0  ;;  %v596_v50 = vadd.f32 %v595_v61, %v522_v47 }
  0xff   :  { %v709_v1 = vpack.c.bf16 %v683_v59, %v683_v59  ;;  %v490_v2 = vadd.f32 %v1379_v60, %v489_v0  ;;  %v563_v3 = vpop.f32.mrf.mxu1 }
 0x101   :  { %736 = vst.msk [vmem:[%s1563_s3 + $0x2c] sm:$0xf] %vm724_vm1, %v709_v1  ;;  %v564_v4 = vadd.f32 %v563_v3, %v490_v2 }
 0x103   :  { %v638_v6 = vadd.f32 %v637_v41, %v564_v4 }
 0x105   :  { %v684_v8 = vmax.f32 %v638_v6, 0.0  ;;  %v644_v9 = vpop.f32.mrf.mxu2  ;;  %v662_v11 = vpop.f32.mrf.mxu3 }
 0x106   :  { %v663_v13 = vadd.f32 %v662_v11, %v589_v7  ;;  %v491_v14 = vpop.f32.mrf.mxu0 }
 0x107   :  { %v710_v15 = vpack.c.bf16 %v684_v8, %v684_v8  ;;  %v492_v16 = vadd.f32 %v1379_v60, %v491_v14  ;;  %v565_v17 = vpop.f32.mrf.mxu1 }
 0x108   :  { %v694_v18 = vmax.f32 %v663_v13, 0.0 }
 0x109   :  { %737 = vst.msk [vmem:[%s1563_s3 + $0x30] sm:$0xf] %vm724_vm1, %v710_v15  ;;  %v566_v10 = vadd.f32 %v565_v17, %v492_v16 }
 0x10a   :  { %v720_v19 = vpack.c.bf16 %v694_v18, %v694_v18 }
 0x10b   :  { %v640_v20 = vadd.f32 %v639_v51, %v566_v10 }
 0x10c   :  { %747 = vst.msk [vmem:[%s1563_s3 + $0x58] sm:$0xf] %vm724_vm1, %v720_v19 }
 0x10d   :  { %v685_v23 = vmax.f32 %v640_v20, 0.0  ;;  %v647_v25 = vpop.f32.mrf.mxu2  ;;  %v664_v26 = vpop.f32.mrf.mxu3 }
 0x10e   :  { %v665_v27 = vadd.f32 %v664_v26, %v591_v21  ;;  %v494_v28 = vpop.f32.mrf.mxu0 }
 0x10f   :  { %v711_v29 = vpack.c.bf16 %v685_v23, %v685_v23  ;;  %v495_v30 = vadd.f32 %v1379_v60, %v494_v28  ;;  %v568_v31 = vpop.f32.mrf.mxu1 }
 0x110   :  { %v695_v24 = vmax.f32 %v665_v27, 0.0 }
 0x111   :  { %738 = vst.msk [vmem:[%s1563_s3 + $0x34] sm:$0xf] %vm724_vm1, %v711_v29  ;;  %v569_v44 = vadd.f32 %v568_v31, %v495_v30 }
 0x112   :  { %v721_v33 = vpack.c.bf16 %v695_v24, %v695_v24 }
 0x113   :  { %v643_v34 = vadd.f32 %v642_v62, %v569_v44 }
 0x114   :  { %748 = vst.msk [vmem:[%s1563_s3 + $0x5c] sm:$0xf] %vm724_vm1, %v721_v33 }
 0x115   :  { %v686_v37 = vmax.f32 %v643_v34, 0.0  ;;  %v649_v38 = vpop.f32.mrf.mxu2  ;;  %v667_v39 = vpop.f32.mrf.mxu3 }
 0x116   :  { %v668_v40 = vadd.f32 %v667_v39, %v594_v36  ;;  %v496_v41 = vpop.f32.mrf.mxu0 }
 0x117   :  { %v712_v42 = vpack.c.bf16 %v686_v37, %v686_v37  ;;  %v497_v43 = vadd.f32 %v1379_v60, %v496_v41  ;;  %v570_v45 = vpop.f32.mrf.mxu1 }
 0x118   :  { %v696_v46 = vmax.f32 %v668_v40, 0.0 }
 0x119   :  { %739 = vst.msk [vmem:[%s1563_s3 + $0x38] sm:$0xf] %vm724_vm1, %v712_v42  ;;  %v571_v53 = vadd.f32 %v570_v45, %v497_v43 }
 0x11a   :  { %v722_v48 = vpack.c.bf16 %v696_v46, %v696_v46 }
 0x11b   :  { %v645_v49 = vadd.f32 %v644_v9, %v571_v53 }
 0x11c   :  { %749 = vst.msk [vmem:[%s1563_s3 + $0x60] sm:$0xf] %vm724_vm1, %v722_v48 }
 0x11d   :  { %v687_v51 = vmax.f32 %v645_v49, 0.0  ;;  %v652_v52 = vpop.f32.mrf.mxu2  ;;  %v669_v54 = vpop.f32.mrf.mxu3 }
 0x11e   :  { %v670_v55 = vadd.f32 %v669_v54, %v596_v50  ;;  %v499_v56 = vpop.f32.mrf.mxu0 }
 0x11f   :  { %v713_v57 = vpack.c.bf16 %v687_v51, %v687_v51  ;;  %v500_v58 = vadd.f32 %v1379_v60, %v499_v56  ;;  %v573_v59 = vpop.f32.mrf.mxu1 }
 0x120   :  { %v697_v62 = vmax.f32 %v670_v55, 0.0 }
 0x121   :  { %740 = vst.msk [vmem:[%s1563_s3 + $0x3c] sm:$0xf] %vm724_vm1, %v713_v57  ;;  %v574_v63 = vadd.f32 %v573_v59, %v500_v58 }
 0x122   :  { %v723_v61 = vpack.c.bf16 %v697_v62, %v697_v62 }
 0x123   :  { %v648_v0 = vadd.f32 %v647_v25, %v574_v63 }
 0x124   :  { %750 = vst.msk [vmem:[%s1563_s3 + $0x64] sm:$0xf] %vm724_vm1, %v723_v61 }
 0x125   :  { %v688_v1 = vmax.f32 %v648_v0, 0.0  ;;  %v654_v2 = vpop.f32.mrf.mxu2 }
 0x126   :  { %v501_v3 = vpop.f32.mrf.mxu0 }
 0x127   :  { %v714_v4 = vpack.c.bf16 %v688_v1, %v688_v1  ;;  %v502_v5 = vadd.f32 %v1379_v60, %v501_v3  ;;  %v575_v6 = vpop.f32.mrf.mxu1 }
 0x129   :  { %741 = vst.msk [vmem:[%s1563_s3 + $0x40] sm:$0xf] %vm724_vm1, %v714_v4  ;;  %v576_v7 = vadd.f32 %v575_v6, %v502_v5 }
 0x12b   :  { %v650_v8 = vadd.f32 %v649_v38, %v576_v7 }
 0x12d   :  { %v689_v9 = vmax.f32 %v650_v8, 0.0  ;;  %v657_v11 = vpop.f32.mrf.mxu2 }
 0x12e   :  { %v658_v13 = vadd.f32 %v657_v11, %v1451_v12  ;;  %v504_v14 = vpop.f32.mrf.mxu0 }
 0x12f   :  { %v715_v15 = vpack.c.bf16 %v689_v9, %v689_v9  ;;  %v505_v16 = vadd.f32 %v1379_v60, %v504_v14  ;;  %v578_v17 = vpop.f32.mrf.mxu1 }
 0x130   :  { %v692_v18 = vmax.f32 %v658_v13, 0.0 }
 0x131   :  { %742 = vst.msk [vmem:[%s1563_s3 + $0x44] sm:$0xf] %vm724_vm1, %v715_v15  ;;  %v579_v10 = vadd.f32 %v578_v17, %v505_v16 }
 0x132   :  { %v718_v35 = vpack.c.bf16 %v692_v18, %v692_v18 }
 0x133   :  { %v653_v19 = vadd.f32 %v652_v52, %v579_v10 }
 0x134   :  { %745 = vst.msk [vmem:[%s1563_s3 + $0x50] sm:$0xf] %vm724_vm1, %v718_v35 }
 0x135   :  { %v690_v12 = vmax.f32 %v653_v19, 0.0  ;;  %v659_v20 = vpop.f32.mrf.mxu2 }
 0x136   :  { %v660_v21 = vadd.f32 %v659_v20, %v1460_v22  ;;  %v506_v23 = vpop.f32.mrf.mxu0 }
 0x137   :  { %v716_v25 = vpack.c.bf16 %v690_v12, %v690_v12  ;;  %v507_v26 = vadd.f32 %v1379_v60, %v506_v23  ;;  %v580_v28 = vpop.f32.mrf.mxu1 }
 0x138   :  { %v693_v27 = vmax.f32 %v660_v21, 0.0 }
 0x139   :  { %743 = vst.msk [vmem:[%s1563_s3 + $0x48] sm:$0xf] %vm724_vm1, %v716_v25  ;;  %v581_v29 = vadd.f32 %v580_v28, %v507_v26 }
 0x13a   :  { %v719_v30 = vpack.c.bf16 %v693_v27, %v693_v27 }
 0x13b   :  { %v655_v31 = vadd.f32 %v654_v2, %v581_v29 }
 0x13c   :  { %746 = vst.msk [vmem:[%s1563_s3 + $0x54] sm:$0xf] %vm724_vm1, %v719_v30 }
 0x13d   :  { %v691_v22 = vmax.f32 %v655_v31, 0.0 }
 0x13f   :  { %v717_v24 = vpack.c.bf16 %v691_v22, %v691_v22 }
 0x141   :  { %744 = vst.msk [vmem:[%s1563_s3 + $0x4c] sm:$0xf] %vm724_vm1, %v717_v24 }

// kernel: forward.18
= control target key start
LH: loop header
LB: loop body
LE: loop exit
PB: predicated region body
PF: predicated region fallthrough
CT: control target
= control target key end

     0   :  { %vm400_vm0 = vcmask 523264   ;;  %s1069_s1 = inlined_call_operand.vmem [shape: bf16[576,128], index: 1, kind: input, shape index: {}]   ;;  %s1070_s2 = inlined_call_operand.vmem [shape: f32[1,128], index: 2, kind: input, shape index: {}]   ;;  %s1071_s0 = inlined_call_operand.vmem [shape: bf16[48,576], index: 0, kind: input, shape index: {}]   ;;  %s1072_s3 = inlined_call_operand.vmem [shape: bf16[48,128], index: 3, kind: output, shape index: {}]  }
   0x1   :  { %v781_v0 = vld [vmem:[%s1069_s1 + $0x38] sm:$0xff]  ;;  %v780_v1 = vld [vmem:[%s1069_s1 + $0x30] sm:$0xff]  ;;  %v779_v6 = vld [vmem:[%s1069_s1 + $0x28] sm:$0xff] }
   0x2   :  { %827 = vmatpush.bf16.msra.mxu1 %v781_v0  ;;  %410 = vmatpush.bf16.msra.mxu0 %v781_v0  ;;  %v797_v2 = vld [vmem:[%s1069_s1 + $0xb8] sm:$0xff]  ;;  %v796_v4 = vld [vmem:[%s1069_s1 + $0xb0] sm:$0xff]  ;;  %v795_v7 = vld [vmem:[%s1069_s1 + $0xa8] sm:$0xff] }
   0x3   :  { %v805_v3 = vld [vmem:[%s1069_s1 + $0xf8] sm:$0xff]  ;;  %458 = vmatpush.bf16.msra.mxu2 %v797_v2  ;;  %v804_v5 = vld [vmem:[%s1069_s1 + $0xf0] sm:$0xff]  ;;  %v803_v8 = vld [vmem:[%s1069_s1 + $0xe8] sm:$0xff] }
   0x4   :  { %482 = vmatpush.bf16.msra.mxu3 %v805_v3  ;;  %v778_v9 = vld [vmem:[%s1069_s1 + $0x20] sm:$0xff]  ;;  %v777_v12 = vld [vmem:[%s1069_s1 + $0x18] sm:$0xff]  ;;  %v776_v15 = vld [vmem:[%s1069_s1 + $0x10] sm:$0xff] }
   0x5   :  { %v794_v10 = vld [vmem:[%s1069_s1 + $0xa0] sm:$0xff]  ;;  %v793_v13 = vld [vmem:[%s1069_s1 + $0x98] sm:$0xff]  ;;  %v792_v16 = vld [vmem:[%s1069_s1 + $0x90] sm:$0xff] }
   0x6   :  { %828 = vmatpush.bf16.msra.mxu1 %v780_v1  ;;  %411 = vmatpush.bf16.msra.mxu0 %v780_v1  ;;  %v802_v11 = vld [vmem:[%s1069_s1 + $0xe0] sm:$0xff]  ;;  %v801_v14 = vld [vmem:[%s1069_s1 + $0xd8] sm:$0xff]  ;;  %v800_v17 = vld [vmem:[%s1069_s1 + $0xd0] sm:$0xff] }
   0x7   :  { %459 = vmatpush.bf16.msra.mxu2 %v796_v4  ;;  %v775_v18 = vld [vmem:[%s1069_s1 + $0x8] sm:$0xff]  ;;  %v774_v21 = vld [vmem:[%s1069_s1] sm:$0xff]  ;;  %v766_v23 = vld [vmem:[%s1071_s0 + $0x38] sm:$0xf0] }
   0x8   :  { %483 = vmatpush.bf16.msra.mxu3 %v804_v5  ;;  %v791_v19 = vld [vmem:[%s1069_s1 + $0x88] sm:$0xff]  ;;  %v554_v24 = vld [vmem:[%s1071_s0] sm:$0xf]  ;;  %v761_v25 = vld [vmem:[%s1071_s0 + $0x10] sm:$0xf0] }
   0x9   :  { %v799_v20 = vld [vmem:[%s1069_s1 + $0xc8] sm:$0xff]  ;;  %v789_v26 = vld [vmem:[%s1069_s1 + $0x78] sm:$0xff]  ;;  %v790_v28 = vld [vmem:[%s1069_s1 + $0x80] sm:$0xff]  ;;  %v555_v32 = vor.u32 %v761_v25, %v554_v24 }
   0xa   :  { %829 = vmatpush.bf16.msra.mxu1 %v779_v6  ;;  %412 = vmatpush.bf16.msra.mxu0 %v779_v6  ;;  %v574_v22 = vld [vmem:[%s1071_s0 + $0x28] sm:$0xf]  ;;  %v809_v27 = vld [vmem:[%s1069_s1 + $0x118] sm:$0xff]  ;;  %v798_v29 = vld [vmem:[%s1069_s1 + $0xc0] sm:$0xff] }
   0xb   :  { %460 = vmatpush.bf16.msra.mxu2 %v795_v7  ;;  %v562_v30 = vld [vmem:[%s1071_s0 + $0x8] sm:$0xf]  ;;  %v575_v31 = vor.u32 %v766_v23, %v574_v22  ;;  %v762_v33 = vld [vmem:[%s1071_s0 + $0x18] sm:$0xf0]  ;;  %v760_v34 = vld [vmem:[%s1071_s0 + $0xc] sm:$0xf] }
   0xc   :  { %484 = vmatpush.bf16.msra.mxu3 %v803_v8  ;;  %v564_v35 = vld [vmem:[%s1071_s0 + $0x1c] sm:$0xf0]  ;;  %v788_v36 = vld [vmem:[%s1069_s1 + $0x70] sm:$0xff]  ;;  %v563_v38 = vor.u32 %v762_v33, %v562_v30  ;;  %v787_v40 = vld [vmem:[%s1069_s1 + $0x68] sm:$0xff] }
   0xd   :  { %v808_v37 = vld [vmem:[%s1069_s1 + $0x110] sm:$0xff]  ;;  %v567_v39 = vor.u32 %v760_v34, %v564_v35  ;;  %v807_v41 = vld [vmem:[%s1069_s1 + $0x108] sm:$0xff]  ;;  %v786_v42 = vld [vmem:[%s1069_s1 + $0x60] sm:$0xff] }
   0xe   :  { %830 = vmatpush.bf16.msra.mxu1 %v778_v9  ;;  %413 = vmatpush.bf16.msra.mxu0 %v778_v9  ;;  %v806_v43 = vld [vmem:[%s1069_s1 + $0x100] sm:$0xff]  ;;  %v594_v44 = vld [vmem:[%s1071_s0 + $0x50] sm:$0xf]  ;;  %v785_v48 = vld [vmem:[%s1069_s1 + $0x58] sm:$0xff] }
   0xf   :  { %461 = vmatpush.bf16.msra.mxu2 %v794_v10  ;;  %v771_v45 = vld [vmem:[%s1071_s0 + $0x60] sm:$0xf0]  ;;  %v570_v46 = vld [vmem:[%s1071_s0 + $0x10] sm:$0xf]  ;;  %v765_v53 = vld [vmem:[%s1071_s0 + $0x34] sm:$0xf] }
  0x10   :  { %485 = vmatpush.bf16.msra.mxu3 %v802_v11  ;;  %v763_v47 = vld [vmem:[%s1071_s0 + $0x20] sm:$0xf0]  ;;  %v582_v49 = vld [vmem:[%s1071_s0 + $0x30] sm:$0xf]  ;;  %v595_v50 = vor.u32 %v771_v45, %v594_v44  ;;  %v584_v54 = vld [vmem:[%s1071_s0 + $0x44] sm:$0xf0] }
  0x11   :  { %v571_v51 = vor.u32 %v763_v47, %v570_v46  ;;  %v767_v52 = vld [vmem:[%s1071_s0 + $0x40] sm:$0xf0]  ;;  %v784_v55 = vld [vmem:[%s1069_s1 + $0x50] sm:$0xff]  ;;  %v587_v57 = vor.u32 %v765_v53, %v584_v54  ;;  %v783_v58 = vld [vmem:[%s1069_s1 + $0x48] sm:$0xff] }
  0x12   :  { %831 = vmatpush.bf16.msra.mxu1 %v777_v12  ;;  %414 = vmatpush.bf16.msra.mxu0 %v777_v12  ;;  %v583_v56 = vor.u32 %v767_v52, %v582_v49  ;;  %v782_v59 = vld [vmem:[%s1069_s1 + $0x40] sm:$0xff]  ;;  %v556_v61 = vld [vmem:[%s1071_s0 + $0x14] sm:$0xf0]  ;;  %v768_v63 = vld [vmem:[%s1071_s0 + $0x48] sm:$0xf0] }
  0x13   :  { %462 = vmatpush.bf16.msra.mxu2 %v793_v13  ;;  %v759_v60 = vld [vmem:[%s1071_s0 + $0x4] sm:$0xf]  ;;  %v590_v62 = vld [vmem:[%s1071_s0 + $0x38] sm:$0xf]  ;;  %v772_v3 = vld [vmem:[%s1071_s0 + $0x68] sm:$0xf0] }
  0x14   :  { %486 = vmatpush.bf16.msra.mxu3 %v801_v14  ;;  %v602_v0 = vld [vmem:[%s1071_s0 + $0x58] sm:$0xf]  ;;  %v559_v1 = vor.u32 %v759_v60, %v556_v61  ;;  %v591_v2 = vor.u32 %v768_v63, %v590_v62  ;;  %v770_v4 = vld [vmem:[%s1071_s0 + $0x5c] sm:$0xf]  ;;  %v604_v5 = vld [vmem:[%s1071_s0 + $0x6c] sm:$0xf0] }
  0x15   :  { %v603_v6 = vor.u32 %v772_v3, %v602_v0  ;;  %v607_v7 = vor.u32 %v770_v4, %v604_v5  ;;  %v764_v8 = vld [vmem:[%s1071_s0 + $0x2c] sm:$0xf]  ;;  %v576_v9 = vld [vmem:[%s1071_s0 + $0x3c] sm:$0xf0]  ;;  %v773_v11 = vld [vmem:[%s1071_s0 + $0x70] sm:$0xf0] }
  0x16   :  { %832 = vmatpush.bf16.msra.mxu1 %v776_v15  ;;  %415 = vmatpush.bf16.msra.mxu0 %v776_v15  ;;  %v610_v10 = vld [vmem:[%s1071_s0 + $0x60] sm:$0xf]  ;;  %v579_v12 = vor.u32 %v764_v8, %v576_v9  ;;  %v769_v14 = vld [vmem:[%s1071_s0 + $0x54] sm:$0xf]  ;;  %v596_v15 = vld [vmem:[%s1071_s0 + $0x64] sm:$0xf0] }
  0x17   :  { %463 = vmatpush.bf16.msra.mxu2 %v792_v16  ;;  %v611_v13 = vor.u32 %v773_v11, %v610_v10  ;;  %v599_v16 = vor.u32 %v769_v14, %v596_v15 }
  0x18   :  { %487 = vmatpush.bf16.msra.mxu3 %v800_v17 }
  0x1a   :  { %833 = vmatpush.bf16.msra.mxu1 %v775_v18  ;;  %416 = vmatpush.bf16.msra.mxu0 %v775_v18 }
  0x1b   :  { %464 = vmatpush.bf16.msra.mxu2 %v791_v19 }
  0x1c   :  { %488 = vmatpush.bf16.msra.mxu3 %v799_v20 }
  0x1e   :  { %834 = vmatpush.bf16.msra.mxu1 %v774_v21  ;;  %417 = vmatpush.bf16.msra.mxu0 %v774_v21 }
  0x1f   :  { %465 = vmatpush.bf16.msra.mxu2 %v790_v28 }
  0x20   :  { %489 = vmatpush.bf16.msra.mxu3 %v798_v29 }
  0x21   :  { %423 = vmatmul.bf16.vlgmr.msra.gmra.mxu1 %v575_v31  ;;  %418 = vmatmul.bf16.vlgmr.msra.gmra.mxu0 %v555_v32 }
  0x22   :  { %434 = vmatpush.bf16.msrb.mxu1 %v789_v26  ;;  %510 = vmatpush.bf16.msrb.mxu0 %v809_v27  ;;  %v835_v26 = vld [vmem:[%s1070_s2] ss:$0 sm:$0xff] }
  0x23   :  { %466 = vmatmul.bf16.vlgmr.msra.gmra.mxu2 %v563_v38  ;;  %490 = vmatmul.bf16.vlgmr.msra.gmra.mxu3 %v567_v39 }
  0x26   :  { %435 = vmatpush.bf16.msrb.mxu1 %v788_v36  ;;  %511 = vmatpush.bf16.msrb.mxu0 %v808_v37 }
  0x2a   :  { %436 = vmatpush.bf16.msrb.mxu1 %v787_v40  ;;  %512 = vmatpush.bf16.msrb.mxu0 %v807_v41 }
  0x2e   :  { %437 = vmatpush.bf16.msrb.mxu1 %v786_v42  ;;  %513 = vmatpush.bf16.msrb.mxu0 %v806_v43 }
  0x31   :  { %428 = vmatmul.bf16.gmra.mxu1 %v595_v50  ;;  %756 = vmatmul.msk.bf16.vlgmr.msrb.gmra.mxu0 %vm400_vm0, %v571_v51 }
  0x32   :  { %438 = vmatpush.bf16.msrb.mxu1 %v785_v48 }
  0x33   :  { %471 = vmatmul.bf16.gmra.mxu2 %v583_v56  ;;  %495 = vmatmul.bf16.gmra.mxu3 %v587_v57 }
  0x36   :  { %439 = vmatpush.bf16.msrb.mxu1 %v784_v55 }
  0x3a   :  { %440 = vmatpush.bf16.msrb.mxu1 %v783_v58 }
  0x3e   :  { %441 = vmatpush.bf16.msrb.mxu1 %v782_v59 }
  0x41   :  { %442 = vmatmul.bf16.vlgmr.msrb.gmra.mxu1 %v559_v1  ;;  %757 = vmatmul.msk.bf16.gmra.mxu0 %vm400_vm0, %v591_v2 }
  0x43   :  { %476 = vmatmul.bf16.gmra.mxu2 %v603_v6  ;;  %500 = vmatmul.bf16.gmra.mxu3 %v607_v7 }
  0x51   :  { %447 = vmatmul.bf16.gmra.mxu1 %v579_v12  ;;  %758 = vmatmul.msk.bf16.gmra.mxu0 %vm400_vm0, %v611_v13 }
  0x61   :  { %452 = vmatmul.bf16.gmra.mxu1 %v599_v16 }
  0x9e   :  { %v424_v17 = vpop.f32.mrf.mxu1  ;;  %v419_v19 = vpop.f32.mrf.mxu0 }
  0x9f   :  { %v420_v27 = vadd.f32 %v835_v26, %v419_v19  ;;  %v425_v43 = vadd.f32 %v835_v26, %v424_v17 }
  0xa6   :  { %v426_v18 = vpop.f32.mrf.mxu1  ;;  %v421_v21 = vpop.f32.mrf.mxu0 }
  0xa7   :  { %v467_v23 = vpop.f32.mrf.mxu2  ;;  %v491_v24 = vpop.f32.mrf.mxu3  ;;  %v422_v34 = vadd.f32 %v835_v26, %v421_v21  ;;  %v427_v53 = vadd.f32 %v835_v26, %v426_v18 }
  0xae   :  { %v429_v20 = vpop.f32.mrf.mxu1  ;;  %v515_v25 = vpop.f32.mrf.mxu0 }
  0xaf   :  { %v469_v30 = vpop.f32.mrf.mxu2  ;;  %v493_v31 = vpop.f32.mrf.mxu3  ;;  %v430_v62 = vadd.f32 %v835_v26, %v429_v20 }
  0xb6   :  { %v431_v22 = vpop.f32.mrf.mxu1  ;;  %v517_v33 = vpop.f32.mrf.mxu0 }
  0xb7   :  { %v472_v39 = vpop.f32.mrf.mxu2  ;;  %v496_v42 = vpop.f32.mrf.mxu3  ;;  %v432_v9 = vadd.f32 %v835_v26, %v431_v22 }
  0xbe   :  { %v443_v28 = vpop.f32.mrf.mxu1  ;;  %v520_v45 = vpop.f32.mrf.mxu0 }
  0xbf   :  { %v444_v29 = vadd.f32 %v443_v28, %v420_v27  ;;  %v474_v52 = vpop.f32.mrf.mxu2  ;;  %v498_v54 = vpop.f32.mrf.mxu3 }
  0xc1   :  { %v468_v32 = vadd.f32 %v467_v23, %v444_v29 }
  0xc3   :  { %v492_v36 = vadd.f32 %v491_v24, %v468_v32 }
  0xc5   :  { %v516_v40 = vadd.f32 %v515_v25, %v492_v36 }
  0xc6   :  { %v445_v35 = vpop.f32.mrf.mxu1  ;;  %v522_v58 = vpop.f32.mrf.mxu0 }
  0xc7   :  { %v446_v37 = vadd.f32 %v445_v35, %v422_v34  ;;  %v530_v47 = vmax.f32 %v516_v40, 0.0  ;;  %v477_v0 = vpop.f32.mrf.mxu2  ;;  %v501_v5 = vpop.f32.mrf.mxu3 }
  0xc9   :  { %v470_v38 = vadd.f32 %v469_v30, %v446_v37 }
  0xcb   :  { %v494_v41 = vadd.f32 %v493_v31, %v470_v38 }
  0xcd   :  { %v518_v44 = vadd.f32 %v517_v33, %v494_v41 }
  0xce   :  { %v448_v46 = vpop.f32.mrf.mxu1  ;;  %v525_v7 = vpop.f32.mrf.mxu0 }
  0xcf   :  { %v531_v48 = vmax.f32 %v518_v44, 0.0  ;;  %v449_v49 = vadd.f32 %v448_v46, %v425_v43  ;;  %v479_v13 = vpop.f32.mrf.mxu2  ;;  %v503_v15 = vpop.f32.mrf.mxu3 }
  0xd1   :  { %v813_v50 = vpack.c.bf16 %v531_v48, %v530_v47  ;;  %v473_v51 = vadd.f32 %v472_v39, %v449_v49 }
  0xd3   :  { %814 = vst [vmem:[%s1072_s3] sm:$0xff] %v813_v50   ;;  %v497_v56 = vadd.f32 %v496_v42, %v473_v51 }
  0xd5   :  { %v521_v60 = vadd.f32 %v520_v45, %v497_v56 }
  0xd6   :  { %v450_v55 = vpop.f32.mrf.mxu1  ;;  %v527_v18 = vpop.f32.mrf.mxu0 }
  0xd7   :  { %v451_v57 = vadd.f32 %v450_v55, %v427_v53  ;;  %v532_v2 = vmax.f32 %v521_v60, 0.0 }
  0xd9   :  { %v475_v59 = vadd.f32 %v474_v52, %v451_v57 }
  0xdb   :  { %v499_v61 = vadd.f32 %v498_v54, %v475_v59 }
  0xdd   :  { %v523_v63 = vadd.f32 %v522_v58, %v499_v61 }
  0xde   :  { %v453_v1 = vpop.f32.mrf.mxu1 }
  0xdf   :  { %v533_v3 = vmax.f32 %v523_v63, 0.0  ;;  %v454_v4 = vadd.f32 %v453_v1, %v430_v62 }
  0xe1   :  { %v818_v6 = vpack.c.bf16 %v533_v3, %v532_v2  ;;  %v478_v8 = vadd.f32 %v477_v0, %v454_v4 }
  0xe3   :  { %825 = vst [vmem:[%s1072_s3 + $0x8] sm:$0xff] %v818_v6   ;;  %v502_v11 = vadd.f32 %v501_v5, %v478_v8 }
  0xe5   :  { %v526_v16 = vadd.f32 %v525_v7, %v502_v11 }
  0xe6   :  { %v455_v10 = vpop.f32.mrf.mxu1 }
  0xe7   :  { %v456_v12 = vadd.f32 %v455_v10, %v432_v9  ;;  %v534_v20 = vmax.f32 %v526_v16, 0.0 }
  0xe9   :  { %v480_v14 = vadd.f32 %v479_v13, %v456_v12 }
  0xeb   :  { %v504_v17 = vadd.f32 %v503_v15, %v480_v14 }
  0xed   :  { %v528_v19 = vadd.f32 %v527_v18, %v504_v17 }
  0xef   :  { %v535_v21 = vmax.f32 %v528_v19, 0.0 }
  0xf1   :  { %v823_v23 = vpack.c.bf16 %v535_v21, %v534_v20 }
  0xf3   :  { %826 = vst [vmem:[%s1072_s3 + $0x10] sm:$0xff] %v823_v23  }

// kernel: forward.19
= control target key start
LH: loop header
LB: loop body
LE: loop exit
PB: predicated region body
PF: predicated region fallthrough
CT: control target
= control target key end

     0   :  { %s1656_s1 = inlined_call_operand.vmem [shape: bf16[1152,128], index: 1, kind: input, shape index: {}]   ;;  %s1657_s2 = inlined_call_operand.vmem [shape: f32[1,128], index: 2, kind: input, shape index: {}]   ;;  %s1658_s0 = inlined_call_operand.vmem [shape: bf16[16,1152], index: 0, kind: input, shape index: {}]   ;;  %s1659_s4 = inlined_call_operand.vmem [shape: f32[1,128], index: 4, kind: input, shape index: {}]   ;;  %s1660_s3 = inlined_call_operand.vmem [shape: bf16[128,128], index: 3, kind: input, shape index: {}]   ;;  %s1661_s5 = inlined_call_operand.vmem [shape: f32[16,128], index: 5, kind: output, shape index: {}]  }
   0x1   :  { %v1245_v0 = vld [vmem:[%s1656_s1 + $0x38] sm:$0xff]  ;;  %v1244_v4 = vld [vmem:[%s1656_s1 + $0x30] sm:$0xff]  ;;  %v1243_v8 = vld [vmem:[%s1656_s1 + $0x28] sm:$0xff] }
   0x2   :  { %v1261_v1 = vld [vmem:[%s1656_s1 + $0xb8] sm:$0xff]  ;;  %656 = vmatpush.bf16.msra.mxu0 %v1245_v0  ;;  %v1260_v5 = vld [vmem:[%s1656_s1 + $0xb0] sm:$0xff]  ;;  %v1259_v9 = vld [vmem:[%s1656_s1 + $0xa8] sm:$0xff] }
   0x3   :  { %v1253_v2 = vld [vmem:[%s1656_s1 + $0x78] sm:$0xff]  ;;  %684 = vmatpush.bf16.msra.mxu2 %v1261_v1  ;;  %v1252_v6 = vld [vmem:[%s1656_s1 + $0x70] sm:$0xff]  ;;  %v1251_v10 = vld [vmem:[%s1656_s1 + $0x68] sm:$0xff] }
   0x4   :  { %v1269_v3 = vld [vmem:[%s1656_s1 + $0xf8] sm:$0xff]  ;;  %670 = vmatpush.bf16.msra.mxu1 %v1253_v2  ;;  %v1268_v7 = vld [vmem:[%s1656_s1 + $0xf0] sm:$0xff]  ;;  %v1267_v11 = vld [vmem:[%s1656_s1 + $0xe8] sm:$0xff] }
   0x5   :  { %698 = vmatpush.bf16.msra.mxu3 %v1269_v3  ;;  %v1242_v12 = vld [vmem:[%s1656_s1 + $0x20] sm:$0xff]  ;;  %v1241_v16 = vld [vmem:[%s1656_s1 + $0x18] sm:$0xff]  ;;  %v1240_v20 = vld [vmem:[%s1656_s1 + $0x10] sm:$0xff] }
   0x6   :  { %657 = vmatpush.bf16.msra.mxu0 %v1244_v4  ;;  %v1258_v13 = vld [vmem:[%s1656_s1 + $0xa0] sm:$0xff]  ;;  %v1257_v17 = vld [vmem:[%s1656_s1 + $0x98] sm:$0xff]  ;;  %v1256_v21 = vld [vmem:[%s1656_s1 + $0x90] sm:$0xff] }
   0x7   :  { %685 = vmatpush.bf16.msra.mxu2 %v1260_v5  ;;  %v1250_v14 = vld [vmem:[%s1656_s1 + $0x60] sm:$0xff]  ;;  %v1249_v18 = vld [vmem:[%s1656_s1 + $0x58] sm:$0xff]  ;;  %v1248_v22 = vld [vmem:[%s1656_s1 + $0x50] sm:$0xff] }
   0x8   :  { %671 = vmatpush.bf16.msra.mxu1 %v1252_v6  ;;  %v1266_v15 = vld [vmem:[%s1656_s1 + $0xe0] sm:$0xff]  ;;  %v1265_v19 = vld [vmem:[%s1656_s1 + $0xd8] sm:$0xff]  ;;  %v1264_v23 = vld [vmem:[%s1656_s1 + $0xd0] sm:$0xff] }
   0x9   :  { %699 = vmatpush.bf16.msra.mxu3 %v1268_v7  ;;  %v1239_v24 = vld [vmem:[%s1656_s1 + $0x8] sm:$0xff]  ;;  %v1238_v28 = vld [vmem:[%s1656_s1] sm:$0xff]  ;;  %v1277_v30 = vld [vmem:[%s1656_s1 + $0x138] sm:$0xff] }
   0xa   :  { %658 = vmatpush.bf16.msra.mxu0 %v1243_v8  ;;  %v1255_v25 = vld [vmem:[%s1656_s1 + $0x88] sm:$0xff]  ;;  %v1254_v29 = vld [vmem:[%s1656_s1 + $0x80] sm:$0xff]  ;;  %v1293_v31 = vld [vmem:[%s1656_s1 + $0x1b8] sm:$0xff] }
   0xb   :  { %686 = vmatpush.bf16.msra.mxu2 %v1259_v9  ;;  %v1247_v26 = vld [vmem:[%s1656_s1 + $0x48] sm:$0xff]  ;;  %v1246_v32 = vld [vmem:[%s1656_s1 + $0x40] sm:$0xff]  ;;  %v1285_v38 = vld [vmem:[%s1656_s1 + $0x178] sm:$0xff] }
   0xc   :  { %672 = vmatpush.bf16.msra.mxu1 %v1251_v10  ;;  %v1263_v27 = vld [vmem:[%s1656_s1 + $0xc8] sm:$0xff]  ;;  %v1262_v33 = vld [vmem:[%s1656_s1 + $0xc0] sm:$0xff]  ;;  %v1301_v39 = vld [vmem:[%s1656_s1 + $0x1f8] sm:$0xff] }
   0xd   :  { %700 = vmatpush.bf16.msra.mxu3 %v1267_v11  ;;  %v875_v34 = vld [vmem:[%s1658_s0] sm:$0xf]  ;;  %v1233_v35 = vld [vmem:[%s1658_s0 + $0x20] sm:$0xf0]  ;;  %v883_v36 = vld [vmem:[%s1658_s0 + $0x8] sm:$0xf] }
   0xe   :  { %659 = vmatpush.bf16.msra.mxu0 %v1242_v12  ;;  %v1234_v37 = vld [vmem:[%s1658_s0 + $0x28] sm:$0xf0]  ;;  %v1229_v40 = vld [vmem:[%s1658_s0 + $0x4] sm:$0xf]  ;;  %v877_v41 = vld [vmem:[%s1658_s0 + $0x24] sm:$0xf0]  ;;  %v876_v44 = vor.u32 %v1233_v35, %v875_v34 }
   0xf   :  { %687 = vmatpush.bf16.msra.mxu2 %v1258_v13  ;;  %v1230_v42 = vld [vmem:[%s1658_s0 + $0xc] sm:$0xf]  ;;  %v885_v43 = vld [vmem:[%s1658_s0 + $0x2c] sm:$0xf0]  ;;  %v884_v45 = vor.u32 %v1234_v37, %v883_v36  ;;  %v880_v48 = vor.u32 %v1229_v40, %v877_v41  ;;  %v1274_v56 = vld [vmem:[%s1656_s1 + $0x120] sm:$0xff] }
  0x10   :  { %673 = vmatpush.bf16.msra.mxu1 %v1250_v14  ;;  %v1276_v46 = vld [vmem:[%s1656_s1 + $0x130] sm:$0xff]  ;;  %v888_v49 = vor.u32 %v1230_v42, %v885_v43  ;;  %v1275_v52 = vld [vmem:[%s1656_s1 + $0x128] sm:$0xff]  ;;  %v1290_v57 = vld [vmem:[%s1656_s1 + $0x1a0] sm:$0xff] }
  0x11   :  { %701 = vmatpush.bf16.msra.mxu3 %v1266_v15  ;;  %v1292_v47 = vld [vmem:[%s1656_s1 + $0x1b0] sm:$0xff]  ;;  %v1291_v53 = vld [vmem:[%s1656_s1 + $0x1a8] sm:$0xff]  ;;  %v1282_v58 = vld [vmem:[%s1656_s1 + $0x160] sm:$0xff] }
  0x12   :  { %660 = vmatpush.bf16.msra.mxu0 %v1241_v16  ;;  %v1284_v50 = vld [vmem:[%s1656_s1 + $0x170] sm:$0xff]  ;;  %v1283_v54 = vld [vmem:[%s1656_s1 + $0x168] sm:$0xff]  ;;  %v1298_v59 = vld [vmem:[%s1656_s1 + $0x1e0] sm:$0xff] }
  0x13   :  { %688 = vmatpush.bf16.msra.mxu2 %v1257_v17  ;;  %v1300_v51 = vld [vmem:[%s1656_s1 + $0x1f0] sm:$0xff]  ;;  %v1299_v55 = vld [vmem:[%s1656_s1 + $0x1e8] sm:$0xff]  ;;  %v1273_v60 = vld [vmem:[%s1656_s1 + $0x118] sm:$0xff] }
  0x14   :  { %674 = vmatpush.bf16.msra.mxu1 %v1249_v18  ;;  %v1289_v61 = vld [vmem:[%s1656_s1 + $0x198] sm:$0xff]  ;;  %v1272_v0 = vld [vmem:[%s1656_s1 + $0x110] sm:$0xff]  ;;  %v1271_v4 = vld [vmem:[%s1656_s1 + $0x108] sm:$0xff] }
  0x15   :  { %702 = vmatpush.bf16.msra.mxu3 %v1265_v19  ;;  %v1281_v62 = vld [vmem:[%s1656_s1 + $0x158] sm:$0xff]  ;;  %v1288_v1 = vld [vmem:[%s1656_s1 + $0x190] sm:$0xff]  ;;  %v1287_v5 = vld [vmem:[%s1656_s1 + $0x188] sm:$0xff] }
  0x16   :  { %661 = vmatpush.bf16.msra.mxu0 %v1240_v20  ;;  %v1297_v63 = vld [vmem:[%s1656_s1 + $0x1d8] sm:$0xff]  ;;  %v1280_v2 = vld [vmem:[%s1656_s1 + $0x150] sm:$0xff]  ;;  %v1279_v6 = vld [vmem:[%s1656_s1 + $0x148] sm:$0xff] }
  0x17   :  { %689 = vmatpush.bf16.msra.mxu2 %v1256_v21  ;;  %v1296_v3 = vld [vmem:[%s1656_s1 + $0x1d0] sm:$0xff]  ;;  %v1295_v7 = vld [vmem:[%s1656_s1 + $0x1c8] sm:$0xff]  ;;  %v1270_v8 = vld [vmem:[%s1656_s1 + $0x100] sm:$0xff] }
  0x18   :  { %675 = vmatpush.bf16.msra.mxu1 %v1248_v22  ;;  %v1286_v9 = vld [vmem:[%s1656_s1 + $0x180] sm:$0xff]  ;;  %v1309_v10 = vld [vmem:[%s1656_s1 + $0x238] sm:$0xff]  ;;  %v891_v11 = vld [vmem:[%s1658_s0 + $0x10] sm:$0xf] }
  0x19   :  { %703 = vmatpush.bf16.msra.mxu3 %v1264_v23  ;;  %v1235_v12 = vld [vmem:[%s1658_s0 + $0x30] sm:$0xf0]  ;;  %v899_v13 = vld [vmem:[%s1658_s0 + $0x18] sm:$0xf]  ;;  %v1236_v14 = vld [vmem:[%s1658_s0 + $0x38] sm:$0xf0] }
  0x1a   :  { %662 = vmatpush.bf16.msra.mxu0 %v1239_v24  ;;  %v1278_v15 = vld [vmem:[%s1656_s1 + $0x140] sm:$0xff]  ;;  %v1231_v17 = vld [vmem:[%s1658_s0 + $0x14] sm:$0xf]  ;;  %v893_v18 = vld [vmem:[%s1658_s0 + $0x34] sm:$0xf0]  ;;  %v892_v21 = vor.u32 %v1235_v12, %v891_v11  ;;  %v900_v22 = vor.u32 %v1236_v14, %v899_v13 }
  0x1b   :  { %690 = vmatpush.bf16.msra.mxu2 %v1255_v25  ;;  %v1294_v16 = vld [vmem:[%s1656_s1 + $0x1c0] sm:$0xff]  ;;  %v1232_v19 = vld [vmem:[%s1658_s0 + $0x1c] sm:$0xf]  ;;  %v896_v23 = vor.u32 %v1231_v17, %v893_v18  ;;  %v1308_v25 = vld [vmem:[%s1656_s1 + $0x230] sm:$0xff] }
  0x1c   :  { %676 = vmatpush.bf16.msra.mxu1 %v1247_v26  ;;  %v901_v20 = vld [vmem:[%s1658_s0 + $0x3c] sm:$0xf0]  ;;  %v1307_v26 = vld [vmem:[%s1656_s1 + $0x228] sm:$0xff]  ;;  %v1317_v35 = vld [vmem:[%s1660_s3 + $0x38] sm:$0xff] }
  0x1d   :  { %704 = vmatpush.bf16.msra.mxu3 %v1263_v27  ;;  %v904_v24 = vor.u32 %v1232_v19, %v901_v20  ;;  %v1306_v27 = vld [vmem:[%s1656_s1 + $0x220] sm:$0xff]  ;;  %v1316_v36 = vld [vmem:[%s1660_s3 + $0x30] sm:$0xff]  ;;  %v1315_v37 = vld [vmem:[%s1660_s3 + $0x28] sm:$0xff] }
  0x1e   :  { %663 = vmatpush.bf16.msra.mxu0 %v1238_v28  ;;  %v1305_v28 = vld [vmem:[%s1656_s1 + $0x218] sm:$0xff]  ;;  %v1312_v43 = vld [vmem:[%s1660_s3 + $0x10] sm:$0xff]  ;;  %v1319_v19 = vld [vmem:[%s1659_s4] ss:$0 sm:$0xff] }
  0x1f   :  { %691 = vmatpush.bf16.msra.mxu2 %v1254_v29  ;;  %v1304_v29 = vld [vmem:[%s1656_s1 + $0x210] sm:$0xff]  ;;  %v1313_v40 = vld [vmem:[%s1660_s3 + $0x18] sm:$0xff] }
  0x20   :  { %677 = vmatpush.bf16.msra.mxu1 %v1246_v32  ;;  %v907_v32 = vld [vmem:[%s1658_s0 + $0x20] sm:$0xf] }
  0x21   :  { %705 = vmatpush.bf16.msra.mxu3 %v1262_v33  ;;  %664 = vmatmul.bf16.vlgmr.msra.gmra.mxu0 %v876_v44  ;;  %v1237_v33 = vld [vmem:[%s1658_s0 + $0x40] sm:$0xf0] }
  0x22   :  { %712 = vmatpush.bf16.msrb.mxu0 %v1277_v30  ;;  %692 = vmatmul.bf16.vlgmr.msra.gmra.mxu2 %v884_v45  ;;  %v1303_v30 = vld [vmem:[%s1656_s1 + $0x208] sm:$0xff]  ;;  %v908_v34 = vor.u32 %v1237_v33, %v907_v32  ;;  %v1318_v45 = vld [vmem:[%s1657_s2] ss:$0 sm:$0xff] }
  0x23   :  { %740 = vmatpush.bf16.msrb.mxu2 %v1293_v31  ;;  %678 = vmatmul.bf16.vlgmr.msra.gmra.mxu1 %v880_v48  ;;  %v1302_v31 = vld [vmem:[%s1656_s1 + $0x200] sm:$0xff] }
  0x24   :  { %726 = vmatpush.bf16.msrb.mxu1 %v1285_v38  ;;  %706 = vmatmul.bf16.vlgmr.msra.gmra.mxu3 %v888_v49  ;;  %v1314_v38 = vld [vmem:[%s1660_s3 + $0x20] sm:$0xff] }
  0x25   :  { %754 = vmatpush.bf16.msrb.mxu3 %v1301_v39 }
  0x26   :  { %713 = vmatpush.bf16.msrb.mxu0 %v1276_v46 }
  0x27   :  { %741 = vmatpush.bf16.msrb.mxu2 %v1292_v47  ;;  %v1311_v47 = vld [vmem:[%s1660_s3 + $0x8] sm:$0xff] }
  0x28   :  { %727 = vmatpush.bf16.msrb.mxu1 %v1284_v50  ;;  %v1310_v50 = vld [vmem:[%s1660_s3] sm:$0xff] }
  0x29   :  { %755 = vmatpush.bf16.msrb.mxu3 %v1300_v51 }
  0x2a   :  { %714 = vmatpush.bf16.msrb.mxu0 %v1275_v52 }
  0x2b   :  { %742 = vmatpush.bf16.msrb.mxu2 %v1291_v53 }
  0x2c   :  { %728 = vmatpush.bf16.msrb.mxu1 %v1283_v54 }
  0x2d   :  { %756 = vmatpush.bf16.msrb.mxu3 %v1299_v55 }
  0x2e   :  { %715 = vmatpush.bf16.msrb.mxu0 %v1274_v56 }
  0x2f   :  { %743 = vmatpush.bf16.msrb.mxu2 %v1290_v57 }
  0x30   :  { %729 = vmatpush.bf16.msrb.mxu1 %v1282_v58 }
  0x31   :  { %757 = vmatpush.bf16.msrb.mxu3 %v1298_v59 }
  0x32   :  { %716 = vmatpush.bf16.msrb.mxu0 %v1273_v60 }
  0x33   :  { %744 = vmatpush.bf16.msrb.mxu2 %v1289_v61 }
  0x34   :  { %730 = vmatpush.bf16.msrb.mxu1 %v1281_v62 }
  0x35   :  { %758 = vmatpush.bf16.msrb.mxu3 %v1297_v63 }
  0x36   :  { %717 = vmatpush.bf16.msrb.mxu0 %v1272_v0 }
  0x37   :  { %745 = vmatpush.bf16.msrb.mxu2 %v1288_v1 }
  0x38   :  { %731 = vmatpush.bf16.msrb.mxu1 %v1280_v2 }
  0x39   :  { %759 = vmatpush.bf16.msrb.mxu3 %v1296_v3 }
  0x3a   :  { %718 = vmatpush.bf16.msrb.mxu0 %v1271_v4 }
  0x3b   :  { %746 = vmatpush.bf16.msrb.mxu2 %v1287_v5 }
  0x3c   :  { %732 = vmatpush.bf16.msrb.mxu1 %v1279_v6 }
  0x3d   :  { %760 = vmatpush.bf16.msrb.mxu3 %v1295_v7 }
  0x3e   :  { %719 = vmatpush.bf16.msrb.mxu0 %v1270_v8 }
  0x3f   :  { %747 = vmatpush.bf16.msrb.mxu2 %v1286_v9 }
  0x40   :  { %733 = vmatpush.bf16.msrb.mxu1 %v1278_v15 }
  0x41   :  { %761 = vmatpush.bf16.msrb.mxu3 %v1294_v16  ;;  %720 = vmatmul.bf16.vlgmr.msrb.gmra.mxu0 %v892_v21 }
  0x42   :  { %768 = vmatpush.bf16.msra.mxu0 %v1309_v10  ;;  %748 = vmatmul.bf16.vlgmr.msrb.gmra.mxu2 %v900_v22 }
  0x43   :  { %734 = vmatmul.bf16.vlgmr.msrb.gmra.mxu1 %v896_v23 }
  0x44   :  { %762 = vmatmul.bf16.vlgmr.msrb.gmra.mxu3 %v904_v24  ;;  %853 = vmatpush.bf16.msra.mxu1 %v1317_v35 }
  0x46   :  { %769 = vmatpush.bf16.msra.mxu0 %v1308_v25 }
  0x48   :  { %854 = vmatpush.bf16.msra.mxu1 %v1316_v36 }
  0x4a   :  { %770 = vmatpush.bf16.msra.mxu0 %v1307_v26 }
  0x4c   :  { %855 = vmatpush.bf16.msra.mxu1 %v1315_v37 }
  0x4e   :  { %771 = vmatpush.bf16.msra.mxu0 %v1306_v27 }
  0x50   :  { %856 = vmatpush.bf16.msra.mxu1 %v1314_v38 }
  0x52   :  { %772 = vmatpush.bf16.msra.mxu0 %v1305_v28 }
  0x54   :  { %857 = vmatpush.bf16.msra.mxu1 %v1313_v40 }
  0x56   :  { %773 = vmatpush.bf16.msra.mxu0 %v1304_v29 }
  0x58   :  { %858 = vmatpush.bf16.msra.mxu1 %v1312_v43 }
  0x5a   :  { %774 = vmatpush.bf16.msra.mxu0 %v1303_v30 }
  0x5c   :  { %859 = vmatpush.bf16.msra.mxu1 %v1311_v47 }
  0x5e   :  { %775 = vmatpush.bf16.msra.mxu0 %v1302_v31 }
  0x60   :  { %860 = vmatpush.bf16.msra.mxu1 %v1310_v50 }
  0x61   :  { %776 = vmatmul.bf16.vlgmr.msra.gmra.mxu0 %v908_v34 }
  0x9e   :  { %v665_v39 = vpop.f32.mrf.mxu0 }
  0x9f   :  { %v666_v48 = vadd.f32 %v1318_v45, %v665_v39 }
  0xa0   :  { %v679_v41 = vpop.f32.mrf.mxu1 }
  0xa1   :  { %v680_v52 = vadd.f32 %v679_v41, %v666_v48 }
  0xa5   :  { %v693_v42 = vpop.f32.mrf.mxu2 }
  0xa6   :  { %v667_v44 = vpop.f32.mrf.mxu0  ;;  %v694_v56 = vadd.f32 %v693_v42, %v680_v52 }
  0xa7   :  { %v707_v46 = vpop.f32.mrf.mxu3  ;;  %v668_v54 = vadd.f32 %v1318_v45, %v667_v44 }
  0xa8   :  { %v681_v49 = vpop.f32.mrf.mxu1  ;;  %v708_v59 = vadd.f32 %v707_v46, %v694_v56 }
  0xa9   :  { %v682_v57 = vadd.f32 %v681_v49, %v668_v54 }
  0xad   :  { %v695_v51 = vpop.f32.mrf.mxu2 }
  0xae   :  { %v696_v61 = vadd.f32 %v695_v51, %v682_v57 }
  0xaf   :  { %v709_v55 = vpop.f32.mrf.mxu3 }
  0xb0   :  { %v710_v1 = vadd.f32 %v709_v55, %v696_v61 }
  0xbe   :  { %v721_v53 = vpop.f32.mrf.mxu0 }
  0xbf   :  { %v722_v63 = vadd.f32 %v721_v53, %v708_v59 }
  0xc0   :  { %v735_v58 = vpop.f32.mrf.mxu1 }
  0xc1   :  { %v736_v2 = vadd.f32 %v735_v58, %v722_v63 }
  0xc5   :  { %v749_v60 = vpop.f32.mrf.mxu2 }
  0xc6   :  { %v723_v62 = vpop.f32.mrf.mxu0  ;;  %v750_v7 = vadd.f32 %v749_v60, %v736_v2 }
  0xc7   :  { %v763_v0 = vpop.f32.mrf.mxu3  ;;  %v724_v3 = vadd.f32 %v723_v62, %v710_v1 }
  0xc8   :  { %v737_v4 = vpop.f32.mrf.mxu1  ;;  %v764_v11 = vadd.f32 %v763_v0, %v750_v7 }
  0xc9   :  { %v738_v8 = vadd.f32 %v737_v4, %v724_v3 }
  0xcd   :  { %v751_v5 = vpop.f32.mrf.mxu2 }
  0xce   :  { %v752_v9 = vadd.f32 %v751_v5, %v738_v8 }
  0xcf   :  { %v765_v10 = vpop.f32.mrf.mxu3 }
  0xd0   :  { %v766_v12 = vadd.f32 %v765_v10, %v752_v9 }
  0xde   :  { %v777_v6 = vpop.f32.mrf.mxu0 }
  0xdf   :  { %v778_v13 = vadd.f32 %v777_v6, %v764_v11 }
  0xe1   :  { %v782_v16 = vmax.f32 %v778_v13, 0.0 }
  0xe6   :  { %v779_v14 = vpop.f32.mrf.mxu0 }
  0xe7   :  { %v780_v15 = vadd.f32 %v779_v14, %v766_v12 }
  0xe9   :  { %v783_v17 = vmax.f32 %v780_v15, 0.0 }
  0xeb   :  { %v784_v18 = vpack.c.bf16 %v783_v17, %v782_v16 }
  0xed   :  { %861 = vmatmul.bf16.vlgmr.msra.gmra.mxu1 %v784_v18 }
 0x16a   :  { %v862_v20 = vpop.f32.mrf.mxu1 }
 0x16b   :  { %v863_v21 = vadd.f32 %v1319_v19, %v862_v20 }
 0x16d   :  { %867 = vst [vmem:[%s1661_s5] sm:$0xff] %v863_v21 }
 0x172   :  { %v864_v22 = vpop.f32.mrf.mxu1 }
 0x173   :  { %v865_v23 = vadd.f32 %v1319_v19, %v864_v22 }
 0x175   :  { %868 = vst [vmem:[%s1661_s5 + $0x8] sm:$0xff] %v865_v23 }

</bundles_post_ra>
